<compile_context>
chip_gen: v7x
topology: tpu7x:2x2x1
jax: 0.10.0
libtpu: 0.0.40
codegen_flags: <defaults>
</compile_context>

<pallas_src>
import functools

import jax
import jax.numpy as jnp
from jax.experimental import pallas as pl
from jax.experimental.pallas import tpu as pltpu

NEG_SLOPE = 0.2       # GATConv default negative_slope
MASK_NEG = -1e30      # safe for f32 logits (self-loops keep every row max finite)


# --------------------------------- kernel ------------------------------------

def _combined_gnn_kernel(x_ref, adj_ref, *refs, layer_cfgs):
    """All four GATLinNet layers of CombinedGNN, fused, on one 128-row slab.

    x_ref   : [BN, Cin0]   node features of this grid step's graphs
    adj_ref : [BN, BN]     block-diagonal dense edge-count matrix adj[dst, src]
                           (self-loops forced to 1; zero across different graphs)
    refs    : per layer (W_cat, A_src, A_dst, bias), then the output ref last
      W_cat : [Cin, H*Co + Dout]  bf16, GATConv weight | Linear weight fused
      A_src : [H, H*Co]           bf16 block matrix (row h <- att_src[h])
      A_dst : [H*Co, H]           bf16 block matrix (col h <- att_dst[h])
      bias  : [1, Dout]           f32, b_gat + b_lin
    layer_cfgs : static tuple of (heads, out_per_head, concat, act) per layer
    """
    o_ref = refs[-1]
    param_refs = refs[:-1]

    x = x_ref[...]                                    # [BN, Cin0] f32
    adj = adj_ref[...]                                # [BN, BN]   f32
    # Hoisted once for all layers/heads: edge mask + parallel-edge multiplicity
    # in log space (softmax over edges then needs only one add per head).
    log_adj = jnp.where(adj > 0.0, jnp.log(adj), MASK_NEG)

    for li, (heads, co, concat, act) in enumerate(layer_cfgs):
        wc_ref, asrc_ref, adst_ref, b_ref = param_refs[4 * li:4 * li + 4]
        hco = heads * co

        # One bf16 MXU pass for both the GATConv transform and the Linear branch.
        xb = x.astype(jnp.bfloat16)
        xall = jnp.dot(xb, wc_ref[...], preferred_element_type=jnp.float32)
        xW = xall[:, :hco]                            # [BN, H*Co]  GAT branch (f32)
        lin = xall[:, hco:]                           # [BN, Dout]  Linear branch
        xWb = xW.astype(jnp.bfloat16)
        # TODO(synk): lane-pad the H*Co / Dout column layout to multiples of 128 so
        # these splits and the per-head slices below land on vreg lane boundaries.

        # All heads' attention coefficients in two contractions.
        a_dst = jnp.dot(xWb, adst_ref[...],
                        preferred_element_type=jnp.float32)                  # [BN, H]
        a_src = jax.lax.dot_general(asrc_ref[...], xWb,
                                    (((1,), (1,)), ((), ())),
                                    preferred_element_type=jnp.float32)      # [H, BN]

        head_outs = []
        for h in range(heads):                        # heads is static (= 2)
            # e[i, j] = leaky_relu(a_dst[i] + a_src[j]); log_adj masks non-edges
            # (and cross-graph pairs) and carries parallel-edge multiplicity.
            logits = a_dst[:, h:h + 1] + a_src[h:h + 1, :]                   # [BN, BN]
            masked = jnp.maximum(logits, NEG_SLOPE * logits) + log_adj
            m = jnp.max(masked, axis=-1, keepdims=True)
            p = jnp.exp(masked - m)
            # Self-loops guarantee denom >= 1; the max() guards malformed adj.
            denom = jnp.maximum(jnp.sum(p, axis=-1, keepdims=True), 1e-30)
            attn = (p * pl.reciprocal(denom, approx=True)).astype(jnp.bfloat16)
            # aggregate incoming edges: out[i] = sum_j attn[i, j] * xW_h[j]
            head_outs.append(
                jnp.dot(attn, xWb[:, h * co:(h + 1) * co],
                        preferred_element_type=jnp.float32))                 # [BN, Co]

        if concat:
            gat = jnp.concatenate(head_outs, axis=-1)                        # [BN, H*Co]
        else:
            gat = head_outs[0]
            for ho in head_outs[1:]:
                gat = gat + ho
            gat = gat * (1.0 / heads)                                        # mean

        out = gat + lin + b_ref[...]
        if act == "relu":
            out = jnp.maximum(out, 0.0)
        elif act == "tanh":
            out = jnp.tanh(out)
        x = out

    o_ref[...] = x                                    # single (narrow) store


# --------------------------------- wrapper ------------------------------------

def _prep_layer(p):
    """Host-side parameter re-layout / bf16 cast for one fused layer."""
    heads, co = p["heads"], p["out_per_head"]
    hco = heads * co
    w_cat = jnp.concatenate([p["W_gat"], p["W_lin"]], axis=1)       # [Cin, H*Co+Dout]
    a_src = jnp.zeros((heads, hco), jnp.float32)
    a_dst = jnp.zeros((hco, heads), jnp.float32)
    for h in range(heads):
        a_src = a_src.at[h, h * co:(h + 1) * co].set(p["att_src"][h])
        a_dst = a_dst.at[h * co:(h + 1) * co, h].set(p["att_dst"][h])
    bias = p["b_gat"] + p["b_lin"]                                   # [1, Dout]
    return (w_cat.astype(jnp.bfloat16), a_src.astype(jnp.bfloat16),
            a_dst.astype(jnp.bfloat16), bias)


def combined_gnn_forward(x, adj_blocks, params_gnn1, params_gnn2):
    """CombinedGNN forward over a batch of graphs as a single pallas_call.

    x          : [R, Cin]      R = (#graphs * nodes_per_graph) node features
    adj_blocks : [nb, BN, BN]  block-diagonal edge-count adjacency per grid step
                               (BN = R // nb rows; self-loops must be present)
    """
    flat, cfgs = [], []
    for params, act in ((params_gnn1, "relu"), (params_gnn2, "tanh")):
        n_layers = len(params)
        for i, p in enumerate(params):
            flat.extend(_prep_layer(p))
            cfgs.append((p["heads"], p["out_per_head"], p["concat"],
                         act if i < n_layers - 1 else None))         # last: no act

    last = params_gnn2[-1]
    d_out = (last["heads"] * last["out_per_head"]
             if last["concat"] else last["out_per_head"])

    rows, c_in = x.shape
    nb, bn, _ = adj_blocks.shape
    assert rows == nb * bn

    kernel = functools.partial(_combined_gnn_kernel, layer_cfgs=tuple(cfgs))

    in_specs = [
        pl.BlockSpec((bn, c_in), lambda i: (i, 0)),            # node rows of this step
        pl.BlockSpec((None, bn, bn), lambda i: (i, 0, 0)),     # this step's adjacency
    ]
    # Small params: resident in VMEM (constant block index -> no re-DMA per step).
    in_specs += [pl.BlockSpec(a.shape, lambda i: (0, 0)) for a in flat]

    return pl.pallas_call(
        kernel,
        out_shape=jax.ShapeDtypeStruct((rows, d_out), jnp.float32),
        grid=(nb,),
        in_specs=in_specs,
        out_specs=pl.BlockSpec((bn, d_out), lambda i: (i, 0)),
        compiler_params=pltpu.CompilerParams(
            dimension_semantics=("parallel",),       # v7x: shard blocks over both TCs
            vmem_limit_bytes=32 * 1024 * 1024),      # explicit (v5e default is 16 MiB)
    )(x, adj_blocks, *flat)
    # TODO(synk): when BN grows to where the [BN, BN] attention maps no longer fit
    # (plan against 64 MiB VMEM on v7x), add a dst-row grid axis with online softmax.


# --------------------------- parameter construction ---------------------------

def make_gatlin_params(key, in_ch, hidden, num_layers, out_ch, heads):
    """Deterministic synthetic params matching GATLinNet.__init__ shapes."""
    layers = []
    c_in = in_ch
    for _ in range(num_layers - 1):
        key, k0, k1, k2, k3, k4, k5 = jax.random.split(key, 7)
        d = heads * hidden
        layers.append(dict(
            W_gat=jax.random.normal(k0, (c_in, d), jnp.float32) / jnp.sqrt(c_in),
            att_src=jax.random.normal(k1, (heads, hidden), jnp.float32) / jnp.sqrt(hidden),
            att_dst=jax.random.normal(k2, (heads, hidden), jnp.float32) / jnp.sqrt(hidden),
            b_gat=0.01 * jax.random.normal(k3, (1, d), jnp.float32),
            W_lin=jax.random.normal(k4, (c_in, d), jnp.float32) / jnp.sqrt(c_in),
            b_lin=0.01 * jax.random.normal(k5, (1, d), jnp.float32),
            heads=heads, out_per_head=hidden, concat=True,
        ))
        c_in = d
    # last layer: GATConv(c_in, out_ch, heads, concat=False) + Linear(c_in, out_ch)
    key, k0, k1, k2, k3, k4, k5 = jax.random.split(key, 7)
    layers.append(dict(
        W_gat=jax.random.normal(k0, (c_in, heads * out_ch), jnp.float32) / jnp.sqrt(c_in),
        att_src=jax.random.normal(k1, (heads, out_ch), jnp.float32) / jnp.sqrt(max(out_ch, 1)),
        att_dst=jax.random.normal(k2, (heads, out_ch), jnp.float32) / jnp.sqrt(max(out_ch, 1)),
        b_gat=0.01 * jax.random.normal(k3, (1, out_ch), jnp.float32),
        W_lin=jax.random.normal(k4, (c_in, out_ch), jnp.float32) / jnp.sqrt(c_in),
        b_lin=0.01 * jax.random.normal(k5, (1, out_ch), jnp.float32),
        heads=heads, out_per_head=out_ch, concat=False,
    ))
    return layers


# ------------------------------ pure-JAX reference ----------------------------

def _gat_lin_layer_ref(x, adj, p, act):
    heads, co, concat = p["heads"], p["out_per_head"], p["concat"]
    xW = x @ p["W_gat"]
    outs = []
    for h in range(heads):
        xW_h = xW[:, h * co:(h + 1) * co]
        a_src = (xW_h * p["att_src"][h]).sum(-1)
        a_dst = (xW_h * p["att_dst"][h]).sum(-1)
        logits = a_dst[:, None] + a_src[None, :]
        logits = jnp.where(logits > 0, logits, NEG_SLOPE * logits)
        logits = jnp.where(adj > 0, logits, MASK_NEG)
        w = adj * jnp.exp(logits - logits.max(-1, keepdims=True))
        attn = w / w.sum(-1, keepdims=True)
        outs.append(attn @ xW_h)
    gat = jnp.concatenate(outs, -1) if concat else sum(outs) / heads
    out = gat + p["b_gat"] + x @ p["W_lin"] + p["b_lin"]
    if act == "relu":
        out = jnp.maximum(out, 0.0)
    elif act == "tanh":
        out = jnp.tanh(out)
    return out


def combined_gnn_ref(x, adj, params1, params2):
    for i, p in enumerate(params1):
        x = _gat_lin_layer_ref(x, adj, p, "relu" if i < len(params1) - 1 else None)
    for i, p in enumerate(params2):
        x = _gat_lin_layer_ref(x, adj, p, "tanh" if i < len(params2) - 1 else None)
    return x


# ----------------------------------- main --------------------------------------

if __name__ == "__main__":
    key = jax.random.PRNGKey(0)

    # CombinedGNN("GATLinNet+GATLinNet", in_channels=3, num_layers=2, out_channels=1)
    N_NODES, IN_CH, NUM_LAYERS, OUT_CH, HEADS = 16, 3, 2, 1, 2
    HIDDEN1, HIDDEN2, MID_CH = 64, 16, 9
    B_GRAPHS, GRAPHS_PER_BLOCK, E = 16, 8, 40     # 16 graphs, 8 graphs per grid step
    BN = GRAPHS_PER_BLOCK * N_NODES               # 128 node rows per program instance
    NB = B_GRAPHS // GRAPHS_PER_BLOCK             # grid size

    kx, ke1, ke2, kp1, kp2 = jax.random.split(key, 5)
    x = jax.random.normal(kx, (B_GRAPHS * N_NODES, IN_CH), jnp.float32)

    # per-graph edge_index -> dense edge-count adjacency adj[dst, src], then
    # remove_self_loops + add_self_loops (exactly one self loop per node),
    # matching PyG GATConv semantics.
    src = jax.random.randint(ke1, (B_GRAPHS, E), 0, N_NODES)
    dst = jax.random.randint(ke2, (B_GRAPHS, E), 0, N_NODES)
    adj_g = jnp.zeros((B_GRAPHS, N_NODES, N_NODES), jnp.float32)
    adj_g = adj_g.at[jnp.arange(B_GRAPHS)[:, None], dst, src].add(1.0)
    eye_n = jnp.eye(N_NODES, dtype=jnp.float32)
    adj_g = adj_g * (1.0 - eye_n) + eye_n

    # block-diagonal adjacency for each grid step: [NB, BN, BN]
    adj_blocks = jnp.einsum(
        "sgij,gh->sgihj",
        adj_g.reshape(NB, GRAPHS_PER_BLOCK, N_NODES, N_NODES),
        jnp.eye(GRAPHS_PER_BLOCK, dtype=jnp.float32),
    ).reshape(NB, BN, BN)

    params_gnn1 = make_gatlin_params(kp1, IN_CH, HIDDEN1, NUM_LAYERS, MID_CH, HEADS)
    params_gnn2 = make_gatlin_params(kp2, MID_CH, HIDDEN2, NUM_LAYERS, OUT_CH, HEADS)

    out = combined_gnn_forward(x, adj_blocks, params_gnn1, params_gnn2)
    out = jax.block_until_ready(out)

    # reference over the whole batch: full block-diagonal adjacency of all graphs
    adj_full = jnp.einsum(
        "bij,bc->bicj", adj_g, jnp.eye(B_GRAPHS, dtype=jnp.float32)
    ).reshape(B_GRAPHS * N_NODES, B_GRAPHS * N_NODES)
    ref = combined_gnn_ref(x, adj_full, params_gnn1, params_gnn2)

    assert out.shape == (B_GRAPHS * N_NODES, OUT_CH)
    assert bool(jnp.all(jnp.isfinite(out)))
    # kernel uses bf16 MXU operands with f32 accumulation; reference is all-f32
    assert bool(jnp.allclose(out, ref, atol=5e-2, rtol=5e-2))

    print("KERNEL_OK")
</pallas_src>

<mosaic_0001>
module attributes {stable_mosaic.version = 11 : i64} {
  func.func @_combined_gnn_kernel(%arg0: i32, %arg1: memref<128x3xf32, #tpu.memory_space<vmem>>, %arg2: memref<1x128x128xf32, #tpu.memory_space<vmem>>, %arg3: memref<3x256xbf16, #tpu.memory_space<vmem>>, %arg4: memref<2x128xbf16, #tpu.memory_space<vmem>>, %arg5: memref<128x2xbf16, #tpu.memory_space<vmem>>, %arg6: memref<1x128xf32, #tpu.memory_space<vmem>>, %arg7: memref<128x27xbf16, #tpu.memory_space<vmem>>, %arg8: memref<2x18xbf16, #tpu.memory_space<vmem>>, %arg9: memref<18x2xbf16, #tpu.memory_space<vmem>>, %arg10: memref<1x9xf32, #tpu.memory_space<vmem>>, %arg11: memref<9x64xbf16, #tpu.memory_space<vmem>>, %arg12: memref<2x32xbf16, #tpu.memory_space<vmem>>, %arg13: memref<32x2xbf16, #tpu.memory_space<vmem>>, %arg14: memref<1x32xf32, #tpu.memory_space<vmem>>, %arg15: memref<32x3xbf16, #tpu.memory_space<vmem>>, %arg16: memref<2x2xbf16, #tpu.memory_space<vmem>>, %arg17: memref<2x2xbf16, #tpu.memory_space<vmem>>, %arg18: memref<1x1xf32, #tpu.memory_space<vmem>>, %arg19: memref<128x1xf32, #tpu.memory_space<vmem>>) attributes {dimension_semantics = [#tpu.dimension_semantics<parallel>], iteration_bounds = array<i64: 2>, scalar_prefetch = 0 : i64, scratch_operands = 0 : i64, tpu.core_type = #tpu.core_type<tc>, window_params = [{transform_indices = @transform_0, window_bounds = array<i64: 128, 3>}, {transform_indices = @transform_1, window_bounds = array<i64: 1, 128, 128>}, {pipeline_mode = #tpu.pipeline_mode<synchronous>, transform_indices = @transform_2, window_bounds = array<i64: 3, 256>}, {pipeline_mode = #tpu.pipeline_mode<synchronous>, transform_indices = @transform_3, window_bounds = array<i64: 2, 128>}, {pipeline_mode = #tpu.pipeline_mode<synchronous>, transform_indices = @transform_4, window_bounds = array<i64: 128, 2>}, {pipeline_mode = #tpu.pipeline_mode<synchronous>, transform_indices = @transform_5, window_bounds = array<i64: 1, 128>}, {pipeline_mode = #tpu.pipeline_mode<synchronous>, transform_indices = @transform_6, window_bounds = array<i64: 128, 27>}, {pipeline_mode = #tpu.pipeline_mode<synchronous>, transform_indices = @transform_7, window_bounds = array<i64: 2, 18>}, {pipeline_mode = #tpu.pipeline_mode<synchronous>, transform_indices = @transform_8, window_bounds = array<i64: 18, 2>}, {pipeline_mode = #tpu.pipeline_mode<synchronous>, transform_indices = @transform_9, window_bounds = array<i64: 1, 9>}, {pipeline_mode = #tpu.pipeline_mode<synchronous>, transform_indices = @transform_10, window_bounds = array<i64: 9, 64>}, {pipeline_mode = #tpu.pipeline_mode<synchronous>, transform_indices = @transform_11, window_bounds = array<i64: 2, 32>}, {pipeline_mode = #tpu.pipeline_mode<synchronous>, transform_indices = @transform_12, window_bounds = array<i64: 32, 2>}, {pipeline_mode = #tpu.pipeline_mode<synchronous>, transform_indices = @transform_13, window_bounds = array<i64: 1, 32>}, {pipeline_mode = #tpu.pipeline_mode<synchronous>, transform_indices = @transform_14, window_bounds = array<i64: 32, 3>}, {pipeline_mode = #tpu.pipeline_mode<synchronous>, transform_indices = @transform_15, window_bounds = array<i64: 2, 2>}, {pipeline_mode = #tpu.pipeline_mode<synchronous>, transform_indices = @transform_16, window_bounds = array<i64: 2, 2>}, {pipeline_mode = #tpu.pipeline_mode<synchronous>, transform_indices = @transform_17, window_bounds = array<i64: 1, 1>}, {transform_indices = @transform_18, window_bounds = array<i64: 128, 1>}]} {
    %c0 = arith.constant 0 : index
    %c0_0 = arith.constant 0 : index
    %0 = vector.load %arg1[%c0, %c0_0] : memref<128x3xf32, #tpu.memory_space<vmem>>, vector<128x3xf32>
    %c0_1 = arith.constant 0 : index
    %c0_2 = arith.constant 0 : index
    %c0_3 = arith.constant 0 : index
    %1 = vector.load %arg2[%c0_1, %c0_2, %c0_3] : memref<1x128x128xf32, #tpu.memory_space<vmem>>, vector<1x128x128xf32>
    %2 = vector.shape_cast %1 : vector<1x128x128xf32> to vector<128x128xf32>
    %cst = arith.constant 0.000000e+00 : f32
    %3 = vector.broadcast %cst : f32 to vector<128x128xf32>
    %4 = arith.cmpf ogt, %2, %3 : vector<128x128xf32>
    %5 = math.log %2 : vector<128x128xf32>
    %cst_4 = arith.constant -1.000000e+30 : f32
    %6 = vector.broadcast %cst_4 : f32 to vector<128x128xf32>
    %7 = arith.select %4, %5, %6 : vector<128x128xi1>, vector<128x128xf32>
    %8 = arith.truncf %0 : vector<128x3xf32> to vector<128x3xbf16>
    %c0_5 = arith.constant 0 : index
    %c0_6 = arith.constant 0 : index
    %9 = vector.load %arg3[%c0_5, %c0_6] : memref<3x256xbf16, #tpu.memory_space<vmem>>, vector<3x256xbf16>
    %cst_7 = arith.constant dense<0.000000e+00> : vector<128x256xf32>
    %10 = tpu.matmul %8, %9, %cst_7 {dimension_numbers = #tpu.dot_dimension_numbers<[1], [0], [0], [1], [0, 0, 1, 1], [], []>} : vector<128x3xbf16>, vector<3x256xbf16>, vector<128x256xf32> -> vector<128x256xf32>
    %11 = vector.extract_strided_slice %10 {offsets = [0, 0], sizes = [128, 128], strides = [1, 1]} : vector<128x256xf32> to vector<128x128xf32>
    %12 = vector.extract_strided_slice %10 {offsets = [0, 128], sizes = [128, 128], strides = [1, 1]} : vector<128x256xf32> to vector<128x128xf32>
    %13 = arith.truncf %11 : vector<128x128xf32> to vector<128x128xbf16>
    %c0_8 = arith.constant 0 : index
    %c0_9 = arith.constant 0 : index
    %14 = vector.load %arg5[%c0_8, %c0_9] : memref<128x2xbf16, #tpu.memory_space<vmem>>, vector<128x2xbf16>
    %cst_10 = arith.constant dense<0.000000e+00> : vector<128x2xf32>
    %15 = tpu.matmul %13, %14, %cst_10 {dimension_numbers = #tpu.dot_dimension_numbers<[1], [0], [0], [1], [0, 0, 1, 1], [], []>} : vector<128x128xbf16>, vector<128x2xbf16>, vector<128x2xf32> -> vector<128x2xf32>
    %c0_11 = arith.constant 0 : index
    %c0_12 = arith.constant 0 : index
    %16 = vector.load %arg4[%c0_11, %c0_12] : memref<2x128xbf16, #tpu.memory_space<vmem>>, vector<2x128xbf16>
    %cst_13 = arith.constant dense<0.000000e+00> : vector<2x128xf32>
    %17 = tpu.matmul %16, %13, %cst_13 {dimension_numbers = #tpu.dot_dimension_numbers<[1], [1], [0], [0], [0, 0, 1, 0], [], []>} : vector<2x128xbf16>, vector<128x128xbf16>, vector<2x128xf32> -> vector<2x128xf32>
    %18 = vector.extract_strided_slice %15 {offsets = [0, 0], sizes = [128, 1], strides = [1, 1]} : vector<128x2xf32> to vector<128x1xf32>
    %19 = vector.extract_strided_slice %17 {offsets = [0, 0], sizes = [1, 128], strides = [1, 1]} : vector<2x128xf32> to vector<1x128xf32>
    %20 = vector.broadcast %18 : vector<128x1xf32> to vector<128x128xf32>
    %21 = vector.broadcast %19 : vector<1x128xf32> to vector<128x128xf32>
    %22 = arith.addf %20, %21 : vector<128x128xf32>
    %cst_14 = arith.constant 2.000000e-01 : f32
    %23 = vector.broadcast %cst_14 : f32 to vector<128x128xf32>
    %24 = arith.mulf %23, %22 : vector<128x128xf32>
    %25 = arith.maximumf %22, %24 : vector<128x128xf32>
    %26 = arith.addf %25, %7 : vector<128x128xf32>
    %cst_15 = arith.constant dense<0xFF800000> : vector<128xf32>
    %27 = vector.multi_reduction <maximumf>, %26, %cst_15 [1] : vector<128x128xf32> to vector<128xf32>
    %28 = vector.shape_cast %27 : vector<128xf32> to vector<128x1xf32>
    %29 = vector.broadcast %28 : vector<128x1xf32> to vector<128x128xf32>
    %30 = arith.subf %26, %29 : vector<128x128xf32>
    %31 = math.exp %30 : vector<128x128xf32>
    %cst_16 = arith.constant dense<0.000000e+00> : vector<128xf32>
    %32 = vector.multi_reduction <add>, %31, %cst_16 [1] : vector<128x128xf32> to vector<128xf32>
    %33 = vector.shape_cast %32 : vector<128xf32> to vector<128x1xf32>
    %cst_17 = arith.constant 1.000000e-30 : f32
    %34 = vector.broadcast %cst_17 : f32 to vector<128x1xf32>
    %35 = arith.maximumf %33, %34 : vector<128x1xf32>
    %36 = tpu.reciprocal %35 {approx = true} : vector<128x1xf32> -> vector<128x1xf32>
    %37 = vector.broadcast %36 : vector<128x1xf32> to vector<128x128xf32>
    %38 = arith.mulf %31, %37 : vector<128x128xf32>
    %39 = arith.truncf %38 : vector<128x128xf32> to vector<128x128xbf16>
    %40 = vector.extract_strided_slice %13 {offsets = [0, 0], sizes = [128, 64], strides = [1, 1]} : vector<128x128xbf16> to vector<128x64xbf16>
    %cst_18 = arith.constant dense<0.000000e+00> : vector<128x64xf32>
    %41 = tpu.matmul %39, %40, %cst_18 {dimension_numbers = #tpu.dot_dimension_numbers<[1], [0], [0], [1], [0, 0, 1, 1], [], []>} : vector<128x128xbf16>, vector<128x64xbf16>, vector<128x64xf32> -> vector<128x64xf32>
    %42 = vector.extract_strided_slice %15 {offsets = [0, 1], sizes = [128, 1], strides = [1, 1]} : vector<128x2xf32> to vector<128x1xf32>
    %43 = vector.extract_strided_slice %17 {offsets = [1, 0], sizes = [1, 128], strides = [1, 1]} : vector<2x128xf32> to vector<1x128xf32>
    %44 = vector.broadcast %42 : vector<128x1xf32> to vector<128x128xf32>
    %45 = vector.broadcast %43 : vector<1x128xf32> to vector<128x128xf32>
    %46 = arith.addf %44, %45 : vector<128x128xf32>
    %cst_19 = arith.constant 2.000000e-01 : f32
    %47 = vector.broadcast %cst_19 : f32 to vector<128x128xf32>
    %48 = arith.mulf %47, %46 : vector<128x128xf32>
    %49 = arith.maximumf %46, %48 : vector<128x128xf32>
    %50 = arith.addf %49, %7 : vector<128x128xf32>
    %cst_20 = arith.constant dense<0xFF800000> : vector<128xf32>
    %51 = vector.multi_reduction <maximumf>, %50, %cst_20 [1] : vector<128x128xf32> to vector<128xf32>
    %52 = vector.shape_cast %51 : vector<128xf32> to vector<128x1xf32>
    %53 = vector.broadcast %52 : vector<128x1xf32> to vector<128x128xf32>
    %54 = arith.subf %50, %53 : vector<128x128xf32>
    %55 = math.exp %54 : vector<128x128xf32>
    %cst_21 = arith.constant dense<0.000000e+00> : vector<128xf32>
    %56 = vector.multi_reduction <add>, %55, %cst_21 [1] : vector<128x128xf32> to vector<128xf32>
    %57 = vector.shape_cast %56 : vector<128xf32> to vector<128x1xf32>
    %cst_22 = arith.constant 1.000000e-30 : f32
    %58 = vector.broadcast %cst_22 : f32 to vector<128x1xf32>
    %59 = arith.maximumf %57, %58 : vector<128x1xf32>
    %60 = tpu.reciprocal %59 {approx = true} : vector<128x1xf32> -> vector<128x1xf32>
    %61 = vector.broadcast %60 : vector<128x1xf32> to vector<128x128xf32>
    %62 = arith.mulf %55, %61 : vector<128x128xf32>
    %63 = arith.truncf %62 : vector<128x128xf32> to vector<128x128xbf16>
    %64 = vector.extract_strided_slice %13 {offsets = [0, 64], sizes = [128, 64], strides = [1, 1]} : vector<128x128xbf16> to vector<128x64xbf16>
    %cst_23 = arith.constant dense<0.000000e+00> : vector<128x64xf32>
    %65 = tpu.matmul %63, %64, %cst_23 {dimension_numbers = #tpu.dot_dimension_numbers<[1], [0], [0], [1], [0, 0, 1, 1], [], []>} : vector<128x128xbf16>, vector<128x64xbf16>, vector<128x64xf32> -> vector<128x64xf32>
    %66 = tpu.concatenate %41, %65 in 1 : vector<128x64xf32>, vector<128x64xf32> -> vector<128x128xf32>
    %67 = arith.addf %66, %12 : vector<128x128xf32>
    %c0_24 = arith.constant 0 : index
    %c0_25 = arith.constant 0 : index
    %68 = vector.load %arg6[%c0_24, %c0_25] : memref<1x128xf32, #tpu.memory_space<vmem>>, vector<1x128xf32>
    %69 = vector.broadcast %68 : vector<1x128xf32> to vector<128x128xf32>
    %70 = arith.addf %67, %69 : vector<128x128xf32>
    %cst_26 = arith.constant 0.000000e+00 : f32
    %71 = vector.broadcast %cst_26 : f32 to vector<128x128xf32>
    %72 = arith.maximumf %70, %71 : vector<128x128xf32>
    %73 = arith.truncf %72 : vector<128x128xf32> to vector<128x128xbf16>
    %c0_27 = arith.constant 0 : index
    %c0_28 = arith.constant 0 : index
    %74 = vector.load %arg7[%c0_27, %c0_28] : memref<128x27xbf16, #tpu.memory_space<vmem>>, vector<128x27xbf16>
    %cst_29 = arith.constant dense<0.000000e+00> : vector<128x27xf32>
    %75 = tpu.matmul %73, %74, %cst_29 {dimension_numbers = #tpu.dot_dimension_numbers<[1], [0], [0], [1], [0, 0, 1, 1], [], []>} : vector<128x128xbf16>, vector<128x27xbf16>, vector<128x27xf32> -> vector<128x27xf32>
    %76 = vector.extract_strided_slice %75 {offsets = [0, 0], sizes = [128, 18], strides = [1, 1]} : vector<128x27xf32> to vector<128x18xf32>
    %77 = vector.extract_strided_slice %75 {offsets = [0, 18], sizes = [128, 9], strides = [1, 1]} : vector<128x27xf32> to vector<128x9xf32>
    %78 = arith.truncf %76 : vector<128x18xf32> to vector<128x18xbf16>
    %c0_30 = arith.constant 0 : index
    %c0_31 = arith.constant 0 : index
    %79 = vector.load %arg9[%c0_30, %c0_31] : memref<18x2xbf16, #tpu.memory_space<vmem>>, vector<18x2xbf16>
    %cst_32 = arith.constant dense<0.000000e+00> : vector<128x2xf32>
    %80 = tpu.matmul %78, %79, %cst_32 {dimension_numbers = #tpu.dot_dimension_numbers<[1], [0], [0], [1], [0, 0, 1, 1], [], []>} : vector<128x18xbf16>, vector<18x2xbf16>, vector<128x2xf32> -> vector<128x2xf32>
    %c0_33 = arith.constant 0 : index
    %c0_34 = arith.constant 0 : index
    %81 = vector.load %arg8[%c0_33, %c0_34] : memref<2x18xbf16, #tpu.memory_space<vmem>>, vector<2x18xbf16>
    %cst_35 = arith.constant dense<0.000000e+00> : vector<2x128xf32>
    %82 = tpu.matmul %81, %78, %cst_35 {dimension_numbers = #tpu.dot_dimension_numbers<[1], [1], [0], [0], [0, 0, 1, 0], [], []>} : vector<2x18xbf16>, vector<128x18xbf16>, vector<2x128xf32> -> vector<2x128xf32>
    %83 = vector.extract_strided_slice %80 {offsets = [0, 0], sizes = [128, 1], strides = [1, 1]} : vector<128x2xf32> to vector<128x1xf32>
    %84 = vector.extract_strided_slice %82 {offsets = [0, 0], sizes = [1, 128], strides = [1, 1]} : vector<2x128xf32> to vector<1x128xf32>
    %85 = vector.broadcast %83 : vector<128x1xf32> to vector<128x128xf32>
    %86 = vector.broadcast %84 : vector<1x128xf32> to vector<128x128xf32>
    %87 = arith.addf %85, %86 : vector<128x128xf32>
    %cst_36 = arith.constant 2.000000e-01 : f32
    %88 = vector.broadcast %cst_36 : f32 to vector<128x128xf32>
    %89 = arith.mulf %88, %87 : vector<128x128xf32>
    %90 = arith.maximumf %87, %89 : vector<128x128xf32>
    %91 = arith.addf %90, %7 : vector<128x128xf32>
    %cst_37 = arith.constant dense<0xFF800000> : vector<128xf32>
    %92 = vector.multi_reduction <maximumf>, %91, %cst_37 [1] : vector<128x128xf32> to vector<128xf32>
    %93 = vector.shape_cast %92 : vector<128xf32> to vector<128x1xf32>
    %94 = vector.broadcast %93 : vector<128x1xf32> to vector<128x128xf32>
    %95 = arith.subf %91, %94 : vector<128x128xf32>
    %96 = math.exp %95 : vector<128x128xf32>
    %cst_38 = arith.constant dense<0.000000e+00> : vector<128xf32>
    %97 = vector.multi_reduction <add>, %96, %cst_38 [1] : vector<128x128xf32> to vector<128xf32>
    %98 = vector.shape_cast %97 : vector<128xf32> to vector<128x1xf32>
    %cst_39 = arith.constant 1.000000e-30 : f32
    %99 = vector.broadcast %cst_39 : f32 to vector<128x1xf32>
    %100 = arith.maximumf %98, %99 : vector<128x1xf32>
    %101 = tpu.reciprocal %100 {approx = true} : vector<128x1xf32> -> vector<128x1xf32>
    %102 = vector.broadcast %101 : vector<128x1xf32> to vector<128x128xf32>
    %103 = arith.mulf %96, %102 : vector<128x128xf32>
    %104 = arith.truncf %103 : vector<128x128xf32> to vector<128x128xbf16>
    %105 = vector.extract_strided_slice %78 {offsets = [0, 0], sizes = [128, 9], strides = [1, 1]} : vector<128x18xbf16> to vector<128x9xbf16>
    %cst_40 = arith.constant dense<0.000000e+00> : vector<128x9xf32>
    %106 = tpu.matmul %104, %105, %cst_40 {dimension_numbers = #tpu.dot_dimension_numbers<[1], [0], [0], [1], [0, 0, 1, 1], [], []>} : vector<128x128xbf16>, vector<128x9xbf16>, vector<128x9xf32> -> vector<128x9xf32>
    %107 = vector.extract_strided_slice %80 {offsets = [0, 1], sizes = [128, 1], strides = [1, 1]} : vector<128x2xf32> to vector<128x1xf32>
    %108 = vector.extract_strided_slice %82 {offsets = [1, 0], sizes = [1, 128], strides = [1, 1]} : vector<2x128xf32> to vector<1x128xf32>
    %109 = vector.broadcast %107 : vector<128x1xf32> to vector<128x128xf32>
    %110 = vector.broadcast %108 : vector<1x128xf32> to vector<128x128xf32>
    %111 = arith.addf %109, %110 : vector<128x128xf32>
    %cst_41 = arith.constant 2.000000e-01 : f32
    %112 = vector.broadcast %cst_41 : f32 to vector<128x128xf32>
    %113 = arith.mulf %112, %111 : vector<128x128xf32>
    %114 = arith.maximumf %111, %113 : vector<128x128xf32>
    %115 = arith.addf %114, %7 : vector<128x128xf32>
    %cst_42 = arith.constant dense<0xFF800000> : vector<128xf32>
    %116 = vector.multi_reduction <maximumf>, %115, %cst_42 [1] : vector<128x128xf32> to vector<128xf32>
    %117 = vector.shape_cast %116 : vector<128xf32> to vector<128x1xf32>
    %118 = vector.broadcast %117 : vector<128x1xf32> to vector<128x128xf32>
    %119 = arith.subf %115, %118 : vector<128x128xf32>
    %120 = math.exp %119 : vector<128x128xf32>
    %cst_43 = arith.constant dense<0.000000e+00> : vector<128xf32>
    %121 = vector.multi_reduction <add>, %120, %cst_43 [1] : vector<128x128xf32> to vector<128xf32>
    %122 = vector.shape_cast %121 : vector<128xf32> to vector<128x1xf32>
    %cst_44 = arith.constant 1.000000e-30 : f32
    %123 = vector.broadcast %cst_44 : f32 to vector<128x1xf32>
    %124 = arith.maximumf %122, %123 : vector<128x1xf32>
    %125 = tpu.reciprocal %124 {approx = true} : vector<128x1xf32> -> vector<128x1xf32>
    %126 = vector.broadcast %125 : vector<128x1xf32> to vector<128x128xf32>
    %127 = arith.mulf %120, %126 : vector<128x128xf32>
    %128 = arith.truncf %127 : vector<128x128xf32> to vector<128x128xbf16>
    %129 = vector.extract_strided_slice %78 {offsets = [0, 9], sizes = [128, 9], strides = [1, 1]} : vector<128x18xbf16> to vector<128x9xbf16>
    %cst_45 = arith.constant dense<0.000000e+00> : vector<128x9xf32>
    %130 = tpu.matmul %128, %129, %cst_45 {dimension_numbers = #tpu.dot_dimension_numbers<[1], [0], [0], [1], [0, 0, 1, 1], [], []>} : vector<128x128xbf16>, vector<128x9xbf16>, vector<128x9xf32> -> vector<128x9xf32>
    %131 = arith.addf %106, %130 : vector<128x9xf32>
    %cst_46 = arith.constant 5.000000e-01 : f32
    %132 = vector.broadcast %cst_46 : f32 to vector<128x9xf32>
    %133 = arith.mulf %131, %132 : vector<128x9xf32>
    %134 = arith.addf %133, %77 : vector<128x9xf32>
    %c0_47 = arith.constant 0 : index
    %c0_48 = arith.constant 0 : index
    %135 = vector.load %arg10[%c0_47, %c0_48] : memref<1x9xf32, #tpu.memory_space<vmem>>, vector<1x9xf32>
    %136 = vector.broadcast %135 : vector<1x9xf32> to vector<128x9xf32>
    %137 = arith.addf %134, %136 : vector<128x9xf32>
    %138 = arith.truncf %137 : vector<128x9xf32> to vector<128x9xbf16>
    %c0_49 = arith.constant 0 : index
    %c0_50 = arith.constant 0 : index
    %139 = vector.load %arg11[%c0_49, %c0_50] : memref<9x64xbf16, #tpu.memory_space<vmem>>, vector<9x64xbf16>
    %cst_51 = arith.constant dense<0.000000e+00> : vector<128x64xf32>
    %140 = tpu.matmul %138, %139, %cst_51 {dimension_numbers = #tpu.dot_dimension_numbers<[1], [0], [0], [1], [0, 0, 1, 1], [], []>} : vector<128x9xbf16>, vector<9x64xbf16>, vector<128x64xf32> -> vector<128x64xf32>
    %141 = vector.extract_strided_slice %140 {offsets = [0, 0], sizes = [128, 32], strides = [1, 1]} : vector<128x64xf32> to vector<128x32xf32>
    %142 = vector.extract_strided_slice %140 {offsets = [0, 32], sizes = [128, 32], strides = [1, 1]} : vector<128x64xf32> to vector<128x32xf32>
    %143 = arith.truncf %141 : vector<128x32xf32> to vector<128x32xbf16>
    %c0_52 = arith.constant 0 : index
    %c0_53 = arith.constant 0 : index
    %144 = vector.load %arg13[%c0_52, %c0_53] : memref<32x2xbf16, #tpu.memory_space<vmem>>, vector<32x2xbf16>
    %cst_54 = arith.constant dense<0.000000e+00> : vector<128x2xf32>
    %145 = tpu.matmul %143, %144, %cst_54 {dimension_numbers = #tpu.dot_dimension_numbers<[1], [0], [0], [1], [0, 0, 1, 1], [], []>} : vector<128x32xbf16>, vector<32x2xbf16>, vector<128x2xf32> -> vector<128x2xf32>
    %c0_55 = arith.constant 0 : index
    %c0_56 = arith.constant 0 : index
    %146 = vector.load %arg12[%c0_55, %c0_56] : memref<2x32xbf16, #tpu.memory_space<vmem>>, vector<2x32xbf16>
    %cst_57 = arith.constant dense<0.000000e+00> : vector<2x128xf32>
    %147 = tpu.matmul %146, %143, %cst_57 {dimension_numbers = #tpu.dot_dimension_numbers<[1], [1], [0], [0], [0, 0, 1, 0], [], []>} : vector<2x32xbf16>, vector<128x32xbf16>, vector<2x128xf32> -> vector<2x128xf32>
    %148 = vector.extract_strided_slice %145 {offsets = [0, 0], sizes = [128, 1], strides = [1, 1]} : vector<128x2xf32> to vector<128x1xf32>
    %149 = vector.extract_strided_slice %147 {offsets = [0, 0], sizes = [1, 128], strides = [1, 1]} : vector<2x128xf32> to vector<1x128xf32>
    %150 = vector.broadcast %148 : vector<128x1xf32> to vector<128x128xf32>
    %151 = vector.broadcast %149 : vector<1x128xf32> to vector<128x128xf32>
    %152 = arith.addf %150, %151 : vector<128x128xf32>
    %cst_58 = arith.constant 2.000000e-01 : f32
    %153 = vector.broadcast %cst_58 : f32 to vector<128x128xf32>
    %154 = arith.mulf %153, %152 : vector<128x128xf32>
    %155 = arith.maximumf %152, %154 : vector<128x128xf32>
    %156 = arith.addf %155, %7 : vector<128x128xf32>
    %cst_59 = arith.constant dense<0xFF800000> : vector<128xf32>
    %157 = vector.multi_reduction <maximumf>, %156, %cst_59 [1] : vector<128x128xf32> to vector<128xf32>
    %158 = vector.shape_cast %157 : vector<128xf32> to vector<128x1xf32>
    %159 = vector.broadcast %158 : vector<128x1xf32> to vector<128x128xf32>
    %160 = arith.subf %156, %159 : vector<128x128xf32>
    %161 = math.exp %160 : vector<128x128xf32>
    %cst_60 = arith.constant dense<0.000000e+00> : vector<128xf32>
    %162 = vector.multi_reduction <add>, %161, %cst_60 [1] : vector<128x128xf32> to vector<128xf32>
    %163 = vector.shape_cast %162 : vector<128xf32> to vector<128x1xf32>
    %cst_61 = arith.constant 1.000000e-30 : f32
    %164 = vector.broadcast %cst_61 : f32 to vector<128x1xf32>
    %165 = arith.maximumf %163, %164 : vector<128x1xf32>
    %166 = tpu.reciprocal %165 {approx = true} : vector<128x1xf32> -> vector<128x1xf32>
    %167 = vector.broadcast %166 : vector<128x1xf32> to vector<128x128xf32>
    %168 = arith.mulf %161, %167 : vector<128x128xf32>
    %169 = arith.truncf %168 : vector<128x128xf32> to vector<128x128xbf16>
    %170 = vector.extract_strided_slice %143 {offsets = [0, 0], sizes = [128, 16], strides = [1, 1]} : vector<128x32xbf16> to vector<128x16xbf16>
    %cst_62 = arith.constant dense<0.000000e+00> : vector<128x16xf32>
    %171 = tpu.matmul %169, %170, %cst_62 {dimension_numbers = #tpu.dot_dimension_numbers<[1], [0], [0], [1], [0, 0, 1, 1], [], []>} : vector<128x128xbf16>, vector<128x16xbf16>, vector<128x16xf32> -> vector<128x16xf32>
    %172 = vector.extract_strided_slice %145 {offsets = [0, 1], sizes = [128, 1], strides = [1, 1]} : vector<128x2xf32> to vector<128x1xf32>
    %173 = vector.extract_strided_slice %147 {offsets = [1, 0], sizes = [1, 128], strides = [1, 1]} : vector<2x128xf32> to vector<1x128xf32>
    %174 = vector.broadcast %172 : vector<128x1xf32> to vector<128x128xf32>
    %175 = vector.broadcast %173 : vector<1x128xf32> to vector<128x128xf32>
    %176 = arith.addf %174, %175 : vector<128x128xf32>
    %cst_63 = arith.constant 2.000000e-01 : f32
    %177 = vector.broadcast %cst_63 : f32 to vector<128x128xf32>
    %178 = arith.mulf %177, %176 : vector<128x128xf32>
    %179 = arith.maximumf %176, %178 : vector<128x128xf32>
    %180 = arith.addf %179, %7 : vector<128x128xf32>
    %cst_64 = arith.constant dense<0xFF800000> : vector<128xf32>
    %181 = vector.multi_reduction <maximumf>, %180, %cst_64 [1] : vector<128x128xf32> to vector<128xf32>
    %182 = vector.shape_cast %181 : vector<128xf32> to vector<128x1xf32>
    %183 = vector.broadcast %182 : vector<128x1xf32> to vector<128x128xf32>
    %184 = arith.subf %180, %183 : vector<128x128xf32>
    %185 = math.exp %184 : vector<128x128xf32>
    %cst_65 = arith.constant dense<0.000000e+00> : vector<128xf32>
    %186 = vector.multi_reduction <add>, %185, %cst_65 [1] : vector<128x128xf32> to vector<128xf32>
    %187 = vector.shape_cast %186 : vector<128xf32> to vector<128x1xf32>
    %cst_66 = arith.constant 1.000000e-30 : f32
    %188 = vector.broadcast %cst_66 : f32 to vector<128x1xf32>
    %189 = arith.maximumf %187, %188 : vector<128x1xf32>
    %190 = tpu.reciprocal %189 {approx = true} : vector<128x1xf32> -> vector<128x1xf32>
    %191 = vector.broadcast %190 : vector<128x1xf32> to vector<128x128xf32>
    %192 = arith.mulf %185, %191 : vector<128x128xf32>
    %193 = arith.truncf %192 : vector<128x128xf32> to vector<128x128xbf16>
    %194 = vector.extract_strided_slice %143 {offsets = [0, 16], sizes = [128, 16], strides = [1, 1]} : vector<128x32xbf16> to vector<128x16xbf16>
    %cst_67 = arith.constant dense<0.000000e+00> : vector<128x16xf32>
    %195 = tpu.matmul %193, %194, %cst_67 {dimension_numbers = #tpu.dot_dimension_numbers<[1], [0], [0], [1], [0, 0, 1, 1], [], []>} : vector<128x128xbf16>, vector<128x16xbf16>, vector<128x16xf32> -> vector<128x16xf32>
    %196 = tpu.concatenate %171, %195 in 1 : vector<128x16xf32>, vector<128x16xf32> -> vector<128x32xf32>
    %197 = arith.addf %196, %142 : vector<128x32xf32>
    %c0_68 = arith.constant 0 : index
    %c0_69 = arith.constant 0 : index
    %198 = vector.load %arg14[%c0_68, %c0_69] : memref<1x32xf32, #tpu.memory_space<vmem>>, vector<1x32xf32>
    %199 = vector.broadcast %198 : vector<1x32xf32> to vector<128x32xf32>
    %200 = arith.addf %197, %199 : vector<128x32xf32>
    %201 = math.tanh %200 : vector<128x32xf32>
    %202 = arith.truncf %201 : vector<128x32xf32> to vector<128x32xbf16>
    %c0_70 = arith.constant 0 : index
    %c0_71 = arith.constant 0 : index
    %203 = vector.load %arg15[%c0_70, %c0_71] : memref<32x3xbf16, #tpu.memory_space<vmem>>, vector<32x3xbf16>
    %cst_72 = arith.constant dense<0.000000e+00> : vector<128x3xf32>
    %204 = tpu.matmul %202, %203, %cst_72 {dimension_numbers = #tpu.dot_dimension_numbers<[1], [0], [0], [1], [0, 0, 1, 1], [], []>} : vector<128x32xbf16>, vector<32x3xbf16>, vector<128x3xf32> -> vector<128x3xf32>
    %205 = vector.extract_strided_slice %204 {offsets = [0, 0], sizes = [128, 2], strides = [1, 1]} : vector<128x3xf32> to vector<128x2xf32>
    %206 = vector.extract_strided_slice %204 {offsets = [0, 2], sizes = [128, 1], strides = [1, 1]} : vector<128x3xf32> to vector<128x1xf32>
    %207 = arith.truncf %205 : vector<128x2xf32> to vector<128x2xbf16>
    %c0_73 = arith.constant 0 : index
    %c0_74 = arith.constant 0 : index
    %208 = vector.load %arg17[%c0_73, %c0_74] : memref<2x2xbf16, #tpu.memory_space<vmem>>, vector<2x2xbf16>
    %cst_75 = arith.constant dense<0.000000e+00> : vector<128x2xf32>
    %209 = tpu.matmul %207, %208, %cst_75 {dimension_numbers = #tpu.dot_dimension_numbers<[1], [0], [0], [1], [0, 0, 1, 1], [], []>} : vector<128x2xbf16>, vector<2x2xbf16>, vector<128x2xf32> -> vector<128x2xf32>
    %c0_76 = arith.constant 0 : index
    %c0_77 = arith.constant 0 : index
    %210 = vector.load %arg16[%c0_76, %c0_77] : memref<2x2xbf16, #tpu.memory_space<vmem>>, vector<2x2xbf16>
    %cst_78 = arith.constant dense<0.000000e+00> : vector<2x128xf32>
    %211 = tpu.matmul %210, %207, %cst_78 {dimension_numbers = #tpu.dot_dimension_numbers<[1], [1], [0], [0], [0, 0, 1, 0], [], []>} : vector<2x2xbf16>, vector<128x2xbf16>, vector<2x128xf32> -> vector<2x128xf32>
    %212 = vector.extract_strided_slice %209 {offsets = [0, 0], sizes = [128, 1], strides = [1, 1]} : vector<128x2xf32> to vector<128x1xf32>
    %213 = vector.extract_strided_slice %211 {offsets = [0, 0], sizes = [1, 128], strides = [1, 1]} : vector<2x128xf32> to vector<1x128xf32>
    %214 = vector.broadcast %212 : vector<128x1xf32> to vector<128x128xf32>
    %215 = vector.broadcast %213 : vector<1x128xf32> to vector<128x128xf32>
    %216 = arith.addf %214, %215 : vector<128x128xf32>
    %cst_79 = arith.constant 2.000000e-01 : f32
    %217 = vector.broadcast %cst_79 : f32 to vector<128x128xf32>
    %218 = arith.mulf %217, %216 : vector<128x128xf32>
    %219 = arith.maximumf %216, %218 : vector<128x128xf32>
    %220 = arith.addf %219, %7 : vector<128x128xf32>
    %cst_80 = arith.constant dense<0xFF800000> : vector<128xf32>
    %221 = vector.multi_reduction <maximumf>, %220, %cst_80 [1] : vector<128x128xf32> to vector<128xf32>
    %222 = vector.shape_cast %221 : vector<128xf32> to vector<128x1xf32>
    %223 = vector.broadcast %222 : vector<128x1xf32> to vector<128x128xf32>
    %224 = arith.subf %220, %223 : vector<128x128xf32>
    %225 = math.exp %224 : vector<128x128xf32>
    %cst_81 = arith.constant dense<0.000000e+00> : vector<128xf32>
    %226 = vector.multi_reduction <add>, %225, %cst_81 [1] : vector<128x128xf32> to vector<128xf32>
    %227 = vector.shape_cast %226 : vector<128xf32> to vector<128x1xf32>
    %cst_82 = arith.constant 1.000000e-30 : f32
    %228 = vector.broadcast %cst_82 : f32 to vector<128x1xf32>
    %229 = arith.maximumf %227, %228 : vector<128x1xf32>
    %230 = tpu.reciprocal %229 {approx = true} : vector<128x1xf32> -> vector<128x1xf32>
    %231 = vector.broadcast %230 : vector<128x1xf32> to vector<128x128xf32>
    %232 = arith.mulf %225, %231 : vector<128x128xf32>
    %233 = arith.truncf %232 : vector<128x128xf32> to vector<128x128xbf16>
    %234 = vector.extract_strided_slice %207 {offsets = [0, 0], sizes = [128, 1], strides = [1, 1]} : vector<128x2xbf16> to vector<128x1xbf16>
    %cst_83 = arith.constant dense<0.000000e+00> : vector<128x1xf32>
    %235 = tpu.matmul %233, %234, %cst_83 {dimension_numbers = #tpu.dot_dimension_numbers<[1], [0], [0], [1], [0, 0, 1, 1], [], []>} : vector<128x128xbf16>, vector<128x1xbf16>, vector<128x1xf32> -> vector<128x1xf32>
    %236 = vector.extract_strided_slice %209 {offsets = [0, 1], sizes = [128, 1], strides = [1, 1]} : vector<128x2xf32> to vector<128x1xf32>
    %237 = vector.extract_strided_slice %211 {offsets = [1, 0], sizes = [1, 128], strides = [1, 1]} : vector<2x128xf32> to vector<1x128xf32>
    %238 = vector.broadcast %236 : vector<128x1xf32> to vector<128x128xf32>
    %239 = vector.broadcast %237 : vector<1x128xf32> to vector<128x128xf32>
    %240 = arith.addf %238, %239 : vector<128x128xf32>
    %cst_84 = arith.constant 2.000000e-01 : f32
    %241 = vector.broadcast %cst_84 : f32 to vector<128x128xf32>
    %242 = arith.mulf %241, %240 : vector<128x128xf32>
    %243 = arith.maximumf %240, %242 : vector<128x128xf32>
    %244 = arith.addf %243, %7 : vector<128x128xf32>
    %cst_85 = arith.constant dense<0xFF800000> : vector<128xf32>
    %245 = vector.multi_reduction <maximumf>, %244, %cst_85 [1] : vector<128x128xf32> to vector<128xf32>
    %246 = vector.shape_cast %245 : vector<128xf32> to vector<128x1xf32>
    %247 = vector.broadcast %246 : vector<128x1xf32> to vector<128x128xf32>
    %248 = arith.subf %244, %247 : vector<128x128xf32>
    %249 = math.exp %248 : vector<128x128xf32>
    %cst_86 = arith.constant dense<0.000000e+00> : vector<128xf32>
    %250 = vector.multi_reduction <add>, %249, %cst_86 [1] : vector<128x128xf32> to vector<128xf32>
    %251 = vector.shape_cast %250 : vector<128xf32> to vector<128x1xf32>
    %cst_87 = arith.constant 1.000000e-30 : f32
    %252 = vector.broadcast %cst_87 : f32 to vector<128x1xf32>
    %253 = arith.maximumf %251, %252 : vector<128x1xf32>
    %254 = tpu.reciprocal %253 {approx = true} : vector<128x1xf32> -> vector<128x1xf32>
    %255 = vector.broadcast %254 : vector<128x1xf32> to vector<128x128xf32>
    %256 = arith.mulf %249, %255 : vector<128x128xf32>
    %257 = arith.truncf %256 : vector<128x128xf32> to vector<128x128xbf16>
    %258 = vector.extract_strided_slice %207 {offsets = [0, 1], sizes = [128, 1], strides = [1, 1]} : vector<128x2xbf16> to vector<128x1xbf16>
    %cst_88 = arith.constant dense<0.000000e+00> : vector<128x1xf32>
    %259 = tpu.matmul %257, %258, %cst_88 {dimension_numbers = #tpu.dot_dimension_numbers<[1], [0], [0], [1], [0, 0, 1, 1], [], []>} : vector<128x128xbf16>, vector<128x1xbf16>, vector<128x1xf32> -> vector<128x1xf32>
    %260 = arith.addf %235, %259 : vector<128x1xf32>
    %cst_89 = arith.constant 5.000000e-01 : f32
    %261 = vector.broadcast %cst_89 : f32 to vector<128x1xf32>
    %262 = arith.mulf %260, %261 : vector<128x1xf32>
    %263 = arith.addf %262, %206 : vector<128x1xf32>
    %c0_90 = arith.constant 0 : index
    %c0_91 = arith.constant 0 : index
    %264 = vector.load %arg18[%c0_90, %c0_91] : memref<1x1xf32, #tpu.memory_space<vmem>>, vector<1x1xf32>
    %265 = vector.broadcast %264 : vector<1x1xf32> to vector<128x1xf32>
    %266 = arith.addf %263, %265 : vector<128x1xf32>
    %c0_92 = arith.constant 0 : index
    %c0_93 = arith.constant 0 : index
    %267 = vector.load %arg19[%c0_92, %c0_93] : memref<128x1xf32, #tpu.memory_space<vmem>>, vector<128x1xf32>
    tpu.vector_store %arg19[%c0_92, %c0_93], %266 {strides = array<i32>} : memref<128x1xf32, #tpu.memory_space<vmem>>, vector<128x1xf32>,
    return
  }
  func.func @transform_0(%arg0: i32) -> (i32, i32) {
    %c0_i32 = arith.constant 0 : i32
    %c0_i32_0 = arith.constant 0 : i32
    return %arg0, %c0_i32 : i32, i32
  }
  func.func @transform_1(%arg0: i32) -> (i32, i32, i32) {
    %c0_i32 = arith.constant 0 : i32
    %c0_i32_0 = arith.constant 0 : i32
    %c0_i32_1 = arith.constant 0 : i32
    return %arg0, %c0_i32, %c0_i32_0 : i32, i32, i32
  }
  func.func @transform_2(%arg0: i32) -> (i32, i32) {
    %c0_i32 = arith.constant 0 : i32
    %c0_i32_0 = arith.constant 0 : i32
    %c0_i32_1 = arith.constant 0 : i32
    return %c0_i32, %c0_i32_0 : i32, i32
  }
  func.func @transform_3(%arg0: i32) -> (i32, i32) {
    %c0_i32 = arith.constant 0 : i32
    %c0_i32_0 = arith.constant 0 : i32
    %c0_i32_1 = arith.constant 0 : i32
    return %c0_i32, %c0_i32_0 : i32, i32
  }
  func.func @transform_4(%arg0: i32) -> (i32, i32) {
    %c0_i32 = arith.constant 0 : i32
    %c0_i32_0 = arith.constant 0 : i32
    %c0_i32_1 = arith.constant 0 : i32
    return %c0_i32, %c0_i32_0 : i32, i32
  }
  func.func @transform_5(%arg0: i32) -> (i32, i32) {
    %c0_i32 = arith.constant 0 : i32
    %c0_i32_0 = arith.constant 0 : i32
    %c0_i32_1 = arith.constant 0 : i32
    return %c0_i32, %c0_i32_0 : i32, i32
  }
  func.func @transform_6(%arg0: i32) -> (i32, i32) {
    %c0_i32 = arith.constant 0 : i32
    %c0_i32_0 = arith.constant 0 : i32
    %c0_i32_1 = arith.constant 0 : i32
    return %c0_i32, %c0_i32_0 : i32, i32
  }
  func.func @transform_7(%arg0: i32) -> (i32, i32) {
    %c0_i32 = arith.constant 0 : i32
    %c0_i32_0 = arith.constant 0 : i32
    %c0_i32_1 = arith.constant 0 : i32
    return %c0_i32, %c0_i32_0 : i32, i32
  }
  func.func @transform_8(%arg0: i32) -> (i32, i32) {
    %c0_i32 = arith.constant 0 : i32
    %c0_i32_0 = arith.constant 0 : i32
    %c0_i32_1 = arith.constant 0 : i32
    return %c0_i32, %c0_i32_0 : i32, i32
  }
  func.func @transform_9(%arg0: i32) -> (i32, i32) {
    %c0_i32 = arith.constant 0 : i32
    %c0_i32_0 = arith.constant 0 : i32
    %c0_i32_1 = arith.constant 0 : i32
    return %c0_i32, %c0_i32_0 : i32, i32
  }
  func.func @transform_10(%arg0: i32) -> (i32, i32) {
    %c0_i32 = arith.constant 0 : i32
    %c0_i32_0 = arith.constant 0 : i32
    %c0_i32_1 = arith.constant 0 : i32
    return %c0_i32, %c0_i32_0 : i32, i32
  }
  func.func @transform_11(%arg0: i32) -> (i32, i32) {
    %c0_i32 = arith.constant 0 : i32
    %c0_i32_0 = arith.constant 0 : i32
    %c0_i32_1 = arith.constant 0 : i32
    return %c0_i32, %c0_i32_0 : i32, i32
  }
  func.func @transform_12(%arg0: i32) -> (i32, i32) {
    %c0_i32 = arith.constant 0 : i32
    %c0_i32_0 = arith.constant 0 : i32
    %c0_i32_1 = arith.constant 0 : i32
    return %c0_i32, %c0_i32_0 : i32, i32
  }
  func.func @transform_13(%arg0: i32) -> (i32, i32) {
    %c0_i32 = arith.constant 0 : i32
    %c0_i32_0 = arith.constant 0 : i32
    %c0_i32_1 = arith.constant 0 : i32
    return %c0_i32, %c0_i32_0 : i32, i32
  }
  func.func @transform_14(%arg0: i32) -> (i32, i32) {
    %c0_i32 = arith.constant 0 : i32
    %c0_i32_0 = arith.constant 0 : i32
    %c0_i32_1 = arith.constant 0 : i32
    return %c0_i32, %c0_i32_0 : i32, i32
  }
  func.func @transform_15(%arg0: i32) -> (i32, i32) {
    %c0_i32 = arith.constant 0 : i32
    %c0_i32_0 = arith.constant 0 : i32
    %c0_i32_1 = arith.constant 0 : i32
    return %c0_i32, %c0_i32_0 : i32, i32
  }
  func.func @transform_16(%arg0: i32) -> (i32, i32) {
    %c0_i32 = arith.constant 0 : i32
    %c0_i32_0 = arith.constant 0 : i32
    %c0_i32_1 = arith.constant 0 : i32
    return %c0_i32, %c0_i32_0 : i32, i32
  }
  func.func @transform_17(%arg0: i32) -> (i32, i32) {
    %c0_i32 = arith.constant 0 : i32
    %c0_i32_0 = arith.constant 0 : i32
    %c0_i32_1 = arith.constant 0 : i32
    return %c0_i32, %c0_i32_0 : i32, i32
  }
  func.func @transform_18(%arg0: i32) -> (i32, i32) {
    %c0_i32 = arith.constant 0 : i32
    %c0_i32_0 = arith.constant 0 : i32
    return %arg0, %c0_i32 : i32, i32
  }
}

</mosaic_0001>

<bundles_post_ra>
// kernel: tpu_custom_call.1
= control target key start
LH: loop header
LB: loop body
LE: loop exit
PB: predicated region body
PF: predicated region fallthrough
CT: control target
= control target key end

     0   :  { %s7794_s29 = smov 0   ;;  %s10464_s0 = inlined_call_operand.vmem [shape: f32[256,3], index: 0, kind: input, shape index: {}]   ;;  %s10465_s1 = inlined_call_operand.vmem [shape: f32[2,128,128], index: 1, kind: input, shape index: {}]   ;;  %s10466_s2 = inlined_call_operand.vmem [shape: bf16[3,256], index: 2, kind: input, shape index: {}]   ;;  %s10467_s3 = inlined_call_operand.vmem [shape: bf16[2,128], index: 3, kind: input, shape index: {}]   ;;  %s10468_s4 = inlined_call_operand.vmem [shape: bf16[128,2], index: 4, kind: input, shape index: {}]   ;;  %s10469_s5 = inlined_call_operand.vmem [shape: f32[1,128], index: 5, kind: input, shape index: {}]   ;;  %s10470_s6 = inlined_call_operand.vmem [shape: bf16[128,27], index: 6, kind: input, shape index: {}]   ;;  %s10471_s7 = inlined_call_operand.vmem [shape: bf16[2,18], index: 7, kind: input, shape index: {}]   ;;  %s10472_s8 = inlined_call_operand.vmem [shape: bf16[18,2], index: 8, kind: input, shape index: {}]   ;;  %s10473_s9 = inlined_call_operand.vmem [shape: f32[1,9], index: 9, kind: input, shape index: {}]   ;;  %s10474_s10 = inlined_call_operand.vmem [shape: bf16[9,64], index: 10, kind: input, shape index: {}]   ;;  %s10475_s11 = inlined_call_operand.vmem [shape: bf16[2,32], index: 11, kind: input, shape index: {}]   ;;  %s10476_s12 = inlined_call_operand.vmem [shape: bf16[32,2], index: 12, kind: input, shape index: {}]   ;;  %s10477_s13 = inlined_call_operand.vmem [shape: f32[1,32], index: 13, kind: input, shape index: {}]   ;;  %s10478_s14 = inlined_call_operand.vmem [shape: bf16[32,3], index: 14, kind: input, shape index: {}]   ;;  %s10479_s15 = inlined_call_operand.vmem [shape: bf16[2,2], index: 15, kind: input, shape index: {}]   ;;  %s10480_s16 = inlined_call_operand.vmem [shape: bf16[2,2], index: 16, kind: input, shape index: {}]   ;;  %s10481_s17 = inlined_call_operand.<no memory space> [shape: f32[1,1], index: 17, kind: input, shape index: {}]   ;;  %s10482_s18 = inlined_call_operand.vmem [shape: f32[256,1], index: 18, kind: output, shape index: {}]  }
   0x1   :  { %10610 = sst [smem:[#allocation34_spill]] %s10464_s0  ;;  %v23_v0 = vstv %s10481_s17 }
   0x2   :  { %10611 = sst [smem:[#allocation35_spill]] %s10465_s1  ;;  %24 = vst [vmem:[#allocation2] sm:$0x1] %v23_v0 }
   0x3   :  { %10612 = sst [smem:[#allocation36_spill]] %s10466_s2 }
   0x4 LB: > { %s7800_s30 = sadd.s32 4294967295, %s7681_s29   ;;  %p6120_p0 = scmp.ge.s32.totalorder %s7681_s29, 1  ;;  %s7681_s29 = sphi %s7794_s29, %s30_s29  }
   0x5   : > { %p525_p1 = scmp.lt.s32.totalorder %s7681_s29, 3 }
   0x7   : > { %p526_p2 = pnand %p6120_p0, %p525_p1 }
   0x9   : > { %529 = sbr.rel (%p526_p2) target bundleno = 5189 (0x1445), region = 92 }
  0x10   : > { %s10613_s17 = sld [smem:[#allocation36_spill]]  ;;  %vm741_vm0 = vcmask 1040384   ;;  %vm742_vm1 = vcmask 1041408   ;;  %s6121_s1 = sshll.u32 %s7800_s30, 4  ;;  %v10483_v3 = vmov 65535   ;;  %v10486_v5 = vmov 0  }
  0x11   : > { %v743_v4 = vsel %vm741_vm0, 4294967295, %v10483_v3  ;;  %783 = vmatprep.mubr.bf16.mxu0 %v10486_v5  ;;  %p585_p3 = scmp.lt.s32.totalorder %s6121_s1, 31  ;;  %v7076_v7 = vld [vmem:[%s10468_s4] sm:$0xff]   ;;  %v7077_v10 = vld [vmem:[%s10468_s4 + $0x8] sm:$0xff]   ;;  %s10614_s26 = sld [smem:[#allocation34_spill]]  ;;  %v7078_v11 = vld [vmem:[%s10468_s4 + $0x10] sm:$0xff]  }
  0x12   : > { %v744_v6 = vsel %vm742_vm1, %v743_v4, 0  ;;  %6453 = vmatprep.subr.bf16.mxu1 %v7076_v7  ;;  %vm716_vm2 = vcmask 23552   ;;  %v7079_v15 = vld [vmem:[%s10468_s4 + $0x18] sm:$0xff]   ;;  %v7080_v18 = vld [vmem:[%s10468_s4 + $0x20] sm:$0xff]   ;;  %v7081_v38 = vld [vmem:[%s10468_s4 + $0x28] sm:$0xff]   ;;  %v10488_v40 = vmov 0.0  }
  0x13   : > { %s10783_s1 = smov (!%p585_p3, %s6121_s1), 31  ;;  %6454 = vmatpush3.bf16.msra.mxu1 %v7076_v7  ;;  %v7082_v39 = vld [vmem:[%s10468_s4 + $0x30] sm:$0xff]   ;;  %v7083_v41 = vld [vmem:[%s10468_s4 + $0x38] sm:$0xff]   ;;  %vm7686_vm3 = vmmov 0   ;;  %s7687_s28 = smov 64   ;;  %v10484_v60 = vmov 1  }
  0x14   : > { %s6122_s23 = sshll.u32 %s10783_s1, 3  ;;  %6455 = vmatprep.subr.bf16.mxu1 %v7077_v10  ;;  %7004 = vset.pattern.permute.xlu1 %v10484_v60  ;;  %p590_p4 = scmp.lt.s32.totalorder %s7800_s30, 1 }
  0x15   : > { %7006 = vset.pattern.permute.xlu0 %v10484_v60  ;;  %s10624_s22 = sld [smem:[#allocation35_spill]]  ;;  %s7689_s21 = smov 119  }
  0x16   : > { %v6127_v1 = vld.sshfl [vmem:[%s10613_s17] sm:$0x33 pattern:$0x76325410]  ;;  %s10785_s30 = smov (!%p590_p4, %s7800_s30), 1  ;;  %s7691_s20 = smov 112  }
  0x17   : > { %v715_v2 = vcombine.high %v6127_v1, %v6127_v1  ;;  %v746_v9 = vand.u32 %v6127_v1, %v744_v6  ;;  %s7825_s27 = scalar_lea.vmem %s10614_s26, %s6122_s23  ;;  %6456 = vmatpush3.bf16.msra.mxu1 %v7077_v10  ;;  %s6208_s17 = sshll.u32 %s10785_s30, 7 }
  0x18   : > { %v602_v12 = vld [vmem:[%s7825_s27] sm:$0xff]  ;;  %v603_v13 = vld [vmem:[%s7825_s27 + $0x8] sm:$0xff]  ;;  %6457 = vmatprep.subr.bf16.mxu1 %v7078_v11  ;;  %v604_v16 = vld [vmem:[%s7825_s27 + $0x10] sm:$0xff]  ;;  %s7690_s30 = smov 110   ;;  %s10411_s25 = scalar_lea.vmem %s10482_s18, %s6122_s23 }
  0x19   : > { %v749_v8 = vand.u32 %v744_v6, %v715_v2  ;;  %v698_v14 = vpack.c.bf16 %v603_v13, %v602_v12  ;;  %v605_v17 = vld [vmem:[%s7825_s27 + $0x18] sm:$0xff]  ;;  %v606_v20 = vld [vmem:[%s7825_s27 + $0x20] sm:$0xff]  ;;  %v607_v21 = vld [vmem:[%s7825_s27 + $0x28] sm:$0xff] }
  0x1a   : > { %v699_v19 = vpack.c.bf16 %v605_v17, %v604_v16  ;;  %v700_v22 = vpack.c.bf16 %v607_v21, %v606_v20  ;;  %v608_v23 = vld [vmem:[%s7825_s27 + $0x30] sm:$0xff]  ;;  %v609_v24 = vld [vmem:[%s7825_s27 + $0x38] sm:$0xff]  ;;  %v610_v26 = vld [vmem:[%s7825_s27 + $0x40] sm:$0xff] }
  0x1b   : > { %751 = vmatprep.subr.bf16.mxu0 %v749_v8  ;;  %6458 = vmatpush3.bf16.msra.mxu1 %v7078_v11  ;;  %v701_v25 = vpack.c.bf16 %v609_v24, %v608_v23  ;;  %v611_v27 = vld [vmem:[%s7825_s27 + $0x48] sm:$0xff]  ;;  %v612_v29 = vld [vmem:[%s7825_s27 + $0x50] sm:$0xff]  ;;  %v613_v30 = vld [vmem:[%s7825_s27 + $0x58] sm:$0xff]  ;;  %s7988_s2 = scalar_lea.vmem %s10624_s22, %s6208_s17 }
  0x1c   : > { %752 = vmatpush1.bf16.msra.mxu0 %v746_v9  ;;  %6459 = vmatprep.subr.bf16.mxu1 %v7079_v15  ;;  %v702_v28 = vpack.c.bf16 %v611_v27, %v610_v26  ;;  %v703_v31 = vpack.c.bf16 %v613_v30, %v612_v29  ;;  %v614_v32 = vld [vmem:[%s7825_s27 + $0x60] sm:$0xff]  ;;  %v615_v33 = vld [vmem:[%s7825_s27 + $0x68] sm:$0xff]  ;;  %v616_v35 = vld [vmem:[%s7825_s27 + $0x70] sm:$0xff] }
  0x1d   : > { %v704_v34 = vpack.c.bf16 %v615_v33, %v614_v32  ;;  %v617_v36 = vld [vmem:[%s7825_s27 + $0x78] sm:$0xff]  ;;  %6485 = vmatprep.subr.bf16.mxu0 %v10488_v40  ;;  %v1033_v21 = vld [vmem:[%s10467_s3] sm:$0x1] }
  0x1e   : > { %v705_v37 = vpack.c.bf16 %v617_v36, %v616_v35  ;;  %v629_v3 = vld [vmem:[%s7988_s2 + $0x58] sm:$0xff] }
  0x1f   : > { %6128 = vmatmul.mubr.msk.bf16.vlgmr.msra.gmra.mrb[0].mxu0 %vm716_vm2, %v698_v14  ;;  %6460 = vmatpush3.bf16.msra.mxu1 %v7079_v15  ;;  %vm645_vm14 = vcmp.gt.f32.partialorder %v629_v3, 0.0 }
  0x20   : > { %793 = vmatprep.mubr.bf16.mxu0 %v10486_v5  ;;  %6461 = vmatprep.subr.bf16.mxu1 %v7080_v18 }
  0x23   : > { %6462 = vmatpush3.bf16.msra.mxu1 %v7080_v18 }
  0x24   : > { %6463 = vmatprep.subr.bf16.mxu1 %v7081_v38 }
  0x27   : > { %6129 = vmatmul.mubr.msk.bf16.gmra.mrb[4].mxu0 %vm716_vm2, %v699_v19  ;;  %6464 = vmatpush3.bf16.msra.mxu1 %v7081_v38 }
  0x28   : > { %803 = vmatprep.mubr.bf16.mxu0 %v10486_v5  ;;  %6465 = vmatprep.subr.bf16.mxu1 %v7082_v39 }
  0x2b   : > { %6466 = vmatpush3.bf16.msra.mxu1 %v7082_v39 }
  0x2c   : > { %6467 = vmatprep.subr.bf16.mxu1 %v7083_v41 }
  0x2f   : > { %6130 = vmatmul.mubr.msk.bf16.gmra.mrb[8].mxu0 %vm716_vm2, %v700_v22  ;;  %6468 = vmatpush3.bf16.msra.mxu1 %v7083_v41 }
  0x30   : > { %813 = vmatprep.mubr.bf16.mxu0 %v10486_v5 }
  0x37   : > { %6131 = vmatmul.mubr.msk.bf16.gmra.mrb[12].mxu0 %vm716_vm2, %v701_v25 }
  0x38   : > { %823 = vmatprep.mubr.bf16.mxu0 %v10486_v5 }
  0x3f   : > { %6132 = vmatmul.mubr.msk.bf16.gmra.mrb[16].mxu0 %vm716_vm2, %v702_v28 }
  0x40   : > { %833 = vmatprep.mubr.bf16.mxu0 %v10486_v5 }
  0x47   : > { %6133 = vmatmul.mubr.msk.bf16.gmra.mrb[20].mxu0 %vm716_vm2, %v703_v31 }
  0x48   : > { %843 = vmatprep.mubr.bf16.mxu0 %v10486_v5 }
  0x4f   : > { %6134 = vmatmul.mubr.msk.bf16.gmra.mrb[24].mxu0 %vm716_vm2, %v704_v34 }
  0x50   : > { %853 = vmatprep.mubr.bf16.mxu0 %v10486_v5 }
  0x57   : > { %6135 = vmatmul.mubr.msk.bf16.gmra.mrb[28].mxu0 %vm716_vm2, %v705_v37 }
  0x58   : > { %6501 = vmatprep.mubr.msk.bf16.mxu0 %vm7686_vm3, %v10488_v40 }
  0xf2   : > { %v785_v42 = vpop.f32.mrb[0].mxu0 }
  0xf3   : > { %v7879_v43 = vpop.f32.mrb[1].mxu0 }
  0xf4   : > { %v789_v44 = vpop.f32.mrb[2].mxu0 }
  0xf5   : > { %v7881_v45 = vpack.c.bf16 %v789_v44, %v785_v42  ;;  %v7883_v46 = vpop.f32.mrb[3].mxu0 }
  0xf7   : > { %1795 = vrot.lane.b32.xlu0 %v7881_v45, %s7687_s28  ;;  %6469 = vmatprep.mubr.bf16.mxu1 %v7881_v45 }
  0xf8   : > { %6486 = vmatpush3.bf16.xpose.msra.mxu0 %v7881_v45 }
  0xf9   : > { %6487 = vmatprep.subr.bf16.mxu0 %v10488_v40 }
  0xfa   : > { %v795_v47 = vpop.f32.mrb[4].mxu0 }
  0xfb   : > { %v7890_v48 = vpop.f32.mrb[5].mxu0 }
  0xfc   : > { %v799_v49 = vpop.f32.mrb[6].mxu0 }
  0xfd   : > { %v7892_v50 = vpack.c.bf16 %v799_v49, %v795_v47  ;;  %v7894_v51 = vpop.f32.mrb[7].mxu0 }
  0xff   : > { %1797 = vrot.lane.b32.xlu1 %v7892_v50, %s7687_s28  ;;  %6470 = vmatmul.mubr.bf16.vlgmr.msra.gmra.mrb[0].mxu1 %v7892_v50 }
 0x100   : > { %6488 = vmatpush3.bf16.xpose.msra.mxu0 %v7892_v50 }
 0x101   : > { %6489 = vmatprep.subr.bf16.mxu0 %v10488_v40 }
 0x102   : > { %v805_v52 = vpop.f32.mrb[8].mxu0 }
 0x103   : > { %v7901_v53 = vpop.f32.mrb[9].mxu0 }
 0x104   : > { %v809_v54 = vpop.f32.mrb[10].mxu0 }
 0x105   : > { %v866_v55 = vpack.c.bf16 %v809_v54, %v805_v52  ;;  %v7903_v56 = vpop.f32.mrb[11].mxu0  ;;  %v620_v52 = vld [vmem:[%s7988_s2 + $0x10] sm:$0xff]  ;;  %v1154_v54 = vlaneseq }
 0x106   : > { %7099 = vlog2.f32 %v620_v52  ;;  %vm636_vm4 = vcmp.gt.f32.partialorder %v620_v52, 0.0 }
 0x107   : > { %1799 = vrot.lane.b32.xlu0 %v866_v55, %s7687_s28  ;;  %6473 = vmatprep.mubr.bf16.mxu1 %v866_v55 }
 0x108   : > { %6490 = vmatpush3.bf16.xpose.msra.mxu0 %v866_v55 }
 0x109   : > { %6491 = vmatprep.subr.bf16.mxu0 %v10488_v40 }
 0x10a   : > { %v815_v57 = vpop.f32.mrb[12].mxu0 }
 0x10b   : > { %v7907_v58 = vpop.f32.mrb[13].mxu0 }
 0x10c   : > { %10615 = vst [vmem:[#allocation3_spill] sm:$0xff] %v7907_v58  ;;  %v819_v59 = vpop.f32.mrb[14].mxu0 }
 0x10d   : > { %v867_v61 = vpack.c.bf16 %v819_v59, %v815_v57  ;;  %v7911_v62 = vpop.f32.mrb[15].mxu0  ;;  %v1155_v57 = vshrl.u32 %v1154_v54, 7 }
 0x10f   : > { %1801 = vrot.lane.b32.xlu1 %v867_v61, %s7687_s28  ;;  %6474 = vmatmul.mubr.bf16.gmra.mrb[4].mxu1 %v867_v61  ;;  %v7992_v59 = vsub.s32 1, %v1155_v57 }
 0x110   : > { %6492 = vmatpush3.bf16.xpose.msra.mxu0 %v867_v61 }
 0x111   : > { %6493 = vmatprep.subr.bf16.mxu0 %v10488_v40  ;;  %10625 = vst [vmem:[#allocation12_spill] sm:$0xff] %v7992_v59 }
 0x112   : > { %v825_v63 = vpop.f32.mrb[16].mxu0 }
 0x113   : > { %v7915_v0 = vpop.f32.mrb[17].mxu0 }
 0x114   : > { %10616 = vst [vmem:[#allocation4_spill] sm:$0xff] %v7915_v0  ;;  %v829_v1 = vpop.f32.mrb[18].mxu0 }
 0x115   : > { %v868_v2 = vpack.c.bf16 %v829_v1, %v825_v63  ;;  %v7917_v4 = vpop.f32.mrb[19].mxu0  ;;  %v7100_v63 = vpop.eup %7099 }
 0x116   : > { %10617 = vst [vmem:[#allocation5_spill] sm:$0xff] %v7917_v4 }
 0x117   : > { %1803 = vrot.lane.b32.xlu0 %v868_v2, %s7687_s28  ;;  %6477 = vmatprep.mubr.bf16.mxu1 %v868_v2 }
 0x118   : > { %6494 = vmatpush3.bf16.xpose.msra.mxu0 %v868_v2 }
 0x119   : > { %6495 = vmatprep.subr.bf16.mxu0 %v10488_v40 }
 0x11a   : > { %v835_v6 = vpop.f32.mrb[20].mxu0 }
 0x11b   : > { %v7921_v7 = vpop.f32.mrb[21].mxu0 }
 0x11c   : > { %10618 = vst [vmem:[#allocation6_spill] sm:$0xff] %v7921_v7  ;;  %v839_v8 = vpop.f32.mrb[22].mxu0 }
 0x11d   : > { %v7923_v9 = vpack.c.bf16 %v839_v8, %v835_v6  ;;  %v7925_v10 = vpop.f32.mrb[23].mxu0  ;;  %v8001_v6 = vld [vmem:[%s7988_s2 + $0x8] sm:$0xff] }
 0x11e   : > { %10619 = vst [vmem:[#allocation7_spill] sm:$0xff] %v7925_v10  ;;  %vm635_vm7 = vcmp.gt.f32.partialorder %v8001_v6, 0.0 }
 0x11f   : > { %6478 = vmatmul.mubr.bf16.gmra.mrb[8].mxu1 %v7923_v9 }
 0x120   : > { %6496 = vmatpush3.bf16.xpose.msra.mxu0 %v7923_v9 }
 0x121   : > { %6497 = vmatprep.subr.bf16.mxu0 %v10488_v40 }
 0x122   : > { %v845_v11 = vpop.f32.mrb[24].mxu0 }
 0x123   : > { %v7930_v12 = vpop.f32.mrb[25].mxu0 }
 0x124   : > { %10620 = vst [vmem:[#allocation8_spill] sm:$0xff] %v7930_v12  ;;  %v849_v13 = vpop.f32.mrb[26].mxu0 }
 0x125   : > { %v7932_v14 = vpack.c.bf16 %v849_v13, %v845_v11  ;;  %v7934_v15 = vpop.f32.mrb[27].mxu0  ;;  %v655_v11 = vmul.f32 0.6931472, %v7100_v63 }
 0x126   : > { %10621 = vst [vmem:[#allocation9_spill] sm:$0xff] %v7934_v15 }
 0x127   : > { %6481 = vmatprep.mubr.bf16.mxu1 %v7932_v14 }
 0x128   : > { %6498 = vmatpush3.bf16.xpose.msra.mxu0 %v7932_v14 }
 0x129   : > { %6499 = vmatprep.subr.bf16.mxu0 %v10488_v40 }
 0x12a   : > { %v855_v16 = vpop.f32.mrb[28].mxu0 }
 0x12b   : > { %v7939_v17 = vpop.f32.mrb[29].mxu0 }
 0x12c   : > { %10622 = vst [vmem:[#allocation10_spill] sm:$0xff] %v7939_v17  ;;  %v859_v18 = vpop.f32.mrb[30].mxu0 }
 0x12d   : > { %v7941_v19 = vpack.c.bf16 %v859_v18, %v855_v16  ;;  %v7943_v20 = vpop.f32.mrb[31].mxu0 }
 0x12e   : > { %10623 = vst [vmem:[#allocation11_spill] sm:$0xff] %v7943_v20 }
 0x12f   : > { %6482 = vmatmul.mubr.bf16.gmra.mrb[12].mxu1 %v7941_v19 }
 0x130   : > { %6500 = vmatpush3.bf16.xpose.msra.mxu0 %v7941_v19 }
 0x131   : > { %6505 = vmatprep.subr.bf16.mxu0 %v7881_v45 }
 0x137   : > { %6502 = vmatmul.mubr.bf16.vlgmr.msra.gmra.mrb[32].mxu0 %v1033_v21 }
 0x138   : > { %6506 = vmatpush3.bf16.msra.mxu0 %v7881_v45 }
 0x139   : > { %6507 = vmatprep.subr.bf16.mxu0 %v7892_v50 }
 0x13c   : > { %6508 = vmatpush3.bf16.msra.mxu0 %v7892_v50 }
 0x13d   : > { %6509 = vmatprep.subr.bf16.mxu0 %v866_v55 }
 0x140   : > { %6510 = vmatpush3.bf16.msra.mxu0 %v866_v55  ;;  %v618_v55 = vld [vmem:[%s7988_s2] sm:$0xff] }
 0x141   : > { %6511 = vmatprep.subr.bf16.mxu0 %v867_v61  ;;  %7101 = vlog2.f32 %v618_v55  ;;  %vm634_vm5 = vcmp.gt.f32.partialorder %v618_v55, 0.0 }
 0x144   : > { %6512 = vmatpush3.bf16.msra.mxu0 %v867_v61  ;;  %v621_v61 = vld [vmem:[%s7988_s2 + $0x18] sm:$0xff] }
 0x145   : > { %6513 = vmatprep.subr.bf16.mxu0 %v868_v2  ;;  %7103 = vlog2.f32 %v621_v61  ;;  %vm637_vm6 = vcmp.gt.f32.partialorder %v621_v61, 0.0 }
 0x146   : > { %7105 = vlog2.f32 %v8001_v6 }
 0x148   : > { %6514 = vmatpush3.bf16.msra.mxu0 %v868_v2  ;;  %v7998_v2 = vsub.s32 0, %v1155_v57  ;;  %v8036_v57 = vld [vmem:[%s7988_s2 + $0x38] sm:$0xff] }
 0x149   : > { %6515 = vmatprep.subr.bf16.mxu0 %v7923_v9  ;;  %vm641_vm10 = vcmp.gt.f32.partialorder %v8036_v57, 0.0 }
 0x14a   : > { %10626 = vst [vmem:[#allocation13_spill] sm:$0xff] %v7998_v2 }
 0x14b   : > { %v7102_v13 = vpop.eup %7101 }
 0x14c   : > { %6516 = vmatpush3.bf16.msra.mxu0 %v7923_v9 }
 0x14d   : > { %6517 = vmatprep.subr.bf16.mxu0 %v7932_v14 }
 0x150   : > { %6518 = vmatpush3.bf16.msra.mxu0 %v7932_v14 }
 0x151   : > { %6519 = vmatprep.subr.bf16.mxu0 %v7941_v19 }
 0x154   : > { %6520 = vmatpush3.bf16.msra.mxu0 %v7941_v19 }
 0x169   : > { %v1796_v22 = vpop.permute.xlu0 %1795 }
 0x16a   : > { %6537 = vmatprep.subr.bf16.mxu1 %v1796_v22 }
 0x16b   : > { %6538 = vmatpush3.bf16.msra.mxu1 %v1796_v22 }
 0x171   : > { %v1798_v23 = vpop.permute.xlu1 %1797 }
 0x172   : > { %6539 = vmatprep.subr.bf16.mxu1 %v1798_v23 }
 0x173   : > { %6540 = vmatpush3.bf16.msra.mxu1 %v1798_v23  ;;  %v8010_v23 = vld [vmem:[%s7988_s2 + $0x30] sm:$0xff] }
 0x174   : > { %7107 = vlog2.f32 %v8010_v23  ;;  %vm640_vm8 = vcmp.gt.f32.partialorder %v8010_v23, 0.0 }
 0x179   : > { %v1800_v24 = vpop.permute.xlu0 %1799 }
 0x17a   : > { %6541 = vmatprep.subr.bf16.mxu1 %v1800_v24 }
 0x17b   : > { %6542 = vmatpush3.bf16.msra.mxu1 %v1800_v24 }
 0x181   : > { %v1802_v25 = vpop.permute.xlu1 %1801 }
 0x182   : > { %6543 = vmatprep.subr.bf16.mxu1 %v1802_v25 }
 0x183   : > { %6544 = vmatpush3.bf16.msra.mxu1 %v1802_v25 }
 0x189   : > { %v1804_v26 = vpop.permute.xlu0 %1803 }
 0x18a   : > { %6545 = vmatprep.subr.bf16.mxu1 %v1804_v26 }
 0x18b   : > { %6546 = vmatpush3.bf16.msra.mxu1 %v1804_v26  ;;  %v8012_v26 = vsel %vm636_vm4, %v655_v11, -1e+30 }
 0x18c   : > { %10627 = vst [vmem:[#allocation14_spill] sm:$0xff] %v8012_v26 }
 0x1d2   : > { %v6471_v27 = vpop.f32.mrb[0].mxu1 }
 0x1d3   : > { %v970_v28 = vpop.f32.mrb[1].mxu1  ;;  %1496 = vperm.xlu1 %7004, %v6471_v27  }
 0x1d4   : > { %v6472_v29 = vpop.f32.mrb[2].mxu1  ;;  %1488 = vperm.xlu0 %7006, %v970_v28  }
 0x1d5   : > { %v973_v30 = vpop.f32.mrb[3].mxu1 }
 0x1d7   : > { %7005 = vset.pattern.permute.xlu1 %v10486_v5 }
 0x1d8   : > { %1086 = vperm.xlu1 %7005, %v6471_v27   ;;  %7007 = vset.pattern.permute.xlu0 %v10486_v5  ;;  %v651_v27 = vmul.f32 0.6931472, %v7102_v13 }
 0x1d9   : > { %1076 = vperm.xlu0 %7007, %v970_v28  }
 0x1dc   : > { %7008 = vset.pattern.permute.xlu1 %v10484_v60 }
 0x1dd   : > { %1500 = vperm.xlu1 %7008, %v6472_v29   ;;  %1091 = vperm.xlu0 %7007, %v6472_v29  }
 0x1e1   : > { %7010 = vset.pattern.permute.xlu1 %v10486_v5  ;;  %7009 = vset.pattern.permute.xlu0 %v10484_v60 }
 0x1e2   : > { %1081 = vperm.xlu1 %7010, %v973_v30   ;;  %v6475_v31 = vpop.f32.mrb[4].mxu1  ;;  %1492 = vperm.xlu0 %7009, %v973_v30  }
 0x1e3   : > { %v986_v32 = vpop.f32.mrb[5].mxu1 }
 0x1e4   : > { %v6476_v33 = vpop.f32.mrb[6].mxu1 }
 0x1e5   : > { %v989_v34 = vpop.f32.mrb[7].mxu1 }
 0x1e6   : > { %1106 = vperm.xlu1 %7010, %v6475_v31   ;;  %1512 = vperm.xlu0 %7009, %v6475_v31  }
 0x1ea   : > { %1096 = vperm.xlu1 %7010, %v986_v32   ;;  %1504 = vperm.xlu0 %7009, %v986_v32   ;;  %v7104_v32 = vpop.eup %7103 }
 0x1eb   : > { %v7106_v52 = vpop.eup %7105 }
 0x1ec   : > { %v7108_v13 = vpop.eup %7107 }
 0x1ee   : > { %7011 = vset.pattern.permute.xlu1 %v10484_v60  ;;  %7012 = vset.pattern.permute.xlu0 %v10486_v5 }
 0x1ef   : > { %1516 = vperm.xlu1 %7011, %v6476_v33   ;;  %1111 = vperm.xlu0 %7012, %v6476_v33  }
 0x1f2   : > { %v6479_v35 = vpop.f32.mrb[8].mxu1 }
 0x1f3   : > { %1508 = vperm.xlu1 %7011, %v989_v34   ;;  %1101 = vperm.xlu0 %7012, %v989_v34   ;;  %v1002_v36 = vpop.f32.mrb[9].mxu1 }
 0x1f4   : > { %v6480_v37 = vpop.f32.mrb[10].mxu1 }
 0x1f5   : > { %v1005_v38 = vpop.f32.mrb[11].mxu1 }
 0x1f7   : > { %7013 = vset.pattern.permute.xlu0 %v10484_v60  ;;  %1532 = vperm.xlu1 %7011, %v6480_v37  }
 0x1f8   : > { %1528 = vperm.xlu0 %7013, %v6479_v35  }
 0x1fb   : > { %7017 = vset.pattern.permute.xlu1 %v10486_v5 }
 0x1fc   : > { %7014 = vset.pattern.permute.xlu0 %v10486_v5  ;;  %1131 = vperm.xlu1 %7017, %v6480_v37  }
 0x1fd   : > { %1126 = vperm.xlu0 %7014, %v6479_v35  }
 0x200   : > { %7018 = vset.pattern.permute.xlu1 %v10484_v60 }
 0x201   : > { %7015 = vset.pattern.permute.xlu0 %v10484_v60  ;;  %1524 = vperm.xlu1 %7018, %v1005_v38  }
 0x202   : > { %1520 = vperm.xlu0 %7015, %v1002_v36   ;;  %v6483_v39 = vpop.f32.mrb[12].mxu1 }
 0x203   : > { %v1018_v41 = vpop.f32.mrb[13].mxu1 }
 0x204   : > { %v6484_v42 = vpop.f32.mrb[14].mxu1 }
 0x205   : > { %7019 = vset.pattern.permute.xlu1 %v10486_v5  ;;  %v1021_v44 = vpop.f32.mrb[15].mxu1 }
 0x206   : > { %7016 = vset.pattern.permute.xlu0 %v10486_v5  ;;  %1121 = vperm.xlu1 %7019, %v1005_v38   ;;  %v8023_v38 = vsel %vm634_vm5, %v651_v27, -1e+30 }
 0x207   : > { %1116 = vperm.xlu0 %7016, %v1002_v36   ;;  %v8021_v36 = vld [vmem:[%s7988_s2 + $0x20] sm:$0xff]  ;;  %10628 = vst [vmem:[#allocation15_spill] sm:$0xff] %v8023_v38 }
 0x208   : > { %7109 = vlog2.f32 %v8021_v36  ;;  %vm638_vm9 = vcmp.gt.f32.partialorder %v8021_v36, 0.0 }
 0x209   : > { %7111 = vlog2.f32 %v8036_v57 }
 0x20a   : > { %7024 = vset.pattern.permute.xlu1 %v10484_v60  ;;  %v1068_v45 = vpop.f32.mrb[32].mxu0 }
 0x20b   : > { %7020 = vset.pattern.permute.xlu0 %v10484_v60  ;;  %1548 = vperm.xlu1 %7024, %v6484_v42   ;;  %v6503_v47 = vpop.f32.mrb[33].mxu0  ;;  %v7996_v1 = vrot.slane %v1068_v45, %v7992_v59  ;;  %v8005_v21 = vrot.slane %v1068_v45, %v7998_v2  ;;  %v657_v45 = vmul.f32 0.6931472, %v7104_v32 }
 0x20c   : > { %1544 = vperm.xlu0 %7020, %v6483_v39   ;;  %v1071_v49 = vpop.f32.mrb[34].mxu0 }
 0x20d   : > { %v6504_v50 = vpop.f32.mrb[35].mxu0  ;;  %v8040_v11 = vsel %vm637_vm6, %v657_v45, -1e+30  ;;  %vm1980_vm6 = vcmask 523264  }
 0x20e   : > { %10629 = vst [vmem:[#allocation16_spill] sm:$0xff] %v8040_v11 }
 0x20f   : > { %7025 = vset.pattern.permute.xlu1 %v10486_v5 }
 0x210   : > { %7021 = vset.pattern.permute.xlu0 %v10486_v5  ;;  %1151 = vperm.xlu1 %7025, %v6484_v42  }
 0x211   : > { %1146 = vperm.xlu0 %7021, %v6483_v39  }
 0x212   : > { %v7110_v6 = vpop.eup %7109 }
 0x214   : > { %7026 = vset.pattern.permute.xlu1 %v10484_v60 }
 0x215   : > { %7022 = vset.pattern.permute.xlu0 %v10484_v60  ;;  %1540 = vperm.xlu1 %7026, %v1021_v44  }
 0x216   : > { %1536 = vperm.xlu0 %7022, %v1018_v41  }
 0x219   : > { %7027 = vset.pattern.permute.xlu1 %v10486_v5 }
 0x21a   : > { %7023 = vset.pattern.permute.xlu0 %v10486_v5  ;;  %1141 = vperm.xlu1 %7027, %v1021_v44   ;;  %v8134_v5 = vld [vmem:[%s7988_s2 + $0x48] sm:$0xff] }
 0x21b   : > { %1136 = vperm.xlu0 %7023, %v1018_v41   ;;  %vm643_vm15 = vcmp.gt.f32.partialorder %v8134_v5, 0.0 }
 0x21e   : > { %7028 = vset.pattern.permute.xlu1 %v10484_v60 }
 0x252   : > { %v1497_v8 = vpop.permute.xlu1 %1496 }
 0x253   : > { %v1557_v16 = vadd.f32 %v7996_v1, %v1497_v8  ;;  %v1489_v18 = vpop.permute.xlu0 %1488 }
 0x254   : > { %v1555_v22 = vadd.f32 %v7996_v1, %v1489_v18 }
 0x255   : > { %v1573_v24 = vmul.f32 0.2, %v1557_v16 }
 0x256   : > { %v1571_v25 = vmul.f32 0.2, %v1555_v22 }
 0x257   : > { %v1087_v28 = vpop.permute.xlu1 %1086  ;;  %v1589_v29 = vmax.f32 %v1557_v16, %v1573_v24  ;;  %v653_v24 = vmul.f32 0.6931472, %v7106_v52 }
 0x258   : > { %v1160_v30 = vadd.f32 %v8005_v21, %v1087_v28  ;;  %v1077_v31 = vpop.permute.xlu0 %1076  ;;  %v1587_v35 = vmax.f32 %v1555_v22, %v1571_v25 }
 0x259   : > { %v1158_v33 = vadd.f32 %v8005_v21, %v1077_v31  ;;  %v8018_v34 = vadd.f32 %v1589_v29, %v8012_v26  ;;  %v8050_v29 = vld [vmem:[%s7988_s2 + $0x28] sm:$0xff] }
 0x25a   : > { %v1176_v37 = vmul.f32 0.2, %v1160_v30  ;;  %v8030_v50 = vadd.f32 %v1587_v35, %v8023_v38  ;;  %7113 = vlog2.f32 %v8050_v29  ;;  %vm639_vm11 = vcmp.gt.f32.partialorder %v8050_v29, 0.0 }
 0x25b   : > { %v1174_v39 = vmul.f32 0.2, %v1158_v33  ;;  %1623 = vmax.xlane.f32.xlu1 %v8018_v34 }
 0x25c   : > { %v1501_v41 = vpop.permute.xlu1 %1500  ;;  %v1092_v42 = vpop.permute.xlu0 %1091  ;;  %v1192_v44 = vmax.f32 %v1160_v30, %v1176_v37 }
 0x25d   : > { %v1558_v47 = vadd.f32 %v7996_v1, %v1501_v41  ;;  %v1161_v49 = vadd.f32 %v8005_v21, %v1092_v42  ;;  %v1190_v55 = vmax.f32 %v1158_v33, %v1174_v39  ;;  %v663_v33 = vmul.f32 0.6931472, %v7108_v13 }
 0x25e   : > { %v8033_v54 = vadd.f32 %v1192_v44, %v8012_v26  ;;  %v8060_v41 = vsel %vm635_vm7, %v653_v24, -1e+30  ;;  %vm2241_vm7 = vcmask 146432  }
 0x25f   : > { %v1574_v63 = vmul.f32 0.2, %v1558_v47  ;;  %v1177_v8 = vmul.f32 0.2, %v1161_v49  ;;  %1619 = vmax.xlane.f32.xlu1 %v8030_v50  ;;  %v8046_v28 = vadd.f32 %v1190_v55, %v8023_v38  ;;  %10630 = vst [vmem:[#allocation17_spill] sm:$0xff] %v8060_v41 }
 0x260   : > { %1226 = vmax.xlane.f32.xlu0 %v8033_v54 }
 0x261   : > { %v1082_v16 = vpop.permute.xlu1 %1081  ;;  %v1493_v18 = vpop.permute.xlu0 %1492  ;;  %v1193_v61 = vmax.f32 %v1161_v49, %v1177_v8  ;;  %v1590_v22 = vmax.f32 %v1558_v47, %v1574_v63  ;;  %v8067_v49 = vld [vmem:[%s7988_s2 + $0x50] sm:$0xff]  ;;  %v8073_v8 = vsel %vm640_vm8, %v663_v33, -1e+30  ;;  %vm3411_vm8 = vcmask 1043456  }
 0x262   : > { %v1159_v25 = vadd.f32 %v8005_v21, %v1082_v16  ;;  %v1556_v27 = vadd.f32 %v7996_v1, %v1493_v18  ;;  %10631 = vst [vmem:[#allocation18_spill] sm:$0xff] %v8073_v8  ;;  %v659_v18 = vmul.f32 0.6931472, %v7110_v6  ;;  %7115 = vlog2.f32 %v8067_v49 }
 0x263   : > { %v8053_v30 = vadd.f32 %v1193_v61, %v8040_v11  ;;  %v8058_v39 = vadd.f32 %v1590_v22, %v8040_v11  ;;  %vm644_vm12 = vcmp.gt.f32.partialorder %v8067_v49, 0.0 }
 0x264   : > { %v1175_v31 = vmul.f32 0.2, %v1159_v25  ;;  %v1572_v32 = vmul.f32 0.2, %v1556_v27  ;;  %1222 = vmax.xlane.f32.xlu0 %v8046_v28  ;;  %v8087_v36 = vsel %vm638_vm9, %v659_v18, -1e+30 }
 0x265   : > { %v1107_v35 = vpop.permute.xlu1 %1106  ;;  %v1513_v37 = vpop.permute.xlu0 %1512  ;;  %1228 = vmax.xlane.f32.xlu1 %v8053_v30  ;;  %10632 = vst [vmem:[#allocation19_spill] sm:$0xff] %v8087_v36  ;;  %vm3412_vm9 = vcmask 1044480  }
 0x266   : > { %v1164_v42 = vadd.f32 %v8005_v21, %v1107_v35  ;;  %v1561_v44 = vadd.f32 %v7996_v1, %v1513_v37  ;;  %v1191_v45 = vmax.f32 %v1159_v25, %v1175_v31  ;;  %v1588_v47 = vmax.f32 %v1556_v27, %v1572_v32  ;;  %v7112_v27 = vpop.eup %7111 }
 0x268   : > { %v1180_v52 = vmul.f32 0.2, %v1164_v42  ;;  %v1577_v55 = vmul.f32 0.2, %v1561_v44  ;;  %1625 = vmax.xlane.f32.xlu0 %v8058_v39  ;;  %v8071_v63 = vadd.f32 %v1191_v45, %v8060_v41  ;;  %v8076_v16 = vadd.f32 %v1588_v47, %v8060_v41  ;;  %v7114_v47 = vpop.eup %7113 }
 0x269   : > { %v1097_v23 = vpop.permute.xlu1 %1096  ;;  %v1505_v13 = vpop.permute.xlu0 %1504  ;;  %v665_v45 = vmul.f32 0.6931472, %v7112_v27  ;;  %v661_v57 = vmul.f32 0.6931472, %v7114_v47 }
 0x26a   : > { %v1162_v61 = vadd.f32 %v8005_v21, %v1097_v23  ;;  %v1559_v22 = vadd.f32 %v7996_v1, %v1505_v13  ;;  %1224 = vmax.xlane.f32.xlu1 %v8071_v63  ;;  %v1593_v24 = vmax.f32 %v1561_v44, %v1577_v55  ;;  %v1196_v25 = vmax.f32 %v1164_v42, %v1180_v52 }
 0x26b   : > { %v8107_v27 = vsel %vm641_vm10, %v665_v45, -1e+30  ;;  %vm3386_vm10 = vcmask 72704  }
 0x26c   : > { %v1178_v31 = vmul.f32 0.2, %v1162_v61  ;;  %v1575_v32 = vmul.f32 0.2, %v1559_v22  ;;  %1621 = vmax.xlane.f32.xlu0 %v8076_v16  ;;  %v8085_v33 = vadd.f32 %v1593_v24, %v8073_v8  ;;  %v8091_v6 = vadd.f32 %v1196_v25, %v8073_v8  ;;  %v8101_v24 = vld [vmem:[%s7988_s2 + $0x40] sm:$0xff]  ;;  %10633 = vst [vmem:[#allocation20_spill] sm:$0xff] %v8107_v27 }
 0x26d   : > { %7117 = vlog2.f32 %v8101_v24  ;;  %vm642_vm13 = vcmp.gt.f32.partialorder %v8101_v24, 0.0  ;;  %v8166_v24 = vld [vmem:[%s7988_s2 + $0x60] sm:$0xff] }
 0x26e   : > { %v1517_v35 = vpop.permute.xlu1 %1516  ;;  %v1112_v37 = vpop.permute.xlu0 %1111  ;;  %1631 = vmax.xlane.f32.xlu1 %v8085_v33  ;;  %v1591_v44 = vmax.f32 %v1559_v22, %v1575_v32  ;;  %v1194_v42 = vmax.f32 %v1162_v61, %v1178_v31  ;;  %7119 = vlog2.f32 %v629_v3  ;;  %vm646_vm4 = vcmp.gt.f32.partialorder %v8166_v24, 0.0 }
 0x26f   : > { %v1562_v52 = vadd.f32 %v7996_v1, %v1517_v35  ;;  %v1165_v55 = vadd.f32 %v8005_v21, %v1112_v37  ;;  %v7116_v31 = vpop.eup %7115  ;;  %7121 = vlog2.f32 %v8134_v5 }
 0x270   : > { %1234 = vmax.xlane.f32.xlu0 %v8091_v6  ;;  %v8098_v23 = vadd.f32 %v1591_v44, %v8087_v36  ;;  %v8105_v25 = vadd.f32 %v1194_v42, %v8087_v36 }
 0x271   : > { %v1578_v13 = vmul.f32 0.2, %v1562_v52  ;;  %v1181_v18 = vmul.f32 0.2, %v1165_v55 }
 0x272   : > { %v1509_v22 = vpop.permute.xlu1 %1508  ;;  %v1102_v61 = vpop.permute.xlu0 %1101  ;;  %1627 = vmax.xlane.f32.xlu1 %v8098_v23 }
 0x273   : > { %v1560_v32 = vadd.f32 %v7996_v1, %v1509_v22  ;;  %v1163_v35 = vadd.f32 %v8005_v21, %v1102_v61  ;;  %v1197_v37 = vmax.f32 %v1165_v55, %v1181_v18  ;;  %v1594_v44 = vmax.f32 %v1562_v52, %v1578_v13 }
 0x274   : > { %1230 = vmax.xlane.f32.xlu0 %v8105_v25  ;;  %v8121_v22 = vsel %vm639_vm11, %v661_v57, -1e+30  ;;  %v671_v18 = vmul.f32 0.6931472, %v7116_v31  ;;  %vm3539_vm11 = vcmask 261120  }
 0x275   : > { %v1576_v60 = vmul.f32 0.2, %v1560_v32  ;;  %v1179_v42 = vmul.f32 0.2, %v1163_v35  ;;  %v8116_v45 = vadd.f32 %v1197_v37, %v8107_v27  ;;  %v8119_v29 = vadd.f32 %v1594_v44, %v8107_v27  ;;  %10634 = vst [vmem:[#allocation21_spill] sm:$0xff] %v8121_v22 }
 0x276   : > { %v1533_v47 = vpop.permute.xlu1 %1532 }
 0x277   : > { %v1529_v55 = vpop.permute.xlu0 %1528  ;;  %1236 = vmax.xlane.f32.xlu1 %v8116_v45  ;;  %v1195_v52 = vmax.f32 %v1163_v35, %v1179_v42  ;;  %v1592_v13 = vmax.f32 %v1560_v32, %v1576_v60  ;;  %v8137_v60 = vsel %vm644_vm12, %v671_v18, -1e+30  ;;  %v7118_v42 = vpop.eup %7117  ;;  %vm6031_vm12 = vcmask 7168  }
 0x278   : > { %v1565_v61 = vadd.f32 %v7996_v1, %v1529_v55  ;;  %1633 = vmax.xlane.f32.xlu0 %v8119_v29  ;;  %10635 = vst [vmem:[#allocation22_spill] sm:$0xff] %v8137_v60  ;;  %v7120_v18 = vpop.eup %7119 }
 0x279   : > { %v8128_v37 = vadd.f32 %v1195_v52, %v8121_v22  ;;  %v8131_v57 = vadd.f32 %v1592_v13, %v8121_v22  ;;  %v8146_v52 = vld [vmem:[%s7988_s2 + $0x70] sm:$0xff]  ;;  %v1566_v13 = vadd.f32 %v7996_v1, %v1533_v47  ;;  %v8150_v22 = vld [vmem:[%s7988_s2 + $0x78] sm:$0xff]  ;;  %v673_v41 = vmul.f32 0.6931472, %v7120_v18  ;;  %v7122_v26 = vpop.eup %7121 }
 0x27a   : > { %v1581_v44 = vmul.f32 0.2, %v1565_v61  ;;  %7123 = vlog2.f32 %v8146_v52  ;;  %vm648_vm1 = vcmp.gt.f32.partialorder %v8146_v52, 0.0  ;;  %vm649_vm2 = vcmp.gt.f32.partialorder %v8150_v22, 0.0 }
 0x27b   : > { %v1132_v35 = vpop.permute.xlu1 %1131  ;;  %1232 = vmax.xlane.f32.xlu1 %v8128_v37  ;;  %7125 = vlog2.f32 %v8150_v22  ;;  %v1582_v47 = vmul.f32 0.2, %v1566_v13  ;;  %v8169_v18 = vsel %vm645_vm14, %v673_v41, -1e+30 }
 0x27c   : > { %v1127_v31 = vpop.permute.xlu0 %1126  ;;  %1629 = vmax.xlane.f32.xlu0 %v8131_v57  ;;  %v1597_v32 = vmax.f32 %v1565_v61, %v1581_v44  ;;  %v1169_v8 = vadd.f32 %v8005_v21, %v1132_v35  ;;  %10637 = vst [vmem:[#allocation24_spill] sm:$0xff] %v8169_v18  ;;  %7127 = vlog2.f32 %v8166_v24 }
 0x27d   : > { %v1168_v49 = vadd.f32 %v8005_v21, %v1127_v31  ;;  %v667_v31 = vmul.f32 0.6931472, %v7118_v42  ;;  %v1598_v35 = vmax.f32 %v1566_v13, %v1582_v47 }
 0x27e   : > { %v8143_v55 = vadd.f32 %v1597_v32, %v8137_v60 }
 0x27f   : > { %v1184_v40 = vmul.f32 0.2, %v1168_v49  ;;  %v8163_v42 = vsel %vm642_vm13, %v667_v31, -1e+30  ;;  %v8177_v31 = vld [vmem:[%s7988_s2 + $0x68] sm:$0xff]  ;;  %v8181_v13 = vadd.f32 %v1598_v35, %v8169_v18  ;;  %s7692_s2 = smov 96  }
 0x280   : > { %v1525_v27 = vpop.permute.xlu1 %1524  ;;  %1639 = vmax.xlane.f32.xlu0 %v8143_v55  ;;  %10636 = vst [vmem:[#allocation23_spill] sm:$0xff] %v8163_v42  ;;  %7129 = vlog2.f32 %v8177_v31  ;;  %vm647_vm5 = vcmp.gt.f32.partialorder %v8177_v31, 0.0 }
 0x281   : > { %v1521_v61 = vpop.permute.xlu0 %1520  ;;  %v1200_v44 = vmax.f32 %v1168_v49, %v1184_v40  ;;  %v1564_v40 = vadd.f32 %v7996_v1, %v1525_v27 }
 0x282   : > { %v1563_v32 = vadd.f32 %v7996_v1, %v1521_v61 }
 0x283   : > { %v8158_v36 = vadd.f32 %v1200_v44, %v8137_v60  ;;  %v1185_v60 = vmul.f32 0.2, %v1169_v8  ;;  %v1580_v2 = vmul.f32 0.2, %v1564_v40 }
 0x284   : > { %v1579_v11 = vmul.f32 0.2, %v1563_v32 }
 0x285   : > { %v1122_v49 = vpop.permute.xlu1 %1121  ;;  %1242 = vmax.xlane.f32.xlu0 %v8158_v36  ;;  %v1201_v15 = vmax.f32 %v1169_v8, %v1185_v60 }
 0x286   : > { %v1117_v61 = vpop.permute.xlu0 %1116  ;;  %v1595_v38 = vmax.f32 %v1563_v32, %v1579_v11  ;;  %v1167_v3 = vadd.f32 %v8005_v21, %v1122_v49  ;;  %v669_v11 = vmul.f32 0.6931472, %v7122_v26  ;;  %v7124_v32 = vpop.eup %7123  ;;  %v1596_v26 = vmax.f32 %v1564_v40, %v1580_v2 }
 0x287   : > { %v1166_v44 = vadd.f32 %v8005_v21, %v1117_v61  ;;  %v8197_v60 = vadd.f32 %v1201_v15, %v8169_v18 }
 0x288   : > { %v8173_v27 = vadd.f32 %v1595_v38, %v8163_v42  ;;  %v7126_v38 = vpop.eup %7125  ;;  %v1183_v49 = vmul.f32 0.2, %v1167_v3  ;;  %v8191_v35 = vsel %vm643_vm15, %v669_v11, -1e+30 }
 0x289   : > { %v1182_v59 = vmul.f32 0.2, %v1166_v44  ;;  %10638 = vst [vmem:[#allocation25_spill] sm:$0xff] %v8191_v35  ;;  %v8201_v11 = vadd.f32 %v1596_v26, %v8191_v35 }
 0x28a   : > { %v1549_v20 = vpop.permute.xlu1 %1548  ;;  %1635 = vmax.xlane.f32.xlu1 %v8173_v27  ;;  %v1199_v2 = vmax.f32 %v1167_v3, %v1183_v49 }
 0x28b   : > { %v1545_v41 = vpop.permute.xlu0 %1544  ;;  %v1198_v47 = vmax.f32 %v1166_v44, %v1182_v59  ;;  %v1570_v61 = vadd.f32 %v7996_v1, %v1549_v20  ;;  %v679_v59 = vmul.f32 0.6931472, %v7124_v32  ;;  %v681_v44 = vmul.f32 0.6931472, %v7126_v38 }
 0x28c   : > { %v1569_v17 = vadd.f32 %v7996_v1, %v1545_v41  ;;  %v8209_v3 = vadd.f32 %v1199_v2, %v8191_v35 }
 0x28d   : > { %v8188_v12 = vadd.f32 %v1198_v47, %v8163_v42  ;;  %v1586_v20 = vmul.f32 0.2, %v1570_v61  ;;  %v7128_v47 = vpop.eup %7127  ;;  %v8205_v52 = vsel %vm648_vm1, %v679_v59, -1e+30  ;;  %v8211_v49 = vsel %vm649_vm2, %v681_v44, -1e+30 }
 0x28e   : > { %v1585_v7 = vmul.f32 0.2, %v1569_v17  ;;  %1641 = vmax.xlane.f32.xlu1 %v8181_v13  ;;  %10639 = vst [vmem:[#allocation26_spill] sm:$0xff] %v8205_v52  ;;  %10640 = vst [vmem:[#allocation27_spill] sm:$0xff] %v8211_v49  ;;  %v675_v18 = vmul.f32 0.6931472, %v7128_v47 }
 0x28f   : > { %v1152_v5 = vpop.permute.xlu1 %1151  ;;  %1238 = vmax.xlane.f32.xlu0 %v8188_v12  ;;  %v1602_v26 = vmax.f32 %v1570_v61, %v1586_v20 }
 0x290   : > { %v1173_v41 = vadd.f32 %v8005_v21, %v1152_v5  ;;  %v1147_v8 = vpop.permute.xlu0 %1146  ;;  %v1601_v32 = vmax.f32 %v1569_v17, %v1585_v7 }
 0x291   : > { %v1172_v40 = vadd.f32 %v8005_v21, %v1147_v8  ;;  %v7130_v8 = vpop.eup %7129  ;;  %v8222_v61 = vadd.f32 %v1602_v26, %v8211_v49 }
 0x292   : > { %1244 = vmax.xlane.f32.xlu1 %v8197_v60  ;;  %v1189_v5 = vmul.f32 0.2, %v1173_v41  ;;  %v8215_v22 = vadd.f32 %v1601_v32, %v8205_v52  ;;  %v677_v47 = vmul.f32 0.6931472, %v7130_v8 }
 0x293   : > { %v1188_v38 = vmul.f32 0.2, %v1172_v40  ;;  %1637 = vmax.xlane.f32.xlu0 %v8201_v11 }
 0x294   : > { %v1541_v15 = vpop.permute.xlu1 %1540  ;;  %v1205_v20 = vmax.f32 %v1173_v41, %v1189_v5 }
 0x295   : > { %v1568_v7 = vadd.f32 %v7996_v1, %v1541_v15  ;;  %v1537_v17 = vpop.permute.xlu0 %1536  ;;  %v1204_v59 = vmax.f32 %v1172_v40, %v1188_v38  ;;  %v8227_v40 = vsel %vm646_vm4, %v675_v18, -1e+30  ;;  %v8239_v18 = vsel %vm647_vm5, %v677_v47, -1e+30 }
 0x296   : > { %v1567_v42 = vadd.f32 %v7996_v1, %v1537_v17  ;;  %1240 = vmax.xlane.f32.xlu1 %v8209_v3  ;;  %10641 = vst [vmem:[#allocation28_spill] sm:$0xff] %v8227_v40  ;;  %v8234_v26 = vadd.f32 %v1205_v20, %v8211_v49  ;;  %10642 = vst [vmem:[#allocation29_spill] sm:$0xff] %v8239_v18 }
 0x297   : > { %1647 = vmax.xlane.f32.xlu0 %v8215_v22  ;;  %v1584_v44 = vmul.f32 0.2, %v1568_v7  ;;  %v8225_v32 = vadd.f32 %v1204_v59, %v8205_v52 }
 0x298   : > { %v1583_v2 = vmul.f32 0.2, %v1567_v42 }
 0x299   : > { %v1142_v15 = vpop.permute.xlu1 %1141  ;;  %v1600_v5 = vmax.f32 %v1568_v7, %v1584_v44 }
 0x29a   : > { %v1171_v1 = vadd.f32 %v8005_v21, %v1142_v15  ;;  %1649 = vmax.xlane.f32.xlu1 %v8222_v61  ;;  %v1599_v24 = vmax.f32 %v1567_v42, %v1583_v2  ;;  %v1137_v7 = vpop.permute.xlu0 %1136 }
 0x29b   : > { %1250 = vmax.xlane.f32.xlu0 %v8225_v32  ;;  %v8244_v42 = vadd.f32 %v1600_v5, %v8239_v18  ;;  %v1170_v17 = vadd.f32 %v8005_v21, %v1137_v7 }
 0x29c   : > { %v1187_v38 = vmul.f32 0.2, %v1171_v1  ;;  %v8237_v41 = vadd.f32 %v1599_v24, %v8227_v40 }
 0x29d   : > { %v1186_v59 = vmul.f32 0.2, %v1170_v17 }
 0x29e   : > { %1252 = vmax.xlane.f32.xlu1 %v8234_v26  ;;  %v1203_v31 = vmax.f32 %v1171_v1, %v1187_v38 }
 0x29f   : > { %1643 = vmax.xlane.f32.xlu0 %v8237_v41  ;;  %v1202_v44 = vmax.f32 %v1170_v17, %v1186_v59 }
 0x2a0   : > { %v8248_v8 = vadd.f32 %v1203_v31, %v8239_v18 }
 0x2a1   : > { %v8255_v2 = vadd.f32 %v1202_v44, %v8227_v40 }
 0x2a2   : > { %1645 = vmax.xlane.f32.xlu1 %v8244_v42 }
 0x2a6   : > { %1248 = vmax.xlane.f32.xlu1 %v8248_v8 }
 0x2b5   : > { %1805 = vrot.lane.b32.xlu0 %v7923_v9, %s7687_s28 }
 0x2d4   : > { %1246 = vmax.xlane.f32.xlu0 %v8255_v2 }
 0x2e8   : > { %v1624_v20 = vpop.xlane.xlu1 %1623 }
 0x2e9   : > { %v1653_v15 = vsub.f32 %v8018_v34, %v1624_v20 }
 0x2eb   : > { %v1671_v47 = vmul.f32 1.442695, %v1653_v15 }
 0x2ec   : > { %v1620_v1 = vpop.xlane.xlu1 %1619 }
 0x2ed   : > { %7131 = vpow2.f32 %v1671_v47  ;;  %v1651_v24 = vsub.f32 %v8030_v50, %v1620_v1  ;;  %v8260_v38 = vpop.xlane.xlu0 %1226 }
 0x2ef   : > { %v1667_v9 = vmul.f32 1.442695, %v1651_v24 }
 0x2f1   : > { %7133 = vpow2.f32 %v1667_v9  ;;  %v8262_v21 = vpop.xlane.xlu0 %1222 }
 0x2f2   : > { %v8264_v5 = vpop.xlane.xlu1 %1228 }
 0x2f5   : > { %v1626_v31 = vpop.xlane.xlu0 %1625 }
 0x2f6   : > { %v1654_v7 = vsub.f32 %v8058_v39, %v1626_v31 }
 0x2f7   : > { %v8267_v17 = vpop.eup %7131  ;;  %v8269_v59 = vpop.xlane.xlu1 %1224 }
 0x2f8   : > { %v1673_v34 = vmul.f32 1.442695, %v1654_v7  ;;  %1703 = vadd.xlane.f32.xlu1 %v8267_v17 }
 0x2f9   : > { %v1622_v44 = vpop.xlane.xlu0 %1621 }
 0x2fa   : > { %7135 = vpow2.f32 %v1673_v34  ;;  %v1652_v50 = vsub.f32 %v8076_v16, %v1622_v44 }
 0x2fb   : > { %v8273_v20 = vpop.eup %7133  ;;  %v1632_v15 = vpop.xlane.xlu1 %1631 }
 0x2fc   : > { %v1669_v47 = vmul.f32 1.442695, %v1652_v50  ;;  %v1657_v1 = vsub.f32 %v8085_v33, %v1632_v15  ;;  %1699 = vadd.xlane.f32.xlu0 %v8273_v20 }
 0x2fd   : > { %v8277_v39 = vpop.xlane.xlu0 %1234 }
 0x2fe   : > { %7137 = vpow2.f32 %v1669_v47  ;;  %v1679_v24 = vmul.f32 1.442695, %v1657_v1 }
 0x2ff   : > { %v1628_v9 = vpop.xlane.xlu1 %1627 }
 0x300   : > { %v1655_v31 = vsub.f32 %v8098_v23, %v1628_v9  ;;  %7139 = vpow2.f32 %v1679_v24 }
 0x301   : > { %v8280_v7 = vpop.xlane.xlu0 %1230 }
 0x302   : > { %v1675_v34 = vmul.f32 1.442695, %v1655_v31 }
 0x304   : > { %v8282_v16 = vpop.eup %7135  ;;  %7141 = vpow2.f32 %v1675_v34  ;;  %v8292_v9 = vpop.xlane.xlu1 %1236 }
 0x305   : > { %1705 = vadd.xlane.f32.xlu1 %v8282_v16  ;;  %v1634_v44 = vpop.xlane.xlu0 %1633 }
 0x306   : > { %v1658_v33 = vsub.f32 %v8119_v29, %v1634_v44 }
 0x308   : > { %v8286_v50 = vpop.eup %7137  ;;  %v1681_v15 = vmul.f32 1.442695, %v1658_v33  ;;  %v8299_v33 = vpop.xlane.xlu1 %1232 }
 0x309   : > { %1701 = vadd.xlane.f32.xlu1 %v8286_v50  ;;  %v1630_v47 = vpop.xlane.xlu0 %1629 }
 0x30a   : > { %7143 = vpow2.f32 %v1681_v15  ;;  %v1656_v23 = vsub.f32 %v8131_v57, %v1630_v47  ;;  %v8290_v1 = vpop.eup %7139 }
 0x30c   : > { %v1677_v24 = vmul.f32 1.442695, %v1656_v23 }
 0x30d   : > { %1711 = vadd.xlane.f32.xlu1 %v8290_v1  ;;  %v1640_v31 = vpop.xlane.xlu0 %1639 }
 0x30e   : > { %v8295_v34 = vpop.eup %7141  ;;  %7145 = vpow2.f32 %v1677_v24  ;;  %v1661_v29 = vsub.f32 %v8143_v55, %v1640_v31 }
 0x30f   : > { %1707 = vadd.xlane.f32.xlu0 %v8295_v34 }
 0x310   : > { %v1687_v44 = vmul.f32 1.442695, %v1661_v29 }
 0x312   : > { %7147 = vpow2.f32 %v1687_v44  ;;  %v8306_v23 = vpop.xlane.xlu0 %1242 }
 0x314   : > { %v8301_v57 = vpop.eup %7143 }
 0x315   : > { %1713 = vadd.xlane.f32.xlu1 %v8301_v57 }
 0x317   : > { %v1636_v15 = vpop.xlane.xlu1 %1635 }
 0x318   : > { %v8304_v47 = vpop.eup %7145  ;;  %v1659_v18 = vsub.f32 %v8173_v27, %v1636_v15 }
 0x319   : > { %1709 = vadd.xlane.f32.xlu1 %v8304_v47 }
 0x31a   : > { %v1683_v55 = vmul.f32 1.442695, %v1659_v18 }
 0x31b   : > { %v1642_v24 = vpop.xlane.xlu1 %1641 }
 0x31c   : > { %v8310_v31 = vpop.eup %7147  ;;  %7149 = vpow2.f32 %v1683_v55  ;;  %v1662_v29 = vsub.f32 %v8181_v13, %v1642_v24  ;;  %v8313_v44 = vpop.xlane.xlu0 %1238 }
 0x31d   : > { %1719 = vadd.xlane.f32.xlu1 %v8310_v31 }
 0x31e   : > { %v1689_v49 = vmul.f32 1.442695, %v1662_v29 }
 0x31f   : > { %v8316_v40 = vpop.xlane.xlu1 %1244 }
 0x320   : > { %7151 = vpow2.f32 %v1689_v49  ;;  %v1638_v35 = vpop.xlane.xlu0 %1637 }
 0x321   : > { %v1660_v27 = vsub.f32 %v8201_v11, %v1638_v35 }
 0x323   : > { %v1685_v15 = vmul.f32 1.442695, %v1660_v27  ;;  %v1241_v52 = vpop.xlane.xlu1 %1240 }
 0x324   : > { %v1648_v18 = vpop.xlane.xlu0 %1647 }
 0x325   : > { %7153 = vpow2.f32 %v1685_v15 }
 0x326   : > { %v8319_v10 = vpop.eup %7149 }
 0x327   : > { %v1650_v55 = vpop.xlane.xlu1 %1649  ;;  %1715 = vadd.xlane.f32.xlu0 %v8319_v10 }
 0x328   : > { %v1666_v13 = vsub.f32 %v8222_v61, %v1650_v55  ;;  %v8323_v24 = vpop.xlane.xlu0 %1250 }
 0x32a   : > { %v8325_v29 = vpop.eup %7151  ;;  %v1697_v0 = vmul.f32 1.442695, %v1666_v13 }
 0x32b   : > { %v8327_v49 = vpop.xlane.xlu1 %1252  ;;  %1721 = vadd.xlane.f32.xlu1 %v8325_v29 }
 0x32c   : > { %7155 = vpow2.f32 %v1697_v0  ;;  %v1644_v35 = vpop.xlane.xlu0 %1643 }
 0x32d   : > { %v1663_v0 = vsub.f32 %v8237_v41, %v1644_v35 }
 0x32f   : > { %v8330_v11 = vpop.eup %7153  ;;  %v1646_v27 = vpop.xlane.xlu1 %1645 }
 0x330   : > { %v1664_v15 = vsub.f32 %v8244_v42, %v1646_v27  ;;  %1717 = vadd.xlane.f32.xlu1 %v8330_v11  ;;  %v1806_v4 = vpop.permute.xlu0 %1805  ;;  %v1665_v42 = vsub.f32 %v8215_v22, %v1648_v18  ;;  %v1254_v27 = vsub.f32 %v8046_v28, %v8262_v21  ;;  %v1263_v28 = vsub.f32 %v8209_v3, %v1241_v52 }
 0x331   : > { %6547 = vmatprep.subr.bf16.mxu1 %v1806_v4  ;;  %v1259_v52 = vsub.f32 %v8128_v37, %v8299_v33  ;;  %v1269_v37 = vsub.f32 %v8234_v26, %v8327_v49 }
 0x332   : > { %v1693_v61 = vmul.f32 1.442695, %v1664_v15  ;;  %6548 = vmatpush3.bf16.msra.mxu1 %v1806_v4  ;;  %v1691_v4 = vmul.f32 1.442695, %v1663_v0  ;;  %v1695_v15 = vmul.f32 1.442695, %v1665_v42 }
 0x333   : > { %v1270_v58 = vmul.f32 1.442695, %v1254_v27  ;;  %v1249_v3 = vpop.xlane.xlu1 %1248 }
 0x334   : > { %7157 = vpow2.f32 %v1693_v61  ;;  %v1256_v61 = vsub.f32 %v8033_v54, %v8260_v38  ;;  %v1258_v54 = vsub.f32 %v8105_v25, %v8280_v7  ;;  %v1267_v25 = vsub.f32 %v8248_v8, %v1249_v3 }
 0x335   : > { %7159 = vpow2.f32 %v1691_v4  ;;  %v1261_v8 = vsub.f32 %v8116_v45, %v8292_v9  ;;  %v1264_v45 = vsub.f32 %v8158_v36, %v8306_v23  ;;  %v1268_v36 = vsub.f32 %v8225_v32, %v8323_v24 }
 0x336   : > { %v8334_v55 = vpop.eup %7155  ;;  %7161 = vpow2.f32 %v1695_v15  ;;  %v1274_v41 = vmul.f32 1.442695, %v1256_v61  ;;  %v1296_v33 = vmul.f32 1.442695, %v1267_v25 }
 0x337   : > { %1729 = vadd.xlane.f32.xlu0 %v8334_v55  ;;  %7163 = vpow2.f32 %v1270_v58  ;;  %v1265_v58 = vsub.f32 %v8197_v60, %v8316_v40  ;;  %v1260_v60 = vsub.f32 %v8091_v6, %v8277_v39  ;;  %v1280_v40 = vmul.f32 1.442695, %v1259_v52 }
 0x338   : > { %7165 = vpow2.f32 %v1274_v41  ;;  %v1300_v6 = vmul.f32 1.442695, %v1269_v37  ;;  %v1284_v26 = vmul.f32 1.442695, %v1261_v8  ;;  %v1262_v39 = vsub.f32 %v8188_v12, %v8313_v44 }
 0x339   : > { %v1282_v35 = vmul.f32 1.442695, %v1260_v60  ;;  %v1290_v12 = vmul.f32 1.442695, %v1264_v45 }
 0x33a   : > { %v1286_v9 = vmul.f32 1.442695, %v1262_v39 }
 0x33e   : > { %v8337_v13 = vpop.eup %7157 }
 0x33f   : > { %1725 = vadd.xlane.f32.xlu0 %v8337_v13  ;;  %v8354_v22 = vpop.eup %7159 }
 0x340   : > { %v8360_v38 = vpop.eup %7161 }
 0x341   : > { %1807 = vrot.lane.b32.xlu1 %v7932_v14, %s7687_s28  ;;  %v1255_v14 = vsub.f32 %v8071_v63, %v8269_v59  ;;  %v1288_v63 = vmul.f32 1.442695, %v1263_v28  ;;  %v1292_v59 = vmul.f32 1.442695, %v1265_v58 }
 0x343   : > { %v1272_v18 = vmul.f32 1.442695, %v1255_v14 }
 0x345   : > { %7167 = vpow2.f32 %v1272_v18 }
 0x355   : > { %1809 = vrot.lane.b32.xlu0 %v7941_v19, %s7687_s28  ;;  %v1257_v19 = vsub.f32 %v8053_v30, %v8264_v5  ;;  %v1278_v30 = vmul.f32 1.442695, %v1258_v54  ;;  %v8367_v5 = vpop.eup %7163 }
 0x356   : > { %v8373_v7 = vpop.eup %7165 }
 0x357   : > { %v1276_v21 = vmul.f32 1.442695, %v1257_v19  ;;  %v8380_v0 = vpop.eup %7167 }
 0x359   : > { %7169 = vpow2.f32 %v1276_v21 }
 0x35a   : > { %7171 = vpow2.f32 %v1288_v63 }
 0x35b   : > { %7173 = vpow2.f32 %v1278_v30 }
 0x35c   : > { %7175 = vpow2.f32 %v1292_v59 }
 0x35d   : > { %7177 = vpow2.f32 %v1280_v40 }
 0x35e   : > { %7179 = vpow2.f32 %v1296_v33 }
 0x35f   : > { %7181 = vpow2.f32 %v1282_v35 }
 0x360   : > { %7183 = vpow2.f32 %v1300_v6 }
 0x361   : > { %7185 = vpow2.f32 %v1284_v26  ;;  %v1247_v15 = vpop.xlane.xlu0 %1246 }
 0x362   : > { %7187 = vpow2.f32 %v1286_v9  ;;  %v1266_v44 = vsub.f32 %v8255_v2, %v1247_v15  ;;  %v1298_v2 = vmul.f32 1.442695, %v1268_v36 }
 0x363   : > { %v8382_v42 = vpop.eup %7169  ;;  %7189 = vpow2.f32 %v1290_v12 }
 0x364   : > { %v8388_v49 = vpop.eup %7171  ;;  %v1294_v23 = vmul.f32 1.442695, %v1266_v44 }
 0x365   : > { %1723 = vadd.xlane.f32.xlu1 %v8354_v22  ;;  %v8390_v4 = vpop.eup %7173 }
 0x366   : > { %v8396_v27 = vpop.eup %7175  ;;  %7191 = vpow2.f32 %v1294_v23 }
 0x367   : > { %v8398_v61 = vpop.eup %7177  ;;  %7193 = vpow2.f32 %v1298_v2 }
 0x368   : > { %v8403_v14 = vpop.eup %7179 }
 0x369   : > { %1727 = vadd.xlane.f32.xlu1 %v8360_v38  ;;  %v8405_v41 = vpop.eup %7181 }
 0x36a   : > { %v8411_v19 = vpop.eup %7183 }
 0x36b   : > { %v8413_v18 = vpop.eup %7185 }
 0x36c   : > { %v8417_v28 = vpop.eup %7187 }
 0x36d   : > { %1302 = vadd.xlane.f32.xlu1 %v8367_v5  ;;  %v8420_v21 = vpop.eup %7189 }
 0x370   : > { %v8423_v24 = vpop.eup %7191 }
 0x371   : > { %1306 = vadd.xlane.f32.xlu1 %v8373_v7  ;;  %v8426_v30 = vpop.eup %7193 }
 0x374   : > { %1304 = vadd.xlane.f32.xlu0 %v8380_v0 }
 0x375   : > { %1308 = vadd.xlane.f32.xlu1 %v8382_v42 }
 0x378   : > { %1320 = vadd.xlane.f32.xlu0 %v8388_v49 }
 0x379   : > { %1310 = vadd.xlane.f32.xlu1 %v8390_v4 }
 0x37c   : > { %1324 = vadd.xlane.f32.xlu0 %v8396_v27 }
 0x37d   : > { %1312 = vadd.xlane.f32.xlu1 %v8398_v61 }
 0x380   : > { %1328 = vadd.xlane.f32.xlu0 %v8403_v14 }
 0x381   : > { %1314 = vadd.xlane.f32.xlu1 %v8405_v41 }
 0x384   : > { %1332 = vadd.xlane.f32.xlu0 %v8411_v19 }
 0x385   : > { %1316 = vadd.xlane.f32.xlu1 %v8413_v18  ;;  %v1704_v32 = vpop.xlane.xlu1 %1703 }
 0x386   : > { %v1733_v12 = vmax.f32 %v1704_v32, 1e-30 }
 0x389   : > { %1318 = vadd.xlane.f32.xlu1 %v8417_v28  ;;  %v1700_v54 = vpop.xlane.xlu0 %1699 }
 0x38a   : > { %v1731_v63 = vmax.f32 %v1700_v54, 1e-30 }
 0x38c   : > { %7195 = vrcp.f32 %v1731_v63 }
 0x38d   : > { %1322 = vadd.xlane.f32.xlu1 %v8420_v21 }
 0x391   : > { %1326 = vadd.xlane.f32.xlu1 %v8423_v24 }
 0x392   : > { %v1706_v58 = vpop.xlane.xlu1 %1705 }
 0x393   : > { %v1734_v45 = vmax.f32 %v1706_v58, 1e-30 }
 0x395   : > { %1330 = vadd.xlane.f32.xlu1 %v8426_v30 }
 0x396   : > { %v1702_v52 = vpop.xlane.xlu1 %1701  ;;  %v7196_v59 = vpop.eup %7195 }
 0x397   : > { %v1732_v3 = vmax.f32 %v1702_v52, 1e-30  ;;  %v1763_v40 = vmul.f32 %v7196_v59, %v8273_v20 }
 0x399   : > { %7197 = vrcp.f32 %v1732_v3 }
 0x39a   : > { %v1712_v60 = vpop.xlane.xlu1 %1711  ;;  %7199 = vrcp.f32 %v1734_v45 }
 0x39b   : > { %v1737_v2 = vmax.f32 %v1712_v60, 1e-30 }
 0x39c   : > { %v1708_v9 = vpop.xlane.xlu0 %1707 }
 0x39d   : > { %v1735_v44 = vmax.f32 %v1708_v9, 1e-30 }
 0x3a2   : > { %v1714_v35 = vpop.xlane.xlu1 %1713 }
 0x3a3   : > { %v7198_v25 = vpop.eup %7197 }
 0x3a4   : > { %v1764_v37 = vmul.f32 %v7198_v25, %v8286_v50  ;;  %v1738_v50 = vmax.f32 %v1714_v35, 1e-30  ;;  %v7200_v58 = vpop.eup %7199 }
 0x3a6   : > { %v1779_v33 = vpack.c.bf16 %v1764_v37, %v1763_v40  ;;  %v1710_v8 = vpop.xlane.xlu1 %1709  ;;  %v1766_v40 = vmul.f32 %v7200_v58, %v8282_v16 }
 0x3a7   : > { %v1736_v15 = vmax.f32 %v1710_v8, 1e-30 }
 0x3a8   : > { %6553 = vmatprep.mubr.bf16.mxu1 %v1779_v33 }
 0x3a9   : > { %7201 = vrcp.f32 %v1736_v15 }
 0x3aa   : > { %v1720_v6 = vpop.xlane.xlu1 %1719  ;;  %7203 = vrcp.f32 %v1733_v12 }
 0x3ab   : > { %7205 = vrcp.f32 %v1735_v44  ;;  %v1741_v37 = vmax.f32 %v1720_v6, 1e-30 }
 0x3ac   : > { %7207 = vrcp.f32 %v1738_v50 }
 0x3b3   : > { %v7202_v32 = vpop.eup %7201 }
 0x3b4   : > { %v1716_v20 = vpop.xlane.xlu0 %1715  ;;  %v7204_v3 = vpop.eup %7203  ;;  %v1768_v35 = vmul.f32 %v7202_v32, %v8304_v47 }
 0x3b5   : > { %v1739_v63 = vmax.f32 %v1716_v20, 1e-30  ;;  %v7206_v25 = vpop.eup %7205  ;;  %v1765_v60 = vmul.f32 %v7204_v3, %v8267_v17 }
 0x3b6   : > { %v1767_v8 = vmul.f32 %v7206_v25, %v8295_v34  ;;  %v7208_v45 = vpop.eup %7207 }
 0x3b7   : > { %v1770_v6 = vmul.f32 %v7208_v45, %v8301_v57 }
 0x3b8   : > { %v1722_v26 = vpop.xlane.xlu1 %1721  ;;  %v1781_v9 = vpack.c.bf16 %v1768_v35, %v1767_v8 }
 0x3b9   : > { %v1742_v59 = vmax.f32 %v1722_v26, 1e-30 }
 0x3bd   : > { %v1718_v39 = vpop.xlane.xlu1 %1717 }
 0x3be   : > { %v1740_v23 = vmax.f32 %v1718_v39, 1e-30  ;;  %v1780_v39 = vpack.c.bf16 %v1766_v40, %v1765_v60 }
 0x3c0   : > { %7209 = vrcp.f32 %v1740_v23 }
 0x3c1   : > { %v1808_v36 = vpop.permute.xlu1 %1807  ;;  %7211 = vrcp.f32 %v1737_v2 }
 0x3c2   : > { %6549 = vmatprep.subr.bf16.mxu1 %v1808_v36  ;;  %7213 = vrcp.f32 %v1739_v63 }
 0x3c3   : > { %6550 = vmatpush3.bf16.msra.mxu1 %v1808_v36  ;;  %7215 = vrcp.f32 %v1742_v59 }
 0x3c4   : > { %v1730_v54 = vpop.xlane.xlu0 %1729  ;;  %7217 = vrcp.f32 %v1741_v37 }
 0x3c5   : > { %v1746_v58 = vmax.f32 %v1730_v54, 1e-30 }
 0x3ca   : > { %v7210_v15 = vpop.eup %7209 }
 0x3cb   : > { %v7212_v26 = vpop.eup %7211  ;;  %v1772_v47 = vmul.f32 %v7210_v15, %v8330_v11 }
 0x3cc   : > { %v1726_v52 = vpop.xlane.xlu0 %1725  ;;  %v7214_v16 = vpop.eup %7213  ;;  %v1769_v17 = vmul.f32 %v7212_v26, %v8290_v1 }
 0x3cd   : > { %v1771_v12 = vmul.f32 %v7214_v16, %v8319_v10  ;;  %v7216_v36 = vpop.eup %7215  ;;  %v1744_v63 = vmax.f32 %v1726_v52, 1e-30 }
 0x3ce   : > { %v1782_v44 = vpack.c.bf16 %v1770_v6, %v1769_v17  ;;  %v7218_v20 = vpop.eup %7217  ;;  %v1774_v50 = vmul.f32 %v7216_v36, %v8325_v29 }
 0x3cf   : > { %v1783_v34 = vpack.c.bf16 %v1772_v47, %v1771_v12  ;;  %v1773_v23 = vmul.f32 %v7218_v20, %v8310_v31  ;;  %7219 = vrcp.f32 %v1744_v63 }
 0x3d0   : > { %v1810_v33 = vpop.permute.xlu0 %1809 }
 0x3d1   : > { %6551 = vmatprep.subr.bf16.mxu1 %v1810_v33  ;;  %v1784_v2 = vpack.c.bf16 %v1774_v50, %v1773_v23 }
 0x3d2   : > { %6552 = vmatpush3.bf16.msra.mxu1 %v1810_v33 }
 0x3d5   : > { %6554 = vmatmul.mubr.bf16.vlgmr.msra.gmra.mrb[16].mxu1 %v1780_v39 }
 0x3d6   : > { %6557 = vmatprep.mubr.bf16.mxu1 %v1781_v9 }
 0x3d9   : > { %v7220_v3 = vpop.eup %7219 }
 0x3da   : > { %v1776_v37 = vmul.f32 %v7220_v3, %v8337_v13 }
 0x3dd   : > { %6558 = vmatmul.mubr.bf16.gmra.mrb[20].mxu1 %v1782_v44 }
 0x3de   : > { %6561 = vmatprep.mubr.bf16.mxu1 %v1783_v34 }
 0x3e5   : > { %6562 = vmatmul.mubr.bf16.gmra.mrb[24].mxu1 %v1784_v2 }
 0x3f2   : > { %v1724_v57 = vpop.xlane.xlu1 %1723 }
 0x3f3   : > { %v1743_v11 = vmax.f32 %v1724_v57, 1e-30 }
 0x3f5   : > { %7221 = vrcp.f32 %v1743_v11 }
 0x3f6   : > { %v1728_v1 = vpop.xlane.xlu1 %1727  ;;  %7223 = vrcp.f32 %v1746_v58 }
 0x3f7   : > { %v1745_v10 = vmax.f32 %v1728_v1, 1e-30 }
 0x3f9   : > { %7225 = vrcp.f32 %v1745_v10 }
 0x3fa   : > { %v1303_v32 = vpop.xlane.xlu1 %1302 }
 0x3fb   : > { %v1334_v59 = vmax.f32 %v1303_v32, 1e-30 }
 0x3fd   : > { %7227 = vrcp.f32 %v1334_v59 }
 0x3fe   : > { %v1307_v25 = vpop.xlane.xlu1 %1306 }
 0x3ff   : > { %v7222_v40 = vpop.eup %7221  ;;  %v1336_v29 = vmax.f32 %v1307_v25, 1e-30 }
 0x400   : > { %v1775_v31 = vmul.f32 %v7222_v40, %v8354_v22  ;;  %v7224_v52 = vpop.eup %7223 }
 0x401   : > { %v1305_v33 = vpop.xlane.xlu0 %1304  ;;  %7229 = vrcp.f32 %v1336_v29  ;;  %v1778_v9 = vmul.f32 %v7224_v52, %v8334_v55 }
 0x402   : > { %v1335_v54 = vmax.f32 %v1305_v33, 1e-30  ;;  %v1309_v35 = vpop.xlane.xlu1 %1308  ;;  %v1785_v60 = vpack.c.bf16 %v1776_v37, %v1775_v31 }
 0x403   : > { %v7226_v8 = vpop.eup %7225  ;;  %v1337_v39 = vmax.f32 %v1309_v35, 1e-30 }
 0x404   : > { %7231 = vrcp.f32 %v1335_v54  ;;  %6565 = vmatprep.mubr.bf16.mxu1 %v1785_v60  ;;  %v1777_v45 = vmul.f32 %v7226_v8, %v8360_v38 }
 0x405   : > { %7233 = vrcp.f32 %v1337_v39  ;;  %v1321_v13 = vpop.xlane.xlu0 %1320 }
 0x406   : > { %v1311_v15 = vpop.xlane.xlu1 %1310  ;;  %v1786_v22 = vpack.c.bf16 %v1778_v9, %v1777_v45  ;;  %v1343_v58 = vmax.f32 %v1321_v13, 1e-30 }
 0x407   : > { %v1338_v26 = vmax.f32 %v1311_v15, 1e-30  ;;  %v7228_v47 = vpop.eup %7227 }
 0x408   : > { %6566 = vmatmul.mubr.bf16.gmra.mrb[28].mxu1 %v1786_v22  ;;  %v1366_v38 = vmul.f32 %v7228_v47, %v8367_v5 }
 0x409   : > { %7235 = vrcp.f32 %v1338_v26  ;;  %v1325_v20 = vpop.xlane.xlu0 %1324 }
 0x40a   : > { %v1313_v16 = vpop.xlane.xlu1 %1312 }
 0x40b   : > { %v1339_v6 = vmax.f32 %v1313_v16, 1e-30  ;;  %v7230_v17 = vpop.eup %7229 }
 0x40c   : > { %v1368_v50 = vmul.f32 %v7230_v17, %v8373_v7 }
 0x40d   : > { %7237 = vrcp.f32 %v1339_v6  ;;  %v1329_v10 = vpop.xlane.xlu0 %1328 }
 0x40e   : > { %v7232_v12 = vpop.eup %7231  ;;  %v1315_v44 = vpop.xlane.xlu1 %1314  ;;  %v1347_v40 = vmax.f32 %v1329_v10, 1e-30 }
 0x40f   : > { %v7234_v36 = vpop.eup %7233  ;;  %v1340_v34 = vmax.f32 %v1315_v44, 1e-30  ;;  %v1367_v55 = vmul.f32 %v7232_v12, %v8380_v0  ;;  %v1345_v0 = vmax.f32 %v1325_v20, 1e-30  ;;  %v7090_v20 = vld [vmem:[%s10470_s6 + $0x30] sm:$0xff]  }
 0x410   : > { %v1369_v23 = vmul.f32 %v7234_v36, %v8382_v42 }
 0x411   : > { %v1382_v2 = vpack.c.bf16 %v1367_v55, %v1366_v38  ;;  %7239 = vrcp.f32 %v1340_v34  ;;  %v1333_v31 = vpop.xlane.xlu0 %1332 }
 0x412   : > { %v1317_v63 = vpop.xlane.xlu1 %1316  ;;  %v1383_v57 = vpack.c.bf16 %v1369_v23, %v1368_v50  ;;  %v1349_v54 = vmax.f32 %v1333_v31, 1e-30  ;;  %v7093_v31 = vld [vmem:[%s10472_s8 + $0x8] ss:$0 sps:$4 sm:$0x11]  }
 0x413   : > { %v1341_v11 = vmax.f32 %v1317_v63, 1e-30  ;;  %6521 = vmatprep.mubr.bf16.mxu0 %v1382_v2  ;;  %v7236_v1 = vpop.eup %7235  ;;  %v7091_v2 = vld [vmem:[%s10470_s6 + $0x38] sm:$0xff]  }
 0x414   : > { %6522 = vmatmul.mubr.bf16.vlgmr.msra.gmra.mrb[36].mxu0 %v1383_v57  ;;  %v1370_v7 = vmul.f32 %v7236_v1, %v8390_v4 }
 0x415   : > { %7241 = vrcp.f32 %v1341_v11 }
 0x416   : > { %v1319_v32 = vpop.xlane.xlu1 %1318  ;;  %7243 = vrcp.f32 %v1343_v58  ;;  %v10643_v58 = vmov 0.0  }
 0x417   : > { %v7238_v5 = vpop.eup %7237  ;;  %v1342_v3 = vmax.f32 %v1319_v32, 1e-30 }
 0x418   : > { %v1371_v42 = vmul.f32 %v7238_v5, %v8398_v61 }
 0x419   : > { %7245 = vrcp.f32 %v1342_v3 }
 0x41a   : > { %v1323_v59 = vpop.xlane.xlu1 %1322  ;;  %v1384_v25 = vpack.c.bf16 %v1371_v42, %v1370_v7  ;;  %7247 = vrcp.f32 %v1345_v0 }
 0x41b   : > { %v1344_v29 = vmax.f32 %v1323_v59, 1e-30  ;;  %v7240_v37 = vpop.eup %7239 }
 0x41c   : > { %6525 = vmatprep.mubr.bf16.mxu0 %v1384_v25  ;;  %v1372_v60 = vmul.f32 %v7240_v37, %v8405_v41  ;;  %v2267_v37 = vsel %vm741_vm0, %v7093_v31, 0 }
 0x41d   : > { %7249 = vrcp.f32 %v1344_v29  ;;  %v7092_v29 = vld [vmem:[%s10472_s8] sm:$0xff]  }
 0x41e   : > { %v1327_v52 = vpop.xlane.xlu1 %1326  ;;  %7251 = vrcp.f32 %v1347_v40  ;;  %6601 = vmatprep.subr.bf16.mxu1 %v7092_v29 }
 0x41f   : > { %v7242_v33 = vpop.eup %7241  ;;  %v1346_v35 = vmax.f32 %v1327_v52, 1e-30  ;;  %6602 = vmatpush3.bf16.msra.mxu1 %v7092_v29 }
 0x420   : > { %v1373_v4 = vmul.f32 %v7242_v33, %v8413_v18  ;;  %v7244_v61 = vpop.eup %7243  ;;  %6981 = vmatprep.subr.msk.bf16.mxu1 %vm741_vm0, %v7093_v31  ;;  %v10645_v31 = vld [vmem:[#allocation5_spill] sm:$0xff] }
 0x421   : > { %7253 = vrcp.f32 %v1346_v35  ;;  %v1375_v22 = vmul.f32 %v7244_v61, %v8388_v49 }
 0x422   : > { %v1331_v8 = vpop.xlane.xlu1 %1330  ;;  %v1385_v39 = vpack.c.bf16 %v1373_v4, %v1372_v60  ;;  %7255 = vrcp.f32 %v1349_v54 }
 0x423   : > { %v7246_v45 = vpop.eup %7245  ;;  %v1348_v9 = vmax.f32 %v1331_v8, 1e-30  ;;  %6604 = vmatpush3.bf16.msra.mxu1 %v2267_v37 }
 0x424   : > { %6526 = vmatmul.mubr.bf16.gmra.mrb[40].mxu0 %v1385_v39  ;;  %v1374_v15 = vmul.f32 %v7246_v45, %v8417_v28  ;;  %v7248_v26 = vpop.eup %7247 }
 0x425   : > { %7257 = vrcp.f32 %v1348_v9  ;;  %v1377_v18 = vmul.f32 %v7248_v26, %v8396_v27  ;;  %v7084_v27 = vld [vmem:[%s10470_s6] sm:$0xff]  }
 0x426   : > { %v1386_v13 = vpack.c.bf16 %v1375_v22, %v1374_v15  ;;  %6569 = vmatprep.subr.bf16.mxu0 %v7084_v27 }
 0x427   : > { %v7250_v16 = vpop.eup %7249  ;;  %6570 = vmatpush3.bf16.msra.mxu0 %v7084_v27 }
 0x428   : > { %6529 = vmatprep.mubr.bf16.mxu0 %v1386_v13  ;;  %v1376_v41 = vmul.f32 %v7250_v16, %v8420_v21  ;;  %v7252_v6 = vpop.eup %7251  ;;  %v7085_v21 = vld [vmem:[%s10470_s6 + $0x8] sm:$0xff]  }
 0x429   : > { %v1379_v44 = vmul.f32 %v7252_v6, %v8403_v14  ;;  %6571 = vmatprep.subr.bf16.mxu0 %v7085_v21  ;;  %v7086_v14 = vld [vmem:[%s10470_s6 + $0x10] sm:$0xff]  }
 0x42a   : > { %v1387_v47 = vpack.c.bf16 %v1377_v18, %v1376_v41  ;;  %v8525_v18 = vld [vmem:[%s10469_s5] ss:$0 sm:$0xff] }
 0x42b   : > { %v7254_v17 = vpop.eup %7253  ;;  %6572 = vmatpush3.bf16.msra.mxu0 %v7085_v21 }
 0x42c   : > { %6530 = vmatmul.mubr.bf16.gmra.mrb[44].mxu0 %v1387_v47  ;;  %v1378_v12 = vmul.f32 %v7254_v17, %v8423_v24  ;;  %v7256_v28 = vpop.eup %7255  ;;  %6573 = vmatprep.subr.bf16.mxu0 %v7086_v14  ;;  %v7088_v24 = vld [vmem:[%s10470_s6 + $0x20] sm:$0xff]  }
 0x42d   : > { %v1381_v38 = vmul.f32 %v7256_v28, %v8411_v19  ;;  %v7087_v19 = vld [vmem:[%s10470_s6 + $0x18] sm:$0xff]  }
 0x42e   : > { %v1388_v36 = vpack.c.bf16 %v1379_v44, %v1378_v12 }
 0x42f   : > { %v7258_v49 = vpop.eup %7257  ;;  %6574 = vmatpush3.bf16.msra.mxu0 %v7086_v14 }
 0x430   : > { %6533 = vmatprep.mubr.bf16.mxu0 %v1388_v36  ;;  %v1380_v34 = vmul.f32 %v7258_v49, %v8426_v30  ;;  %6575 = vmatprep.subr.bf16.mxu0 %v7087_v19  ;;  %v7089_v30 = vld [vmem:[%s10470_s6 + $0x28] sm:$0xff]  }
 0x432   : > { %v1389_v55 = vpack.c.bf16 %v1381_v38, %v1380_v34 }
 0x433   : > { %6576 = vmatpush3.bf16.msra.mxu0 %v7087_v19 }
 0x434   : > { %6534 = vmatmul.mubr.bf16.gmra.mrb[48].mxu0 %v1389_v55  ;;  %6577 = vmatprep.subr.bf16.mxu0 %v7088_v24 }
 0x437   : > { %6578 = vmatpush3.bf16.msra.mxu0 %v7088_v24 }
 0x438   : > { %6579 = vmatprep.subr.bf16.mxu0 %v7089_v30 }
 0x43b   : > { %6580 = vmatpush3.bf16.msra.mxu0 %v7089_v30 }
 0x43c   : > { %6581 = vmatprep.subr.bf16.mxu0 %v7090_v20 }
 0x43f   : > { %6582 = vmatpush3.bf16.msra.mxu0 %v7090_v20 }
 0x440   : > { %6583 = vmatprep.subr.bf16.mxu0 %v7091_v2 }
 0x443   : > { %6584 = vmatpush3.bf16.msra.mxu0 %v7091_v2 }
 0x444   : > { %6621 = vmatprep.subr.bf16.mxu0 %v10643_v58 }
 0x4a8   : > { %v6555_v50 = vpop.f32.mrb[16].mxu1 }
 0x4a9   : > { %v1853_v23 = vpop.f32.mrb[17].mxu1 }
 0x4aa   : > { %1932 = vrot.lane.b32.xlu1 %v1853_v23, %s7687_s28  ;;  %v6556_v63 = vpop.f32.mrb[18].mxu1 }
 0x4ab   : > { %v1856_v57 = vpop.f32.mrb[19].mxu1 }
 0x4ac   : > { %1934 = vrot.lane.b32.xlu0 %v1856_v57, %s7687_s28 }
 0x4ae   : > { %1936 = vrot.lane.b32.xlu1 %v6555_v50, %s7687_s28 }
 0x4b0   : > { %v6559_v11 = vpop.f32.mrb[20].mxu1 }
 0x4b1   : > { %v1869_v1 = vpop.f32.mrb[21].mxu1 }
 0x4b2   : > { %1938 = vrot.lane.b32.xlu1 %v6556_v63, %s7687_s28  ;;  %v6560_v10 = vpop.f32.mrb[22].mxu1 }
 0x4b3   : > { %v1872_v32 = vpop.f32.mrb[23].mxu1 }
 0x4b4   : > { %1942 = vrot.lane.b32.xlu0 %v1872_v32, %s7687_s28 }
 0x4b6   : > { %1940 = vrot.lane.b32.xlu1 %v1869_v1, %s7687_s28 }
 0x4b8   : > { %1946 = vrot.lane.b32.xlu0 %v6560_v10, %s7687_s28  ;;  %v6563_v5 = vpop.f32.mrb[24].mxu1 }
 0x4b9   : > { %v1885_v0 = vpop.f32.mrb[25].mxu1 }
 0x4ba   : > { %1944 = vrot.lane.b32.xlu1 %v6559_v11, %s7687_s28  ;;  %v6564_v3 = vpop.f32.mrb[26].mxu1 }
 0x4bb   : > { %v1888_v7 = vpop.f32.mrb[27].mxu1 }
 0x4bc   : > { %1950 = vrot.lane.b32.xlu0 %v1888_v7, %s7687_s28 }
 0x4be   : > { %1948 = vrot.lane.b32.xlu1 %v1885_v0, %s7687_s28 }
 0x4c0   : > { %1954 = vrot.lane.b32.xlu0 %v6564_v3, %s7687_s28 }
 0x4c2   : > { %1952 = vrot.lane.b32.xlu1 %v6563_v5, %s7687_s28 }
 0x4db   : > { %v6567_v42 = vpop.f32.mrb[28].mxu1 }
 0x4dc   : > { %v1901_v59 = vpop.f32.mrb[29].mxu1 }
 0x4dd   : > { %1956 = vrot.lane.b32.xlu1 %v1901_v59, %s7687_s28  ;;  %v6568_v25 = vpop.f32.mrb[30].mxu1  ;;  %v10644_v59 = vld [vmem:[#allocation3_spill] sm:$0xff] }
 0x4de   : > { %v1904_v40 = vpop.f32.mrb[31].mxu1 }
 0x4df   : > { %1958 = vrot.lane.b32.xlu0 %v1904_v40, %s7687_s28 }
 0x4e1   : > { %1960 = vrot.lane.b32.xlu1 %v6567_v42, %s7687_s28 }
 0x4e3   : > { %1962 = vrot.lane.b32.xlu0 %v6568_v25, %s7687_s28 }
 0x4e7   : > { %v6523_v52 = vpop.f32.mrb[36].mxu0 }
 0x4e8   : > { %v1424_v33 = vpop.f32.mrb[37].mxu0 }
 0x4e9   : > { %v6524_v54 = vpop.f32.mrb[38].mxu0 }
 0x4ea   : > { %v1427_v35 = vpop.f32.mrb[39].mxu0 }
 0x4f7   : > { %v6527_v60 = vpop.f32.mrb[40].mxu0 }
 0x4f8   : > { %v1440_v4 = vpop.f32.mrb[41].mxu0 }
 0x4f9   : > { %v6528_v61 = vpop.f32.mrb[42].mxu0 }
 0x4fa   : > { %v1443_v8 = vpop.f32.mrb[43].mxu0 }
 0x4ff   : > { %v8510_v39 = vpop.f32.mrb[44].mxu0 }
 0x500   : > { %v1456_v45 = vpop.f32.mrb[45].mxu0 }
 0x501   : > { %v8512_v9 = vpop.f32.mrb[46].mxu0 }
 0x502   : > { %v1459_v15 = vpop.f32.mrb[47].mxu0 }
 0x507   : > { %v8514_v22 = vpop.f32.mrb[48].mxu0 }
 0x508   : > { %v8516_v26 = vpop.f32.mrb[49].mxu0 }
 0x509   : > { %v8518_v13 = vpop.f32.mrb[50].mxu0 }
 0x50a   : > { %v8520_v16 = vpop.f32.mrb[51].mxu0 }
 0x51c   : > { %v1933_v41 = vpop.permute.xlu1 %1932 }
 0x51d   : > { %v1981_v6 = vsel %vm1980_vm6, %v1424_v33, %v1933_v41 }
 0x51e   : > { %v1997_v47 = vadd.f32 %v1981_v6, %v7879_v43  ;;  %v1935_v17 = vpop.permute.xlu0 %1934  ;;  %v10647_v6 = vld [vmem:[#allocation7_spill] sm:$0xff] }
 0x51f   : > { %v1982_v12 = vsel %vm1980_vm6, %v1427_v35, %v1935_v17 }
 0x520   : > { %v2020_v44 = vadd.f32 %v8525_v18, %v1997_v47  ;;  %v1998_v28 = vadd.f32 %v1982_v12, %v7883_v46  ;;  %v1937_v36 = vpop.permute.xlu1 %1936 }
 0x521   : > { %v1983_v49 = vsel %vm1980_vm6, %v6523_v52, %v1937_v36 }
 0x522   : > { %v2021_v34 = vadd.f32 %v8525_v18, %v1998_v28  ;;  %v1999_v38 = vadd.f32 %v1983_v49, %v7890_v48  ;;  %v2036_v55 = vmax.f32 %v2020_v44, 0.0  ;;  %v10648_v49 = vld [vmem:[#allocation6_spill] sm:$0xff] }
 0x524   : > { %v2037_v27 = vmax.f32 %v2021_v34, 0.0  ;;  %v1939_v21 = vpop.permute.xlu1 %1938  ;;  %v2022_v43 = vadd.f32 %v8525_v18, %v1999_v38 }
 0x525   : > { %v1984_v14 = vsel %vm1980_vm6, %v6524_v54, %v1939_v21 }
 0x526   : > { %v2000_v19 = vadd.f32 %v1984_v14, %v7894_v51  ;;  %v1943_v24 = vpop.permute.xlu0 %1942  ;;  %v2052_v30 = vpack.c.bf16 %v2037_v27, %v2036_v55  ;;  %v2038_v2 = vmax.f32 %v2022_v43, 0.0 }
 0x527   : > { %v1986_v46 = vsel %vm1980_vm6, %v1443_v8, %v1943_v24 }
 0x528   : > { %v2023_v20 = vadd.f32 %v8525_v18, %v2000_v19  ;;  %v2002_v50 = vadd.f32 %v1986_v46, %v7903_v56  ;;  %v1941_v23 = vpop.permute.xlu1 %1940  ;;  %6585 = vmatprep.mubr.bf16.mxu0 %v2052_v30 }
 0x529   : > { %v1985_v48 = vsel %vm1980_vm6, %v1440_v4, %v1941_v23  ;;  %v10646_v4 = vld [vmem:[#allocation4_spill] sm:$0xff] }
 0x52a   : > { %v2039_v63 = vmax.f32 %v2023_v20, 0.0  ;;  %v2025_v57 = vadd.f32 %v8525_v18, %v2002_v50  ;;  %v2001_v11 = vadd.f32 %v1985_v48, %v7901_v53  ;;  %v1947_v1 = vpop.permute.xlu0 %1946  ;;  %v10650_v20 = vld [vmem:[#allocation9_spill] sm:$0xff] }
 0x52b   : > { %v1988_v51 = vsel %vm1980_vm6, %v6528_v61, %v1947_v1 }
 0x52c   : > { %v2053_v10 = vpack.c.bf16 %v2039_v63, %v2038_v2  ;;  %v2024_v32 = vadd.f32 %v8525_v18, %v2001_v11  ;;  %v2004_v5 = vadd.f32 %v1988_v51, %v7911_v62  ;;  %v1945_v0 = vpop.permute.xlu1 %1944  ;;  %v2041_v3 = vmax.f32 %v2025_v57, 0.0  ;;  %v10651_v63 = vld [vmem:[#allocation10_spill] sm:$0xff] }
 0x52d   : > { %v1987_v56 = vsel %vm1980_vm6, %v6527_v60, %v1945_v0 }
 0x52e   : > { %v2040_v7 = vmax.f32 %v2024_v32, 0.0  ;;  %v2027_v42 = vadd.f32 %v8525_v18, %v2004_v5  ;;  %v2003_v25 = vadd.f32 %v1987_v56, %v10644_v59  ;;  %v1951_v40 = vpop.permute.xlu0 %1950  ;;  %6586 = vmatmul.mubr.bf16.vlgmr.msra.gmra.mrb[52].mxu0 %v2053_v10  ;;  %v10652_v10 = vld [vmem:[#allocation11_spill] sm:$0xff] }
 0x52f   : > { %v1990_v53 = vsel %vm1980_vm6, %v1459_v15, %v1951_v40 }
 0x530   : > { %v2026_v29 = vadd.f32 %v8525_v18, %v2003_v25  ;;  %v2006_v37 = vadd.f32 %v1990_v53, %v10645_v31  ;;  %v1949_v52 = vpop.permute.xlu1 %1948  ;;  %v2054_v33 = vpack.c.bf16 %v2041_v3, %v2040_v7  ;;  %v2043_v54 = vmax.f32 %v2027_v42, 0.0 }
 0x531   : > { %v1989_v62 = vsel %vm1980_vm6, %v1456_v45, %v1949_v52 }
 0x532   : > { %v2042_v35 = vmax.f32 %v2026_v29, 0.0  ;;  %v2029_v60 = vadd.f32 %v8525_v18, %v2006_v37  ;;  %v2005_v61 = vadd.f32 %v1989_v62, %v10646_v4  ;;  %v1955_v8 = vpop.permute.xlu0 %1954  ;;  %6589 = vmatprep.mubr.bf16.mxu0 %v2054_v33 }
 0x533   : > { %v1992_v41 = vsel %vm1980_vm6, %v8512_v9, %v1955_v8 }
 0x534   : > { %v2028_v15 = vadd.f32 %v8525_v18, %v2005_v61  ;;  %v2008_v47 = vadd.f32 %v1992_v41, %v10647_v6  ;;  %v1953_v17 = vpop.permute.xlu1 %1952  ;;  %v2055_v12 = vpack.c.bf16 %v2043_v54, %v2042_v35  ;;  %v2045_v44 = vmax.f32 %v2029_v60, 0.0 }
 0x535   : > { %v1991_v45 = vsel %vm1980_vm6, %v8510_v39, %v1953_v17  ;;  %v10649_v39 = vld [vmem:[#allocation8_spill] sm:$0xff] }
 0x536   : > { %v2044_v28 = vmax.f32 %v2028_v15, 0.0  ;;  %v2031_v36 = vadd.f32 %v8525_v18, %v2008_v47  ;;  %v2007_v34 = vadd.f32 %v1991_v45, %v10648_v49  ;;  %6590 = vmatmul.mubr.bf16.gmra.mrb[56].mxu0 %v2055_v12 }
 0x538   : > { %v2030_v38 = vadd.f32 %v8525_v18, %v2007_v34  ;;  %v2056_v55 = vpack.c.bf16 %v2045_v44, %v2044_v28  ;;  %v2047_v9 = vmax.f32 %v2031_v36, 0.0 }
 0x53a   : > { %v2046_v27 = vmax.f32 %v2030_v38, 0.0  ;;  %6593 = vmatprep.mubr.bf16.mxu0 %v2056_v55  ;;  %v2366_v38 = vld [vmem:[%s10471_s7] sm:$0x1] }
 0x53c   : > { %v2057_v21 = vpack.c.bf16 %v2047_v9, %v2046_v27 }
 0x53e   : > { %6594 = vmatmul.mubr.bf16.gmra.mrb[60].mxu0 %v2057_v21 }
 0x54f   : > { %v1957_v14 = vpop.permute.xlu1 %1956 }
 0x550   : > { %v1993_v43 = vsel %vm1980_vm6, %v8516_v26, %v1957_v14 }
 0x551   : > { %v2009_v19 = vadd.f32 %v1993_v43, %v10649_v39  ;;  %v1959_v24 = vpop.permute.xlu0 %1958 }
 0x552   : > { %v1994_v30 = vsel %vm1980_vm6, %v8520_v16, %v1959_v24 }
 0x553   : > { %v2032_v46 = vadd.f32 %v8525_v18, %v2009_v19  ;;  %v2010_v50 = vadd.f32 %v1994_v30, %v10650_v20  ;;  %v1961_v23 = vpop.permute.xlu1 %1960  ;;  %v10661_v30 = vmov 0  }
 0x554   : > { %v1995_v48 = vsel %vm1980_vm6, %v8514_v22, %v1961_v23 }
 0x555   : > { %v2033_v2 = vadd.f32 %v8525_v18, %v2010_v50  ;;  %v2011_v57 = vadd.f32 %v1995_v48, %v10651_v63  ;;  %v1963_v11 = vpop.permute.xlu0 %1962  ;;  %v2048_v1 = vmax.f32 %v2032_v46, 0.0  ;;  %v10662_v50 = vmov 1  }
 0x556   : > { %v1996_v26 = vsel %vm1980_vm6, %v8518_v13, %v1963_v11 }
 0x557   : > { %v2049_v51 = vmax.f32 %v2033_v2, 0.0  ;;  %v2034_v16 = vadd.f32 %v8525_v18, %v2011_v57  ;;  %v2012_v32 = vadd.f32 %v1996_v26, %v10652_v10 }
 0x559   : > { %v2035_v5 = vadd.f32 %v8525_v18, %v2012_v32  ;;  %v2058_v0 = vpack.c.bf16 %v2049_v51, %v2048_v1  ;;  %v2050_v56 = vmax.f32 %v2034_v16, 0.0 }
 0x55b   : > { %v2051_v3 = vmax.f32 %v2035_v5, 0.0  ;;  %6597 = vmatprep.mubr.bf16.mxu0 %v2058_v0 }
 0x55d   : > { %v2059_v22 = vpack.c.bf16 %v2051_v3, %v2050_v56  ;;  %v10663_v56 = vld [vmem:[#allocation12_spill] sm:$0xff] }
 0x55f   : > { %6598 = vmatmul.mubr.bf16.gmra.mrb[64].mxu0 %v2059_v22 }
 0x560   : > { %6637 = vmatprep.mubr.msk.bf16.mxu0 %vm7686_vm3, %v10643_v58 }
 0x601   : > { %v8583_v7 = vpop.f32.mrb[52].mxu0 }
 0x602   : > { %v8585_v13 = vpop.f32.mrb[53].mxu0 }
 0x603   : > { %v8587_v42 = vpop.f32.mrb[54].mxu0 }
 0x604   : > { %v8591_v59 = vpack.c.bf16 %v8587_v42, %v8583_v7  ;;  %v8593_v18 = vpop.f32.mrb[55].mxu0 }
 0x605   : > { %v8597_v25 = vpack.c.bf16 %v8593_v18, %v8585_v13 }
 0x606   : > { %10653 = vst [vmem:[#allocation3_spill] sm:$0xff] %v8591_v59  ;;  %3036 = vrot.lane.b32.xlu0 %v8591_v59, %s7689_s21  ;;  %v2246_v62 = vsel %vm2241_vm7, %v8591_v59, 0 }
 0x607   : > { %10654 = vst [vmem:[#allocation5_spill] sm:$0xff] %v8597_v25  ;;  %3034 = vrot.lane.b32.xlu1 %v8597_v25, %s7689_s21  ;;  %6605 = vmatprep.mubr.msk.bf16.mxu1 %vm2241_vm7, %v8597_v25  ;;  %v2243_v40 = vsel %vm2241_vm7, %v8597_v25, 0 }
 0x608   : > { %6606 = vmatmul.mubr.msk.bf16.vlgmr.msra.gmra.mrb[32].mxu1 %vm2241_vm7, %v8591_v59  ;;  %6622 = vmatpush3.bf16.xpose.msra.mxu0 %v2243_v40  ;;  %v10677_v59 = vld [vmem:[#allocation25_spill] sm:$0xff] }
 0x609   : > { %v8609_v53 = vpop.f32.mrb[56].mxu0  ;;  %6623 = vmatprep.subr.bf16.mxu0 %v10643_v58 }
 0x60a   : > { %v8612_v29 = vpop.f32.mrb[57].mxu0 }
 0x60b   : > { %v8614_v31 = vpop.f32.mrb[58].mxu0 }
 0x60c   : > { %v8618_v37 = vpack.c.bf16 %v8614_v31, %v8609_v53  ;;  %v8620_v52 = vpop.f32.mrb[59].mxu0 }
 0x60d   : > { %v8624_v33 = vpack.c.bf16 %v8620_v52, %v8612_v29 }
 0x60e   : > { %10655 = vst [vmem:[#allocation4_spill] sm:$0xff] %v8618_v37  ;;  %3040 = vrot.lane.b32.xlu1 %v8618_v37, %s7689_s21  ;;  %v2252_v15 = vsel %vm2241_vm7, %v8618_v37, 0 }
 0x60f   : > { %10656 = vst [vmem:[#allocation7_spill] sm:$0xff] %v8624_v33  ;;  %6609 = vmatprep.mubr.msk.bf16.mxu1 %vm2241_vm7, %v8624_v33  ;;  %v2249_v41 = vsel %vm2241_vm7, %v8624_v33, 0 }
 0x610   : > { %6610 = vmatmul.mubr.msk.bf16.gmra.mrb[36].mxu1 %vm2241_vm7, %v8618_v37  ;;  %6624 = vmatpush3.bf16.xpose.msra.mxu0 %v2246_v62 }
 0x611   : > { %v8634_v54 = vpop.f32.mrb[60].mxu0  ;;  %6625 = vmatprep.subr.bf16.mxu0 %v10643_v58 }
 0x612   : > { %3038 = vrot.lane.b32.xlu1 %v8624_v33, %s7689_s21  ;;  %v8639_v35 = vpop.f32.mrb[61].mxu0 }
 0x613   : > { %v8641_v60 = vpop.f32.mrb[62].mxu0 }
 0x614   : > { %v8645_v4 = vpack.c.bf16 %v8641_v60, %v8634_v54  ;;  %v8647_v61 = vpop.f32.mrb[63].mxu0 }
 0x615   : > { %v8651_v8 = vpack.c.bf16 %v8647_v61, %v8639_v35 }
 0x616   : > { %10657 = vst [vmem:[#allocation6_spill] sm:$0xff] %v8645_v4  ;;  %v2258_v47 = vsel %vm2241_vm7, %v8645_v4, 0 }
 0x617   : > { %10658 = vst [vmem:[#allocation8_spill] sm:$0xff] %v8651_v8  ;;  %3042 = vrot.lane.b32.xlu0 %v8651_v8, %s7689_s21  ;;  %6613 = vmatprep.mubr.msk.bf16.mxu1 %vm2241_vm7, %v8651_v8  ;;  %v2255_v6 = vsel %vm2241_vm7, %v8651_v8, 0 }
 0x618   : > { %6614 = vmatmul.mubr.msk.bf16.gmra.mrb[40].mxu1 %vm2241_vm7, %v8645_v4  ;;  %6626 = vmatpush3.bf16.xpose.msra.mxu0 %v2249_v41 }
 0x619   : > { %6627 = vmatprep.subr.bf16.mxu0 %v10643_v58 }
 0x620   : > { %6628 = vmatpush3.bf16.xpose.msra.mxu0 %v2252_v15  ;;  %v10664_v15 = vld [vmem:[#allocation13_spill] sm:$0xff] }
 0x621   : > { %6629 = vmatprep.subr.bf16.mxu0 %v10643_v58 }
 0x628   : > { %6630 = vmatpush3.bf16.xpose.msra.mxu0 %v2255_v6 }
 0x629   : > { %6631 = vmatprep.subr.bf16.mxu0 %v10643_v58 }
 0x630   : > { %6632 = vmatpush3.bf16.xpose.msra.mxu0 %v2258_v47 }
 0x631   : > { %6633 = vmatprep.subr.bf16.mxu0 %v10643_v58 }
 0x632   : > { %v8671_v17 = vpop.f32.mrb[64].mxu0 }
 0x633   : > { %10659 = vst [vmem:[#allocation9_spill] sm:$0xff] %v8671_v17  ;;  %v8673_v12 = vpop.f32.mrb[65].mxu0 }
 0x634   : > { %v8675_v45 = vpop.f32.mrb[66].mxu0 }
 0x635   : > { %v8679_v44 = vpack.c.bf16 %v8675_v45, %v8671_v17  ;;  %v8681_v28 = vpop.f32.mrb[67].mxu0 }
 0x636   : > { %v8685_v36 = vpack.c.bf16 %v8681_v28, %v8673_v12 }
 0x637   : > { %v2264_v34 = vsel %vm2241_vm7, %v8679_v44, 0 }
 0x638   : > { %10660 = vst [vmem:[#allocation10_spill] sm:$0xff] %v8685_v36  ;;  %6617 = vmatprep.mubr.msk.bf16.mxu1 %vm2241_vm7, %v8685_v36  ;;  %v2261_v49 = vsel %vm2241_vm7, %v8685_v36, 0 }
 0x639   : > { %6618 = vmatmul.mubr.msk.bf16.gmra.mrb[44].mxu1 %vm2241_vm7, %v8679_v44  ;;  %6634 = vmatpush3.bf16.xpose.msra.mxu0 %v2261_v49 }
 0x63a   : > { %6635 = vmatprep.subr.bf16.mxu0 %v10643_v58 }
 0x641   : > { %6636 = vmatpush3.bf16.xpose.msra.mxu0 %v2264_v34 }
 0x648   : > { %6638 = vmatmul.mubr.msk.bf16.vlgmr.msra.gmra.mrb[68].mxu0 %vm2241_vm7, %v2366_v38 }
 0x678   : > { %v3037_v9 = vpop.permute.xlu0 %3036 }
 0x679   : > { %v3035_v55 = vpop.permute.xlu1 %3034 }
 0x67a   : > { %6641 = vmatprep.subr.bf16.mxu1 %v3035_v55 }
 0x67b   : > { %6642 = vmatpush3.bf16.msra.mxu1 %v3035_v55  ;;  %v10665_v55 = vld [vmem:[#allocation14_spill] sm:$0xff] }
 0x67c   : > { %6643 = vmatprep.subr.bf16.mxu1 %v3037_v9 }
 0x67f   : > { %6644 = vmatpush3.bf16.msra.mxu1 %v3037_v9 }
 0x680   : > { %v3041_v27 = vpop.permute.xlu1 %3040 }
 0x684   : > { %v3039_v21 = vpop.permute.xlu1 %3038 }
 0x685   : > { %6645 = vmatprep.subr.bf16.mxu1 %v3039_v21 }
 0x686   : > { %6646 = vmatpush3.bf16.msra.mxu1 %v3039_v21 }
 0x687   : > { %6647 = vmatprep.subr.bf16.mxu1 %v3041_v27 }
 0x689   : > { %v3043_v14 = vpop.permute.xlu0 %3042 }
 0x68a   : > { %6648 = vmatpush3.bf16.msra.mxu1 %v3041_v27 }
 0x68b   : > { %6649 = vmatprep.subr.bf16.mxu1 %v3043_v14 }
 0x68e   : > { %6650 = vmatpush3.bf16.msra.mxu1 %v3043_v14 }
 0x6db   : > { %v6607_v43 = vpop.f32.mrb[32].mxu1 }
 0x6dc   : > { %v2303_v39 = vpop.f32.mrb[33].mxu1  ;;  %2735 = vperm.xlu1 %7028, %v6607_v43  }
 0x6dd   : > { %v6608_v19 = vpop.f32.mrb[34].mxu1  ;;  %2412 = vperm.xlu0 %7023, %v2303_v39  }
 0x6de   : > { %v2306_v24 = vpop.f32.mrb[35].mxu1 }
 0x6e0   : > { %7029 = vset.pattern.permute.xlu1 %v10661_v30 }
 0x6e1   : > { %2422 = vperm.xlu1 %7029, %v6607_v43   ;;  %2427 = vperm.xlu0 %7023, %v6608_v19  }
 0x6e3   : > { %v6611_v46 = vpop.f32.mrb[36].mxu1 }
 0x6e4   : > { %v2319_v20 = vpop.f32.mrb[37].mxu1 }
 0x6e5   : > { %7030 = vset.pattern.permute.xlu1 %v10662_v50  ;;  %v6612_v23 = vpop.f32.mrb[38].mxu1  ;;  %7031 = vset.pattern.permute.xlu0 %v10662_v50 }
 0x6e6   : > { %2727 = vperm.xlu1 %7030, %v2303_v39   ;;  %v2322_v48 = vpop.f32.mrb[39].mxu1  ;;  %2731 = vperm.xlu0 %7031, %v2306_v24  }
 0x6ea   : > { %2739 = vperm.xlu1 %7030, %v6608_v19   ;;  %2751 = vperm.xlu0 %7031, %v6611_v46  }
 0x6eb   : > { %v6615_v2 = vpop.f32.mrb[40].mxu1 }
 0x6ec   : > { %v2335_v63 = vpop.f32.mrb[41].mxu1 }
 0x6ed   : > { %v6616_v57 = vpop.f32.mrb[42].mxu1 }
 0x6ee   : > { %7032 = vset.pattern.permute.xlu1 %v10661_v30  ;;  %2743 = vperm.xlu0 %7031, %v2319_v20   ;;  %v2338_v11 = vpop.f32.mrb[43].mxu1 }
 0x6ef   : > { %2417 = vperm.xlu1 %7032, %v2306_v24  }
 0x6f2   : > { %7034 = vset.pattern.permute.xlu0 %v10661_v30 }
 0x6f3   : > { %2442 = vperm.xlu1 %7032, %v6611_v46   ;;  %2447 = vperm.xlu0 %7034, %v6612_v23  }
 0x6f7   : > { %2432 = vperm.xlu1 %7032, %v2319_v20   ;;  %2437 = vperm.xlu0 %7034, %v2322_v48  }
 0x6fb   : > { %7033 = vset.pattern.permute.xlu1 %v10662_v50  ;;  %7035 = vset.pattern.permute.xlu0 %v10662_v50 }
 0x6fc   : > { %2755 = vperm.xlu1 %7033, %v6612_v23   ;;  %2767 = vperm.xlu0 %7035, %v6615_v2  }
 0x700   : > { %2747 = vperm.xlu1 %7033, %v2322_v48   ;;  %2759 = vperm.xlu0 %7035, %v2335_v63  }
 0x704   : > { %7036 = vset.pattern.permute.xlu1 %v10661_v30  ;;  %7038 = vset.pattern.permute.xlu0 %v10661_v30 }
 0x705   : > { %2462 = vperm.xlu1 %7036, %v6615_v2   ;;  %2467 = vperm.xlu0 %7038, %v6616_v57  }
 0x709   : > { %2452 = vperm.xlu1 %7036, %v2335_v63   ;;  %2457 = vperm.xlu0 %7038, %v2338_v11  }
 0x70c   : > { %v6619_v26 = vpop.f32.mrb[44].mxu1 }
 0x70d   : > { %7037 = vset.pattern.permute.xlu1 %v10662_v50  ;;  %7039 = vset.pattern.permute.xlu0 %v10662_v50  ;;  %v2351_v1 = vpop.f32.mrb[45].mxu1 }
 0x70e   : > { %2771 = vperm.xlu1 %7037, %v6616_v57   ;;  %2783 = vperm.xlu0 %7039, %v6619_v26   ;;  %v6620_v51 = vpop.f32.mrb[46].mxu1 }
 0x70f   : > { %v2354_v16 = vpop.f32.mrb[47].mxu1 }
 0x712   : > { %2763 = vperm.xlu1 %7037, %v2338_v11   ;;  %2775 = vperm.xlu0 %7039, %v2351_v1  }
 0x716   : > { %7040 = vset.pattern.permute.xlu1 %v10661_v30  ;;  %7042 = vset.pattern.permute.xlu0 %v10661_v30 }
 0x717   : > { %2482 = vperm.xlu1 %7040, %v6619_v26   ;;  %2487 = vperm.xlu0 %7042, %v6620_v51  }
 0x71b   : > { %2472 = vperm.xlu1 %7040, %v2351_v1   ;;  %2477 = vperm.xlu0 %7042, %v2354_v16   ;;  %v2404_v10 = vpop.f32.mrb[68].mxu0 }
 0x71c   : > { %v6639_v32 = vpop.f32.mrb[69].mxu0  ;;  %v8716_v3 = vrot.slane %v2404_v10, %v10663_v56  ;;  %v8720_v6 = vrot.slane %v2404_v10, %v10664_v15  ;;  %v10673_v15 = vld [vmem:[#allocation21_spill] sm:$0xff] }
 0x71d   : > { %v2407_v5 = vpop.f32.mrb[70].mxu0  ;;  %v10666_v32 = vld [vmem:[#allocation15_spill] sm:$0xff] }
 0x71e   : > { %v6640_v0 = vpop.f32.mrb[71].mxu0 }
 0x71f   : > { %7041 = vset.pattern.permute.xlu1 %v10662_v50 }
 0x720   : > { %2787 = vperm.xlu1 %7041, %v6620_v51  }
 0x724   : > { %2779 = vperm.xlu1 %7041, %v2354_v16  }
 0x728   : > { %7043 = vset.pattern.permute.xlu1 %v10661_v30 }
 0x75b   : > { %v2736_v22 = vpop.permute.xlu1 %2735 }
 0x75c   : > { %v2796_v40 = vadd.f32 %v8716_v3, %v2736_v22  ;;  %v2413_v62 = vpop.permute.xlu0 %2412 }
 0x75d   : > { %v2494_v27 = vadd.f32 %v8720_v6, %v2413_v62 }
 0x75e   : > { %v2812_v41 = vmul.f32 0.2, %v2796_v40 }
 0x75f   : > { %v2510_v24 = vmul.f32 0.2, %v2494_v27 }
 0x760   : > { %v2828_v47 = vmax.f32 %v2796_v40, %v2812_v41  ;;  %v2423_v49 = vpop.permute.xlu1 %2422  ;;  %v2428_v34 = vpop.permute.xlu0 %2427 }
 0x761   : > { %v2496_v38 = vadd.f32 %v8720_v6, %v2423_v49  ;;  %v2497_v46 = vadd.f32 %v8720_v6, %v2428_v34  ;;  %v2526_v26 = vmax.f32 %v2494_v27, %v2510_v24 }
 0x762   : > { %v8724_v9 = vadd.f32 %v2828_v47, %v10665_v55 }
 0x763   : > { %v2512_v21 = vmul.f32 0.2, %v2496_v38  ;;  %v2513_v1 = vmul.f32 0.2, %v2497_v46  ;;  %v8742_v41 = vadd.f32 %v2526_v26, %v10666_v32 }
 0x764   : > { %2862 = vmax.xlane.f32.xlu0 %v8724_v9 }
 0x765   : > { %v2528_v14 = vmax.f32 %v2496_v38, %v2512_v21  ;;  %v2728_v43 = vpop.permute.xlu1 %2727  ;;  %v2732_v39 = vpop.permute.xlu0 %2731  ;;  %v2529_v62 = vmax.f32 %v2497_v46, %v2513_v1  ;;  %v10667_v38 = vld [vmem:[#allocation16_spill] sm:$0xff] }
 0x766   : > { %v2794_v19 = vadd.f32 %v8716_v3, %v2728_v43  ;;  %v2795_v51 = vadd.f32 %v8716_v3, %v2732_v39 }
 0x767   : > { %v8731_v20 = vadd.f32 %v2528_v14, %v10665_v55  ;;  %v8753_v46 = vadd.f32 %v2529_v62, %v10667_v38 }
 0x768   : > { %v2810_v23 = vmul.f32 0.2, %v2794_v19  ;;  %v2811_v47 = vmul.f32 0.2, %v2795_v51 }
 0x769   : > { %v2740_v48 = vpop.permute.xlu1 %2739  ;;  %v2752_v2 = vpop.permute.xlu0 %2751  ;;  %2562 = vmax.xlane.f32.xlu1 %v8731_v20 }
 0x76a   : > { %v2826_v63 = vmax.f32 %v2794_v19, %v2810_v23  ;;  %v2797_v57 = vadd.f32 %v8716_v3, %v2740_v48  ;;  %v2800_v11 = vadd.f32 %v8716_v3, %v2752_v2  ;;  %v2827_v19 = vmax.f32 %v2795_v51, %v2811_v47  ;;  %v10668_v23 = vld [vmem:[#allocation18_spill] sm:$0xff]  ;;  %v10669_v51 = vld [vmem:[#allocation17_spill] sm:$0xff] }
 0x76c   : > { %v2813_v16 = vmul.f32 0.2, %v2797_v57  ;;  %v2816_v10 = vmul.f32 0.2, %v2800_v11  ;;  %v8738_v5 = vadd.f32 %v2826_v63, %v10666_v32 }
 0x76d   : > { %v2744_v0 = vpop.permute.xlu0 %2743 }
 0x76e   : > { %v2829_v22 = vmax.f32 %v2797_v57, %v2813_v16  ;;  %v2418_v40 = vpop.permute.xlu1 %2417  ;;  %2858 = vmax.xlane.f32.xlu1 %v8738_v5  ;;  %v2832_v49 = vmax.f32 %v2800_v11, %v2816_v10  ;;  %v2798_v21 = vadd.f32 %v8716_v3, %v2744_v0  ;;  %v8762_v10 = vadd.f32 %v2827_v19, %v10669_v51  ;;  %v10670_v19 = vld [vmem:[#allocation19_spill] sm:$0xff] }
 0x76f   : > { %v2495_v34 = vadd.f32 %v8720_v6, %v2418_v40 }
 0x770   : > { %v8746_v27 = vadd.f32 %v2829_v22, %v10667_v38  ;;  %v8756_v48 = vadd.f32 %v2832_v49, %v10668_v23  ;;  %v2814_v2 = vmul.f32 0.2, %v2798_v21 }
 0x771   : > { %v2511_v24 = vmul.f32 0.2, %v2495_v34 }
 0x772   : > { %v2443_v14 = vpop.permute.xlu1 %2442  ;;  %v2448_v43 = vpop.permute.xlu0 %2447  ;;  %2864 = vmax.xlane.f32.xlu0 %v8746_v27  ;;  %2558 = vmax.xlane.f32.xlu1 %v8742_v41  ;;  %v2830_v0 = vmax.f32 %v2798_v21, %v2814_v2 }
 0x773   : > { %v2500_v39 = vadd.f32 %v8720_v6, %v2443_v14  ;;  %v2527_v16 = vmax.f32 %v2495_v34, %v2511_v24  ;;  %v2501_v62 = vadd.f32 %v8720_v6, %v2448_v43 }
 0x774   : > { %v8776_v24 = vadd.f32 %v2830_v0, %v10670_v19 }
 0x775   : > { %v2516_v63 = vmul.f32 0.2, %v2500_v39  ;;  %v2517_v2 = vmul.f32 0.2, %v2501_v62 }
 0x776   : > { %v2433_v57 = vpop.permute.xlu1 %2432  ;;  %v2438_v11 = vpop.permute.xlu0 %2437  ;;  %2564 = vmax.xlane.f32.xlu0 %v8753_v46  ;;  %2870 = vmax.xlane.f32.xlu1 %v8756_v48 }
 0x777   : > { %v2532_v26 = vmax.f32 %v2500_v39, %v2516_v63  ;;  %v2498_v1 = vadd.f32 %v8720_v6, %v2433_v57  ;;  %v8773_v39 = vadd.f32 %v2527_v16, %v10669_v51  ;;  %v2499_v0 = vadd.f32 %v8720_v6, %v2438_v11  ;;  %v10671_v51 = vld [vmem:[#allocation20_spill] sm:$0xff] }
 0x779   : > { %v2514_v22 = vmul.f32 0.2, %v2498_v1  ;;  %v8765_v40 = vadd.f32 %v2532_v26, %v10668_v23 }
 0x77a   : > { %2860 = vmax.xlane.f32.xlu0 %v8762_v10 }
 0x77b   : > { %v2756_v47 = vpop.permute.xlu1 %2755  ;;  %v2768_v49 = vpop.permute.xlu0 %2767  ;;  %2570 = vmax.xlane.f32.xlu1 %v8765_v40  ;;  %v2530_v21 = vmax.f32 %v2498_v1, %v2514_v22  ;;  %v2533_v1 = vmax.f32 %v2501_v62, %v2517_v2  ;;  %v2515_v62 = vmul.f32 0.2, %v2499_v0 }
 0x77c   : > { %v2801_v14 = vadd.f32 %v8716_v3, %v2756_v47  ;;  %v2804_v34 = vadd.f32 %v8716_v3, %v2768_v49 }
 0x77d   : > { %v8782_v16 = vadd.f32 %v2530_v21, %v10670_v19  ;;  %v8796_v11 = vadd.f32 %v2533_v1, %v10671_v51 }
 0x77e   : > { %v2817_v63 = vmul.f32 0.2, %v2801_v14  ;;  %v2820_v43 = vmul.f32 0.2, %v2804_v34  ;;  %2560 = vmax.xlane.f32.xlu0 %v8773_v39 }
 0x77f   : > { %v2748_v57 = vpop.permute.xlu1 %2747  ;;  %v2760_v26 = vpop.permute.xlu0 %2759  ;;  %2866 = vmax.xlane.f32.xlu1 %v8776_v24 }
 0x780   : > { %v2833_v23 = vmax.f32 %v2801_v14, %v2817_v63  ;;  %v2799_v47 = vadd.f32 %v8716_v3, %v2748_v57  ;;  %v2836_v49 = vmax.f32 %v2804_v34, %v2820_v43  ;;  %v2802_v32 = vadd.f32 %v8716_v3, %v2760_v26  ;;  %v10672_v34 = vld [vmem:[#allocation22_spill] sm:$0xff] }
 0x782   : > { %v2815_v22 = vmul.f32 0.2, %v2799_v47  ;;  %v8786_v38 = vadd.f32 %v2833_v23, %v10671_v51  ;;  %v8793_v21 = vadd.f32 %v2836_v49, %v10672_v34  ;;  %v2818_v23 = vmul.f32 0.2, %v2802_v32 }
 0x783   : > { %2566 = vmax.xlane.f32.xlu1 %v8782_v16 }
 0x784   : > { %v2463_v55 = vpop.permute.xlu1 %2462  ;;  %v2468_v56 = vpop.permute.xlu0 %2467  ;;  %2872 = vmax.xlane.f32.xlu0 %v8786_v38  ;;  %v2831_v2 = vmax.f32 %v2799_v47, %v2815_v22  ;;  %v2834_v30 = vmax.f32 %v2802_v32, %v2818_v23 }
 0x785   : > { %v2504_v14 = vadd.f32 %v8720_v6, %v2463_v55  ;;  %v2531_v55 = vmax.f32 %v2499_v0, %v2515_v62  ;;  %v2505_v22 = vadd.f32 %v8720_v6, %v2468_v56 }
 0x786   : > { %v8802_v49 = vadd.f32 %v2831_v2, %v10673_v15  ;;  %v10674_v2 = vld [vmem:[#allocation23_spill] sm:$0xff] }
 0x787   : > { %v2520_v63 = vmul.f32 0.2, %v2504_v14  ;;  %2878 = vmax.xlane.f32.xlu1 %v8793_v21  ;;  %v8813_v62 = vadd.f32 %v2531_v55, %v10673_v15  ;;  %v8816_v23 = vadd.f32 %v2834_v30, %v10674_v2  ;;  %v10675_v15 = vld [vmem:[#allocation24_spill] sm:$0xff] }
 0x788   : > { %v2453_v43 = vpop.permute.xlu1 %2452  ;;  %v2458_v57 = vpop.permute.xlu0 %2457  ;;  %2572 = vmax.xlane.f32.xlu0 %v8796_v11 }
 0x789   : > { %v2536_v26 = vmax.f32 %v2504_v14, %v2520_v63  ;;  %v2502_v19 = vadd.f32 %v8720_v6, %v2453_v43  ;;  %v2521_v63 = vmul.f32 0.2, %v2505_v22  ;;  %v2503_v30 = vadd.f32 %v8720_v6, %v2458_v57 }
 0x78b   : > { %v2518_v47 = vmul.f32 0.2, %v2502_v19  ;;  %v8805_v1 = vadd.f32 %v2536_v26, %v10672_v34 }
 0x78c   : > { %2868 = vmax.xlane.f32.xlu0 %v8802_v49 }
 0x78d   : > { %v2772_v51 = vpop.permute.xlu1 %2771  ;;  %v2784_v50 = vpop.permute.xlu0 %2783  ;;  %2578 = vmax.xlane.f32.xlu1 %v8805_v1  ;;  %v2534_v32 = vmax.f32 %v2502_v19, %v2518_v47  ;;  %v2537_v19 = vmax.f32 %v2505_v22, %v2521_v63 }
 0x78e   : > { %v2805_v14 = vadd.f32 %v8716_v3, %v2772_v51  ;;  %v2808_v0 = vadd.f32 %v8716_v3, %v2784_v50 }
 0x78f   : > { %v8822_v55 = vadd.f32 %v2534_v32, %v10674_v2  ;;  %v2519_v32 = vmul.f32 0.2, %v2503_v30  ;;  %v8836_v57 = vadd.f32 %v2537_v19, %v10675_v15 }
 0x790   : > { %v2821_v43 = vmul.f32 0.2, %v2805_v14  ;;  %v2824_v56 = vmul.f32 0.2, %v2808_v0  ;;  %2568 = vmax.xlane.f32.xlu0 %v8813_v62 }
 0x791   : > { %v2764_v26 = vpop.permute.xlu1 %2763  ;;  %2874 = vmax.xlane.f32.xlu1 %v8816_v23  ;;  %v2776_v58 = vpop.permute.xlu0 %2775  ;;  %v2535_v2 = vmax.f32 %v2503_v30, %v2519_v32  ;;  %v10678_v30 = vld [vmem:[#allocation28_spill] sm:$0xff] }
 0x792   : > { %v2837_v34 = vmax.f32 %v2805_v14, %v2821_v43  ;;  %v2803_v51 = vadd.f32 %v8716_v3, %v2764_v26  ;;  %v2840_v50 = vmax.f32 %v2808_v0, %v2824_v56  ;;  %v2806_v37 = vadd.f32 %v8716_v3, %v2776_v58  ;;  %v10676_v0 = vld [vmem:[#allocation26_spill] sm:$0xff] }
 0x794   : > { %v2819_v47 = vmul.f32 0.2, %v2803_v51  ;;  %v8826_v8 = vadd.f32 %v2837_v34, %v10675_v15  ;;  %v8833_v43 = vadd.f32 %v2840_v50, %v10676_v0  ;;  %v2822_v63 = vmul.f32 0.2, %v2806_v37  ;;  %v10679_v15 = vld [vmem:[#allocation27_spill] sm:$0xff] }
 0x795   : > { %2574 = vmax.xlane.f32.xlu1 %v8822_v55 }
 0x796   : > { %v2483_v33 = vpop.permute.xlu1 %2482  ;;  %2880 = vmax.xlane.f32.xlu0 %v8826_v8  ;;  %v2835_v22 = vmax.f32 %v2803_v51, %v2819_v47  ;;  %v2488_v26 = vpop.permute.xlu0 %2487  ;;  %v2838_v50 = vmax.f32 %v2806_v37, %v2822_v63 }
 0x797   : > { %v2508_v14 = vadd.f32 %v8720_v6, %v2483_v33  ;;  %v2509_v51 = vadd.f32 %v8720_v6, %v2488_v26 }
 0x798   : > { %v8841_v33 = vadd.f32 %v2835_v22, %v10677_v59  ;;  %v8854_v32 = vadd.f32 %v2838_v50, %v10678_v30 }
 0x799   : > { %v2524_v34 = vmul.f32 0.2, %v2508_v14  ;;  %2886 = vmax.xlane.f32.xlu1 %v8833_v43  ;;  %v2525_v22 = vmul.f32 0.2, %v2509_v51 }
 0x79a   : > { %v2473_v58 = vpop.permute.xlu1 %2472  ;;  %2580 = vmax.xlane.f32.xlu0 %v8836_v57 }
 0x79b   : > { %v2540_v56 = vmax.f32 %v2508_v14, %v2524_v34  ;;  %v8851_v14 = vadd.f32 %v2535_v2, %v10677_v59  ;;  %v2541_v26 = vmax.f32 %v2509_v51, %v2525_v22  ;;  %v10680_v59 = vld [vmem:[#allocation29_spill] sm:$0xff] }
 0x79d   : > { %v8844_v25 = vadd.f32 %v2540_v56, %v10676_v0  ;;  %v8864_v50 = vadd.f32 %v2541_v26, %v10679_v15 }
 0x79e   : > { %2876 = vmax.xlane.f32.xlu0 %v8841_v33 }
 0x79f   : > { %v2788_v19 = vpop.permute.xlu1 %2787  ;;  %2586 = vmax.xlane.f32.xlu1 %v8844_v25 }
 0x7a0   : > { %v2809_v47 = vadd.f32 %v8716_v3, %v2788_v19 }
 0x7a2   : > { %v2825_v37 = vmul.f32 0.2, %v2809_v47  ;;  %2576 = vmax.xlane.f32.xlu0 %v8851_v14 }
 0x7a3   : > { %v2780_v63 = vpop.permute.xlu1 %2779  ;;  %2882 = vmax.xlane.f32.xlu1 %v8854_v32 }
 0x7a4   : > { %v2841_v34 = vmax.f32 %v2809_v47, %v2825_v37  ;;  %v2807_v56 = vadd.f32 %v8716_v3, %v2780_v63  ;;  %v2506_v3 = vadd.f32 %v8720_v6, %v2473_v58  ;;  %v2478_v47 = vpop.permute.xlu0 %2477 }
 0x7a5   : > { %v2507_v37 = vadd.f32 %v8720_v6, %v2478_v47 }
 0x7a6   : > { %v2823_v0 = vmul.f32 0.2, %v2807_v56  ;;  %v8860_v19 = vadd.f32 %v2841_v34, %v10679_v15  ;;  %v2522_v51 = vmul.f32 0.2, %v2506_v3 }
 0x7a7   : > { %v2523_v63 = vmul.f32 0.2, %v2507_v37 }
 0x7a8   : > { %2888 = vmax.xlane.f32.xlu0 %v8860_v19  ;;  %v2839_v2 = vmax.f32 %v2807_v56, %v2823_v0  ;;  %v2538_v0 = vmax.f32 %v2506_v3, %v2522_v51 }
 0x7a9   : > { %v2539_v34 = vmax.f32 %v2507_v37, %v2523_v63 }
 0x7aa   : > { %v8868_v17 = vadd.f32 %v2839_v2, %v10680_v59  ;;  %v8877_v22 = vadd.f32 %v2538_v0, %v10678_v30 }
 0x7ab   : > { %v8882_v56 = vadd.f32 %v2539_v34, %v10680_v59 }
 0x7ac   : > { %2588 = vmax.xlane.f32.xlu0 %v8864_v50 }
 0x7b0   : > { %2884 = vmax.xlane.f32.xlu0 %v8868_v17 }
 0x7b4   : > { %3044 = vrot.lane.b32.xlu1 %v8645_v4, %s7689_s21 }
 0x7c6   : > { %3046 = vrot.lane.b32.xlu0 %v8685_v36, %s7689_s21 }
 0x7d8   : > { %2582 = vmax.xlane.f32.xlu1 %v8877_v22 }
 0x7e5   : > { %2584 = vmax.xlane.f32.xlu0 %v8882_v56 }
 0x7f1   : > { %v2863_v26 = vpop.xlane.xlu0 %2862 }
 0x7f2   : > { %v2892_v58 = vsub.f32 %v8724_v9, %v2863_v26 }
 0x7f4   : > { %v2910_v2 = vmul.f32 1.442695, %v2892_v58 }
 0x7f6   : > { %7259 = vpow2.f32 %v2910_v2  ;;  %v8886_v3 = vpop.xlane.xlu1 %2562 }
 0x7fb   : > { %v2859_v51 = vpop.xlane.xlu1 %2858 }
 0x7fc   : > { %v2890_v0 = vsub.f32 %v8738_v5, %v2859_v51 }
 0x7fe   : > { %v2906_v6 = vmul.f32 1.442695, %v2890_v0 }
 0x7ff   : > { %v2865_v47 = vpop.xlane.xlu0 %2864  ;;  %v8889_v30 = vpop.xlane.xlu1 %2558 }
 0x800   : > { %v8891_v37 = vpop.eup %7259  ;;  %7261 = vpow2.f32 %v2906_v6  ;;  %v2893_v63 = vsub.f32 %v8746_v27, %v2865_v47 }
 0x801   : > { %10681 = vst [vmem:[#allocation11_spill] sm:$0xff] %v8891_v37  ;;  %2942 = vadd.xlane.f32.xlu0 %v8891_v37 }
 0x802   : > { %v2912_v34 = vmul.f32 1.442695, %v2893_v63 }
 0x803   : > { %v8895_v9 = vpop.xlane.xlu0 %2564  ;;  %v2871_v26 = vpop.xlane.xlu1 %2870 }
 0x804   : > { %7263 = vpow2.f32 %v2912_v34  ;;  %v2896_v2 = vsub.f32 %v8756_v48, %v2871_v26 }
 0x806   : > { %v2918_v27 = vmul.f32 1.442695, %v2896_v2 }
 0x807   : > { %v2861_v58 = vpop.xlane.xlu0 %2860 }
 0x808   : > { %v2891_v5 = vsub.f32 %v8762_v10, %v2861_v58  ;;  %v8899_v51 = vpop.xlane.xlu1 %2570 }
 0x80a   : > { %v8901_v0 = vpop.eup %7261  ;;  %v2908_v59 = vmul.f32 1.442695, %v2891_v5 }
 0x80b   : > { %2938 = vadd.xlane.f32.xlu1 %v8901_v0  ;;  %v8904_v47 = vpop.xlane.xlu0 %2560 }
 0x80c   : > { %7265 = vpow2.f32 %v2908_v59  ;;  %v2867_v6 = vpop.xlane.xlu1 %2866 }
 0x80d   : > { %v2894_v63 = vsub.f32 %v8776_v24, %v2867_v6  ;;  %7267 = vpow2.f32 %v2918_v27 }
 0x80e   : > { %v8907_v34 = vpop.eup %7263 }
 0x80f   : > { %v2914_v15 = vmul.f32 1.442695, %v2894_v63  ;;  %2944 = vadd.xlane.f32.xlu0 %v8907_v34 }
 0x810   : > { %v8910_v48 = vpop.xlane.xlu1 %2566 }
 0x811   : > { %7269 = vpow2.f32 %v2914_v15  ;;  %v2873_v10 = vpop.xlane.xlu0 %2872 }
 0x812   : > { %v2897_v26 = vsub.f32 %v8786_v38, %v2873_v10 }
 0x814   : > { %v2920_v58 = vmul.f32 1.442695, %v2897_v26  ;;  %v2879_v5 = vpop.xlane.xlu1 %2878 }
 0x815   : > { %v8913_v2 = vpop.xlane.xlu0 %2572  ;;  %v2900_v27 = vsub.f32 %v8793_v21, %v2879_v5 }
 0x816   : > { %v8915_v59 = vpop.eup %7265  ;;  %7271 = vpow2.f32 %v2920_v58 }
 0x817   : > { %2940 = vadd.xlane.f32.xlu0 %v8915_v59  ;;  %v8918_v6 = vpop.eup %7267  ;;  %v2926_v10 = vmul.f32 1.442695, %v2900_v27 }
 0x818   : > { %10682 = vst [vmem:[#allocation30_spill] sm:$0xff] %v8918_v6 }
 0x819   : > { %v2869_v24 = vpop.xlane.xlu0 %2868 }
 0x81a   : > { %v2895_v63 = vsub.f32 %v8802_v49, %v2869_v24  ;;  %v8922_v15 = vpop.xlane.xlu1 %2578 }
 0x81b   : > { %v8924_v36 = vpop.eup %7269  ;;  %2950 = vadd.xlane.f32.xlu0 %v8918_v6 }
 0x81c   : > { %10683 = vst [vmem:[#allocation31_spill] sm:$0xff] %v8924_v36  ;;  %v2916_v38 = vmul.f32 1.442695, %v2895_v63  ;;  %2946 = vadd.xlane.f32.xlu1 %v8924_v36 }
 0x81d   : > { %v8928_v58 = vpop.xlane.xlu0 %2568 }
 0x81e   : > { %7273 = vpow2.f32 %v2916_v38  ;;  %v2875_v26 = vpop.xlane.xlu1 %2874 }
 0x81f   : > { %v2898_v4 = vsub.f32 %v8816_v23, %v2875_v26  ;;  %7275 = vpow2.f32 %v2926_v10 }
 0x820   : > { %v8931_v37 = vpop.eup %7271 }
 0x821   : > { %2952 = vadd.xlane.f32.xlu0 %v8931_v37  ;;  %v2922_v21 = vmul.f32 1.442695, %v2898_v4 }
 0x822   : > { %v8934_v49 = vpop.xlane.xlu1 %2574 }
 0x823   : > { %v2881_v5 = vpop.xlane.xlu0 %2880  ;;  %7277 = vpow2.f32 %v2922_v21 }
 0x824   : > { %v2901_v24 = vsub.f32 %v8826_v8, %v2881_v5 }
 0x826   : > { %v2928_v63 = vmul.f32 1.442695, %v2901_v24  ;;  %v2887_v27 = vpop.xlane.xlu1 %2886  ;;  %v2590_v24 = vsub.f32 %v8742_v41, %v8889_v30 }
 0x827   : > { %v2904_v38 = vsub.f32 %v8833_v43, %v2887_v27  ;;  %v8938_v6 = vpop.xlane.xlu0 %2580 }
 0x828   : > { %v8940_v36 = vpop.eup %7273  ;;  %7279 = vpow2.f32 %v2928_v63 }
 0x829   : > { %v2934_v23 = vmul.f32 1.442695, %v2904_v38  ;;  %2948 = vadd.xlane.f32.xlu0 %v8940_v36  ;;  %v8943_v10 = vpop.eup %7275 }
 0x82a   : > { %10684 = vst [vmem:[#allocation32_spill] sm:$0xff] %v8943_v10 }
 0x82b   : > { %7281 = vpow2.f32 %v2934_v23  ;;  %v2877_v4 = vpop.xlane.xlu0 %2876 }
 0x82c   : > { %v2899_v26 = vsub.f32 %v8841_v33, %v2877_v4  ;;  %v8946_v8 = vpop.xlane.xlu1 %2586 }
 0x82d   : > { %2958 = vadd.xlane.f32.xlu0 %v8943_v10  ;;  %v8949_v43 = vpop.eup %7277 }
 0x82e   : > { %v2924_v21 = vmul.f32 1.442695, %v2899_v26  ;;  %v2592_v26 = vsub.f32 %v8731_v20, %v8886_v3 }
 0x82f   : > { %v8953_v63 = vpop.xlane.xlu0 %2576 }
 0x830   : > { %7283 = vpow2.f32 %v2924_v21  ;;  %v2883_v5 = vpop.xlane.xlu1 %2882  ;;  %v2606_v21 = vmul.f32 1.442695, %v2590_v24 }
 0x831   : > { %v2902_v27 = vsub.f32 %v8854_v32, %v2883_v5  ;;  %2954 = vadd.xlane.f32.xlu0 %v8949_v43  ;;  %v2610_v5 = vmul.f32 1.442695, %v2592_v26 }
 0x832   : > { %v8957_v38 = vpop.eup %7279 }
 0x833   : > { %10685 = vst [vmem:[#allocation33_spill] sm:$0xff] %v8957_v38  ;;  %v2930_v33 = vmul.f32 1.442695, %v2902_v27  ;;  %2960 = vadd.xlane.f32.xlu1 %v8957_v38  ;;  %v2593_v27 = vsub.f32 %v8753_v46, %v8895_v9  ;;  %v2595_v9 = vsub.f32 %v8813_v62, %v8928_v58  ;;  %v2597_v58 = vsub.f32 %v8796_v11, %v8913_v2 }
 0x834   : > { %v3045_v23 = vpop.permute.xlu1 %3044  ;;  %v2599_v2 = vsub.f32 %v8851_v14, %v8953_v63  ;;  %v2604_v63 = vsub.f32 %v8844_v25, %v8946_v8 }
 0x835   : > { %v8960_v4 = vpop.eup %7281  ;;  %7285 = vpow2.f32 %v2930_v33  ;;  %v2889_v41 = vpop.xlane.xlu0 %2888  ;;  %6651 = vmatprep.subr.bf16.mxu1 %v3045_v23  ;;  %v2612_v20 = vmul.f32 1.442695, %v2593_v27 }
 0x836   : > { %v2905_v30 = vsub.f32 %v8860_v19, %v2889_v41  ;;  %2966 = vadd.xlane.f32.xlu0 %v8960_v4  ;;  %6652 = vmatpush3.bf16.msra.mxu1 %v3045_v23  ;;  %7287 = vpow2.f32 %v2606_v21  ;;  %v2594_v19 = vsub.f32 %v8782_v16, %v8910_v48  ;;  %v2616_v48 = vmul.f32 1.442695, %v2595_v9 }
 0x837   : > { %v2634_v9 = vmul.f32 1.442695, %v2604_v63 }
 0x838   : > { %v2936_v32 = vmul.f32 1.442695, %v2905_v30  ;;  %v2614_v46 = vmul.f32 1.442695, %v2594_v19 }
 0x839   : > { %v8968_v10 = vpop.xlane.xlu0 %2588 }
 0x83a   : > { %v8970_v38 = vpop.eup %7283  ;;  %7289 = vpow2.f32 %v2936_v32 }
 0x83b   : > { %2956 = vadd.xlane.f32.xlu1 %v8970_v38  ;;  %7291 = vpow2.f32 %v2610_v5 }
 0x83c   : > { %7293 = vpow2.f32 %v2612_v20  ;;  %v2600_v20 = vsub.f32 %v8805_v1, %v8922_v15 }
 0x83d   : > { %v2885_v3 = vpop.xlane.xlu0 %2884 }
 0x83e   : > { %v2903_v24 = vsub.f32 %v8868_v17, %v2885_v3  ;;  %v2596_v17 = vsub.f32 %v8765_v40, %v8899_v51  ;;  %v2620_v40 = vmul.f32 1.442695, %v2597_v58  ;;  %v2598_v51 = vsub.f32 %v8822_v55, %v8934_v49 }
 0x83f   : > { %v8976_v33 = vpop.eup %7285  ;;  %v2624_v55 = vmul.f32 1.442695, %v2599_v2  ;;  %v2626_v19 = vmul.f32 1.442695, %v2600_v20 }
 0x840   : > { %v2932_v23 = vmul.f32 1.442695, %v2903_v24  ;;  %2962 = vadd.xlane.f32.xlu0 %v8976_v33  ;;  %v8981_v21 = vpop.eup %7287  ;;  %v2618_v62 = vmul.f32 1.442695, %v2596_v17  ;;  %v2622_v11 = vmul.f32 1.442695, %v2598_v51 }
 0x841   : > { %v3047_v26 = vpop.permute.xlu0 %3046 }
 0x842   : > { %7295 = vpow2.f32 %v2932_v23  ;;  %6653 = vmatprep.subr.bf16.mxu1 %v3047_v26 }
 0x843   : > { %6654 = vmatpush3.bf16.msra.mxu1 %v3047_v26  ;;  %7297 = vpow2.f32 %v2614_v46  ;;  %v2591_v26 = vsub.f32 %v8773_v39, %v8904_v47  ;;  %v2605_v39 = vsub.f32 %v8864_v50, %v8968_v10 }
 0x844   : > { %v8983_v16 = vpop.eup %7289  ;;  %2638 = vadd.xlane.f32.xlu0 %v8981_v21  ;;  %7299 = vpow2.f32 %v2616_v48  ;;  %v2601_v48 = vsub.f32 %v8836_v57, %v8938_v6 }
 0x845   : > { %2968 = vadd.xlane.f32.xlu1 %v8983_v16  ;;  %v8989_v41 = vpop.eup %7291  ;;  %7301 = vpow2.f32 %v2618_v62  ;;  %v2608_v17 = vmul.f32 1.442695, %v2591_v26 }
 0x846   : > { %v8994_v30 = vpop.eup %7293  ;;  %7303 = vpow2.f32 %v2620_v40  ;;  %v2636_v40 = vmul.f32 1.442695, %v2605_v39 }
 0x847   : > { %7305 = vpow2.f32 %v2622_v11 }
 0x848   : > { %2642 = vadd.xlane.f32.xlu0 %v8989_v41  ;;  %7307 = vpow2.f32 %v2624_v55 }
 0x849   : > { %7309 = vpow2.f32 %v2626_v19 }
 0x84c   : > { %v8996_v32 = vpop.eup %7295  ;;  %2644 = vadd.xlane.f32.xlu0 %v8994_v30 }
 0x84d   : > { %2964 = vadd.xlane.f32.xlu1 %v8996_v32  ;;  %v9002_v5 = vpop.eup %7297 }
 0x84e   : > { %v9007_v27 = vpop.eup %7299 }
 0x84f   : > { %v9012_v49 = vpop.eup %7301 }
 0x850   : > { %2646 = vadd.xlane.f32.xlu0 %v9002_v5  ;;  %v9015_v3 = vpop.eup %7303 }
 0x851   : > { %v9020_v14 = vpop.eup %7305 }
 0x852   : > { %v9023_v1 = vpop.eup %7307 }
 0x853   : > { %v9029_v23 = vpop.eup %7309 }
 0x854   : > { %2648 = vadd.xlane.f32.xlu0 %v9007_v27 }
 0x858   : > { %2650 = vadd.xlane.f32.xlu0 %v9012_v49 }
 0x85c   : > { %2652 = vadd.xlane.f32.xlu0 %v9015_v3 }
 0x85e   : > { %3048 = vrot.lane.b32.xlu1 %v8679_v44, %s7689_s21 }
 0x860   : > { %2654 = vadd.xlane.f32.xlu0 %v9020_v14 }
 0x864   : > { %2656 = vadd.xlane.f32.xlu0 %v9023_v1 }
 0x865   : > { %v2583_v15 = vpop.xlane.xlu1 %2582 }
 0x866   : > { %v2602_v24 = vsub.f32 %v8877_v22, %v2583_v15  ;;  %v2628_v22 = vmul.f32 1.442695, %v2601_v48 }
 0x868   : > { %v2630_v46 = vmul.f32 1.442695, %v2602_v24  ;;  %2658 = vadd.xlane.f32.xlu0 %v9029_v23 }
 0x86a   : > { %7311 = vpow2.f32 %v2630_v46 }
 0x86b   : > { %7313 = vpow2.f32 %v2634_v9 }
 0x86c   : > { %7315 = vpow2.f32 %v2608_v17 }
 0x86d   : > { %7317 = vpow2.f32 %v2628_v22 }
 0x872   : > { %v2585_v25 = vpop.xlane.xlu0 %2584 }
 0x873   : > { %v2603_v8 = vsub.f32 %v8882_v56, %v2585_v25 }
 0x874   : > { %v9036_v62 = vpop.eup %7311 }
 0x875   : > { %2662 = vadd.xlane.f32.xlu0 %v9036_v62  ;;  %v9040_v58 = vpop.eup %7313  ;;  %v2632_v47 = vmul.f32 1.442695, %v2603_v8 }
 0x876   : > { %v9045_v57 = vpop.eup %7315 }
 0x877   : > { %7319 = vpow2.f32 %v2632_v47  ;;  %v9048_v6 = vpop.eup %7317 }
 0x878   : > { %7321 = vpow2.f32 %v2636_v40 }
 0x879   : > { %2666 = vadd.xlane.f32.xlu0 %v9040_v58 }
 0x881   : > { %v9051_v56 = vpop.eup %7319 }
 0x882   : > { %2640 = vadd.xlane.f32.xlu1 %v9045_v57  ;;  %v9054_v51 = vpop.eup %7321 }
 0x886   : > { %2660 = vadd.xlane.f32.xlu1 %v9048_v6 }
 0x88a   : > { %2664 = vadd.xlane.f32.xlu1 %v9051_v56 }
 0x88e   : > { %2668 = vadd.xlane.f32.xlu1 %v9054_v51  ;;  %v2943_v50 = vpop.xlane.xlu0 %2942 }
 0x88f   : > { %3284 = vrot.lane.b32.xlu0 %v8585_v13, %s7690_s30  ;;  %v2972_v19 = vmax.f32 %v2943_v50, 1e-30 }
 0x893   : > { %3290 = vrot.lane.b32.xlu0 %v8587_v42, %s7690_s30 }
 0x897   : > { %3294 = vrot.lane.b32.xlu0 %v8620_v52, %s7690_s30 }
 0x898   : > { %v2939_v10 = vpop.xlane.xlu1 %2938 }
 0x899   : > { %v2970_v2 = vmax.f32 %v2939_v10, 1e-30 }
 0x89b   : > { %3298 = vrot.lane.b32.xlu0 %v8614_v31, %s7690_s30  ;;  %7323 = vrcp.f32 %v2970_v2 }
 0x89c   : > { %v2945_v11 = vpop.xlane.xlu0 %2944 }
 0x89d   : > { %v2973_v55 = vmax.f32 %v2945_v11, 1e-30 }
 0x89f   : > { %3286 = vrot.lane.b32.xlu1 %v8593_v18, %s7690_s30  ;;  %3302 = vrot.lane.b32.xlu0 %v8647_v61, %s7690_s30 }
 0x8a3   : > { %3288 = vrot.lane.b32.xlu1 %v8583_v7, %s7690_s30  ;;  %3306 = vrot.lane.b32.xlu0 %v8641_v60, %s7690_s30 }
 0x8a4   : > { %v2941_v20 = vpop.xlane.xlu0 %2940 }
 0x8a5   : > { %v2971_v13 = vmax.f32 %v2941_v20, 1e-30  ;;  %v7324_v42 = vpop.eup %7323  ;;  %v10687_v20 = vld [vmem:[#allocation11_spill] sm:$0xff] }
 0x8a6   : > { %v3002_v7 = vmul.f32 %v7324_v42, %v8901_v0 }
 0x8a7   : > { %7325 = vrcp.f32 %v2971_v13  ;;  %3292 = vrot.lane.b32.xlu1 %v8612_v29, %s7690_s30  ;;  %3310 = vrot.lane.b32.xlu0 %v8681_v28, %s7690_s30  ;;  %v10686_v29 = vld [vmem:[#allocation9_spill] sm:$0xff] }
 0x8a8   : > { %v2951_v60 = vpop.xlane.xlu0 %2950  ;;  %7327 = vrcp.f32 %v2973_v55 }
 0x8a9   : > { %v2976_v24 = vmax.f32 %v2951_v60, 1e-30 }
 0x8ab   : > { %3296 = vrot.lane.b32.xlu1 %v8609_v53, %s7690_s30  ;;  %3314 = vrot.lane.b32.xlu0 %v8675_v45, %s7690_s30  ;;  %v2947_v45 = vpop.xlane.xlu1 %2946 }
 0x8ac   : > { %v2974_v0 = vmax.f32 %v2947_v45, 1e-30 }
 0x8ae   : > { %v2953_v53 = vpop.xlane.xlu0 %2952 }
 0x8af   : > { %3300 = vrot.lane.b32.xlu1 %v8639_v35, %s7690_s30  ;;  %v2977_v63 = vmax.f32 %v2953_v53, 1e-30 }
 0x8b1   : > { %v7326_v18 = vpop.eup %7325 }
 0x8b2   : > { %v3003_v31 = vmul.f32 %v7326_v18, %v8915_v59  ;;  %v7328_v17 = vpop.eup %7327  ;;  %v10688_v18 = vld [vmem:[#allocation31_spill] sm:$0xff] }
 0x8b3   : > { %3304 = vrot.lane.b32.xlu1 %v8634_v54, %s7690_s30  ;;  %v3005_v40 = vmul.f32 %v7328_v17, %v8907_v34  ;;  %v10693_v17 = vld [vmem:[#allocation4_spill] sm:$0xff] }
 0x8b4   : > { %v3018_v52 = vpack.c.bf16 %v3003_v31, %v3002_v7 }
 0x8b6   : > { %6657 = vmatprep.mubr.bf16.mxu1 %v3018_v52  ;;  %v2949_v61 = vpop.xlane.xlu0 %2948  ;;  %v10689_v52 = vld [vmem:[#allocation5_spill] sm:$0xff] }
 0x8b7   : > { %3308 = vrot.lane.b32.xlu1 %v8673_v12, %s7690_s30  ;;  %v2975_v35 = vmax.f32 %v2949_v61, 1e-30 }
 0x8b9   : > { %7329 = vrcp.f32 %v2975_v35 }
 0x8ba   : > { %v2959_v28 = vpop.xlane.xlu0 %2958  ;;  %7331 = vrcp.f32 %v2972_v19 }
 0x8bb   : > { %3312 = vrot.lane.b32.xlu1 %v10686_v29, %s7690_s30  ;;  %7333 = vrcp.f32 %v2974_v0  ;;  %v2980_v10 = vmax.f32 %v2959_v28, 1e-30  ;;  %v10690_v28 = vld [vmem:[#allocation3_spill] sm:$0xff]  ;;  %v10691_v0 = vld [vmem:[#allocation30_spill] sm:$0xff]  ;;  %s7693_s30 = smov 16  }
 0x8bc   : > { %7335 = vrcp.f32 %v2977_v63  ;;  %v10692_v63 = vld [vmem:[#allocation7_spill] sm:$0xff] }
 0x8be   : > { %v2955_v59 = vpop.xlane.xlu0 %2954 }
 0x8bf   : > { %v2978_v9 = vmax.f32 %v2955_v59, 1e-30 }
 0x8c0   : > { %v2961_v15 = vpop.xlane.xlu1 %2960 }
 0x8c1   : > { %v2981_v39 = vmax.f32 %v2961_v15, 1e-30 }
 0x8c3   : > { %v2967_v26 = vpop.xlane.xlu0 %2966  ;;  %v7330_v25 = vpop.eup %7329 }
 0x8c4   : > { %v7332_v8 = vpop.eup %7331  ;;  %v3007_v2 = vmul.f32 %v7330_v25, %v8940_v36  ;;  %v2984_v35 = vmax.f32 %v2967_v26, 1e-30 }
 0x8c5   : > { %v7334_v47 = vpop.eup %7333  ;;  %v3004_v13 = vmul.f32 %v7332_v8, %v10687_v20  ;;  %v10697_v20 = vld [vmem:[#allocation6_spill] sm:$0xff] }
 0x8c6   : > { %v3006_v7 = vmul.f32 %v7334_v47, %v10688_v18  ;;  %v7336_v34 = vpop.eup %7335  ;;  %v10696_v47 = vld [vmem:[#allocation8_spill] sm:$0xff] }
 0x8c7   : > { %v3019_v29 = vpack.c.bf16 %v3005_v40, %v3004_v13  ;;  %v3009_v55 = vmul.f32 %v7336_v34, %v8931_v37 }
 0x8c8   : > { %v2957_v54 = vpop.xlane.xlu1 %2956  ;;  %v3020_v60 = vpack.c.bf16 %v3007_v2, %v3006_v7 }
 0x8c9   : > { %v2979_v12 = vmax.f32 %v2957_v54, 1e-30 }
 0x8cb   : > { %7337 = vrcp.f32 %v2979_v12 }
 0x8cc   : > { %7339 = vrcp.f32 %v2976_v24 }
 0x8cd   : > { %7341 = vrcp.f32 %v2978_v9  ;;  %v2963_v22 = vpop.xlane.xlu0 %2962 }
 0x8ce   : > { %v2982_v42 = vmax.f32 %v2963_v22, 1e-30  ;;  %7343 = vrcp.f32 %v2981_v39  ;;  %v10695_v22 = vld [vmem:[#allocation32_spill] sm:$0xff] }
 0x8d1   : > { %v9079_v31 = vpop.xlane.xlu0 %2638 }
 0x8d2   : > { %v2969_v46 = vpop.xlane.xlu1 %2968 }
 0x8d3   : > { %v2985_v61 = vmax.f32 %v2969_v46, 1e-30 }
 0x8d5   : > { %v7338_v53 = vpop.eup %7337  ;;  %v2643_v15 = vpop.xlane.xlu0 %2642 }
 0x8d6   : > { %v7340_v36 = vpop.eup %7339  ;;  %v3011_v19 = vmul.f32 %v7338_v53, %v8970_v38 }
 0x8d7   : > { %v7342_v45 = vpop.eup %7341  ;;  %v3008_v59 = vmul.f32 %v7340_v36, %v10691_v0 }
 0x8d8   : > { %v3010_v54 = vmul.f32 %v7342_v45, %v8949_v43  ;;  %v7344_v24 = vpop.eup %7343 }
 0x8d9   : > { %v3021_v12 = vpack.c.bf16 %v3009_v55, %v3008_v59  ;;  %v2645_v26 = vpop.xlane.xlu0 %2644 }
 0x8da   : > { %v2965_v48 = vpop.xlane.xlu1 %2964  ;;  %v3022_v46 = vpack.c.bf16 %v3011_v19, %v3010_v54  ;;  %v2673_v34 = vmax.f32 %v2645_v26, 1e-30 }
 0x8db   : > { %v2983_v50 = vmax.f32 %v2965_v48, 1e-30  ;;  %v10694_v48 = vld [vmem:[#allocation33_spill] sm:$0xff] }
 0x8dc   : > { %v3013_v25 = vmul.f32 %v7344_v24, %v10694_v48 }
 0x8dd   : > { %7345 = vrcp.f32 %v2983_v50 }
 0x8de   : > { %v3049_v11 = vpop.permute.xlu1 %3048  ;;  %7347 = vrcp.f32 %v2980_v10 }
 0x8df   : > { %6655 = vmatprep.subr.bf16.mxu1 %v3049_v11  ;;  %7349 = vrcp.f32 %v2982_v42  ;;  %v10698_v42 = vld [vmem:[#allocation10_spill] sm:$0xff] }
 0x8e0   : > { %6656 = vmatpush3.bf16.msra.mxu1 %v3049_v11  ;;  %7351 = vrcp.f32 %v2985_v61  ;;  %v2647_v11 = vpop.xlane.xlu0 %2646 }
 0x8e1   : > { %6673 = vmatprep.subr.bf16.mxu1 %v10689_v52  ;;  %7353 = vrcp.f32 %v2984_v35  ;;  %v2674_v36 = vmax.f32 %v2647_v11, 1e-30 }
 0x8e3   : > { %6658 = vmatmul.mubr.bf16.vlgmr.msra.gmra.mrb[48].mxu1 %v3019_v29 }
 0x8e4   : > { %6661 = vmatprep.mubr.bf16.mxu1 %v3020_v60  ;;  %6674 = vmatpush3.bf16.msra.mxu1 %v10689_v52  ;;  %v10699_v52 = vmov 0.0  }
 0x8e5   : > { %6675 = vmatprep.subr.bf16.mxu1 %v10690_v28 }
 0x8e7   : > { %v7346_v9 = vpop.eup %7345 }
 0x8e8   : > { %6676 = vmatpush3.bf16.msra.mxu1 %v10690_v28  ;;  %v7348_v37 = vpop.eup %7347  ;;  %v3015_v43 = vmul.f32 %v7346_v9, %v8996_v32 }
 0x8e9   : > { %6677 = vmatprep.subr.bf16.mxu1 %v10692_v63  ;;  %v7350_v38 = vpop.eup %7349  ;;  %v3012_v8 = vmul.f32 %v7348_v37, %v10695_v22 }
 0x8ea   : > { %v3014_v39 = vmul.f32 %v7350_v38, %v8976_v33  ;;  %v7352_v50 = vpop.eup %7351  ;;  %v2649_v33 = vpop.xlane.xlu0 %2648 }
 0x8eb   : > { %6662 = vmatmul.mubr.bf16.gmra.mrb[52].mxu1 %v3021_v12  ;;  %v3023_v40 = vpack.c.bf16 %v3013_v25, %v3012_v8  ;;  %v7354_v2 = vpop.eup %7353  ;;  %v3017_v32 = vmul.f32 %v7352_v50, %v8983_v16  ;;  %v2670_v16 = vmax.f32 %v9079_v31, 1e-30  ;;  %v2675_v53 = vmax.f32 %v2649_v33, 1e-30 }
 0x8ec   : > { %6665 = vmatprep.mubr.bf16.mxu1 %v3022_v46  ;;  %6678 = vmatpush3.bf16.msra.mxu1 %v10692_v63  ;;  %v3024_v10 = vpack.c.bf16 %v3015_v43, %v3014_v39  ;;  %v3016_v13 = vmul.f32 %v7354_v2, %v8960_v4  ;;  %v2672_v4 = vmax.f32 %v2643_v15, 1e-30 }
 0x8ed   : > { %6679 = vmatprep.subr.bf16.mxu1 %v10693_v17  ;;  %7355 = vrcp.f32 %v2670_v16 }
 0x8ee   : > { %v3025_v18 = vpack.c.bf16 %v3017_v32, %v3016_v13  ;;  %v2651_v7 = vpop.xlane.xlu0 %2650  ;;  %7357 = vrcp.f32 %v2672_v4 }
 0x8ef   : > { %7359 = vrcp.f32 %v2673_v34  ;;  %v2676_v19 = vmax.f32 %v2651_v7, 1e-30 }
 0x8f0   : > { %6680 = vmatpush3.bf16.msra.mxu1 %v10693_v17  ;;  %7361 = vrcp.f32 %v2675_v53 }
 0x8f1   : > { %6681 = vmatprep.subr.bf16.mxu1 %v10696_v47  ;;  %7363 = vrcp.f32 %v2674_v36 }
 0x8f2   : > { %v2653_v29 = vpop.xlane.xlu0 %2652 }
 0x8f3   : > { %6666 = vmatmul.mubr.bf16.gmra.mrb[56].mxu1 %v3023_v40 }
 0x8f4   : > { %6669 = vmatprep.mubr.bf16.mxu1 %v3024_v10  ;;  %6682 = vmatpush3.bf16.msra.mxu1 %v10696_v47 }
 0x8f5   : > { %6683 = vmatprep.subr.bf16.mxu1 %v10697_v20 }
 0x8f6   : > { %v2655_v60 = vpop.xlane.xlu0 %2654 }
 0x8f7   : > { %v2678_v0 = vmax.f32 %v2655_v60, 1e-30  ;;  %v7356_v31 = vpop.eup %7355 }
 0x8f8   : > { %6684 = vmatpush3.bf16.msra.mxu1 %v10697_v20  ;;  %v7358_v59 = vpop.eup %7357  ;;  %v2702_v48 = vmul.f32 %v7356_v31, %v8981_v21 }
 0x8f9   : > { %6685 = vmatprep.subr.bf16.mxu1 %v10698_v42  ;;  %v7360_v54 = vpop.eup %7359  ;;  %v2704_v22 = vmul.f32 %v7358_v59, %v8989_v41 }
 0x8fa   : > { %v2657_v28 = vpop.xlane.xlu0 %2656  ;;  %v7362_v12 = vpop.eup %7361  ;;  %v2705_v38 = vmul.f32 %v7360_v54, %v8994_v30 }
 0x8fb   : > { %6670 = vmatmul.mubr.bf16.gmra.mrb[60].mxu1 %v3025_v18  ;;  %v2679_v35 = vmax.f32 %v2657_v28, 1e-30  ;;  %v7364_v24 = vpop.eup %7363  ;;  %v2707_v43 = vmul.f32 %v7362_v12, %v9007_v27 }
 0x8fc   : > { %6686 = vmatpush3.bf16.msra.mxu1 %v10698_v42  ;;  %v2706_v47 = vmul.f32 %v7364_v24, %v9002_v5  ;;  %v2719_v50 = vpack.c.bf16 %v2705_v38, %v2704_v22  ;;  %v9137_v38 = vld [vmem:[%s10473_s9] ss:$0 sm:$0xff] }
 0x8fd   : > { %6687 = vmatprep.subr.bf16.mxu1 %v8679_v44 }
 0x8fe   : > { %v2659_v15 = vpop.xlane.xlu0 %2658  ;;  %v2720_v30 = vpack.c.bf16 %v2707_v43, %v2706_v47 }
 0x8ff   : > { %v2680_v17 = vmax.f32 %v2659_v15, 1e-30 }
 0x900   : > { %6688 = vmatpush3.bf16.msra.mxu1 %v8679_v44  ;;  %v2677_v44 = vmax.f32 %v2653_v29, 1e-30 }
 0x901   : > { %6743 = vmatprep.subr.bf16.mxu1 %v10699_v52 }
 0x902   : > { %v2663_v46 = vpop.xlane.xlu0 %2662 }
 0x903   : > { %v2682_v8 = vmax.f32 %v2663_v46, 1e-30 }
 0x906   : > { %v2667_v21 = vpop.xlane.xlu0 %2666 }
 0x907   : > { %v2684_v20 = vmax.f32 %v2667_v21, 1e-30 }
 0x90f   : > { %v2641_v61 = vpop.xlane.xlu1 %2640 }
 0x910   : > { %v2671_v45 = vmax.f32 %v2641_v61, 1e-30 }
 0x912   : > { %7365 = vrcp.f32 %v2671_v45 }
 0x913   : > { %v2661_v55 = vpop.xlane.xlu1 %2660  ;;  %7367 = vrcp.f32 %v2677_v44  ;;  %v3285_v44 = vpop.permute.xlu0 %3284 }
 0x914   : > { %7369 = vrcp.f32 %v2679_v35  ;;  %v2681_v9 = vmax.f32 %v2661_v55, 1e-30 }
 0x915   : > { %7371 = vrcp.f32 %v2676_v19 }
 0x916   : > { %7373 = vrcp.f32 %v2678_v0 }
 0x917   : > { %v2665_v63 = vpop.xlane.xlu1 %2664  ;;  %7375 = vrcp.f32 %v2681_v9  ;;  %v3291_v35 = vpop.permute.xlu0 %3290 }
 0x918   : > { %v2683_v26 = vmax.f32 %v2665_v63, 1e-30 }
 0x91a   : > { %7377 = vrcp.f32 %v2683_v26 }
 0x91b   : > { %v2669_v40 = vpop.xlane.xlu1 %2668  ;;  %7379 = vrcp.f32 %v2680_v17  ;;  %v3295_v0 = vpop.permute.xlu0 %3294 }
 0x91c   : > { %v7366_v37 = vpop.eup %7365  ;;  %7381 = vrcp.f32 %v2682_v8  ;;  %v2685_v27 = vmax.f32 %v2669_v40, 1e-30 }
 0x91d   : > { %v2703_v25 = vmul.f32 %v7366_v37, %v9045_v57  ;;  %v7368_v10 = vpop.eup %7367 }
 0x91e   : > { %v7370_v11 = vpop.eup %7369  ;;  %v2709_v2 = vmul.f32 %v7368_v10, %v9015_v3  ;;  %7383 = vrcp.f32 %v2685_v27 }
 0x91f   : > { %v2718_v39 = vpack.c.bf16 %v2703_v25, %v2702_v48  ;;  %v7372_v57 = vpop.eup %7371  ;;  %v2711_v5 = vmul.f32 %v7370_v11, %v9023_v1  ;;  %7385 = vrcp.f32 %v2684_v20  ;;  %v3299_v37 = vpop.permute.xlu0 %3298 }
 0x920   : > { %v7374_v41 = vpop.eup %7373  ;;  %v2708_v32 = vmul.f32 %v7372_v57, %v9012_v49 }
 0x921   : > { %6689 = vmatprep.mubr.bf16.mxu1 %v2718_v39  ;;  %v2710_v13 = vmul.f32 %v7374_v41, %v9020_v14  ;;  %v7376_v42 = vpop.eup %7375 }
 0x922   : > { %6690 = vmatmul.mubr.bf16.vlgmr.msra.gmra.mrb[48].mxu1 %v2719_v50  ;;  %v2721_v33 = vpack.c.bf16 %v2709_v2, %v2708_v32  ;;  %v2713_v4 = vmul.f32 %v7376_v42, %v9048_v6  ;;  %v10700_v6 = vmov 65535  }
 0x923   : > { %6693 = vmatprep.mubr.bf16.mxu1 %v2720_v30  ;;  %v2722_v18 = vpack.c.bf16 %v2711_v5, %v2710_v13  ;;  %v3303_v11 = vpop.permute.xlu0 %3302  ;;  %v7096_v5 = vld [vmem:[%s10476_s12 + $0x8] sm:$0xff]  }
 0x924   : > { %v7378_v7 = vpop.eup %7377 }
 0x925   : > { %v7380_v29 = vpop.eup %7379  ;;  %v2715_v3 = vmul.f32 %v7378_v7, %v9051_v56 }
 0x926   : > { %v7382_v16 = vpop.eup %7381  ;;  %v2712_v1 = vmul.f32 %v7380_v29, %v9029_v23  ;;  %v3413_v23 = vsel %vm3411_vm8, 4294967295, %v10700_v6 }
 0x927   : > { %v2714_v49 = vmul.f32 %v7382_v16, %v9036_v62  ;;  %v7094_v62 = vld [vmem:[%s10474_s10] sm:$0x1f]   ;;  %v3414_v56 = vsel %vm3412_vm9, %v3413_v23, 0  ;;  %v3307_v16 = vpop.permute.xlu0 %3306 }
 0x928   : > { %v2723_v34 = vpack.c.bf16 %v2713_v4, %v2712_v1  ;;  %v7384_v60 = vpop.eup %7383  ;;  %v3416_v28 = vand.u32 %v7094_v62, %v3414_v56 }
 0x929   : > { %v2724_v14 = vpack.c.bf16 %v2715_v3, %v2714_v49  ;;  %v7386_v53 = vpop.eup %7385  ;;  %v2717_v36 = vmul.f32 %v7384_v60, %v9054_v51  ;;  %v3287_v51 = vpop.permute.xlu1 %3286 }
 0x92a   : > { %6694 = vmatmul.mubr.bf16.gmra.mrb[52].mxu1 %v2721_v33  ;;  %v2716_v61 = vmul.f32 %v7386_v53, %v9040_v58  ;;  %6705 = vmatprep.subr.bf16.mxu0 %v3416_v28  ;;  %v7095_v58 = vld [vmem:[%s10476_s12] sm:$0xff]  }
 0x92b   : > { %6697 = vmatprep.mubr.bf16.mxu1 %v2722_v18  ;;  %6706 = vmatpush3.bf16.msra.mxu0 %v3416_v28 }
 0x92c   : > { %v2725_v45 = vpack.c.bf16 %v2717_v36, %v2716_v61  ;;  %6723 = vmatprep.subr.bf16.mxu0 %v7095_v58 }
 0x92d   : > { %v3289_v55 = vpop.permute.xlu1 %3288 }
 0x931   : > { %v3293_v19 = vpop.permute.xlu1 %3292 }
 0x932   : > { %6698 = vmatmul.mubr.bf16.gmra.mrb[56].mxu1 %v2723_v34 }
 0x933   : > { %6701 = vmatprep.mubr.bf16.mxu1 %v2724_v14 }
 0x935   : > { %v3297_v54 = vpop.permute.xlu1 %3296 }
 0x939   : > { %v3301_v8 = vpop.permute.xlu1 %3300 }
 0x93a   : > { %6702 = vmatmul.mubr.bf16.gmra.mrb[60].mxu1 %v2725_v45 }
 0x93b   : > { %6759 = vmatprep.mubr.msk.bf16.mxu1 %vm7686_vm3, %v10699_v52 }
 0x93d   : > { %v3305_v42 = vpop.permute.xlu1 %3304 }
 0x941   : > { %v3309_v23 = vpop.permute.xlu1 %3308 }
 0x9f5   : > { %v6691_v31 = vpop.f32.mrb[48].mxu1 }
 0x9f6   : > { %v3254_v15 = vmul.f32 0.5, %v6691_v31  ;;  %v3189_v59 = vpop.f32.mrb[49].mxu1 }
 0x9f7   : > { %v3252_v63 = vmul.f32 0.5, %v3189_v59  ;;  %v6692_v12 = vpop.f32.mrb[50].mxu1 }
 0x9f8   : > { %v3334_v24 = vadd.f32 %v3289_v55, %v3254_v15  ;;  %v3255_v46 = vmul.f32 0.5, %v6692_v12  ;;  %v3192_v9 = vpop.f32.mrb[51].mxu1 }
 0x9f9   : > { %v3332_v26 = vadd.f32 %v3285_v44, %v3252_v63  ;;  %v3253_v17 = vmul.f32 0.5, %v3192_v9 }
 0x9fa   : > { %v3335_v48 = vadd.f32 %v3291_v35, %v3255_v46  ;;  %v3357_v43 = vadd.f32 %v9137_v38, %v3334_v24 }
 0x9fb   : > { %v3333_v25 = vadd.f32 %v3287_v51, %v3253_v17  ;;  %v3355_v39 = vadd.f32 %v9137_v38, %v3332_v26 }
 0x9fc   : > { %v3358_v22 = vadd.f32 %v9137_v38, %v3335_v48 }
 0x9fd   : > { %v3356_v47 = vadd.f32 %v9137_v38, %v3333_v25  ;;  %v6695_v40 = vpop.f32.mrb[52].mxu1 }
 0x9fe   : > { %v3372_v50 = vpack.c.bf16 %v3358_v22, %v3357_v43  ;;  %v3258_v10 = vmul.f32 0.5, %v6695_v40  ;;  %v3205_v30 = vpop.f32.mrb[53].mxu1 }
 0x9ff   : > { %v3371_v21 = vpack.c.bf16 %v3356_v47, %v3355_v39  ;;  %v3256_v57 = vmul.f32 0.5, %v3205_v30  ;;  %v6696_v27 = vpop.f32.mrb[54].mxu1 }
 0xa00   : > { %v3338_v41 = vadd.f32 %v3297_v54, %v3258_v10  ;;  %v3259_v2 = vmul.f32 0.5, %v6696_v27  ;;  %v3208_v20 = vpop.f32.mrb[55].mxu1  ;;  %v3313_v54 = vpop.permute.xlu1 %3312 }
 0xa01   : > { %v3336_v32 = vadd.f32 %v3293_v19, %v3256_v57  ;;  %v3257_v13 = vmul.f32 0.5, %v3208_v20  ;;  %6707 = vmatprep.mubr.msk.bf16.mxu0 %vm3386_vm10, %v3371_v21 }
 0xa02   : > { %v3339_v33 = vadd.f32 %v3299_v37, %v3259_v2  ;;  %6708 = vmatmul.mubr.msk.bf16.vlgmr.msra.gmra.mrb[72].mxu0 %vm3386_vm10, %v3372_v50  ;;  %v3361_v7 = vadd.f32 %v9137_v38, %v3338_v41 }
 0xa03   : > { %v3337_v18 = vadd.f32 %v3295_v0, %v3257_v13  ;;  %6724 = vmatpush3.bf16.msra.mxu0 %v7095_v58  ;;  %v3359_v4 = vadd.f32 %v9137_v38, %v3336_v32  ;;  %v3311_v58 = vpop.permute.xlu0 %3310 }
 0xa04   : > { %v3362_v29 = vadd.f32 %v9137_v38, %v3339_v33  ;;  %6725 = vmatprep.subr.bf16.mxu0 %v7096_v5 }
 0xa05   : > { %v3360_v3 = vadd.f32 %v9137_v38, %v3337_v18  ;;  %v6699_v1 = vpop.f32.mrb[56].mxu1 }
 0xa06   : > { %v3374_v49 = vpack.c.bf16 %v3362_v29, %v3361_v7  ;;  %v3262_v34 = vmul.f32 0.5, %v6699_v1  ;;  %v3221_v60 = vpop.f32.mrb[57].mxu1 }
 0xa07   : > { %v3373_v14 = vpack.c.bf16 %v3360_v3, %v3359_v4  ;;  %v3260_v53 = vmul.f32 0.5, %v3221_v60  ;;  %v6700_v36 = vpop.f32.mrb[58].mxu1  ;;  %6726 = vmatpush3.bf16.msra.mxu0 %v7096_v5  ;;  %v3315_v26 = vpop.permute.xlu0 %3314 }
 0xa08   : > { %v3342_v61 = vadd.f32 %v3305_v42, %v3262_v34  ;;  %v3263_v45 = vmul.f32 0.5, %v6700_v36  ;;  %v3224_v6 = vpop.f32.mrb[59].mxu1 }
 0xa09   : > { %v3340_v62 = vadd.f32 %v3301_v8, %v3260_v53  ;;  %v3261_v56 = vmul.f32 0.5, %v3224_v6  ;;  %6711 = vmatprep.mubr.msk.bf16.mxu0 %vm3386_vm10, %v3373_v14 }
 0xa0a   : > { %v3343_v28 = vadd.f32 %v3307_v16, %v3263_v45  ;;  %6712 = vmatmul.mubr.msk.bf16.gmra.mrb[76].mxu0 %vm3386_vm10, %v3374_v49  ;;  %v3365_v44 = vadd.f32 %v9137_v38, %v3342_v61 }
 0xa0b   : > { %v3341_v51 = vadd.f32 %v3303_v11, %v3261_v56  ;;  %v3363_v35 = vadd.f32 %v9137_v38, %v3340_v62  ;;  %v3661_v62 = vld [vmem:[%s10475_s11] sm:$0x1] }
 0xa0c   : > { %v3366_v55 = vadd.f32 %v9137_v38, %v3343_v28 }
 0xa0d   : > { %v3364_v19 = vadd.f32 %v9137_v38, %v3341_v51  ;;  %v6703_v0 = vpop.f32.mrb[60].mxu1 }
 0xa0e   : > { %v3376_v31 = vpack.c.bf16 %v3366_v55, %v3365_v44  ;;  %v3266_v15 = vmul.f32 0.5, %v6703_v0  ;;  %v3237_v59 = vpop.f32.mrb[61].mxu1  ;;  %v10707_v55 = vmov 1   ;;  %v10708_v0 = vmov 0  }
 0xa0f   : > { %v3375_v63 = vpack.c.bf16 %v3364_v19, %v3363_v35  ;;  %v3264_v12 = vmul.f32 0.5, %v3237_v59  ;;  %v6704_v24 = vpop.f32.mrb[62].mxu1 }
 0xa10   : > { %v3346_v46 = vadd.f32 %v3313_v54, %v3266_v15  ;;  %v3267_v9 = vmul.f32 0.5, %v6704_v24  ;;  %v3240_v37 = vpop.f32.mrb[63].mxu1 }
 0xa11   : > { %v3344_v17 = vadd.f32 %v3309_v23, %v3264_v12  ;;  %v3265_v48 = vmul.f32 0.5, %v3240_v37  ;;  %6715 = vmatprep.mubr.msk.bf16.mxu0 %vm3386_vm10, %v3375_v63 }
 0xa12   : > { %v3347_v25 = vadd.f32 %v3315_v26, %v3267_v9  ;;  %6716 = vmatmul.mubr.msk.bf16.gmra.mrb[80].mxu0 %vm3386_vm10, %v3376_v31  ;;  %v3369_v22 = vadd.f32 %v9137_v38, %v3346_v46 }
 0xa13   : > { %v3345_v43 = vadd.f32 %v3311_v58, %v3265_v48  ;;  %v3367_v39 = vadd.f32 %v9137_v38, %v3344_v17 }
 0xa14   : > { %v3370_v8 = vadd.f32 %v9137_v38, %v3347_v25 }
 0xa15   : > { %v3368_v47 = vadd.f32 %v9137_v38, %v3345_v43 }
 0xa16   : > { %v3378_v40 = vpack.c.bf16 %v3370_v8, %v3369_v22 }
 0xa17   : > { %v3377_v50 = vpack.c.bf16 %v3368_v47, %v3367_v39  ;;  %v10709_v39 = vld [vmem:[#allocation13_spill] sm:$0xff] }
 0xa19   : > { %6719 = vmatprep.mubr.msk.bf16.mxu0 %vm3386_vm10, %v3377_v50 }
 0xa1a   : > { %6720 = vmatmul.mubr.msk.bf16.gmra.mrb[84].mxu0 %vm3386_vm10, %v3378_v40 }
 0xad5   : > { %v9166_v10 = vpop.f32.mrb[72].mxu0 }
 0xad6   : > { %v9168_v30 = vpop.f32.mrb[73].mxu0 }
 0xad7   : > { %v9170_v11 = vpop.f32.mrb[74].mxu0 }
 0xad8   : > { %v3516_v21 = vpack.c.bf16 %v9170_v11, %v9166_v10  ;;  %v9174_v57 = vpop.f32.mrb[75].mxu0 }
 0xad9   : > { %v3515_v38 = vpack.c.bf16 %v9174_v57, %v9168_v30 }
 0xada   : > { %4428 = vrot.lane.b32.xlu0 %v3516_v21, %s7691_s20  ;;  %v3544_v33 = vsel %vm3539_vm11, %v3516_v21, 0 }
 0xadb   : > { %4426 = vrot.lane.b32.xlu1 %v3515_v38, %s7691_s20  ;;  %6727 = vmatprep.mubr.msk.bf16.mxu0 %vm3539_vm11, %v3515_v38  ;;  %v3541_v27 = vsel %vm3539_vm11, %v3515_v38, 0 }
 0xadc   : > { %6763 = vmatprep.subr.bf16.mxu0 %v3515_v38  ;;  %6728 = vmatmul.mubr.msk.bf16.vlgmr.msra.gmra.mrb[88].mxu0 %vm3539_vm11, %v3516_v21 }
 0xadd   : > { %6744 = vmatpush3.bf16.xpose.msra.mxu1 %v3541_v27  ;;  %6764 = vmatpush3.bf16.msra.mxu0 %v3515_v38  ;;  %v9183_v41 = vpop.f32.mrb[76].mxu0  ;;  %v10710_v38 = vld [vmem:[#allocation12_spill] sm:$0xff] }
 0xade   : > { %10701 = vst [vmem:[#allocation9_spill] sm:$0xff] %v9183_v41  ;;  %6765 = vmatprep.subr.bf16.mxu0 %v3516_v21  ;;  %v9185_v2 = vpop.f32.mrb[77].mxu0  ;;  %6745 = vmatprep.subr.bf16.mxu1 %v10699_v52 }
 0xadf   : > { %v9188_v20 = vpop.f32.mrb[78].mxu0 }
 0xae0   : > { %v3518_v5 = vpack.c.bf16 %v9188_v20, %v9183_v41  ;;  %v9192_v32 = vpop.f32.mrb[79].mxu0 }
 0xae1   : > { %v3517_v13 = vpack.c.bf16 %v9192_v32, %v9185_v2  ;;  %6766 = vmatpush3.bf16.msra.mxu0 %v3516_v21 }
 0xae2   : > { %4432 = vrot.lane.b32.xlu1 %v3518_v5, %s7691_s20  ;;  %v3550_v36 = vsel %vm3539_vm11, %v3518_v5, 0 }
 0xae3   : > { %6731 = vmatprep.mubr.msk.bf16.mxu0 %vm3539_vm11, %v3517_v13  ;;  %6767 = vmatprep.subr.bf16.mxu0 %v3517_v13  ;;  %v3547_v3 = vsel %vm3539_vm11, %v3517_v13, 0 }
 0xae4   : > { %6732 = vmatmul.mubr.msk.bf16.gmra.mrb[92].mxu0 %vm3539_vm11, %v3518_v5 }
 0xae5   : > { %6746 = vmatpush3.bf16.xpose.msra.mxu1 %v3544_v33  ;;  %6768 = vmatpush3.bf16.msra.mxu0 %v3517_v13  ;;  %v9200_v42 = vpop.f32.mrb[80].mxu0 }
 0xae6   : > { %10702 = vst [vmem:[#allocation11_spill] sm:$0xff] %v9200_v42  ;;  %6769 = vmatprep.subr.bf16.mxu0 %v3518_v5  ;;  %4430 = vrot.lane.b32.xlu1 %v3517_v13, %s7691_s20  ;;  %v9203_v18 = vpop.f32.mrb[81].mxu0 }
 0xae7   : > { %10703 = vst [vmem:[#allocation31_spill] sm:$0xff] %v9203_v18  ;;  %v9205_v7 = vpop.f32.mrb[82].mxu0  ;;  %6747 = vmatprep.subr.bf16.mxu1 %v10699_v52 }
 0xae8   : > { %v9210_v29 = vpack.c.bf16 %v9205_v7, %v9200_v42  ;;  %v9212_v16 = vpop.f32.mrb[83].mxu0 }
 0xae9   : > { %v3519_v4 = vpack.c.bf16 %v9212_v16, %v9203_v18  ;;  %6770 = vmatpush3.bf16.msra.mxu0 %v3518_v5 }
 0xaea   : > { %v3556_v45 = vsel %vm3539_vm11, %v9210_v29, 0 }
 0xaeb   : > { %4434 = vrot.lane.b32.xlu0 %v3519_v4, %s7691_s20  ;;  %6735 = vmatprep.mubr.msk.bf16.mxu0 %vm3539_vm11, %v3519_v4  ;;  %v3553_v61 = vsel %vm3539_vm11, %v3519_v4, 0 }
 0xaec   : > { %6771 = vmatprep.subr.bf16.mxu0 %v3519_v4  ;;  %6736 = vmatmul.mubr.msk.bf16.gmra.mrb[96].mxu0 %vm3539_vm11, %v9210_v29 }
 0xaed   : > { %6748 = vmatpush3.bf16.xpose.msra.mxu1 %v3547_v3  ;;  %6772 = vmatpush3.bf16.msra.mxu0 %v3519_v4  ;;  %v9221_v1 = vpop.f32.mrb[84].mxu0 }
 0xaee   : > { %10704 = vst [vmem:[#allocation5_spill] sm:$0xff] %v9221_v1  ;;  %6773 = vmatprep.subr.bf16.mxu0 %v9210_v29  ;;  %v9224_v49 = vpop.f32.mrb[85].mxu0  ;;  %6749 = vmatprep.subr.bf16.mxu1 %v10699_v52 }
 0xaef   : > { %10705 = vst [vmem:[#allocation3_spill] sm:$0xff] %v9224_v49  ;;  %v9227_v34 = vpop.f32.mrb[86].mxu0 }
 0xaf0   : > { %10706 = vst [vmem:[#allocation30_spill] sm:$0xff] %v9227_v34  ;;  %v9231_v60 = vpack.c.bf16 %v9227_v34, %v9221_v1  ;;  %v9233_v14 = vpop.f32.mrb[87].mxu0  ;;  %v10721_v1 = vld [vmem:[#allocation23_spill] sm:$0xff] }
 0xaf1   : > { %v9237_v53 = vpack.c.bf16 %v9233_v14, %v9224_v49  ;;  %6774 = vmatpush3.bf16.msra.mxu0 %v9210_v29 }
 0xaf2   : > { %v3562_v23 = vsel %vm3539_vm11, %v9231_v60, 0 }
 0xaf3   : > { %6739 = vmatprep.mubr.msk.bf16.mxu0 %vm3539_vm11, %v9237_v53  ;;  %6775 = vmatprep.subr.bf16.mxu0 %v9237_v53  ;;  %v3559_v6 = vsel %vm3539_vm11, %v9237_v53, 0 }
 0xaf4   : > { %6740 = vmatmul.mubr.msk.bf16.gmra.mrb[100].mxu0 %vm3539_vm11, %v9231_v60 }
 0xaf5   : > { %6750 = vmatpush3.bf16.xpose.msra.mxu1 %v3550_v36  ;;  %6776 = vmatpush3.bf16.msra.mxu0 %v9237_v53 }
 0xaf6   : > { %6777 = vmatprep.subr.bf16.mxu0 %v9231_v60  ;;  %6751 = vmatprep.subr.bf16.mxu1 %v10699_v52 }
 0xaf9   : > { %6778 = vmatpush3.bf16.msra.mxu0 %v9231_v60 }
 0xafd   : > { %6752 = vmatpush3.bf16.xpose.msra.mxu1 %v3553_v61  ;;  %v10711_v61 = vld [vmem:[#allocation14_spill] sm:$0xff] }
 0xafe   : > { %6753 = vmatprep.subr.bf16.mxu1 %v10699_v52 }
 0xb05   : > { %6754 = vmatpush3.bf16.xpose.msra.mxu1 %v3556_v45 }
 0xb06   : > { %6755 = vmatprep.subr.bf16.mxu1 %v10699_v52 }
 0xb0d   : > { %6756 = vmatpush3.bf16.xpose.msra.mxu1 %v3559_v6 }
 0xb0e   : > { %6757 = vmatprep.subr.bf16.mxu1 %v10699_v52 }
 0xb15   : > { %6758 = vmatpush3.bf16.xpose.msra.mxu1 %v3562_v23 }
 0xb1c   : > { %6760 = vmatmul.mubr.msk.bf16.vlgmr.msra.gmra.mrb[64].mxu1 %vm3539_vm11, %v3661_v62 }
 0xb4c   : > { %v9286_v22 = vpop.permute.xlu0 %4428 }
 0xb4d   : > { %v9264_v56 = vpop.permute.xlu1 %4426 }
 0xb4e   : > { %6795 = vmatprep.subr.bf16.mxu0 %v9264_v56 }
 0xb54   : > { %v9284_v43 = vpop.permute.xlu1 %4432 }
 0xb58   : > { %v9288_v8 = vpop.permute.xlu1 %4430 }
 0xb5d   : > { %v9293_v40 = vpop.permute.xlu0 %4434 }
 0xbaf   : > { %v6729_v28 = vpop.f32.mrb[88].mxu0 }
 0xbb0   : > { %3717 = vperm.xlu1 %7043, %v6729_v28   ;;  %v3598_v58 = vpop.f32.mrb[89].mxu0 }
 0xbb1   : > { %v6730_v51 = vpop.f32.mrb[90].mxu0 }
 0xbb2   : > { %3722 = vperm.xlu0 %7042, %v6730_v51   ;;  %v3601_v44 = vpop.f32.mrb[91].mxu0 }
 0xbb4   : > { %7044 = vset.pattern.permute.xlu1 %v10707_v55 }
 0xbb5   : > { %4127 = vperm.xlu1 %7044, %v6729_v28  }
 0xbb6   : > { %3712 = vperm.xlu0 %7042, %v3601_v44  }
 0xbb7   : > { %v6733_v35 = vpop.f32.mrb[92].mxu0 }
 0xbb8   : > { %v3614_v19 = vpop.f32.mrb[93].mxu0 }
 0xbb9   : > { %7045 = vset.pattern.permute.xlu1 %v10708_v0  ;;  %v6734_v31 = vpop.f32.mrb[94].mxu0 }
 0xbba   : > { %3707 = vperm.xlu1 %7045, %v3598_v58   ;;  %7047 = vset.pattern.permute.xlu0 %v10707_v55  ;;  %v3617_v15 = vpop.f32.mrb[95].mxu0 }
 0xbbb   : > { %4123 = vperm.xlu0 %7047, %v3601_v44  }
 0xbbe   : > { %7046 = vset.pattern.permute.xlu1 %v10707_v55 }
 0xbbf   : > { %4119 = vperm.xlu1 %7046, %v3598_v58   ;;  %4143 = vperm.xlu0 %7047, %v6733_v35   ;;  %v6737_v59 = vpop.f32.mrb[96].mxu0 }
 0xbc0   : > { %v3630_v54 = vpop.f32.mrb[97].mxu0 }
 0xbc1   : > { %v6738_v63 = vpop.f32.mrb[98].mxu0 }
 0xbc2   : > { %v3633_v12 = vpop.f32.mrb[99].mxu0 }
 0xbc3   : > { %4131 = vperm.xlu1 %7046, %v6730_v51   ;;  %4135 = vperm.xlu0 %7047, %v3614_v19  }
 0xbc7   : > { %7048 = vset.pattern.permute.xlu1 %v10708_v0  ;;  %7049 = vset.pattern.permute.xlu0 %v10708_v0  ;;  %v6741_v24 = vpop.f32.mrb[100].mxu0 }
 0xbc8   : > { %3737 = vperm.xlu1 %7048, %v6733_v35   ;;  %3742 = vperm.xlu0 %7049, %v6734_v31   ;;  %v3646_v46 = vpop.f32.mrb[101].mxu0 }
 0xbc9   : > { %v6742_v9 = vpop.f32.mrb[102].mxu0 }
 0xbca   : > { %v3649_v37 = vpop.f32.mrb[103].mxu0 }
 0xbcc   : > { %3727 = vperm.xlu1 %7048, %v3614_v19   ;;  %3732 = vperm.xlu0 %7049, %v3617_v15  }
 0xbd0   : > { %7050 = vset.pattern.permute.xlu1 %v10707_v55  ;;  %7052 = vset.pattern.permute.xlu0 %v10707_v55 }
 0xbd1   : > { %4147 = vperm.xlu1 %7050, %v6734_v31   ;;  %4159 = vperm.xlu0 %7052, %v6737_v59  }
 0xbd5   : > { %4139 = vperm.xlu1 %7050, %v3617_v15   ;;  %4151 = vperm.xlu0 %7052, %v3630_v54  }
 0xbd9   : > { %7051 = vset.pattern.permute.xlu1 %v10708_v0  ;;  %7053 = vset.pattern.permute.xlu0 %v10708_v0 }
 0xbda   : > { %3757 = vperm.xlu1 %7051, %v6737_v59   ;;  %3762 = vperm.xlu0 %7053, %v6738_v63  }
 0xbde   : > { %3747 = vperm.xlu1 %7051, %v3630_v54   ;;  %3752 = vperm.xlu0 %7053, %v3633_v12  }
 0xbe2   : > { %7054 = vset.pattern.permute.xlu1 %v10707_v55  ;;  %7056 = vset.pattern.permute.xlu0 %v10707_v55 }
 0xbe3   : > { %4163 = vperm.xlu1 %7054, %v6738_v63   ;;  %4175 = vperm.xlu0 %7056, %v6741_v24  }
 0xbe7   : > { %4155 = vperm.xlu1 %7054, %v3633_v12   ;;  %4167 = vperm.xlu0 %7056, %v3646_v46  }
 0xbeb   : > { %7055 = vset.pattern.permute.xlu1 %v10708_v0  ;;  %7057 = vset.pattern.permute.xlu0 %v10708_v0 }
 0xbec   : > { %3777 = vperm.xlu1 %7055, %v6741_v24   ;;  %3782 = vperm.xlu0 %7057, %v6742_v9   ;;  %v10712_v24 = vld [vmem:[#allocation15_spill] sm:$0xff] }
 0xbef   : > { %v3699_v26 = vpop.f32.mrb[64].mxu1 }
 0xbf0   : > { %3767 = vperm.xlu1 %7055, %v3646_v46   ;;  %3772 = vperm.xlu0 %7057, %v3649_v37   ;;  %v6761_v17 = vpop.f32.mrb[65].mxu1  ;;  %v9291_v47 = vrot.slane %v3699_v26, %v10709_v39  ;;  %v9297_v27 = vrot.slane %v3699_v26, %v10710_v38 }
 0xbf1   : > { %v3702_v48 = vpop.f32.mrb[66].mxu1 }
 0xbf2   : > { %v6762_v25 = vpop.f32.mrb[67].mxu1 }
 0xbf4   : > { %7058 = vset.pattern.permute.xlu1 %v10707_v55  ;;  %7059 = vset.pattern.permute.xlu0 %v10707_v55 }
 0xbf5   : > { %4179 = vperm.xlu1 %7058, %v6742_v9  }
 0xbf9   : > { %4171 = vperm.xlu1 %7058, %v3649_v37  }
 0xbfd   : > { %7060 = vset.pattern.permute.xlu1 %v10708_v0 }
 0xc2f   : > { %v3718_v50 = vpop.permute.xlu1 %3717 }
 0xc30   : > { %v3791_v21 = vadd.f32 %v9291_v47, %v3718_v50 }
 0xc31   : > { %v3723_v5 = vpop.permute.xlu0 %3722 }
 0xc32   : > { %v3807_v13 = vmul.f32 0.2, %v3791_v21  ;;  %v3792_v23 = vadd.f32 %v9291_v47, %v3723_v5 }
 0xc34   : > { %v3823_v33 = vmax.f32 %v3791_v21, %v3807_v13  ;;  %v4128_v4 = vpop.permute.xlu1 %4127  ;;  %v3808_v35 = vmul.f32 0.2, %v3792_v23  ;;  %v10713_v21 = vld [vmem:[#allocation16_spill] sm:$0xff] }
 0xc35   : > { %v4188_v3 = vadd.f32 %v9297_v27, %v4128_v4  ;;  %v3713_v36 = vpop.permute.xlu0 %3712 }
 0xc36   : > { %v9301_v45 = vadd.f32 %v3823_v33, %v10711_v61  ;;  %v3790_v31 = vadd.f32 %v9291_v47, %v3713_v36  ;;  %v3824_v12 = vmax.f32 %v3792_v23, %v3808_v35  ;;  %v10714_v35 = vld [vmem:[#allocation17_spill] sm:$0xff] }
 0xc37   : > { %v4204_v6 = vmul.f32 0.2, %v4188_v3 }
 0xc38   : > { %3857 = vmax.xlane.f32.xlu0 %v9301_v45  ;;  %v3806_v9 = vmul.f32 0.2, %v3790_v31  ;;  %v9319_v5 = vadd.f32 %v3824_v12, %v10713_v21 }
 0xc39   : > { %v4220_v62 = vmax.f32 %v4188_v3, %v4204_v6  ;;  %v3708_v28 = vpop.permute.xlu1 %3707 }
 0xc3a   : > { %v3789_v58 = vadd.f32 %v9291_v47, %v3708_v28  ;;  %v4124_v51 = vpop.permute.xlu0 %4123  ;;  %v3822_v13 = vmax.f32 %v3790_v31, %v3806_v9 }
 0xc3b   : > { %v9307_v44 = vadd.f32 %v4220_v62, %v10711_v61  ;;  %v4187_v37 = vadd.f32 %v9297_v27, %v4124_v51 }
 0xc3c   : > { %v3805_v19 = vmul.f32 0.2, %v3789_v58 }
 0xc3d   : > { %4254 = vmax.xlane.f32.xlu1 %v9307_v44  ;;  %v4203_v33 = vmul.f32 0.2, %v4187_v37 }
 0xc3e   : > { %v3821_v15 = vmax.f32 %v3789_v58, %v3805_v19  ;;  %v4120_v59 = vpop.permute.xlu1 %4119  ;;  %v4144_v54 = vpop.permute.xlu0 %4143  ;;  %v9330_v19 = vadd.f32 %v3822_v13, %v10714_v35 }
 0xc3f   : > { %v4186_v63 = vadd.f32 %v9297_v27, %v4120_v59  ;;  %v4192_v36 = vadd.f32 %v9297_v27, %v4144_v54  ;;  %v4219_v51 = vmax.f32 %v4187_v37, %v4203_v33  ;;  %v10715_v33 = vld [vmem:[#allocation18_spill] sm:$0xff] }
 0xc40   : > { %v9313_v46 = vadd.f32 %v3821_v15, %v10712_v24 }
 0xc41   : > { %v4202_v26 = vmul.f32 0.2, %v4186_v63  ;;  %v4208_v15 = vmul.f32 0.2, %v4192_v36  ;;  %v9339_v37 = vadd.f32 %v4219_v51, %v10714_v35 }
 0xc42   : > { %v4132_v17 = vpop.permute.xlu1 %4131  ;;  %v4136_v48 = vpop.permute.xlu0 %4135  ;;  %3853 = vmax.xlane.f32.xlu0 %v9313_v46 }
 0xc43   : > { %v4218_v25 = vmax.f32 %v4186_v63, %v4202_v26  ;;  %v4189_v50 = vadd.f32 %v9297_v27, %v4132_v17 }
 0xc45   : > { %v4205_v4 = vmul.f32 0.2, %v4189_v50  ;;  %v9322_v3 = vadd.f32 %v4218_v25, %v10712_v24  ;;  %v4224_v25 = vmax.f32 %v4192_v36, %v4208_v15 }
 0xc46   : > { %3859 = vmax.xlane.f32.xlu0 %v9319_v5 }
 0xc47   : > { %v4221_v6 = vmax.f32 %v4189_v50, %v4205_v4  ;;  %v3738_v23 = vpop.permute.xlu1 %3737  ;;  %v3743_v62 = vpop.permute.xlu0 %3742  ;;  %4250 = vmax.xlane.f32.xlu1 %v9322_v3  ;;  %v4190_v50 = vadd.f32 %v9297_v27, %v4136_v48  ;;  %v9353_v48 = vadd.f32 %v4224_v25, %v10715_v33 }
 0xc48   : > { %v3795_v28 = vadd.f32 %v9291_v47, %v3738_v23  ;;  %v3796_v58 = vadd.f32 %v9291_v47, %v3743_v62 }
 0xc49   : > { %v9333_v31 = vadd.f32 %v4221_v6, %v10713_v21  ;;  %v4206_v36 = vmul.f32 0.2, %v4190_v50  ;;  %v10717_v21 = vld [vmem:[#allocation19_spill] sm:$0xff] }
 0xc4a   : > { %v3811_v59 = vmul.f32 0.2, %v3795_v28  ;;  %v3812_v54 = vmul.f32 0.2, %v3796_v58 }
 0xc4b   : > { %v3728_v63 = vpop.permute.xlu1 %3727  ;;  %v3733_v12 = vpop.permute.xlu0 %3732  ;;  %3855 = vmax.xlane.f32.xlu1 %v9330_v19  ;;  %4256 = vmax.xlane.f32.xlu0 %v9333_v31 }
 0xc4c   : > { %v3827_v9 = vmax.f32 %v3795_v28, %v3811_v59  ;;  %v3793_v26 = vadd.f32 %v9291_v47, %v3728_v63  ;;  %v3828_v17 = vmax.f32 %v3796_v58, %v3812_v54  ;;  %v3794_v6 = vadd.f32 %v9291_v47, %v3733_v12  ;;  %v10716_v58 = vld [vmem:[#allocation20_spill] sm:$0xff] }
 0xc4e   : > { %v3809_v13 = vmul.f32 0.2, %v3793_v26  ;;  %v9343_v4 = vadd.f32 %v3827_v9, %v10715_v33  ;;  %v9350_v51 = vadd.f32 %v3828_v17, %v10716_v58  ;;  %v3810_v59 = vmul.f32 0.2, %v3794_v6 }
 0xc4f   : > { %4252 = vmax.xlane.f32.xlu0 %v9339_v37 }
 0xc50   : > { %v4148_v23 = vpop.permute.xlu1 %4147  ;;  %v4160_v62 = vpop.permute.xlu0 %4159  ;;  %3865 = vmax.xlane.f32.xlu1 %v9343_v4  ;;  %v3825_v15 = vmax.f32 %v3793_v26, %v3809_v13  ;;  %v3826_v24 = vmax.f32 %v3794_v6, %v3810_v59 }
 0xc51   : > { %v4193_v28 = vadd.f32 %v9297_v27, %v4148_v23  ;;  %v4222_v23 = vmax.f32 %v4190_v50, %v4206_v36  ;;  %v4196_v13 = vadd.f32 %v9297_v27, %v4160_v62 }
 0xc52   : > { %v9359_v17 = vadd.f32 %v3825_v15, %v10717_v21  ;;  %v10718_v15 = vld [vmem:[#allocation21_spill] sm:$0xff] }
 0xc53   : > { %v4209_v54 = vmul.f32 0.2, %v4193_v28  ;;  %3867 = vmax.xlane.f32.xlu0 %v9350_v51  ;;  %v9370_v36 = vadd.f32 %v4222_v23, %v10717_v21  ;;  %v9373_v59 = vadd.f32 %v3826_v24, %v10718_v15  ;;  %v10719_v21 = vld [vmem:[#allocation22_spill] sm:$0xff] }
 0xc54   : > { %v4140_v63 = vpop.permute.xlu1 %4139  ;;  %v4152_v12 = vpop.permute.xlu0 %4151  ;;  %4262 = vmax.xlane.f32.xlu1 %v9353_v48 }
 0xc55   : > { %v4225_v9 = vmax.f32 %v4193_v28, %v4209_v54  ;;  %v4191_v35 = vadd.f32 %v9297_v27, %v4140_v63  ;;  %v4212_v54 = vmul.f32 0.2, %v4196_v13  ;;  %v4194_v24 = vadd.f32 %v9297_v27, %v4152_v12 }
 0xc57   : > { %v4207_v26 = vmul.f32 0.2, %v4191_v35  ;;  %v9362_v25 = vadd.f32 %v4225_v9, %v10716_v58 }
 0xc58   : > { %3861 = vmax.xlane.f32.xlu1 %v9359_v17 }
 0xc59   : > { %v3758_v33 = vpop.permute.xlu1 %3757  ;;  %v3763_v61 = vpop.permute.xlu0 %3762  ;;  %4264 = vmax.xlane.f32.xlu0 %v9362_v25  ;;  %v4223_v6 = vmax.f32 %v4191_v35, %v4207_v26  ;;  %v4228_v35 = vmax.f32 %v4196_v13, %v4212_v54  ;;  %v4210_v13 = vmul.f32 0.2, %v4194_v24 }
 0xc5a   : > { %v3799_v28 = vadd.f32 %v9291_v47, %v3758_v33  ;;  %v3800_v50 = vadd.f32 %v9291_v47, %v3763_v61 }
 0xc5b   : > { %v9379_v23 = vadd.f32 %v4223_v6, %v10718_v15  ;;  %v9393_v12 = vadd.f32 %v4228_v35, %v10719_v21 }
 0xc5c   : > { %v3815_v63 = vmul.f32 0.2, %v3799_v28  ;;  %v3816_v62 = vmul.f32 0.2, %v3800_v50  ;;  %4258 = vmax.xlane.f32.xlu1 %v9370_v36 }
 0xc5d   : > { %v3748_v9 = vpop.permute.xlu1 %3747  ;;  %v3753_v58 = vpop.permute.xlu0 %3752  ;;  %3863 = vmax.xlane.f32.xlu0 %v9373_v59 }
 0xc5e   : > { %v3831_v38 = vmax.f32 %v3799_v28, %v3815_v63  ;;  %v3797_v33 = vadd.f32 %v9291_v47, %v3748_v9  ;;  %v3832_v61 = vmax.f32 %v3800_v50, %v3816_v62  ;;  %v3798_v0 = vadd.f32 %v9291_v47, %v3753_v58  ;;  %v10720_v50 = vld [vmem:[#allocation24_spill] sm:$0xff] }
 0xc60   : > { %v3813_v26 = vmul.f32 0.2, %v3797_v33  ;;  %v9383_v39 = vadd.f32 %v3831_v38, %v10719_v21  ;;  %v9390_v6 = vadd.f32 %v3832_v61, %v10720_v50  ;;  %v3814_v38 = vmul.f32 0.2, %v3798_v0 }
 0xc61   : > { %4260 = vmax.xlane.f32.xlu0 %v9379_v23 }
 0xc62   : > { %v4164_v55 = vpop.permute.xlu1 %4163  ;;  %v4176_v34 = vpop.permute.xlu0 %4175  ;;  %3873 = vmax.xlane.f32.xlu1 %v9383_v39  ;;  %v3829_v54 = vmax.f32 %v3797_v33, %v3813_v26  ;;  %v3830_v52 = vmax.f32 %v3798_v0, %v3814_v38 }
 0xc63   : > { %v4197_v28 = vadd.f32 %v9297_v27, %v4164_v55  ;;  %v4226_v55 = vmax.f32 %v4194_v24, %v4210_v13  ;;  %v4200_v26 = vadd.f32 %v9297_v27, %v4176_v34 }
 0xc64   : > { %v9399_v61 = vadd.f32 %v3829_v54, %v10721_v1  ;;  %v10722_v54 = vld [vmem:[#allocation25_spill] sm:$0xff] }
 0xc65   : > { %v4213_v63 = vmul.f32 0.2, %v4197_v28  ;;  %3875 = vmax.xlane.f32.xlu0 %v9390_v6  ;;  %v9410_v13 = vadd.f32 %v4226_v55, %v10721_v1  ;;  %v9413_v38 = vadd.f32 %v3830_v52, %v10722_v54  ;;  %v10723_v52 = vld [vmem:[#allocation26_spill] sm:$0xff] }
 0xc66   : > { %v4156_v58 = vpop.permute.xlu1 %4155  ;;  %v4168_v62 = vpop.permute.xlu0 %4167  ;;  %4270 = vmax.xlane.f32.xlu1 %v9393_v12 }
 0xc67   : > { %v4229_v9 = vmax.f32 %v4197_v28, %v4213_v63  ;;  %v4195_v15 = vadd.f32 %v9297_v27, %v4156_v58  ;;  %v4216_v63 = vmul.f32 0.2, %v4200_v26 }
 0xc69   : > { %v4211_v33 = vmul.f32 0.2, %v4195_v15  ;;  %v9402_v35 = vadd.f32 %v4229_v9, %v10720_v50 }
 0xc6a   : > { %3869 = vmax.xlane.f32.xlu1 %v9399_v61 }
 0xc6b   : > { %v3778_v21 = vpop.permute.xlu1 %3777  ;;  %v3783_v49 = vpop.permute.xlu0 %3782  ;;  %4272 = vmax.xlane.f32.xlu0 %v9402_v35  ;;  %v4227_v0 = vmax.f32 %v4195_v15, %v4211_v33  ;;  %v4232_v15 = vmax.f32 %v4200_v26, %v4216_v63 }
 0xc6c   : > { %v3803_v28 = vadd.f32 %v9291_v47, %v3778_v21  ;;  %v3804_v24 = vadd.f32 %v9291_v47, %v3783_v49 }
 0xc6d   : > { %v9419_v55 = vadd.f32 %v4227_v0, %v10722_v54  ;;  %v9432_v0 = vadd.f32 %v4232_v15, %v10723_v52 }
 0xc6e   : > { %v3819_v58 = vmul.f32 0.2, %v3803_v28  ;;  %v3820_v34 = vmul.f32 0.2, %v3804_v24  ;;  %4266 = vmax.xlane.f32.xlu1 %v9410_v13 }
 0xc6f   : > { %v3768_v9 = vpop.permute.xlu1 %3767  ;;  %3871 = vmax.xlane.f32.xlu0 %v9413_v38  ;;  %v3773_v42 = vpop.permute.xlu0 %3772 }
 0xc70   : > { %v3835_v50 = vmax.f32 %v3803_v28, %v3819_v58  ;;  %v3801_v21 = vadd.f32 %v9291_v47, %v3768_v9  ;;  %v3836_v49 = vmax.f32 %v3804_v24, %v3820_v34  ;;  %v3802_v18 = vadd.f32 %v9291_v47, %v3773_v42  ;;  %v10724_v58 = vld [vmem:[#allocation27_spill] sm:$0xff]  ;;  %v10725_v34 = vld [vmem:[#allocation28_spill] sm:$0xff] }
 0xc72   : > { %v3817_v33 = vmul.f32 0.2, %v3801_v21  ;;  %v9422_v1 = vadd.f32 %v3835_v50, %v10723_v52  ;;  %v9429_v9 = vadd.f32 %v3836_v49, %v10724_v58  ;;  %v3818_v26 = vmul.f32 0.2, %v3802_v18 }
 0xc73   : > { %4268 = vmax.xlane.f32.xlu0 %v9419_v55 }
 0xc74   : > { %v4180_v41 = vpop.permute.xlu1 %4179  ;;  %3881 = vmax.xlane.f32.xlu1 %v9422_v1  ;;  %v3833_v24 = vmax.f32 %v3801_v21, %v3817_v33  ;;  %v10726_v33 = vld [vmem:[#allocation29_spill] sm:$0xff] }
 0xc75   : > { %v4201_v28 = vadd.f32 %v9297_v27, %v4180_v41  ;;  %v3834_v41 = vmax.f32 %v3802_v18, %v3818_v26  ;;  %v4198_v18 = vadd.f32 %v9297_v27, %v4168_v62 }
 0xc76   : > { %v9438_v54 = vadd.f32 %v3833_v24, %v10725_v34 }
 0xc77   : > { %v4217_v63 = vmul.f32 0.2, %v4201_v28  ;;  %3883 = vmax.xlane.f32.xlu0 %v9429_v9  ;;  %v9446_v52 = vadd.f32 %v3834_v41, %v10726_v33  ;;  %v4214_v24 = vmul.f32 0.2, %v4198_v18 }
 0xc78   : > { %v4172_v50 = vpop.permute.xlu1 %4171  ;;  %4278 = vmax.xlane.f32.xlu1 %v9432_v0 }
 0xc79   : > { %v4233_v42 = vmax.f32 %v4201_v28, %v4217_v63  ;;  %v4199_v47 = vadd.f32 %v9297_v27, %v4172_v50  ;;  %v4230_v26 = vmax.f32 %v4198_v18, %v4214_v24 }
 0xc7b   : > { %v4215_v49 = vmul.f32 0.2, %v4199_v47  ;;  %v9441_v21 = vadd.f32 %v4233_v42, %v10724_v58  ;;  %v9457_v63 = vadd.f32 %v4230_v26, %v10725_v34 }
 0xc7c   : > { %3877 = vmax.xlane.f32.xlu1 %v9438_v54 }
 0xc7d   : > { %4280 = vmax.xlane.f32.xlu0 %v9441_v21  ;;  %v4231_v15 = vmax.f32 %v4199_v47, %v4215_v49 }
 0xc7f   : > { %v9450_v28 = vadd.f32 %v4231_v15, %v10726_v33 }
 0xc81   : > { %3879 = vmax.xlane.f32.xlu0 %v9446_v52 }
 0xc85   : > { %4276 = vmax.xlane.f32.xlu0 %v9450_v28 }
 0xc8d   : > { %4436 = vrot.lane.b32.xlu1 %v9210_v29, %s7691_s20 }
 0xcb1   : > { %4274 = vmax.xlane.f32.xlu1 %v9457_v63 }
 0xcc5   : > { %v3858_v50 = vpop.xlane.xlu0 %3857 }
 0xcc6   : > { %v3887_v42 = vsub.f32 %v9301_v45, %v3858_v50 }
 0xcc8   : > { %v3905_v47 = vmul.f32 1.442695, %v3887_v42 }
 0xcca   : > { %7387 = vpow2.f32 %v3905_v47  ;;  %v4255_v41 = vpop.xlane.xlu1 %4254 }
 0xccb   : > { %v4284_v49 = vsub.f32 %v9307_v44, %v4255_v41 }
 0xccd   : > { %v4302_v15 = vmul.f32 1.442695, %v4284_v49 }
 0xccf   : > { %7389 = vpow2.f32 %v4302_v15  ;;  %v3854_v29 = vpop.xlane.xlu0 %3853 }
 0xcd0   : > { %v3885_v27 = vsub.f32 %v9313_v46, %v3854_v29 }
 0xcd2   : > { %v3901_v62 = vmul.f32 1.442695, %v3885_v27 }
 0xcd3   : > { %v3860_v18 = vpop.xlane.xlu0 %3859 }
 0xcd4   : > { %v9463_v24 = vpop.eup %7387  ;;  %7391 = vpow2.f32 %v3901_v62  ;;  %v3888_v26 = vsub.f32 %v9319_v5, %v3860_v18  ;;  %v4251_v33 = vpop.xlane.xlu1 %4250 }
 0xcd5   : > { %v4282_v45 = vsub.f32 %v9322_v3, %v4251_v33  ;;  %3937 = vadd.xlane.f32.xlu1 %v9463_v24 }
 0xcd6   : > { %v3907_v50 = vmul.f32 1.442695, %v3888_v26 }
 0xcd7   : > { %v4298_v42 = vmul.f32 1.442695, %v4282_v45 }
 0xcd8   : > { %7393 = vpow2.f32 %v3907_v50  ;;  %v3856_v44 = vpop.xlane.xlu1 %3855  ;;  %v4257_v47 = vpop.xlane.xlu0 %4256 }
 0xcd9   : > { %v9468_v41 = vpop.eup %7389  ;;  %7395 = vpow2.f32 %v4298_v42  ;;  %v3886_v46 = vsub.f32 %v9330_v19, %v3856_v44  ;;  %v4285_v49 = vsub.f32 %v9333_v31, %v4257_v47 }
 0xcda   : > { %4334 = vadd.xlane.f32.xlu0 %v9468_v41 }
 0xcdb   : > { %v4304_v5 = vmul.f32 1.442695, %v4285_v49  ;;  %v3903_v29 = vmul.f32 1.442695, %v3886_v46 }
 0xcdc   : > { %v4253_v15 = vpop.xlane.xlu0 %4252 }
 0xcdd   : > { %v3866_v3 = vpop.xlane.xlu1 %3865  ;;  %7397 = vpow2.f32 %v4304_v5  ;;  %v4283_v27 = vsub.f32 %v9339_v37, %v4253_v15 }
 0xcde   : > { %v9473_v33 = vpop.eup %7391  ;;  %v3891_v62 = vsub.f32 %v9343_v4, %v3866_v3  ;;  %7399 = vpow2.f32 %v3903_v29 }
 0xcdf   : > { %3933 = vadd.xlane.f32.xlu1 %v9473_v33  ;;  %v4300_v31 = vmul.f32 1.442695, %v4283_v27 }
 0xce0   : > { %v3913_v18 = vmul.f32 1.442695, %v3891_v62  ;;  %v3868_v45 = vpop.xlane.xlu0 %3867 }
 0xce1   : > { %v4263_v19 = vpop.xlane.xlu1 %4262  ;;  %v3892_v37 = vsub.f32 %v9350_v51, %v3868_v45 }
 0xce2   : > { %v9478_v26 = vpop.eup %7393  ;;  %7401 = vpow2.f32 %v3913_v18  ;;  %v4288_v50 = vsub.f32 %v9353_v48, %v4263_v19 }
 0xce3   : > { %v9481_v42 = vpop.eup %7395  ;;  %3939 = vadd.xlane.f32.xlu0 %v9478_v26  ;;  %7403 = vpow2.f32 %v4300_v31  ;;  %v3915_v15 = vmul.f32 1.442695, %v3892_v37 }
 0xce4   : > { %4330 = vadd.xlane.f32.xlu1 %v9481_v42  ;;  %v4310_v4 = vmul.f32 1.442695, %v4288_v50 }
 0xce5   : > { %v3862_v44 = vpop.xlane.xlu1 %3861 }
 0xce6   : > { %v3889_v47 = vsub.f32 %v9359_v17, %v3862_v44  ;;  %v4265_v46 = vpop.xlane.xlu0 %4264  ;;  %7405 = vpow2.f32 %v4310_v4 }
 0xce7   : > { %v9487_v49 = vpop.eup %7397  ;;  %v4289_v29 = vsub.f32 %v9362_v25, %v4265_v46 }
 0xce8   : > { %v3909_v5 = vmul.f32 1.442695, %v3889_v47  ;;  %4336 = vadd.xlane.f32.xlu0 %v9487_v49  ;;  %v9492_v27 = vpop.eup %7399 }
 0xce9   : > { %v4259_v48 = vpop.xlane.xlu1 %4258  ;;  %v4312_v18 = vmul.f32 1.442695, %v4289_v29 }
 0xcea   : > { %7407 = vpow2.f32 %v3909_v5  ;;  %v4286_v3 = vsub.f32 %v9370_v36, %v4259_v48  ;;  %v3864_v51 = vpop.xlane.xlu0 %3863 }
 0xceb   : > { %7409 = vpow2.f32 %v3915_v15  ;;  %v3890_v19 = vsub.f32 %v9373_v59, %v3864_v51 }
 0xcec   : > { %v9494_v62 = vpop.eup %7401  ;;  %v4306_v17 = vmul.f32 1.442695, %v4286_v3  ;;  %3935 = vadd.xlane.f32.xlu0 %v9492_v27 }
 0xced   : > { %3945 = vadd.xlane.f32.xlu1 %v9494_v62  ;;  %v9499_v25 = vpop.eup %7403  ;;  %v3911_v50 = vmul.f32 1.442695, %v3890_v19 }
 0xcee   : > { %7411 = vpow2.f32 %v4306_v17  ;;  %v4261_v31 = vpop.xlane.xlu0 %4260 }
 0xcef   : > { %v3874_v45 = vpop.xlane.xlu1 %3873  ;;  %7413 = vpow2.f32 %v4312_v18  ;;  %v4287_v37 = vsub.f32 %v9379_v23, %v4261_v31 }
 0xcf0   : > { %v3895_v36 = vsub.f32 %v9383_v39, %v3874_v45  ;;  %4332 = vadd.xlane.f32.xlu0 %v9499_v25  ;;  %v9504_v44 = vpop.eup %7405 }
 0xcf1   : > { %v4308_v39 = vmul.f32 1.442695, %v4287_v37 }
 0xcf2   : > { %v3921_v4 = vmul.f32 1.442695, %v3895_v36  ;;  %v3876_v59 = vpop.xlane.xlu0 %3875 }
 0xcf3   : > { %v4271_v47 = vpop.xlane.xlu1 %4270 }
 0xcf4   : > { %v9506_v46 = vpop.eup %7407  ;;  %7415 = vpow2.f32 %v3921_v4  ;;  %4342 = vadd.xlane.f32.xlu0 %v9504_v44  ;;  %v4292_v5 = vsub.f32 %v9393_v12, %v4271_v47 }
 0xcf5   : > { %3941 = vadd.xlane.f32.xlu1 %v9506_v46  ;;  %7417 = vpow2.f32 %v3911_v50  ;;  %v9511_v15 = vpop.eup %7409  ;;  %v3896_v50 = vsub.f32 %v9390_v6, %v3876_v59 }
 0xcf6   : > { %7419 = vpow2.f32 %v4308_v39  ;;  %v4318_v17 = vmul.f32 1.442695, %v4292_v5 }
 0xcf7   : > { %v3870_v48 = vpop.xlane.xlu1 %3869  ;;  %v3923_v39 = vmul.f32 1.442695, %v3896_v50 }
 0xcf8   : > { %v9513_v23 = vpop.eup %7411  ;;  %v3893_v29 = vsub.f32 %v9399_v61, %v3870_v48  ;;  %v4273_v3 = vpop.xlane.xlu0 %4272  ;;  %3947 = vadd.xlane.f32.xlu0 %v9511_v15 }
 0xcf9   : > { %v4293_v51 = vsub.f32 %v9402_v35, %v4273_v3  ;;  %4338 = vadd.xlane.f32.xlu1 %v9513_v23  ;;  %v9519_v12 = vpop.eup %7413 }
 0xcfa   : > { %v3917_v18 = vmul.f32 1.442695, %v3893_v29 }
 0xcfb   : > { %v4320_v19 = vmul.f32 1.442695, %v4293_v51  ;;  %v4267_v31 = vpop.xlane.xlu1 %4266 }
 0xcfc   : > { %7421 = vpow2.f32 %v3917_v18  ;;  %v4290_v45 = vsub.f32 %v9410_v13, %v4267_v31  ;;  %v3872_v36 = vpop.xlane.xlu0 %3871  ;;  %4344 = vadd.xlane.f32.xlu0 %v9519_v12 }
 0xcfd   : > { %7423 = vpow2.f32 %v4318_v17  ;;  %v3894_v5 = vsub.f32 %v9413_v38, %v3872_v36 }
 0xcfe   : > { %v9523_v61 = vpop.eup %7415  ;;  %v4314_v35 = vmul.f32 1.442695, %v4290_v45  ;;  %7425 = vpow2.f32 %v4320_v19 }
 0xcff   : > { %3953 = vadd.xlane.f32.xlu1 %v9523_v61  ;;  %v9527_v37 = vpop.eup %7417  ;;  %v3919_v17 = vmul.f32 1.442695, %v3894_v5 }
 0xd00   : > { %7427 = vpow2.f32 %v4314_v35  ;;  %v4269_v4 = vpop.xlane.xlu0 %4268  ;;  %3943 = vadd.xlane.f32.xlu0 %v9527_v37  ;;  %v9533_v59 = vpop.eup %7419 }
 0xd01   : > { %v4291_v13 = vsub.f32 %v9419_v55, %v4269_v4  ;;  %v3882_v47 = vpop.xlane.xlu1 %3881 }
 0xd02   : > { %v3899_v48 = vsub.f32 %v9422_v1, %v3882_v47 }
 0xd03   : > { %v4316_v6 = vmul.f32 1.442695, %v4291_v13 }
 0xd04   : > { %v3929_v29 = vmul.f32 1.442695, %v3899_v48  ;;  %4340 = vadd.xlane.f32.xlu0 %v9533_v59  ;;  %v3884_v55 = vpop.xlane.xlu0 %3883 }
 0xd05   : > { %7429 = vpow2.f32 %v4316_v6  ;;  %v9536_v3 = vpop.xlane.xlu1 %4278 }
 0xd06   : > { %v9538_v51 = vpop.eup %7421  ;;  %7431 = vpow2.f32 %v3923_v39 }
 0xd07   : > { %3949 = vadd.xlane.f32.xlu1 %v9538_v51  ;;  %v9541_v18 = vpop.eup %7423  ;;  %7433 = vpow2.f32 %v3929_v29 }
 0xd08   : > { %v9543_v38 = vpop.eup %7425  ;;  %4350 = vadd.xlane.f32.xlu0 %v9541_v18  ;;  %7435 = vpow2.f32 %v3919_v17 }
 0xd09   : > { %v3878_v1 = vpop.xlane.xlu1 %3877 }
 0xd0a   : > { %v9546_v19 = vpop.eup %7427  ;;  %v3897_v31 = vsub.f32 %v9438_v54, %v3878_v1  ;;  %v4281_v45 = vpop.xlane.xlu0 %4280 }
 0xd0b   : > { %v4297_v36 = vsub.f32 %v9441_v21, %v4281_v45  ;;  %4352 = vadd.xlane.f32.xlu1 %v9543_v38 }
 0xd0c   : > { %v3925_v50 = vmul.f32 1.442695, %v3897_v31  ;;  %4346 = vadd.xlane.f32.xlu0 %v9546_v19  ;;  %v3900_v31 = vsub.f32 %v9429_v9, %v3884_v55 }
 0xd0d   : > { %v4328_v35 = vmul.f32 1.442695, %v4297_v36 }
 0xd0e   : > { %7437 = vpow2.f32 %v3925_v50  ;;  %v3880_v4 = vpop.xlane.xlu0 %3879  ;;  %v3931_v50 = vmul.f32 1.442695, %v3900_v31 }
 0xd0f   : > { %v9552_v13 = vpop.eup %7429  ;;  %7439 = vpow2.f32 %v4328_v35  ;;  %v4296_v35 = vsub.f32 %v9432_v0, %v9536_v3 }
 0xd10   : > { %v9554_v47 = vpop.eup %7431  ;;  %4348 = vadd.xlane.f32.xlu1 %v9552_v13 }
 0xd11   : > { %3955 = vadd.xlane.f32.xlu0 %v9554_v47  ;;  %v9558_v39 = vpop.eup %7433 }
 0xd12   : > { %v4277_v54 = vpop.xlane.xlu0 %4276  ;;  %v9561_v5 = vpop.eup %7435 }
 0xd13   : > { %v4295_v21 = vsub.f32 %v9450_v28, %v4277_v54  ;;  %v9578_v28 = vpop.permute.xlu1 %4436 }
 0xd14   : > { %3961 = vadd.xlane.f32.xlu1 %v9558_v39 }
 0xd15   : > { %v4324_v48 = vmul.f32 1.442695, %v4295_v21  ;;  %3951 = vadd.xlane.f32.xlu0 %v9561_v5  ;;  %v4326_v21 = vmul.f32 1.442695, %v4296_v35 }
 0xd17   : > { %7441 = vpow2.f32 %v4324_v48 }
 0xd18   : > { %v9565_v6 = vpop.eup %7437 }
 0xd19   : > { %3957 = vadd.xlane.f32.xlu1 %v9565_v6  ;;  %v9568_v29 = vpop.eup %7439 }
 0xd1d   : > { %4360 = vadd.xlane.f32.xlu1 %v9568_v29 }
 0xd21   : > { %v9571_v17 = vpop.eup %7441 }
 0xd22   : > { %4356 = vadd.xlane.f32.xlu1 %v9571_v17 }
 0xd33   : > { %4440 = vrot.lane.b32.xlu1 %v9231_v60, %s7691_s20  ;;  %v3898_v60 = vsub.f32 %v9446_v52, %v3880_v4 }
 0xd37   : > { %4644 = vrot.lane.b32.xlu1 %v9168_v30, %s7692_s2  ;;  %v3927_v30 = vmul.f32 1.442695, %v3898_v60 }
 0xd3b   : > { %4646 = vrot.lane.b32.xlu1 %v9174_v57, %s7692_s2 }
 0xd3e   : > { %v4275_v1 = vpop.xlane.xlu1 %4274 }
 0xd3f   : > { %v4294_v45 = vsub.f32 %v9457_v63, %v4275_v1  ;;  %4650 = vrot.lane.b32.xlu1 %v9170_v11, %s7692_s2 }
 0xd41   : > { %v4322_v36 = vmul.f32 1.442695, %v4294_v45 }
 0xd43   : > { %7443 = vpow2.f32 %v4322_v36  ;;  %4654 = vrot.lane.b32.xlu1 %v9192_v32, %s7692_s2 }
 0xd44   : > { %7445 = vpow2.f32 %v3931_v50 }
 0xd45   : > { %7447 = vpow2.f32 %v3927_v30 }
 0xd47   : > { %4658 = vrot.lane.b32.xlu1 %v9188_v20, %s7692_s2 }
 0xd4b   : > { %4662 = vrot.lane.b32.xlu1 %v9212_v16, %s7692_s2 }
 0xd4d   : > { %v9593_v57 = vpop.eup %7443 }
 0xd4e   : > { %4354 = vadd.xlane.f32.xlu0 %v9593_v57  ;;  %v9598_v11 = vpop.eup %7445 }
 0xd4f   : > { %4666 = vrot.lane.b32.xlu1 %v9205_v7, %s7692_s2  ;;  %v9603_v32 = vpop.eup %7447 }
 0xd52   : > { %3963 = vadd.xlane.f32.xlu0 %v9598_v11 }
 0xd53   : > { %4670 = vrot.lane.b32.xlu1 %v9233_v14, %s7692_s2 }
 0xd56   : > { %3959 = vadd.xlane.f32.xlu0 %v9603_v32 }
 0xd62   : > { %v3938_v16 = vpop.xlane.xlu1 %3937 }
 0xd63   : > { %v3967_v14 = vmax.f32 %v3938_v16, 1e-30 }
 0xd67   : > { %v9606_v20 = vpop.xlane.xlu0 %4334 }
 0xd6c   : > { %4438 = vrot.lane.b32.xlu0 %v9237_v53, %s7691_s20  ;;  %v3934_v9 = vpop.xlane.xlu1 %3933  ;;  %s7694_s20 = smov 127  }
 0xd6d   : > { %v3965_v55 = vmax.f32 %v3934_v9, 1e-30 }
 0xd70   : > { %v3940_v52 = vpop.xlane.xlu0 %3939 }
 0xd71   : > { %v3968_v7 = vmax.f32 %v3940_v52, 1e-30  ;;  %v9616_v53 = vpop.xlane.xlu1 %4330 }
 0xd73   : > { %7449 = vrcp.f32 %v3968_v7 }
 0xd74   : > { %7451 = vrcp.f32 %v3965_v55 }
 0xd75   : > { %v9610_v63 = vpop.xlane.xlu0 %4336  ;;  %7453 = vrcp.f32 %v3967_v14 }
 0xd79   : > { %v3936_v4 = vpop.xlane.xlu0 %3935 }
 0xd7a   : > { %v3966_v54 = vmax.f32 %v3936_v4, 1e-30  ;;  %v3946_v45 = vpop.xlane.xlu1 %3945 }
 0xd7c   : > { %7455 = vrcp.f32 %v3966_v54 }
 0xd7d   : > { %v9614_v48 = vpop.xlane.xlu0 %4332  ;;  %7457 = vpow2.f32 %v4326_v21  ;;  %v7450_v31 = vpop.eup %7449  ;;  %v3971_v21 = vmax.f32 %v3946_v45, 1e-30 }
 0xd7e   : > { %v7452_v36 = vpop.eup %7451  ;;  %v4000_v60 = vmul.f32 %v7450_v31, %v9478_v26 }
 0xd7f   : > { %v7454_v50 = vpop.eup %7453  ;;  %v3997_v16 = vmul.f32 %v7452_v36, %v9473_v33 }
 0xd80   : > { %v3999_v9 = vmul.f32 %v7454_v50, %v9463_v24 }
 0xd81   : > { %v9618_v1 = vpop.xlane.xlu0 %4342 }
 0xd82   : > { %v3942_v30 = vpop.xlane.xlu1 %3941  ;;  %v4014_v54 = vpack.c.bf16 %v4000_v60, %v3999_v9 }
 0xd83   : > { %v3969_v4 = vmax.f32 %v3942_v30, 1e-30 }
 0xd85   : > { %v3948_v0 = vpop.xlane.xlu0 %3947 }
 0xd86   : > { %v7456_v3 = vpop.eup %7455  ;;  %v3972_v55 = vmax.f32 %v3948_v0, 1e-30 }
 0xd87   : > { %v3998_v52 = vmul.f32 %v7456_v3, %v9492_v27  ;;  %v9624_v7 = vpop.eup %7457  ;;  %v9635_v27 = vpop.xlane.xlu1 %4338 }
 0xd88   : > { %7459 = vrcp.f32 %v3972_v55 }
 0xd89   : > { %v9626_v35 = vpop.xlane.xlu0 %4344  ;;  %v4013_v14 = vpack.c.bf16 %v3998_v52, %v3997_v16  ;;  %7461 = vrcp.f32 %v3969_v4 }
 0xd8a   : > { %7463 = vrcp.f32 %v3971_v21 }
 0xd8b   : > { %4358 = vadd.xlane.f32.xlu0 %v9624_v7  ;;  %6779 = vmatprep.mubr.bf16.mxu0 %v4013_v14 }
 0xd8c   : > { %6780 = vmatmul.mubr.bf16.vlgmr.msra.gmra.mrb[104].mxu0 %v4014_v54  ;;  %v3954_v45 = vpop.xlane.xlu1 %3953  ;;  %v10728_v54 = vld [vmem:[#allocation31_spill] sm:$0xff] }
 0xd8d   : > { %6796 = vmatpush3.bf16.msra.mxu0 %v9264_v56  ;;  %v3944_v33 = vpop.xlane.xlu0 %3943  ;;  %v3975_v4 = vmax.f32 %v3954_v45, 1e-30 }
 0xd8e   : > { %6797 = vmatprep.subr.bf16.mxu0 %v9286_v22  ;;  %v3970_v24 = vmax.f32 %v3944_v33, 1e-30 }
 0xd90   : > { %7465 = vrcp.f32 %v3970_v24 }
 0xd91   : > { %6798 = vmatpush3.bf16.msra.mxu0 %v9286_v22  ;;  %v9632_v26 = vpop.xlane.xlu0 %4340 }
 0xd92   : > { %6799 = vmatprep.subr.bf16.mxu0 %v9288_v8  ;;  %v7460_v56 = vpop.eup %7459 }
 0xd93   : > { %v7462_v36 = vpop.eup %7461  ;;  %v4004_v3 = vmul.f32 %v7460_v56, %v9511_v15  ;;  %v10729_v56 = vld [vmem:[#allocation11_spill] sm:$0xff] }
 0xd94   : > { %v7464_v50 = vpop.eup %7463  ;;  %v3950_v60 = vpop.xlane.xlu1 %3949 }
 0xd95   : > { %6800 = vmatpush3.bf16.msra.mxu0 %v9288_v8  ;;  %v9638_v31 = vpop.xlane.xlu0 %4350  ;;  %v4001_v8 = vmul.f32 %v7462_v36, %v9506_v46  ;;  %v4003_v16 = vmul.f32 %v7464_v50, %v9494_v62  ;;  %v3973_v55 = vmax.f32 %v3950_v60, 1e-30  ;;  %v10730_v50 = vld [vmem:[#allocation3_spill] sm:$0xff] }
 0xd96   : > { %6801 = vmatprep.subr.bf16.mxu0 %v9284_v43 }
 0xd97   : > { %v4016_v14 = vpack.c.bf16 %v4004_v3, %v4003_v16 }
 0xd99   : > { %6802 = vmatpush3.bf16.msra.mxu0 %v9284_v43  ;;  %v9642_v0 = vpop.xlane.xlu0 %4346 }
 0xd9a   : > { %v7466_v22 = vpop.eup %7465  ;;  %6803 = vmatprep.subr.bf16.mxu0 %v9293_v40 }
 0xd9b   : > { %v4002_v30 = vmul.f32 %v7466_v22, %v9527_v37  ;;  %v9668_v22 = vpop.xlane.xlu1 %4352 }
 0xd9d   : > { %6804 = vmatpush3.bf16.msra.mxu0 %v9293_v40  ;;  %v4015_v9 = vpack.c.bf16 %v4002_v30, %v4001_v8  ;;  %v10727_v40 = vld [vmem:[#allocation9_spill] sm:$0xff] }
 0xd9e   : > { %v3956_v52 = vpop.xlane.xlu0 %3955  ;;  %6805 = vmatprep.subr.bf16.mxu0 %v9578_v28 }
 0xd9f   : > { %v3976_v43 = vmax.f32 %v3956_v52, 1e-30  ;;  %6783 = vmatprep.mubr.bf16.mxu0 %v4015_v9  ;;  %v4349_v3 = vpop.xlane.xlu1 %4348 }
 0xda0   : > { %6784 = vmatmul.mubr.bf16.gmra.mrb[108].mxu0 %v4016_v14 }
 0xda1   : > { %4648 = vrot.lane.b32.xlu0 %v9166_v10, %s7692_s2  ;;  %7467 = vrcp.f32 %v3976_v43  ;;  %6806 = vmatpush3.bf16.msra.mxu0 %v9578_v28 }
 0xda2   : > { %v3952_v46 = vpop.xlane.xlu0 %3951  ;;  %7469 = vrcp.f32 %v3973_v55 }
 0xda3   : > { %v3974_v62 = vmax.f32 %v3952_v46, 1e-30  ;;  %7471 = vrcp.f32 %v3975_v4  ;;  %v4367_v46 = vmax.f32 %v9632_v26, 1e-30 }
 0xda5   : > { %7473 = vrcp.f32 %v3974_v62  ;;  %4652 = vrot.lane.b32.xlu0 %v9185_v2, %s7692_s2 }
 0xda9   : > { %4656 = vrot.lane.b32.xlu0 %v10727_v40, %s7692_s2  ;;  %v4366_v40 = vmax.f32 %v9635_v27, 1e-30  ;;  %v4368_v27 = vmax.f32 %v9618_v1, 1e-30 }
 0xdab   : > { %v7468_v15 = vpop.eup %7467 }
 0xdac   : > { %v7470_v37 = vpop.eup %7469  ;;  %v4008_v28 = vmul.f32 %v7468_v15, %v9554_v47  ;;  %v3962_v47 = vpop.xlane.xlu1 %3961 }
 0xdad   : > { %4660 = vrot.lane.b32.xlu0 %v10728_v54, %s7692_s2  ;;  %v7472_v10 = vpop.eup %7471  ;;  %v4005_v33 = vmul.f32 %v7470_v37, %v9538_v51  ;;  %v3979_v9 = vmax.f32 %v3962_v47, 1e-30 }
 0xdae   : > { %v4007_v2 = vmul.f32 %v7472_v10, %v9523_v61  ;;  %v4363_v61 = vmax.f32 %v9614_v48, 1e-30  ;;  %v4364_v48 = vmax.f32 %v9606_v20, 1e-30 }
 0xdaf   : > { %v7474_v21 = vpop.eup %7473 }
 0xdb0   : > { %v4006_v24 = vmul.f32 %v7474_v21, %v9561_v5  ;;  %v4018_v36 = vpack.c.bf16 %v4008_v28, %v4007_v2  ;;  %v3958_v60 = vpop.xlane.xlu1 %3957  ;;  %v4362_v5 = vmax.f32 %v9616_v53, 1e-30  ;;  %v4365_v53 = vmax.f32 %v9610_v63, 1e-30 }
 0xdb1   : > { %4664 = vrot.lane.b32.xlu0 %v10729_v56, %s7692_s2  ;;  %v3977_v16 = vmax.f32 %v3958_v60, 1e-30  ;;  %v10731_v63 = vmov 0.0   ;;  %v4369_v21 = vmax.f32 %v9626_v35, 1e-30 }
 0xdb2   : > { %v4017_v45 = vpack.c.bf16 %v4006_v24, %v4005_v33  ;;  %7475 = vrcp.f32 %v4362_v5  ;;  %v4371_v28 = vmax.f32 %v4349_v3, 1e-30 }
 0xdb3   : > { %7477 = vrcp.f32 %v4363_v61 }
 0xdb4   : > { %6787 = vmatprep.mubr.bf16.mxu0 %v4017_v45  ;;  %v9673_v8 = vpop.xlane.xlu1 %4360  ;;  %v4370_v45 = vmax.f32 %v9642_v0, 1e-30 }
 0xdb5   : > { %6788 = vmatmul.mubr.bf16.gmra.mrb[112].mxu0 %v4018_v36  ;;  %4668 = vrot.lane.b32.xlu0 %v10730_v50, %s7692_s2 }
 0xdb8   : > { %v9676_v55 = vpop.xlane.xlu1 %4356 }
 0xdb9   : > { %v4375_v61 = vmax.f32 %v9676_v55, 1e-30 }
 0xdbc   : > { %v4441_v62 = vpop.permute.xlu1 %4440  ;;  %v7476_v15 = vpop.eup %7475 }
 0xdbd   : > { %v7478_v37 = vpop.eup %7477  ;;  %v4394_v35 = vmul.f32 %v7476_v15, %v9481_v42  ;;  %v4372_v42 = vmax.f32 %v9638_v31, 1e-30 }
 0xdbe   : > { %v4395_v2 = vmul.f32 %v7478_v37, %v9499_v25  ;;  %v4373_v25 = vmax.f32 %v9668_v22, 1e-30 }
 0xddb   : > { %v9670_v51 = vpop.xlane.xlu0 %4354 }
 0xddc   : > { %v4374_v0 = vmax.f32 %v9670_v51, 1e-30 }
 0xddf   : > { %v3964_v30 = vpop.xlane.xlu0 %3963 }
 0xde0   : > { %v3980_v52 = vmax.f32 %v3964_v30, 1e-30 }
 0xde2   : > { %7479 = vrcp.f32 %v3980_v52 }
 0xde3   : > { %v3960_v43 = vpop.xlane.xlu0 %3959  ;;  %7481 = vrcp.f32 %v3977_v16 }
 0xde4   : > { %v3978_v14 = vmax.f32 %v3960_v43, 1e-30  ;;  %7483 = vrcp.f32 %v3979_v9 }
 0xde6   : > { %7485 = vrcp.f32 %v3978_v14 }
 0xde7   : > { %v4439_v4 = vpop.permute.xlu0 %4438  ;;  %7487 = vrcp.f32 %v4365_v53 }
 0xde8   : > { %6807 = vmatprep.subr.bf16.mxu0 %v4439_v4  ;;  %7489 = vrcp.f32 %v4367_v46 }
 0xde9   : > { %6808 = vmatpush3.bf16.msra.mxu0 %v4439_v4  ;;  %7491 = vrcp.f32 %v4364_v48 }
 0xdea   : > { %6809 = vmatprep.subr.bf16.mxu0 %v4441_v62  ;;  %7493 = vrcp.f32 %v4366_v40 }
 0xdeb   : > { %7495 = vrcp.f32 %v4369_v21 }
 0xdec   : > { %v7480_v54 = vpop.eup %7479  ;;  %7497 = vrcp.f32 %v4371_v28 }
 0xded   : > { %6810 = vmatpush3.bf16.msra.mxu0 %v4441_v62  ;;  %v7482_v10 = vpop.eup %7481  ;;  %v4012_v33 = vmul.f32 %v7480_v54, %v9598_v11  ;;  %7499 = vrcp.f32 %v4368_v27  ;;  %v4410_v11 = vpack.c.bf16 %v4395_v2, %v4394_v35 }
 0xdee   : > { %6865 = vmatprep.subr.bf16.mxu0 %v10731_v63  ;;  %v7484_v26 = vpop.eup %7483  ;;  %v4009_v24 = vmul.f32 %v7482_v10, %v9565_v6  ;;  %7501 = vrcp.f32 %v4370_v45 }
 0xdef   : > { %v4011_v36 = vmul.f32 %v7484_v26, %v9558_v39  ;;  %7503 = vrcp.f32 %v4373_v25 }
 0xdf0   : > { %v7486_v20 = vpop.eup %7485  ;;  %7505 = vrcp.f32 %v4374_v0  ;;  %v7098_v0 = vld [vmem:[%s10478_s14 + $0x8] sm:$0xff]  }
 0xdf1   : > { %v4010_v56 = vmul.f32 %v7486_v20, %v9603_v32  ;;  %v4020_v3 = vpack.c.bf16 %v4012_v33, %v4011_v36  ;;  %v7488_v47 = vpop.eup %7487  ;;  %7507 = vrcp.f32 %v4372_v42 }
 0xdf2   : > { %v7490_v1 = vpop.eup %7489  ;;  %v4397_v39 = vmul.f32 %v7488_v47, %v9487_v49  ;;  %7509 = vrcp.f32 %v4375_v61 }
 0xdf3   : > { %v4019_v50 = vpack.c.bf16 %v4010_v56, %v4009_v24  ;;  %v7492_v6 = vpop.eup %7491  ;;  %v4399_v60 = vmul.f32 %v7490_v1, %v9533_v59  ;;  %v7097_v1 = vld [vmem:[%s10478_s14] sm:$0xff]  }
 0xdf4   : > { %v7494_v32 = vpop.eup %7493  ;;  %v4396_v5 = vmul.f32 %v7492_v6, %v9468_v41  ;;  %6827 = vmatprep.subr.bf16.mxu1 %v7097_v1 }
 0xdf5   : > { %6791 = vmatprep.mubr.bf16.mxu0 %v4019_v50  ;;  %v4398_v30 = vmul.f32 %v7494_v32, %v9513_v23  ;;  %v7496_v22 = vpop.eup %7495  ;;  %6828 = vmatpush3.bf16.msra.mxu1 %v7097_v1 }
 0xdf6   : > { %6792 = vmatmul.mubr.bf16.gmra.mrb[116].mxu0 %v4020_v3  ;;  %v4411_v16 = vpack.c.bf16 %v4397_v39, %v4396_v5  ;;  %v7498_v9 = vpop.eup %7497  ;;  %v4401_v59 = vmul.f32 %v7496_v22, %v9519_v12  ;;  %6829 = vmatprep.subr.bf16.mxu1 %v7098_v0 }
 0xdf7   : > { %6811 = vmatprep.mubr.bf16.mxu0 %v4410_v11  ;;  %v4412_v52 = vpack.c.bf16 %v4399_v60, %v4398_v30  ;;  %v7500_v49 = vpop.eup %7499  ;;  %v4403_v41 = vmul.f32 %v7498_v9, %v9552_v13  ;;  %v10732_v9 = vld [vmem:[#allocation5_spill] sm:$0xff] }
 0xdf8   : > { %v7502_v31 = vpop.eup %7501  ;;  %v4400_v51 = vmul.f32 %v7500_v49, %v9504_v44  ;;  %v10733_v49 = vld [vmem:[#allocation30_spill] sm:$0xff] }
 0xdf9   : > { %v4402_v55 = vmul.f32 %v7502_v31, %v9546_v19  ;;  %v7504_v43 = vpop.eup %7503  ;;  %v4377_v19 = vmax.f32 %v9673_v8, 1e-30  ;;  %6830 = vmatpush3.bf16.msra.mxu1 %v7098_v0  ;;  %v9774_v31 = vld [vmem:[%s10480_s16] sm:$0x1] }
 0xdfa   : > { %v4413_v23 = vpack.c.bf16 %v4401_v59, %v4400_v51  ;;  %v7506_v53 = vpop.eup %7505  ;;  %v4405_v48 = vmul.f32 %v7504_v43, %v9543_v38  ;;  %6982 = vmatprep.subr.msk.bf16.mxu1 %vm741_vm0, %v9774_v31  ;;  %v4645_v59 = vpop.permute.xlu1 %4644 }
 0xdfb   : > { %v4414_v14 = vpack.c.bf16 %v4403_v41, %v4402_v55  ;;  %v7508_v4 = vpop.eup %7507  ;;  %v4406_v62 = vmul.f32 %v7506_v53, %v9593_v57  ;;  %7511 = vrcp.f32 %v4377_v19 }
 0xdfc   : > { %v7510_v46 = vpop.eup %7509  ;;  %v4404_v12 = vmul.f32 %v7508_v4, %v9541_v18 }
 0xdfd   : > { %v4407_v13 = vmul.f32 %v7510_v46, %v9571_v17 }
 0xdfe   : > { %6812 = vmatmul.mubr.bf16.vlgmr.msra.gmra.mrb[120].mxu0 %v4411_v16  ;;  %v4415_v40 = vpack.c.bf16 %v4405_v48, %v4404_v12  ;;  %v4647_v41 = vpop.permute.xlu1 %4646 }
 0xdff   : > { %6815 = vmatprep.mubr.bf16.mxu0 %v4412_v52  ;;  %v4416_v44 = vpack.c.bf16 %v4407_v13, %v4406_v62 }
 0xe02   : > { %v4651_v51 = vpop.permute.xlu1 %4650 }
 0xe05   : > { %v7512_v54 = vpop.eup %7511 }
 0xe06   : > { %6816 = vmatmul.mubr.bf16.gmra.mrb[124].mxu0 %v4413_v23  ;;  %v4409_v57 = vmul.f32 %v7512_v54, %v9568_v29  ;;  %v4655_v23 = vpop.permute.xlu1 %4654 }
 0xe07   : > { %6819 = vmatprep.mubr.bf16.mxu0 %v4414_v14 }
 0xe0a   : > { %v4659_v14 = vpop.permute.xlu1 %4658 }
 0xe0e   : > { %6820 = vmatmul.mubr.bf16.gmra.mrb[128].mxu0 %v4415_v40  ;;  %v9778_v4 = vpop.permute.xlu1 %4662 }
 0xe0f   : > { %6823 = vmatprep.mubr.bf16.mxu0 %v4416_v44 }
 0xe12   : > { %v4667_v48 = vpop.permute.xlu1 %4666 }
 0xe16   : > { %v9780_v12 = vpop.permute.xlu1 %4670 }
 0xe18   : > { %v4359_v15 = vpop.xlane.xlu0 %4358 }
 0xe19   : > { %v4376_v37 = vmax.f32 %v4359_v15, 1e-30  ;;  %v9789_v15 = vld [vmem:[%s10477_s13] ss:$0 sm:$0xff] }
 0xe1b   : > { %7513 = vrcp.f32 %v4376_v37 }
 0xe1c   : > { %v4649_v55 = vpop.permute.xlu0 %4648 }
 0xe20   : > { %v4653_v43 = vpop.permute.xlu0 %4652 }
 0xe24   : > { %v4657_v53 = vpop.permute.xlu0 %4656 }
 0xe25   : > { %v7514_v10 = vpop.eup %7513 }
 0xe26   : > { %v4408_v38 = vmul.f32 %v7514_v10, %v9624_v7 }
 0xe28   : > { %v4417_v26 = vpack.c.bf16 %v4409_v57, %v4408_v38  ;;  %v4661_v46 = vpop.permute.xlu0 %4660 }
 0xe2a   : > { %6824 = vmatmul.mubr.bf16.gmra.mrb[132].mxu0 %v4417_v26 }
 0xe2b   : > { %6881 = vmatprep.mubr.msk.bf16.mxu0 %vm7686_vm3, %v10731_v63  ;;  %vm4611_vm3 = vcmask 130048  }
 0xe2c   : > { %v4665_v62 = vpop.permute.xlu0 %4664 }
 0xe30   : > { %v9782_v13 = vpop.permute.xlu0 %4668 }
 0xe5f   : > { %v9713_v18 = vpop.f32.mrb[104].mxu0 }
 0xe60   : > { %v9715_v17 = vpop.f32.mrb[105].mxu0 }
 0xe61   : > { %v9717_v8 = vpop.f32.mrb[106].mxu0 }
 0xe62   : > { %v9719_v21 = vpop.f32.mrb[107].mxu0 }
 0xe73   : > { %v9721_v20 = vpop.f32.mrb[108].mxu0 }
 0xe74   : > { %v9723_v28 = vpop.f32.mrb[109].mxu0 }
 0xe75   : > { %v9725_v7 = vpop.f32.mrb[110].mxu0 }
 0xe76   : > { %v9727_v29 = vpop.f32.mrb[111].mxu0 }
 0xe88   : > { %v9729_v33 = vpop.f32.mrb[112].mxu0 }
 0xe89   : > { %v9731_v27 = vpop.f32.mrb[113].mxu0 }
 0xe8a   : > { %v9733_v24 = vpop.f32.mrb[114].mxu0 }
 0xe8b   : > { %v9735_v56 = vpop.f32.mrb[115].mxu0 }
 0xec9   : > { %v9737_v2 = vpop.f32.mrb[116].mxu0 }
 0xeca   : > { %v9739_v45 = vpop.f32.mrb[117].mxu0 }
 0xecb   : > { %v9741_v36 = vpop.f32.mrb[118].mxu0 }
 0xecc   : > { %v9743_v50 = vpop.f32.mrb[119].mxu0 }
 0xed1   : > { %v6813_v35 = vpop.f32.mrb[120].mxu0 }
 0xed2   : > { %4567 = vrot.lane.b32.xlu1 %v6813_v35, %s7693_s30  ;;  %v4484_v3 = vpop.f32.mrb[121].mxu0 }
 0xed3   : > { %4563 = vrot.lane.b32.xlu0 %v4484_v3, %s7693_s30  ;;  %v6814_v47 = vpop.f32.mrb[122].mxu0 }
 0xed4   : > { %v4487_v11 = vpop.f32.mrb[123].mxu0 }
 0xed6   : > { %4569 = vrot.lane.b32.xlu1 %v6814_v47, %s7693_s30 }
 0xed9   : > { %v6817_v6 = vpop.f32.mrb[124].mxu0 }
 0xeda   : > { %4565 = vrot.lane.b32.xlu1 %v4487_v11, %s7693_s30  ;;  %4575 = vrot.lane.b32.xlu0 %v6817_v6, %s7693_s30  ;;  %v4500_v25 = vpop.f32.mrb[125].mxu0 }
 0xedb   : > { %v6818_v32 = vpop.f32.mrb[126].mxu0 }
 0xedc   : > { %v4503_v39 = vpop.f32.mrb[127].mxu0 }
 0xede   : > { %4571 = vrot.lane.b32.xlu0 %v4500_v25, %s7693_s30  ;;  %4577 = vrot.lane.b32.xlu1 %v6818_v32, %s7693_s30 }
 0xee1   : > { %v6821_v42 = vpop.f32.mrb[128].mxu0 }
 0xee2   : > { %4573 = vrot.lane.b32.xlu1 %v4503_v39, %s7693_s30  ;;  %4583 = vrot.lane.b32.xlu0 %v6821_v42, %s7693_s30  ;;  %v4516_v60 = vpop.f32.mrb[129].mxu0 }
 0xee3   : > { %v6822_v5 = vpop.f32.mrb[130].mxu0 }
 0xee4   : > { %v4519_v61 = vpop.f32.mrb[131].mxu0 }
 0xee6   : > { %4579 = vrot.lane.b32.xlu0 %v4516_v60, %s7693_s30  ;;  %4585 = vrot.lane.b32.xlu1 %v6822_v5, %s7693_s30 }
 0xeea   : > { %4581 = vrot.lane.b32.xlu1 %v4519_v61, %s7693_s30 }
 0xefd   : > { %v6825_v30 = vpop.f32.mrb[132].mxu0 }
 0xefe   : > { %4591 = vrot.lane.b32.xlu0 %v6825_v30, %s7693_s30  ;;  %v4532_v16 = vpop.f32.mrb[133].mxu0 }
 0xeff   : > { %v6826_v22 = vpop.f32.mrb[134].mxu0 }
 0xf00   : > { %4593 = vrot.lane.b32.xlu1 %v6826_v22, %s7693_s30  ;;  %v4535_v52 = vpop.f32.mrb[135].mxu0 }
 0xf02   : > { %4587 = vrot.lane.b32.xlu0 %v4532_v16, %s7693_s30 }
 0xf04   : > { %4589 = vrot.lane.b32.xlu1 %v4535_v52, %s7693_s30 }
 0xf06   : > { %4672 = vrot.lane.b32.xlu0 %v10732_v9, %s7692_s2 }
 0xf08   : > { %4674 = vrot.lane.b32.xlu1 %v10733_v49, %s7692_s2  ;;  %s7695_s2 = smov 126  }
 0xf44   : > { %v4568_v40 = vpop.permute.xlu1 %4567 }
 0xf45   : > { %v4614_v44 = vsel %vm4611_vm3, %v9713_v18, %v4568_v40  ;;  %v4564_v19 = vpop.permute.xlu0 %4563 }
 0xf46   : > { %v4694_v37 = vadd.f32 %v4649_v55, %v4614_v44  ;;  %v4612_v54 = vsel %vm4611_vm3, %v9715_v17, %v4564_v19 }
 0xf47   : > { %v4692_v57 = vadd.f32 %v4645_v59, %v4612_v54 }
 0xf48   : > { %v4570_v10 = vpop.permute.xlu1 %4569  ;;  %v4717_v38 = vadd.f32 %v9789_v15, %v4694_v37 }
 0xf49   : > { %v4615_v26 = vsel %vm4611_vm3, %v9717_v8, %v4570_v10  ;;  %v4715_v11 = vadd.f32 %v9789_v15, %v4692_v57 }
 0xf4a   : > { %v4695_v35 = vadd.f32 %v4651_v51, %v4615_v26  ;;  %7515 = vtanh.f32 %v4717_v38 }
 0xf4c   : > { %v4718_v18 = vadd.f32 %v9789_v15, %v4695_v35  ;;  %v4566_v3 = vpop.permute.xlu1 %4565  ;;  %v4576_v47 = vpop.permute.xlu0 %4575 }
 0xf4d   : > { %v4613_v1 = vsel %vm4611_vm3, %v9719_v21, %v4566_v3  ;;  %v4618_v17 = vsel %vm4611_vm3, %v9721_v20, %v4576_v47 }
 0xf4e   : > { %7517 = vtanh.f32 %v4718_v18  ;;  %v4693_v6 = vadd.f32 %v4647_v41, %v4613_v1  ;;  %v4698_v25 = vadd.f32 %v4657_v53, %v4618_v17 }
 0xf4f   : > { %7519 = vtanh.f32 %v4715_v11 }
 0xf50   : > { %v4716_v32 = vadd.f32 %v9789_v15, %v4693_v6  ;;  %v4578_v8 = vpop.permute.xlu1 %4577  ;;  %v4572_v39 = vpop.permute.xlu0 %4571  ;;  %v4721_v0 = vadd.f32 %v9789_v15, %v4698_v25 }
 0xf51   : > { %v4619_v42 = vsel %vm4611_vm3, %v9725_v7, %v4578_v8  ;;  %v4616_v60 = vsel %vm4611_vm3, %v9723_v28, %v4572_v39 }
 0xf52   : > { %7521 = vtanh.f32 %v4716_v32  ;;  %v4699_v21 = vadd.f32 %v4659_v14, %v4619_v42  ;;  %v4696_v5 = vadd.f32 %v4653_v43, %v4616_v60 }
 0xf53   : > { %7523 = vtanh.f32 %v4721_v0 }
 0xf54   : > { %v4722_v20 = vadd.f32 %v9789_v15, %v4699_v21  ;;  %v4719_v61 = vadd.f32 %v9789_v15, %v4696_v5  ;;  %v4574_v30 = vpop.permute.xlu1 %4573  ;;  %v4584_v16 = vpop.permute.xlu0 %4583 }
 0xf55   : > { %v4617_v22 = vsel %vm4611_vm3, %v9727_v29, %v4574_v30  ;;  %v4622_v52 = vsel %vm4611_vm3, %v9729_v33, %v4584_v16  ;;  %v7516_v28 = vpop.eup %7515 }
 0xf56   : > { %7525 = vtanh.f32 %v4722_v20  ;;  %v4697_v7 = vadd.f32 %v4655_v23, %v4617_v22  ;;  %v4702_v9 = vadd.f32 %v4665_v62, %v4622_v52 }
 0xf57   : > { %7527 = vtanh.f32 %v4719_v61 }
 0xf58   : > { %v7518_v49 = vpop.eup %7517  ;;  %v4720_v59 = vadd.f32 %v9789_v15, %v4697_v7  ;;  %v4586_v41 = vpop.permute.xlu1 %4585  ;;  %v4725_v55 = vadd.f32 %v9789_v15, %v4702_v9 }
 0xf59   : > { %v4580_v51 = vpop.permute.xlu0 %4579  ;;  %v4623_v43 = vsel %vm4611_vm3, %v9733_v24, %v4586_v41  ;;  %v4748_v14 = vpack.c.bf16 %v7518_v49, %v7516_v28  ;;  %v7520_v53 = vpop.eup %7519 }
 0xf5a   : > { %v4620_v29 = vsel %vm4611_vm3, %v9731_v27, %v4580_v51  ;;  %7529 = vtanh.f32 %v4720_v59  ;;  %v4703_v33 = vadd.f32 %v4667_v48, %v4623_v43  ;;  %v4927_v27 = vsel %vm741_vm0, %v9774_v31, 0 }
 0xf5b   : > { %v4700_v23 = vadd.f32 %v4661_v46, %v4620_v29  ;;  %7531 = vtanh.f32 %v4725_v55  ;;  %vm4901_vm0 = vcmask 15360  }
 0xf5c   : > { %v7522_v62 = vpop.eup %7521  ;;  %v4726_v40 = vadd.f32 %v9789_v15, %v4703_v33  ;;  %v4582_v44 = vpop.permute.xlu1 %4581 }
 0xf5d   : > { %v4723_v19 = vadd.f32 %v9789_v15, %v4700_v23  ;;  %v4621_v37 = vsel %vm4611_vm3, %v9735_v56, %v4582_v44  ;;  %v4747_v54 = vpack.c.bf16 %v7522_v62, %v7520_v53  ;;  %v7524_v48 = vpop.eup %7523 }
 0xf5e   : > { %7533 = vtanh.f32 %v4726_v40  ;;  %v4701_v24 = vadd.f32 %v9778_v4, %v4621_v37 }
 0xf5f   : > { %6831 = vmatprep.mubr.msk.bf16.mxu1 %vm3539_vm11, %v4747_v54  ;;  %7535 = vtanh.f32 %v4723_v19 }
 0xf60   : > { %v7526_v46 = vpop.eup %7525  ;;  %v4724_v10 = vadd.f32 %v9789_v15, %v4701_v24  ;;  %6832 = vmatmul.mubr.msk.bf16.vlgmr.msra.gmra.mrb[68].mxu1 %vm3539_vm11, %v4748_v14 }
 0xf61   : > { %v4750_v38 = vpack.c.bf16 %v7526_v46, %v7524_v48  ;;  %6848 = vmatpush3.bf16.msra.mxu1 %v4927_v27  ;;  %v7528_v57 = vpop.eup %7527 }
 0xf62   : > { %7537 = vtanh.f32 %v4724_v10 }
 0xf64   : > { %v7530_v56 = vpop.eup %7529 }
 0xf65   : > { %v4749_v26 = vpack.c.bf16 %v7530_v56, %v7528_v57  ;;  %v7532_v35 = vpop.eup %7531 }
 0xf67   : > { %6835 = vmatprep.mubr.msk.bf16.mxu1 %vm3539_vm11, %v4749_v26 }
 0xf68   : > { %v7534_v4 = vpop.eup %7533  ;;  %6836 = vmatmul.mubr.msk.bf16.gmra.mrb[72].mxu1 %vm3539_vm11, %v4750_v38 }
 0xf69   : > { %v4752_v31 = vpack.c.bf16 %v7534_v4, %v7532_v35  ;;  %v7536_v18 = vpop.eup %7535  ;;  %v5026_v4 = vld [vmem:[%s10479_s15] sm:$0x1] }
 0xf6c   : > { %v7538_v3 = vpop.eup %7537 }
 0xf6d   : > { %v4751_v47 = vpack.c.bf16 %v7538_v3, %v7536_v18 }
 0xf6f   : > { %6839 = vmatprep.mubr.msk.bf16.mxu1 %vm3539_vm11, %v4751_v47 }
 0xf70   : > { %6840 = vmatmul.mubr.msk.bf16.gmra.mrb[76].mxu1 %vm3539_vm11, %v4752_v31  ;;  %v4592_v11 = vpop.permute.xlu0 %4591 }
 0xf71   : > { %v4626_v39 = vsel %vm4611_vm3, %v9737_v2, %v4592_v11 }
 0xf72   : > { %v4594_v1 = vpop.permute.xlu1 %4593 }
 0xf73   : > { %v4627_v5 = vsel %vm4611_vm3, %v9741_v36, %v4594_v1 }
 0xf74   : > { %v4588_v17 = vpop.permute.xlu0 %4587 }
 0xf75   : > { %v4624_v6 = vsel %vm4611_vm3, %v9739_v45, %v4588_v17 }
 0xf76   : > { %v4704_v25 = vadd.f32 %v9782_v13, %v4624_v6  ;;  %v4590_v32 = vpop.permute.xlu1 %4589 }
 0xf77   : > { %v4625_v8 = vsel %vm4611_vm3, %v9743_v50, %v4590_v32 }
 0xf78   : > { %v4727_v0 = vadd.f32 %v9789_v15, %v4704_v25  ;;  %v4705_v42 = vadd.f32 %v9780_v12, %v4625_v8  ;;  %v4673_v60 = vpop.permute.xlu0 %4672  ;;  %v10743_v25 = vmov 1   ;;  %v10744_v8 = vmov 0  }
 0xf79   : > { %v4706_v21 = vadd.f32 %v4673_v60, %v4626_v39 }
 0xf7a   : > { %v4728_v45 = vadd.f32 %v9789_v15, %v4705_v42  ;;  %v4675_v20 = vpop.permute.xlu1 %4674  ;;  %7539 = vtanh.f32 %v4727_v0 }
 0xf7b   : > { %v4729_v13 = vadd.f32 %v9789_v15, %v4706_v21  ;;  %v4707_v61 = vadd.f32 %v4675_v20, %v4627_v5 }
 0xf7c   : > { %7541 = vtanh.f32 %v4728_v45 }
 0xf7d   : > { %v4730_v50 = vadd.f32 %v9789_v15, %v4707_v61  ;;  %7543 = vtanh.f32 %v4729_v13 }
 0xf7f   : > { %7545 = vtanh.f32 %v4730_v50 }
 0xf84   : > { %v7540_v2 = vpop.eup %7539 }
 0xf86   : > { %v7542_v30 = vpop.eup %7541 }
 0xf87   : > { %v4753_v12 = vpack.c.bf16 %v7542_v30, %v7540_v2  ;;  %v7544_v16 = vpop.eup %7543 }
 0xf89   : > { %v7546_v22 = vpop.eup %7545  ;;  %6843 = vmatprep.mubr.msk.bf16.mxu1 %vm3539_vm11, %v4753_v12 }
 0xf8a   : > { %v4754_v36 = vpack.c.bf16 %v7546_v22, %v7544_v16  ;;  %v10745_v22 = vld [vmem:[#allocation13_spill] sm:$0xff] }
 0xf8c   : > { %6844 = vmatmul.mubr.msk.bf16.gmra.mrb[80].mxu1 %vm3539_vm11, %v4754_v36 }
0x1033   : > { %v9850_v52 = vpop.f32.mrb[68].mxu1 }
0x1034   : > { %v9852_v7 = vpop.f32.mrb[69].mxu1 }
0x1035   : > { %v9854_v9 = vpop.f32.mrb[70].mxu1 }
0x1036   : > { %v9858_v15 = vpack.c.bf16 %v9854_v9, %v9850_v52  ;;  %v9860_v28 = vpop.f32.mrb[71].mxu1 }
0x1037   : > { %v9864_v49 = vpack.c.bf16 %v9860_v28, %v9852_v7 }
0x1038   : > { %10734 = vst [vmem:[#allocation7_spill] sm:$0xff] %v9858_v15  ;;  %5696 = vrot.lane.b32.xlu1 %v9858_v15, %s7694_s20  ;;  %v4906_v33 = vsel %vm4901_vm0, %v9858_v15, 0 }
0x1039   : > { %10735 = vst [vmem:[#allocation4_spill] sm:$0xff] %v9864_v49  ;;  %5694 = vrot.lane.b32.xlu0 %v9864_v49, %s7694_s20  ;;  %6849 = vmatprep.mubr.msk.bf16.mxu1 %vm4901_vm0, %v9864_v49  ;;  %v4903_v59 = vsel %vm4901_vm0, %v9864_v49, 0  ;;  %v10758_v49 = vld [vmem:[#allocation25_spill] sm:$0xff] }
0x103a   : > { %6850 = vmatmul.mubr.msk.bf16.vlgmr.msra.gmra.mrb[84].mxu1 %vm4901_vm0, %v9858_v15  ;;  %6866 = vmatpush3.bf16.xpose.msra.mxu0 %v4903_v59  ;;  %v10746_v59 = vld [vmem:[#allocation12_spill] sm:$0xff] }
0x103b   : > { %v9876_v41 = vpop.f32.mrb[72].mxu1  ;;  %6867 = vmatprep.subr.bf16.mxu0 %v10731_v63 }
0x103c   : > { %v9879_v51 = vpop.f32.mrb[73].mxu1 }
0x103d   : > { %v9881_v55 = vpop.f32.mrb[74].mxu1 }
0x103e   : > { %v9885_v43 = vpack.c.bf16 %v9881_v55, %v9876_v41  ;;  %v9887_v29 = vpop.f32.mrb[75].mxu1 }
0x103f   : > { %v9891_v14 = vpack.c.bf16 %v9887_v29, %v9879_v51 }
0x1040   : > { %10736 = vst [vmem:[#allocation33_spill] sm:$0xff] %v9885_v43  ;;  %5700 = vrot.lane.b32.xlu1 %v9885_v43, %s7694_s20  ;;  %v4912_v54 = vsel %vm4901_vm0, %v9885_v43, 0 }
0x1041   : > { %10737 = vst [vmem:[#allocation32_spill] sm:$0xff] %v9891_v14  ;;  %5698 = vrot.lane.b32.xlu0 %v9891_v14, %s7694_s20  ;;  %6853 = vmatprep.mubr.msk.bf16.mxu1 %vm4901_vm0, %v9891_v14  ;;  %v4909_v37 = vsel %vm4901_vm0, %v9891_v14, 0 }
0x1042   : > { %6854 = vmatmul.mubr.msk.bf16.gmra.mrb[88].mxu1 %vm4901_vm0, %v9885_v43  ;;  %6868 = vmatpush3.bf16.xpose.msra.mxu0 %v4906_v33 }
0x1043   : > { %v9903_v23 = vpop.f32.mrb[76].mxu1  ;;  %6869 = vmatprep.subr.bf16.mxu0 %v10731_v63 }
0x1044   : > { %v9906_v53 = vpop.f32.mrb[77].mxu1 }
0x1045   : > { %v9908_v62 = vpop.f32.mrb[78].mxu1 }
0x1046   : > { %v9912_v40 = vpack.c.bf16 %v9908_v62, %v9903_v23  ;;  %v9914_v44 = vpop.f32.mrb[79].mxu1 }
0x1047   : > { %v9918_v19 = vpack.c.bf16 %v9914_v44, %v9906_v53 }
0x1048   : > { %10738 = vst [vmem:[#allocation8_spill] sm:$0xff] %v9912_v40  ;;  %v4918_v10 = vsel %vm4901_vm0, %v9912_v40, 0 }
0x1049   : > { %10739 = vst [vmem:[#allocation6_spill] sm:$0xff] %v9918_v19  ;;  %5702 = vrot.lane.b32.xlu0 %v9918_v19, %s7694_s20  ;;  %6857 = vmatprep.mubr.msk.bf16.mxu1 %vm4901_vm0, %v9918_v19  ;;  %v4915_v24 = vsel %vm4901_vm0, %v9918_v19, 0  ;;  %v10756_v19 = vld [vmem:[#allocation23_spill] sm:$0xff] }
0x104a   : > { %6858 = vmatmul.mubr.msk.bf16.gmra.mrb[92].mxu1 %vm4901_vm0, %v9912_v40  ;;  %6870 = vmatpush3.bf16.xpose.msra.mxu0 %v4909_v37 }
0x104b   : > { %6871 = vmatprep.subr.bf16.mxu0 %v10731_v63 }
0x1052   : > { %6872 = vmatpush3.bf16.xpose.msra.mxu0 %v4912_v54 }
0x1053   : > { %6873 = vmatprep.subr.bf16.mxu0 %v10731_v63 }
0x105a   : > { %6874 = vmatpush3.bf16.xpose.msra.mxu0 %v4915_v24 }
0x105b   : > { %6875 = vmatprep.subr.bf16.mxu0 %v10731_v63 }
0x105f   : > { %v9935_v27 = vpop.f32.mrb[80].mxu1 }
0x1060   : > { %v9937_v48 = vpop.f32.mrb[81].mxu1 }
0x1061   : > { %v9939_v46 = vpop.f32.mrb[82].mxu1 }
0x1062   : > { %10740 = vst [vmem:[#allocation10_spill] sm:$0xff] %v9939_v46  ;;  %v9945_v38 = vpack.c.bf16 %v9939_v46, %v9935_v27  ;;  %v9947_v57 = vpop.f32.mrb[83].mxu1  ;;  %6876 = vmatpush3.bf16.xpose.msra.mxu0 %v4918_v10 }
0x1063   : > { %10741 = vst [vmem:[#allocation27_spill] sm:$0xff] %v9947_v57  ;;  %v9951_v56 = vpack.c.bf16 %v9947_v57, %v9937_v48  ;;  %6877 = vmatprep.subr.bf16.mxu0 %v10731_v63 }
0x1064   : > { %v4924_v35 = vsel %vm4901_vm0, %v9945_v38, 0 }
0x1065   : > { %10742 = vst [vmem:[#allocation28_spill] sm:$0xff] %v9951_v56  ;;  %6861 = vmatprep.mubr.msk.bf16.mxu1 %vm4901_vm0, %v9951_v56  ;;  %v4921_v26 = vsel %vm4901_vm0, %v9951_v56, 0 }
0x1066   : > { %6862 = vmatmul.mubr.msk.bf16.gmra.mrb[96].mxu1 %vm4901_vm0, %v9945_v38 }
0x106a   : > { %6878 = vmatpush3.bf16.xpose.msra.mxu0 %v4921_v26 }
0x106b   : > { %6879 = vmatprep.subr.bf16.mxu0 %v10731_v63 }
0x1072   : > { %6880 = vmatpush3.bf16.xpose.msra.mxu0 %v4924_v35 }
0x1079   : > { %6882 = vmatmul.mubr.msk.bf16.vlgmr.msra.gmra.mrb[136].mxu0 %vm4901_vm0, %v5026_v4 }
0x10aa   : > { %v5697_v18 = vpop.permute.xlu1 %5696 }
0x10ab   : > { %v5695_v31 = vpop.permute.xlu0 %5694 }
0x10ac   : > { %6885 = vmatprep.subr.bf16.mxu1 %v5695_v31 }
0x10ad   : > { %6886 = vmatpush3.bf16.msra.mxu1 %v5695_v31 }
0x10ae   : > { %6887 = vmatprep.subr.bf16.mxu1 %v5697_v18 }
0x10b1   : > { %6888 = vmatpush3.bf16.msra.mxu1 %v5697_v18 }
0x10b2   : > { %v5701_v47 = vpop.permute.xlu1 %5700 }
0x10b3   : > { %v5699_v3 = vpop.permute.xlu0 %5698 }
0x10b4   : > { %6889 = vmatprep.subr.bf16.mxu1 %v5699_v3 }
0x10b5   : > { %6890 = vmatpush3.bf16.msra.mxu1 %v5699_v3 }
0x10b6   : > { %6891 = vmatprep.subr.bf16.mxu1 %v5701_v47 }
0x10b9   : > { %6892 = vmatpush3.bf16.msra.mxu1 %v5701_v47 }
0x10bb   : > { %v5703_v63 = vpop.permute.xlu0 %5702 }
0x10bc   : > { %6893 = vmatprep.subr.bf16.mxu1 %v5703_v63 }
0x10bd   : > { %6894 = vmatpush3.bf16.msra.mxu1 %v5703_v63 }
0x110d   : > { %v6851_v11 = vpop.f32.mrb[84].mxu1 }
0x110e   : > { %5082 = vperm.xlu1 %7060, %v6851_v11   ;;  %5395 = vperm.xlu0 %7059, %v6851_v11   ;;  %v4963_v1 = vpop.f32.mrb[85].mxu1 }
0x110f   : > { %v6852_v17 = vpop.f32.mrb[86].mxu1 }
0x1110   : > { %v4966_v6 = vpop.f32.mrb[87].mxu1 }
0x1112   : > { %7062 = vset.pattern.permute.xlu1 %v10743_v25  ;;  %5387 = vperm.xlu0 %7059, %v4963_v1  }
0x1113   : > { %5399 = vperm.xlu1 %7062, %v6852_v17  }
0x1115   : > { %v6855_v32 = vpop.f32.mrb[88].mxu1 }
0x1116   : > { %7061 = vset.pattern.permute.xlu0 %v10744_v8  ;;  %v4979_v39 = vpop.f32.mrb[89].mxu1 }
0x1117   : > { %5072 = vperm.xlu0 %7061, %v4963_v1   ;;  %5391 = vperm.xlu1 %7062, %v4966_v6   ;;  %v6856_v0 = vpop.f32.mrb[90].mxu1  ;;  %v10747_v1 = vld [vmem:[#allocation14_spill] sm:$0xff] }
0x1118   : > { %v4982_v42 = vpop.f32.mrb[91].mxu1 }
0x111b   : > { %5087 = vperm.xlu0 %7061, %v6852_v17   ;;  %7063 = vset.pattern.permute.xlu1 %v10744_v8 }
0x111c   : > { %5077 = vperm.xlu1 %7063, %v4966_v6  }
0x111d   : > { %v6859_v60 = vpop.f32.mrb[92].mxu1 }
0x111e   : > { %v4995_v21 = vpop.f32.mrb[93].mxu1 }
0x111f   : > { %7064 = vset.pattern.permute.xlu0 %v10743_v25  ;;  %v6860_v5 = vpop.f32.mrb[94].mxu1 }
0x1120   : > { %5102 = vperm.xlu1 %7063, %v6855_v32   ;;  %5411 = vperm.xlu0 %7064, %v6855_v32   ;;  %v4998_v45 = vpop.f32.mrb[95].mxu1 }
0x1124   : > { %5092 = vperm.xlu1 %7063, %v4979_v39   ;;  %5403 = vperm.xlu0 %7064, %v4979_v39  }
0x1128   : > { %7065 = vset.pattern.permute.xlu1 %v10743_v25  ;;  %7066 = vset.pattern.permute.xlu0 %v10744_v8 }
0x1129   : > { %5107 = vperm.xlu0 %7066, %v6856_v0   ;;  %5415 = vperm.xlu1 %7065, %v6856_v0  }
0x112d   : > { %5097 = vperm.xlu0 %7066, %v4982_v42   ;;  %5407 = vperm.xlu1 %7065, %v4982_v42  }
0x1131   : > { %7067 = vset.pattern.permute.xlu0 %v10743_v25  ;;  %7068 = vset.pattern.permute.xlu1 %v10744_v8 }
0x1132   : > { %5122 = vperm.xlu1 %7068, %v6859_v60   ;;  %5427 = vperm.xlu0 %7067, %v6859_v60   ;;  %v10748_v60 = vld [vmem:[#allocation15_spill] sm:$0xff] }
0x1136   : > { %5112 = vperm.xlu1 %7068, %v4995_v21   ;;  %5419 = vperm.xlu0 %7067, %v4995_v21  }
0x1139   : > { %v6863_v20 = vpop.f32.mrb[96].mxu1 }
0x113a   : > { %7069 = vset.pattern.permute.xlu1 %v10743_v25  ;;  %7070 = vset.pattern.permute.xlu0 %v10744_v8  ;;  %v5011_v13 = vpop.f32.mrb[97].mxu1 }
0x113b   : > { %5127 = vperm.xlu0 %7070, %v6860_v5   ;;  %5431 = vperm.xlu1 %7069, %v6860_v5   ;;  %v6864_v61 = vpop.f32.mrb[98].mxu1 }
0x113c   : > { %v5014_v50 = vpop.f32.mrb[99].mxu1 }
0x113f   : > { %5117 = vperm.xlu0 %7070, %v4998_v45   ;;  %5423 = vperm.xlu1 %7069, %v4998_v45  }
0x1143   : > { %7071 = vset.pattern.permute.xlu0 %v10743_v25  ;;  %7072 = vset.pattern.permute.xlu1 %v10744_v8 }
0x1144   : > { %5142 = vperm.xlu1 %7072, %v6863_v20   ;;  %5443 = vperm.xlu0 %7071, %v6863_v20  }
0x1148   : > { %5132 = vperm.xlu1 %7072, %v5011_v13   ;;  %5435 = vperm.xlu0 %7071, %v5011_v13  }
0x114c   : > { %7073 = vset.pattern.permute.xlu1 %v10743_v25  ;;  %7074 = vset.pattern.permute.xlu0 %v10744_v8  ;;  %v5064_v2 = vpop.f32.mrb[136].mxu0 }
0x114d   : > { %5147 = vperm.xlu0 %7074, %v6864_v61   ;;  %5447 = vperm.xlu1 %7073, %v6864_v61   ;;  %v6883_v30 = vpop.f32.mrb[137].mxu0  ;;  %v9983_v36 = vrot.slane %v5064_v2, %v10745_v22  ;;  %v9986_v33 = vrot.slane %v5064_v2, %v10746_v59 }
0x114e   : > { %v5067_v12 = vpop.f32.mrb[138].mxu0 }
0x114f   : > { %v6884_v16 = vpop.f32.mrb[139].mxu0  ;;  %v10749_v12 = vld [vmem:[#allocation16_spill] sm:$0xff] }
0x1151   : > { %5137 = vperm.xlu0 %7074, %v5014_v50   ;;  %5439 = vperm.xlu1 %7073, %v5014_v50  }
0x1155   : > { %7075 = vset.pattern.permute.xlu0 %v10743_v25 }
0x118d   : > { %v5083_v37 = vpop.permute.xlu1 %5082  ;;  %v5396_v54 = vpop.permute.xlu0 %5395 }
0x118e   : > { %v5156_v24 = vadd.f32 %v9983_v36, %v5083_v37  ;;  %v5456_v10 = vadd.f32 %v9986_v33, %v5396_v54 }
0x1190   : > { %v5172_v26 = vmul.f32 0.2, %v5156_v24  ;;  %v5472_v35 = vmul.f32 0.2, %v5456_v10 }
0x1191   : > { %v5388_v4 = vpop.permute.xlu0 %5387 }
0x1192   : > { %v5488_v31 = vmax.f32 %v5456_v10, %v5472_v35  ;;  %v5454_v18 = vadd.f32 %v9986_v33, %v5388_v4  ;;  %v5400_v3 = vpop.permute.xlu1 %5399  ;;  %v5188_v63 = vmax.f32 %v5156_v24, %v5172_v26 }
0x1193   : > { %v5457_v47 = vadd.f32 %v9986_v33, %v5400_v3  ;;  %v10750_v3 = vld [vmem:[#allocation17_spill] sm:$0xff] }
0x1194   : > { %v5470_v11 = vmul.f32 0.2, %v5454_v18  ;;  %v9993_v17 = vadd.f32 %v5488_v31, %v10747_v1  ;;  %v10002_v5 = vadd.f32 %v5188_v63, %v10747_v1 }
0x1195   : > { %v5473_v6 = vmul.f32 0.2, %v5457_v47 }
0x1196   : > { %v5486_v25 = vmax.f32 %v5454_v18, %v5470_v11  ;;  %v5073_v32 = vpop.permute.xlu0 %5072  ;;  %v5392_v8 = vpop.permute.xlu1 %5391  ;;  %5522 = vmax.xlane.f32.xlu0 %v9993_v17 }
0x1197   : > { %v5154_v39 = vadd.f32 %v9983_v36, %v5073_v32  ;;  %v5455_v0 = vadd.f32 %v9986_v33, %v5392_v8  ;;  %v5489_v42 = vmax.f32 %v5457_v47, %v5473_v6 }
0x1198   : > { %v9999_v21 = vadd.f32 %v5486_v25, %v10748_v60 }
0x1199   : > { %v5170_v45 = vmul.f32 0.2, %v5154_v39  ;;  %v5471_v20 = vmul.f32 0.2, %v5455_v0  ;;  %v10009_v16 = vadd.f32 %v5489_v42, %v10749_v12 }
0x119a   : > { %v5088_v13 = vpop.permute.xlu0 %5087  ;;  %5518 = vmax.xlane.f32.xlu1 %v9999_v21  ;;  %5222 = vmax.xlane.f32.xlu0 %v10002_v5 }
0x119b   : > { %v5186_v61 = vmax.f32 %v5154_v39, %v5170_v45  ;;  %v5157_v50 = vadd.f32 %v9983_v36, %v5088_v13  ;;  %v5078_v2 = vpop.permute.xlu1 %5077  ;;  %v5487_v22 = vmax.f32 %v5455_v0, %v5471_v20 }
0x119c   : > { %v5155_v30 = vadd.f32 %v9983_v36, %v5078_v2 }
0x119d   : > { %v5173_v59 = vmul.f32 0.2, %v5157_v50  ;;  %v10012_v37 = vadd.f32 %v5186_v61, %v10748_v60  ;;  %v10022_v47 = vadd.f32 %v5487_v22, %v10750_v3  ;;  %v10751_v60 = vld [vmem:[#allocation18_spill] sm:$0xff] }
0x119e   : > { %v5171_v54 = vmul.f32 0.2, %v5155_v30  ;;  %5524 = vmax.xlane.f32.xlu1 %v10009_v16 }
0x119f   : > { %v5189_v24 = vmax.f32 %v5157_v50, %v5173_v59  ;;  %v5103_v10 = vpop.permute.xlu1 %5102  ;;  %v5412_v26 = vpop.permute.xlu0 %5411  ;;  %5218 = vmax.xlane.f32.xlu0 %v10012_v37 }
0x11a0   : > { %v5160_v35 = vadd.f32 %v9983_v36, %v5103_v10  ;;  %v5460_v4 = vadd.f32 %v9986_v33, %v5412_v26  ;;  %v5187_v31 = vmax.f32 %v5155_v30, %v5171_v54 }
0x11a1   : > { %v10019_v18 = vadd.f32 %v5189_v24, %v10749_v12 }
0x11a2   : > { %v5176_v63 = vmul.f32 0.2, %v5160_v35  ;;  %v5476_v11 = vmul.f32 0.2, %v5460_v4  ;;  %v10028_v8 = vadd.f32 %v5187_v31, %v10750_v3 }
0x11a3   : > { %v5093_v1 = vpop.permute.xlu1 %5092  ;;  %v5404_v6 = vpop.permute.xlu0 %5403  ;;  %5224 = vmax.xlane.f32.xlu1 %v10019_v18  ;;  %5520 = vmax.xlane.f32.xlu0 %v10022_v47 }
0x11a4   : > { %v5492_v25 = vmax.f32 %v5460_v4, %v5476_v11  ;;  %v5458_v32 = vadd.f32 %v9986_v33, %v5404_v6  ;;  %v5192_v39 = vmax.f32 %v5160_v35, %v5176_v63  ;;  %v5158_v0 = vadd.f32 %v9983_v36, %v5093_v1  ;;  %v10752_v4 = vld [vmem:[#allocation19_spill] sm:$0xff]  ;;  %v10753_v1 = vld [vmem:[#allocation20_spill] sm:$0xff] }
0x11a6   : > { %v5474_v42 = vmul.f32 0.2, %v5458_v32  ;;  %v10032_v45 = vadd.f32 %v5492_v25, %v10751_v60  ;;  %v5174_v2 = vmul.f32 0.2, %v5158_v0  ;;  %v10039_v12 = vadd.f32 %v5192_v39, %v10751_v60 }
0x11a7   : > { %5220 = vmax.xlane.f32.xlu1 %v10028_v8 }
0x11a8   : > { %v5108_v20 = vpop.permute.xlu0 %5107  ;;  %v5416_v13 = vpop.permute.xlu1 %5415  ;;  %5530 = vmax.xlane.f32.xlu0 %v10032_v45  ;;  %v5490_v30 = vmax.f32 %v5458_v32, %v5474_v42  ;;  %v5190_v35 = vmax.f32 %v5158_v0, %v5174_v2 }
0x11a9   : > { %v5161_v61 = vadd.f32 %v9983_v36, %v5108_v20  ;;  %v5461_v50 = vadd.f32 %v9986_v33, %v5416_v13 }
0x11aa   : > { %v10044_v31 = vadd.f32 %v5490_v30, %v10752_v4  ;;  %v10055_v42 = vadd.f32 %v5190_v35, %v10752_v4 }
0x11ab   : > { %v5177_v22 = vmul.f32 0.2, %v5161_v61  ;;  %v5477_v59 = vmul.f32 0.2, %v5461_v50 }
0x11ac   : > { %v5098_v54 = vpop.permute.xlu0 %5097  ;;  %v5408_v24 = vpop.permute.xlu1 %5407  ;;  %5230 = vmax.xlane.f32.xlu0 %v10039_v12 }
0x11ad   : > { %v5493_v10 = vmax.f32 %v5461_v50, %v5477_v59  ;;  %v5459_v26 = vadd.f32 %v9986_v33, %v5408_v24  ;;  %v5193_v3 = vmax.f32 %v5161_v61, %v5177_v22  ;;  %v5159_v63 = vadd.f32 %v9983_v36, %v5098_v54  ;;  %v10754_v24 = vld [vmem:[#allocation21_spill] sm:$0xff] }
0x11af   : > { %v5475_v11 = vmul.f32 0.2, %v5459_v26  ;;  %v10048_v6 = vadd.f32 %v5493_v10, %v10753_v1  ;;  %v5175_v60 = vmul.f32 0.2, %v5159_v63  ;;  %v10058_v13 = vadd.f32 %v5193_v3, %v10753_v1  ;;  %v10755_v3 = vld [vmem:[#allocation22_spill] sm:$0xff] }
0x11b0   : > { %5526 = vmax.xlane.f32.xlu0 %v10044_v31 }
0x11b1   : > { %v5123_v25 = vpop.permute.xlu1 %5122  ;;  %v5428_v32 = vpop.permute.xlu0 %5427  ;;  %5532 = vmax.xlane.f32.xlu1 %v10048_v6  ;;  %v5491_v20 = vmax.f32 %v5459_v26, %v5475_v11  ;;  %v5191_v54 = vmax.f32 %v5159_v63, %v5175_v60 }
0x11b2   : > { %v5164_v39 = vadd.f32 %v9983_v36, %v5123_v25  ;;  %v5464_v0 = vadd.f32 %v9986_v33, %v5428_v32 }
0x11b3   : > { %v10064_v10 = vadd.f32 %v5491_v20, %v10754_v24 }
0x11b4   : > { %v5180_v61 = vmul.f32 0.2, %v5164_v39  ;;  %v5480_v50 = vmul.f32 0.2, %v5464_v0  ;;  %5226 = vmax.xlane.f32.xlu0 %v10055_v42 }
0x11b5   : > { %v5113_v2 = vpop.permute.xlu1 %5112  ;;  %v5420_v30 = vpop.permute.xlu0 %5419  ;;  %5232 = vmax.xlane.f32.xlu1 %v10058_v13 }
0x11b6   : > { %v5496_v22 = vmax.f32 %v5464_v0, %v5480_v50  ;;  %v5462_v59 = vadd.f32 %v9986_v33, %v5420_v30  ;;  %v5196_v35 = vmax.f32 %v5164_v39, %v5180_v61  ;;  %v5162_v26 = vadd.f32 %v9983_v36, %v5113_v2 }
0x11b7   : > { %v10075_v0 = vadd.f32 %v5191_v54, %v10754_v24 }
0x11b8   : > { %v5478_v4 = vmul.f32 0.2, %v5462_v59  ;;  %v10068_v11 = vadd.f32 %v5496_v22, %v10755_v3  ;;  %v5178_v39 = vmul.f32 0.2, %v5162_v26  ;;  %v10078_v20 = vadd.f32 %v5196_v35, %v10755_v3 }
0x11b9   : > { %5528 = vmax.xlane.f32.xlu1 %v10064_v10 }
0x11ba   : > { %v5128_v1 = vpop.permute.xlu0 %5127  ;;  %v5432_v25 = vpop.permute.xlu1 %5431  ;;  %5538 = vmax.xlane.f32.xlu0 %v10068_v11  ;;  %v5494_v60 = vmax.f32 %v5462_v59, %v5478_v4  ;;  %v10757_v4 = vld [vmem:[#allocation24_spill] sm:$0xff] }
0x11bb   : > { %v5165_v32 = vadd.f32 %v9983_v36, %v5128_v1  ;;  %v5465_v63 = vadd.f32 %v9986_v33, %v5432_v25  ;;  %v5194_v25 = vmax.f32 %v5162_v26, %v5178_v39 }
0x11bc   : > { %v10084_v54 = vadd.f32 %v5494_v60, %v10756_v19 }
0x11bd   : > { %v5181_v61 = vmul.f32 0.2, %v5165_v32  ;;  %v5481_v50 = vmul.f32 0.2, %v5465_v63  ;;  %5228 = vmax.xlane.f32.xlu1 %v10075_v0  ;;  %v10095_v39 = vadd.f32 %v5194_v25, %v10756_v19 }
0x11be   : > { %v5118_v2 = vpop.permute.xlu0 %5117  ;;  %v5424_v30 = vpop.permute.xlu1 %5423  ;;  %5238 = vmax.xlane.f32.xlu0 %v10078_v20 }
0x11bf   : > { %v5497_v22 = vmax.f32 %v5465_v63, %v5481_v50  ;;  %v5463_v1 = vadd.f32 %v9986_v33, %v5424_v30  ;;  %v5197_v24 = vmax.f32 %v5165_v32, %v5181_v61  ;;  %v5163_v59 = vadd.f32 %v9983_v36, %v5118_v2 }
0x11c1   : > { %v5479_v35 = vmul.f32 0.2, %v5463_v1  ;;  %v10088_v3 = vadd.f32 %v5497_v22, %v10757_v4  ;;  %v5179_v32 = vmul.f32 0.2, %v5163_v59  ;;  %v10098_v61 = vadd.f32 %v5197_v24, %v10757_v4 }
0x11c2   : > { %5534 = vmax.xlane.f32.xlu0 %v10084_v54 }
0x11c3   : > { %v5143_v43 = vpop.permute.xlu1 %5142  ;;  %v5444_v14 = vpop.permute.xlu0 %5443  ;;  %5540 = vmax.xlane.f32.xlu1 %v10088_v3  ;;  %v5495_v60 = vmax.f32 %v5463_v1, %v5479_v35  ;;  %v10759_v35 = vld [vmem:[#allocation26_spill] sm:$0xff] }
0x11c4   : > { %v5168_v63 = vadd.f32 %v9983_v36, %v5143_v43  ;;  %v5468_v26 = vadd.f32 %v9986_v33, %v5444_v14  ;;  %v5195_v14 = vmax.f32 %v5163_v59, %v5179_v32 }
0x11c5   : > { %v10104_v19 = vadd.f32 %v5495_v60, %v10758_v49 }
0x11c6   : > { %v5184_v50 = vmul.f32 0.2, %v5168_v63  ;;  %v5484_v2 = vmul.f32 0.2, %v5468_v26  ;;  %5234 = vmax.xlane.f32.xlu0 %v10095_v39  ;;  %v10114_v59 = vadd.f32 %v5195_v14, %v10758_v49 }
0x11c7   : > { %v5133_v30 = vpop.permute.xlu1 %5132  ;;  %v5436_v22 = vpop.permute.xlu0 %5435  ;;  %5240 = vmax.xlane.f32.xlu1 %v10098_v61 }
0x11c8   : > { %v5500_v15 = vmax.f32 %v5468_v26, %v5484_v2  ;;  %v5466_v43 = vadd.f32 %v9986_v33, %v5436_v22  ;;  %v5200_v25 = vmax.f32 %v5168_v63, %v5184_v50 }
0x11ca   : > { %v5482_v1 = vmul.f32 0.2, %v5466_v43  ;;  %v10107_v24 = vadd.f32 %v5500_v15, %v10759_v35  ;;  %v10117_v63 = vadd.f32 %v5200_v25, %v10759_v35 }
0x11cb   : > { %5536 = vmax.xlane.f32.xlu1 %v10104_v19 }
0x11cc   : > { %v5148_v4 = vpop.permute.xlu0 %5147  ;;  %v5448_v46 = vpop.permute.xlu1 %5447  ;;  %5546 = vmax.xlane.f32.xlu0 %v10107_v24  ;;  %v5498_v32 = vmax.f32 %v5466_v43, %v5482_v1  ;;  %v10760_v1 = vld [vmem:[#allocation29_spill] sm:$0xff] }
0x11cd   : > { %v5169_v57 = vadd.f32 %v9983_v36, %v5148_v4  ;;  %v5469_v26 = vadd.f32 %v9986_v33, %v5448_v46 }
0x11ce   : > { %v10123_v4 = vadd.f32 %v5498_v32, %v10725_v34 }
0x11cf   : > { %v5185_v60 = vmul.f32 0.2, %v5169_v57  ;;  %v5485_v15 = vmul.f32 0.2, %v5469_v26  ;;  %5236 = vmax.xlane.f32.xlu1 %v10114_v59 }
0x11d0   : > { %v5440_v50 = vpop.permute.xlu1 %5439  ;;  %5246 = vmax.xlane.f32.xlu0 %v10117_v63 }
0x11d1   : > { %v5501_v2 = vmax.f32 %v5469_v26, %v5485_v15  ;;  %v5467_v22 = vadd.f32 %v9986_v33, %v5440_v50  ;;  %v5201_v46 = vmax.f32 %v5169_v57, %v5185_v60  ;;  %v5166_v57 = vadd.f32 %v9983_v36, %v5133_v30  ;;  %v5138_v26 = vpop.permute.xlu0 %5137 }
0x11d3   : > { %v5483_v49 = vmul.f32 0.2, %v5467_v22  ;;  %v10126_v43 = vadd.f32 %v5501_v2, %v10724_v58  ;;  %v10131_v25 = vadd.f32 %v5201_v46, %v10724_v58  ;;  %v5182_v35 = vmul.f32 0.2, %v5166_v57 }
0x11d4   : > { %5542 = vmax.xlane.f32.xlu0 %v10123_v4  ;;  %v5167_v58 = vadd.f32 %v9983_v36, %v5138_v26 }
0x11d5   : > { %5548 = vmax.xlane.f32.xlu1 %v10126_v43  ;;  %v5499_v14 = vmax.f32 %v5467_v22, %v5483_v49  ;;  %v5198_v32 = vmax.f32 %v5166_v57, %v5182_v35 }
0x11d6   : > { %v5183_v15 = vmul.f32 0.2, %v5167_v58 }
0x11d7   : > { %v10135_v33 = vadd.f32 %v5499_v14, %v10760_v1  ;;  %v10145_v60 = vadd.f32 %v5198_v32, %v10725_v34 }
0x11d8   : > { %v5199_v50 = vmax.f32 %v5167_v58, %v5183_v15 }
0x11d9   : > { %5248 = vmax.xlane.f32.xlu1 %v10131_v25 }
0x11da   : > { %v10149_v2 = vadd.f32 %v5199_v50, %v10760_v1 }
0x11dd   : > { %5544 = vmax.xlane.f32.xlu1 %v10135_v33 }
0x11ea   : > { %5704 = vrot.lane.b32.xlu0 %v9912_v40, %s7694_s20 }
0x11ee   : > { %5706 = vrot.lane.b32.xlu1 %v9951_v56, %s7694_s20 }
0x1209   : > { %5242 = vmax.xlane.f32.xlu0 %v10145_v60 }
0x1212   : > { %5244 = vmax.xlane.f32.xlu1 %v10149_v2 }
0x1223   : > { %v5523_v22 = vpop.xlane.xlu0 %5522 }
0x1224   : > { %v5552_v30 = vsub.f32 %v9993_v17, %v5523_v22 }
0x1226   : > { %v5570_v46 = vmul.f32 1.442695, %v5552_v30 }
0x1227   : > { %v5519_v49 = vpop.xlane.xlu1 %5518  ;;  %v10153_v14 = vpop.xlane.xlu0 %5222 }
0x1228   : > { %7547 = vpow2.f32 %v5570_v46  ;;  %v5550_v34 = vsub.f32 %v9999_v21, %v5519_v49 }
0x122a   : > { %v5566_v36 = vmul.f32 1.442695, %v5550_v34 }
0x122b   : > { %v5525_v57 = vpop.xlane.xlu1 %5524 }
0x122c   : > { %7549 = vpow2.f32 %v5566_v36  ;;  %v5553_v35 = vsub.f32 %v10009_v16, %v5525_v57  ;;  %v10157_v26 = vpop.xlane.xlu0 %5218 }
0x122e   : > { %v5572_v1 = vmul.f32 1.442695, %v5553_v35 }
0x1230   : > { %7551 = vpow2.f32 %v5572_v1  ;;  %v5521_v32 = vpop.xlane.xlu0 %5520  ;;  %v10163_v50 = vpop.xlane.xlu1 %5224 }
0x1231   : > { %v5551_v58 = vsub.f32 %v10022_v47, %v5521_v32 }
0x1232   : > { %v10160_v17 = vpop.eup %7547 }
0x1233   : > { %10761 = vst [vmem:[#allocation9_spill] sm:$0xff] %v10160_v17  ;;  %v5568_v15 = vmul.f32 1.442695, %v5551_v58  ;;  %5602 = vadd.xlane.f32.xlu1 %v10160_v17 }
0x1234   : > { %v10173_v47 = vpop.xlane.xlu1 %5220 }
0x1235   : > { %v5531_v21 = vpop.xlane.xlu0 %5530  ;;  %7553 = vpow2.f32 %v5568_v15 }
0x1236   : > { %v10165_v22 = vpop.eup %7549  ;;  %v5556_v16 = vsub.f32 %v10032_v45, %v5531_v21 }
0x1237   : > { %5598 = vadd.xlane.f32.xlu0 %v10165_v22 }
0x1238   : > { %v5578_v30 = vmul.f32 1.442695, %v5556_v16 }
0x1239   : > { %v10169_v46 = vpop.xlane.xlu0 %5230 }
0x123a   : > { %v10171_v49 = vpop.eup %7551  ;;  %7555 = vpow2.f32 %v5578_v30 }
0x123b   : > { %5604 = vadd.xlane.f32.xlu1 %v10171_v49 }
0x123d   : > { %v5527_v34 = vpop.xlane.xlu0 %5526 }
0x123e   : > { %v5554_v36 = vsub.f32 %v10044_v31, %v5527_v34  ;;  %v5533_v57 = vpop.xlane.xlu1 %5532 }
0x123f   : > { %v5557_v35 = vsub.f32 %v10048_v6, %v5533_v57  ;;  %v10178_v1 = vpop.eup %7553 }
0x1240   : > { %v5574_v45 = vmul.f32 1.442695, %v5554_v36  ;;  %5600 = vadd.xlane.f32.xlu1 %v10178_v1 }
0x1241   : > { %v5580_v32 = vmul.f32 1.442695, %v5557_v35  ;;  %v10183_v15 = vpop.xlane.xlu0 %5226 }
0x1242   : > { %7557 = vpow2.f32 %v5574_v45  ;;  %v10181_v58 = vpop.xlane.xlu1 %5232 }
0x1243   : > { %7559 = vpow2.f32 %v5580_v32 }
0x1244   : > { %v10185_v21 = vpop.eup %7555 }
0x1245   : > { %10762 = vst [vmem:[#allocation31_spill] sm:$0xff] %v10185_v21  ;;  %5610 = vadd.xlane.f32.xlu1 %v10185_v21 }
0x1246   : > { %v5529_v31 = vpop.xlane.xlu1 %5528 }
0x1247   : > { %v5555_v16 = vsub.f32 %v10064_v10, %v5529_v31  ;;  %v5539_v6 = vpop.xlane.xlu0 %5538 }
0x1248   : > { %v5560_v30 = vsub.f32 %v10068_v11, %v5539_v6 }
0x1249   : > { %v5576_v34 = vmul.f32 1.442695, %v5555_v16 }
0x124a   : > { %v5586_v36 = vmul.f32 1.442695, %v5560_v30  ;;  %v10194_v45 = vpop.xlane.xlu1 %5228 }
0x124b   : > { %7561 = vpow2.f32 %v5576_v34  ;;  %v10190_v57 = vpop.xlane.xlu0 %5238 }
0x124c   : > { %v10192_v35 = vpop.eup %7557  ;;  %7563 = vpow2.f32 %v5586_v36 }
0x124d   : > { %10763 = vst [vmem:[#allocation11_spill] sm:$0xff] %v10192_v35  ;;  %v10196_v32 = vpop.eup %7559  ;;  %5606 = vadd.xlane.f32.xlu0 %v10192_v35  ;;  %v5252_v35 = vsub.f32 %v10002_v5, %v10153_v14 }
0x124e   : > { %10764 = vst [vmem:[#allocation3_spill] sm:$0xff] %v10196_v32  ;;  %5612 = vadd.xlane.f32.xlu1 %v10196_v32 }
0x124f   : > { %v5535_v10 = vpop.xlane.xlu0 %5534 }
0x1250   : > { %v5558_v31 = vsub.f32 %v10084_v54, %v5535_v10  ;;  %v5541_v11 = vpop.xlane.xlu1 %5540 }
0x1251   : > { %v5561_v16 = vsub.f32 %v10088_v3, %v5541_v11 }
0x1252   : > { %v5582_v6 = vmul.f32 1.442695, %v5558_v31 }
0x1253   : > { %v5588_v30 = vmul.f32 1.442695, %v5561_v16  ;;  %v10206_v40 = vpop.xlane.xlu0 %5234 }
0x1254   : > { %7565 = vpow2.f32 %v5582_v6  ;;  %v10202_v34 = vpop.xlane.xlu1 %5240 }
0x1255   : > { %v10204_v56 = vpop.eup %7561  ;;  %7567 = vpow2.f32 %v5588_v30 }
0x1256   : > { %5608 = vadd.xlane.f32.xlu1 %v10204_v56  ;;  %v10209_v36 = vpop.eup %7563 }
0x1257   : > { %10765 = vst [vmem:[#allocation5_spill] sm:$0xff] %v10209_v36 }
0x1258   : > { %v5537_v21 = vpop.xlane.xlu1 %5536 }
0x1259   : > { %v5559_v54 = vsub.f32 %v10104_v19, %v5537_v21  ;;  %v5547_v10 = vpop.xlane.xlu0 %5546 }
0x125a   : > { %v5564_v3 = vsub.f32 %v10107_v24, %v5547_v10  ;;  %5618 = vadd.xlane.f32.xlu1 %v10209_v36  ;;  %v5250_v24 = vsub.f32 %v10012_v37, %v10157_v26  ;;  %v5270_v37 = vmul.f32 1.442695, %v5252_v35 }
0x125b   : > { %v5584_v31 = vmul.f32 1.442695, %v5559_v54 }
0x125c   : > { %v5594_v11 = vmul.f32 1.442695, %v5564_v3  ;;  %v10218_v30 = vpop.xlane.xlu1 %5236  ;;  %v5266_v17 = vmul.f32 1.442695, %v5250_v24 }
0x125d   : > { %7569 = vpow2.f32 %v5584_v31  ;;  %v10214_v16 = vpop.xlane.xlu0 %5246 }
0x125e   : > { %v10216_v6 = vpop.eup %7565  ;;  %7571 = vpow2.f32 %v5594_v11 }
0x125f   : > { %10766 = vst [vmem:[#allocation30_spill] sm:$0xff] %v10216_v6  ;;  %v10220_v32 = vpop.eup %7567  ;;  %5614 = vadd.xlane.f32.xlu0 %v10216_v6 }
0x1260   : > { %5620 = vadd.xlane.f32.xlu1 %v10220_v32 }
0x1261   : > { %v5543_v19 = vpop.xlane.xlu0 %5542 }
0x1262   : > { %v5562_v21 = vsub.f32 %v10123_v4, %v5543_v19  ;;  %v5549_v54 = vpop.xlane.xlu1 %5548  ;;  %v5253_v4 = vsub.f32 %v10019_v18, %v10163_v50  ;;  %v5255_v50 = vsub.f32 %v10075_v0, %v10194_v45  ;;  %v5257_v0 = vsub.f32 %v10058_v13, %v10181_v58 }
0x1263   : > { %v5565_v10 = vsub.f32 %v10126_v43, %v5549_v54  ;;  %v5260_v13 = vsub.f32 %v10078_v20, %v10190_v57 }
0x1264   : > { %v5590_v3 = vmul.f32 1.442695, %v5562_v21  ;;  %v5272_v19 = vmul.f32 1.442695, %v5253_v4 }
0x1265   : > { %v5596_v31 = vmul.f32 1.442695, %v5565_v10  ;;  %v5705_v36 = vpop.permute.xlu0 %5704 }
0x1266   : > { %7573 = vpow2.f32 %v5590_v3  ;;  %v10230_v6 = vpop.xlane.xlu1 %5248  ;;  %6895 = vmatprep.subr.bf16.mxu1 %v5705_v36 }
0x1267   : > { %v10232_v11 = vpop.eup %7569  ;;  %7575 = vpow2.f32 %v5596_v31  ;;  %6896 = vmatpush3.bf16.msra.mxu1 %v5705_v36  ;;  %v5254_v36 = vsub.f32 %v10055_v42, %v10183_v15  ;;  %v5256_v42 = vsub.f32 %v10039_v12, %v10169_v46  ;;  %v5276_v15 = vmul.f32 1.442695, %v5255_v50 }
0x1268   : > { %5616 = vadd.xlane.f32.xlu1 %v10232_v11  ;;  %7577 = vpow2.f32 %v5266_v17  ;;  %v10237_v26 = vpop.eup %7571  ;;  %v5280_v12 = vmul.f32 1.442695, %v5257_v0  ;;  %v5258_v46 = vsub.f32 %v10095_v39, %v10206_v40  ;;  %v5261_v50 = vsub.f32 %v10098_v61, %v10202_v34 }
0x1269   : > { %7579 = vpow2.f32 %v5270_v37  ;;  %v5278_v10 = vmul.f32 1.442695, %v5256_v42  ;;  %v5286_v37 = vmul.f32 1.442695, %v5260_v13 }
0x126a   : > { %v5545_v43 = vpop.xlane.xlu1 %5544  ;;  %v5282_v58 = vmul.f32 1.442695, %v5258_v46 }
0x126b   : > { %v5563_v5 = vsub.f32 %v10135_v33, %v5545_v43  ;;  %v5274_v33 = vmul.f32 1.442695, %v5254_v36  ;;  %v5264_v43 = vsub.f32 %v10117_v63, %v10214_v16  ;;  %v5251_v36 = vsub.f32 %v10028_v8, %v10173_v47 }
0x126c   : > { %5626 = vadd.xlane.f32.xlu1 %v10237_v26 }
0x126d   : > { %v5592_v14 = vmul.f32 1.442695, %v5563_v5 }
0x126e   : > { %v5707_v24 = vpop.permute.xlu1 %5706 }
0x126f   : > { %7581 = vpow2.f32 %v5592_v14  ;;  %6897 = vmatprep.subr.bf16.mxu1 %v5707_v24 }
0x1270   : > { %v10243_v17 = vpop.eup %7573  ;;  %6898 = vmatpush3.bf16.msra.mxu1 %v5707_v24  ;;  %7583 = vpow2.f32 %v5272_v19  ;;  %v5294_v19 = vmul.f32 1.442695, %v5264_v43  ;;  %v5268_v24 = vmul.f32 1.442695, %v5251_v36 }
0x1271   : > { %v10245_v18 = vpop.eup %7575  ;;  %5622 = vadd.xlane.f32.xlu1 %v10243_v17  ;;  %7585 = vpow2.f32 %v5274_v33  ;;  %v5259_v33 = vsub.f32 %v10114_v59, %v10218_v30  ;;  %v5265_v59 = vsub.f32 %v10131_v25, %v10230_v6 }
0x1272   : > { %5628 = vadd.xlane.f32.xlu0 %v10245_v18  ;;  %v10251_v35 = vpop.eup %7577  ;;  %7587 = vpow2.f32 %v5276_v15 }
0x1273   : > { %v10256_v21 = vpop.eup %7579  ;;  %7589 = vpow2.f32 %v5278_v10  ;;  %v5284_v42 = vmul.f32 1.442695, %v5259_v33  ;;  %v5296_v34 = vmul.f32 1.442695, %v5265_v59 }
0x1274   : > { %7591 = vpow2.f32 %v5280_v12 }
0x1275   : > { %5298 = vadd.xlane.f32.xlu1 %v10251_v35  ;;  %7593 = vpow2.f32 %v5282_v58 }
0x1276   : > { %7595 = vpow2.f32 %v5286_v37 }
0x1279   : > { %v10258_v54 = vpop.eup %7581  ;;  %5302 = vadd.xlane.f32.xlu1 %v10256_v21 }
0x127a   : > { %5624 = vadd.xlane.f32.xlu0 %v10258_v54  ;;  %v10264_v45 = vpop.eup %7583 }
0x127b   : > { %v10269_v3 = vpop.eup %7585 }
0x127c   : > { %v10274_v31 = vpop.eup %7587 }
0x127d   : > { %5304 = vadd.xlane.f32.xlu1 %v10264_v45  ;;  %v10277_v4 = vpop.eup %7589 }
0x127e   : > { %v10280_v40 = vpop.eup %7591 }
0x127f   : > { %v10283_v39 = vpop.eup %7593 }
0x1280   : > { %v10288_v20 = vpop.eup %7595 }
0x1281   : > { %5306 = vadd.xlane.f32.xlu1 %v10269_v3 }
0x1285   : > { %5308 = vadd.xlane.f32.xlu1 %v10274_v31 }
0x1289   : > { %5310 = vadd.xlane.f32.xlu1 %v10277_v4 }
0x128d   : > { %5312 = vadd.xlane.f32.xlu1 %v10280_v40 }
0x1290   : > { %5708 = vrot.lane.b32.xlu0 %v9945_v38, %s7694_s20 }
0x1291   : > { %5314 = vadd.xlane.f32.xlu1 %v10283_v39 }
0x1295   : > { %5318 = vadd.xlane.f32.xlu1 %v10288_v20 }
0x1296   : > { %v5243_v57 = vpop.xlane.xlu0 %5242 }
0x1297   : > { %v5262_v5 = vsub.f32 %v10145_v60, %v5243_v57  ;;  %v5288_v60 = vmul.f32 1.442695, %v5261_v50 }
0x1299   : > { %v5290_v14 = vmul.f32 1.442695, %v5262_v5 }
0x129b   : > { %7597 = vpow2.f32 %v5290_v14 }
0x129c   : > { %7599 = vpow2.f32 %v5294_v19 }
0x129d   : > { %7601 = vpow2.f32 %v5268_v24 }
0x129e   : > { %7603 = vpow2.f32 %v5284_v42 }
0x129f   : > { %v5245_v63 = vpop.xlane.xlu1 %5244  ;;  %7605 = vpow2.f32 %v5288_v60 }
0x12a0   : > { %v5263_v16 = vsub.f32 %v10149_v2, %v5245_v63 }
0x12a2   : > { %v5292_v47 = vmul.f32 1.442695, %v5263_v16 }
0x12a4   : > { %7607 = vpow2.f32 %v5292_v47 }
0x12a5   : > { %v10300_v15 = vpop.eup %7597  ;;  %7609 = vpow2.f32 %v5296_v34 }
0x12a6   : > { %5322 = vadd.xlane.f32.xlu1 %v10300_v15  ;;  %v10304_v8 = vpop.eup %7599 }
0x12a7   : > { %v10309_v61 = vpop.eup %7601 }
0x12a8   : > { %v10312_v30 = vpop.eup %7603 }
0x12a9   : > { %v10315_v2 = vpop.eup %7605 }
0x12aa   : > { %5326 = vadd.xlane.f32.xlu1 %v10304_v8 }
0x12ae   : > { %v10318_v10 = vpop.eup %7607 }
0x12af   : > { %5300 = vadd.xlane.f32.xlu0 %v10309_v61  ;;  %v10323_v25 = vpop.eup %7609 }
0x12b3   : > { %5316 = vadd.xlane.f32.xlu0 %v10312_v30 }
0x12b7   : > { %5320 = vadd.xlane.f32.xlu0 %v10315_v2 }
0x12bb   : > { %5324 = vadd.xlane.f32.xlu0 %v10318_v10  ;;  %5944 = vrot.lane.b32.xlu1 %v9852_v7, %s7695_s2 }
0x12bf   : > { %5328 = vadd.xlane.f32.xlu0 %v10323_v25  ;;  %5948 = vrot.lane.b32.xlu1 %v9850_v52, %s7695_s2 }
0x12c0   : > { %v5603_v6 = vpop.xlane.xlu1 %5602 }
0x12c1   : > { %v5632_v57 = vmax.f32 %v5603_v6, 1e-30 }
0x12c3   : > { %5950 = vrot.lane.b32.xlu1 %v9854_v9, %s7695_s2 }
0x12c4   : > { %v5599_v0 = vpop.xlane.xlu0 %5598 }
0x12c5   : > { %v5630_v46 = vmax.f32 %v5599_v0, 1e-30 }
0x12c7   : > { %5952 = vrot.lane.b32.xlu1 %v9879_v51, %s7695_s2  ;;  %7611 = vrcp.f32 %v5630_v46 }
0x12c8   : > { %v5605_v12 = vpop.xlane.xlu1 %5604 }
0x12cb   : > { %5956 = vrot.lane.b32.xlu1 %v9876_v41, %s7695_s2 }
0x12cd   : > { %v5601_v7 = vpop.xlane.xlu1 %5600 }
0x12ce   : > { %v5631_v13 = vmax.f32 %v5601_v7, 1e-30  ;;  %v10769_v7 = vld [vmem:[#allocation9_spill] sm:$0xff] }
0x12cf   : > { %5960 = vrot.lane.b32.xlu1 %v9906_v53, %s7695_s2 }
0x12d0   : > { %7613 = vrcp.f32 %v5631_v13 }
0x12d1   : > { %v7612_v52 = vpop.eup %7611 }
0x12d2   : > { %v5662_v41 = vmul.f32 %v7612_v52, %v10165_v22 }
0x12d3   : > { %5964 = vrot.lane.b32.xlu1 %v9903_v23, %s7695_s2 }
0x12d5   : > { %5946 = vrot.lane.b32.xlu0 %v9860_v28, %s7695_s2  ;;  %v5611_v28 = vpop.xlane.xlu1 %5610 }
0x12d6   : > { %v5636_v19 = vmax.f32 %v5611_v28, 1e-30 }
0x12d7   : > { %5968 = vrot.lane.b32.xlu1 %v9937_v48, %s7695_s2 }
0x12d9   : > { %5954 = vrot.lane.b32.xlu0 %v9887_v29, %s7695_s2  ;;  %v10767_v29 = vld [vmem:[#allocation27_spill] sm:$0xff] }
0x12da   : > { %v7614_v9 = vpop.eup %7613 }
0x12db   : > { %5972 = vrot.lane.b32.xlu1 %v9935_v27, %s7695_s2  ;;  %v5663_v51 = vmul.f32 %v7614_v9, %v10178_v1  ;;  %v5613_v53 = vpop.xlane.xlu1 %5612  ;;  %v10768_v27 = vld [vmem:[#allocation10_spill] sm:$0xff]  ;;  %v5633_v1 = vmax.f32 %v5605_v12, 1e-30  ;;  %v10770_v9 = vld [vmem:[#allocation11_spill] sm:$0xff] }
0x12dc   : > { %v5637_v5 = vmax.f32 %v5613_v53, 1e-30 }
0x12dd   : > { %5958 = vrot.lane.b32.xlu0 %v9881_v55, %s7695_s2  ;;  %v5678_v23 = vpack.c.bf16 %v5663_v51, %v5662_v41  ;;  %v5607_v55 = vpop.xlane.xlu0 %5606  ;;  %7615 = vrcp.f32 %v5633_v1  ;;  %v10771_v51 = vld [vmem:[#allocation4_spill] sm:$0xff] }
0x12de   : > { %v5634_v43 = vmax.f32 %v5607_v55, 1e-30 }
0x12df   : > { %6901 = vmatprep.mubr.bf16.mxu1 %v5678_v23 }
0x12e1   : > { %5962 = vrot.lane.b32.xlu0 %v9914_v44, %s7695_s2 }
0x12e3   : > { %v5609_v48 = vpop.xlane.xlu1 %5608 }
0x12e4   : > { %v5635_v37 = vmax.f32 %v5609_v48, 1e-30  ;;  %v10772_v48 = vld [vmem:[#allocation7_spill] sm:$0xff] }
0x12e5   : > { %5966 = vrot.lane.b32.xlu0 %v9908_v62, %s7695_s2 }
0x12e6   : > { %7617 = vrcp.f32 %v5635_v37 }
0x12e7   : > { %v5619_v22 = vpop.xlane.xlu1 %5618  ;;  %7619 = vrcp.f32 %v5632_v57  ;;  %v7616_v50 = vpop.eup %7615  ;;  %v10774_v57 = vld [vmem:[#allocation31_spill] sm:$0xff] }
0x12e8   : > { %7621 = vrcp.f32 %v5634_v43  ;;  %v5665_v34 = vmul.f32 %v7616_v50, %v10171_v49  ;;  %v5640_v0 = vmax.f32 %v5619_v22, 1e-30  ;;  %v10773_v22 = vld [vmem:[#allocation3_spill] sm:$0xff] }
0x12e9   : > { %5970 = vrot.lane.b32.xlu0 %v10767_v29, %s7695_s2  ;;  %7623 = vrcp.f32 %v5637_v5  ;;  %v10776_v5 = vld [vmem:[#allocation32_spill] sm:$0xff] }
0x12ec   : > { %v5615_v62 = vpop.xlane.xlu0 %5614 }
0x12ed   : > { %5974 = vrot.lane.b32.xlu0 %v10768_v27, %s7695_s2  ;;  %v5621_v58 = vpop.xlane.xlu1 %5620  ;;  %v5638_v33 = vmax.f32 %v5615_v62, 1e-30 }
0x12ee   : > { %v5641_v16 = vmax.f32 %v5621_v58, 1e-30 }
0x12f0   : > { %v7618_v63 = vpop.eup %7617 }
0x12f1   : > { %v7620_v60 = vpop.eup %7619  ;;  %v5667_v46 = vmul.f32 %v7618_v63, %v10204_v56 }
0x12f2   : > { %v7622_v47 = vpop.eup %7621  ;;  %v5664_v13 = vmul.f32 %v7620_v60, %v10769_v7 }
0x12f3   : > { %v5666_v41 = vmul.f32 %v7622_v47, %v10770_v9  ;;  %v7624_v28 = vpop.eup %7623 }
0x12f4   : > { %v5679_v23 = vpack.c.bf16 %v5665_v34, %v5664_v13  ;;  %v5669_v1 = vmul.f32 %v7624_v28, %v10773_v22  ;;  %v10779_v34 = vld [vmem:[#allocation6_spill] sm:$0xff] }
0x12f5   : > { %v5617_v44 = vpop.xlane.xlu1 %5616  ;;  %v5680_v49 = vpack.c.bf16 %v5667_v46, %v5666_v41 }
0x12f6   : > { %v5639_v14 = vmax.f32 %v5617_v44, 1e-30  ;;  %v10775_v44 = vld [vmem:[#allocation30_spill] sm:$0xff] }
0x12f8   : > { %7625 = vrcp.f32 %v5639_v14 }
0x12f9   : > { %v5627_v36 = vpop.xlane.xlu1 %5626  ;;  %7627 = vrcp.f32 %v5636_v19 }
0x12fa   : > { %7629 = vrcp.f32 %v5638_v33  ;;  %v5644_v55 = vmax.f32 %v5627_v36, 1e-30 }
0x12fb   : > { %7631 = vrcp.f32 %v5641_v16  ;;  %v10778_v16 = vld [vmem:[#allocation5_spill] sm:$0xff] }
0x12fe   : > { %v5623_v59 = vpop.xlane.xlu1 %5622 }
0x12ff   : > { %v5629_v24 = vpop.xlane.xlu0 %5628  ;;  %v5642_v52 = vmax.f32 %v5623_v59, 1e-30 }
0x1300   : > { %v5645_v56 = vmax.f32 %v5629_v24, 1e-30 }
0x1302   : > { %v7626_v29 = vpop.eup %7625  ;;  %v5299_v37 = vpop.xlane.xlu1 %5298 }
0x1303   : > { %v7628_v53 = vpop.eup %7627  ;;  %v5671_v58 = vmul.f32 %v7626_v29, %v10232_v11 }
0x1304   : > { %v7630_v27 = vpop.eup %7629  ;;  %v5668_v43 = vmul.f32 %v7628_v53, %v10774_v57 }
0x1305   : > { %v5670_v62 = vmul.f32 %v7630_v27, %v10775_v44  ;;  %v7632_v19 = vpop.eup %7631 }
0x1306   : > { %v5681_v14 = vpack.c.bf16 %v5669_v1, %v5668_v43  ;;  %v5303_v36 = vpop.xlane.xlu1 %5302  ;;  %v5673_v63 = vmul.f32 %v7632_v19, %v10220_v32  ;;  %v10780_v32 = vld [vmem:[#allocation8_spill] sm:$0xff] }
0x1307   : > { %v5625_v42 = vpop.xlane.xlu0 %5624  ;;  %v5682_v24 = vpack.c.bf16 %v5671_v58, %v5670_v62  ;;  %v5332_v28 = vmax.f32 %v5303_v36, 1e-30 }
0x1308   : > { %v5643_v6 = vmax.f32 %v5625_v42, 1e-30  ;;  %v10777_v42 = vld [vmem:[#allocation33_spill] sm:$0xff] }
0x130a   : > { %7633 = vrcp.f32 %v5643_v6  ;;  %v5305_v46 = vpop.xlane.xlu1 %5304 }
0x130b   : > { %v5709_v12 = vpop.permute.xlu0 %5708  ;;  %7635 = vrcp.f32 %v5640_v0 }
0x130c   : > { %6899 = vmatprep.subr.bf16.mxu1 %v5709_v12  ;;  %7637 = vrcp.f32 %v5642_v52  ;;  %v10781_v52 = vld [vmem:[#allocation28_spill] sm:$0xff] }
0x130d   : > { %6900 = vmatpush3.bf16.msra.mxu1 %v5709_v12  ;;  %7639 = vrcp.f32 %v5645_v56 }
0x130e   : > { %6917 = vmatprep.subr.bf16.mxu1 %v10771_v51  ;;  %7641 = vrcp.f32 %v5644_v55 }
0x1310   : > { %6902 = vmatmul.mubr.bf16.vlgmr.msra.gmra.mrb[100].mxu1 %v5679_v23  ;;  %v5330_v23 = vmax.f32 %v5299_v37, 1e-30 }
0x1311   : > { %6905 = vmatprep.mubr.bf16.mxu1 %v5680_v49  ;;  %6918 = vmatpush3.bf16.msra.mxu1 %v10771_v51 }
0x1312   : > { %6919 = vmatprep.subr.bf16.mxu1 %v10772_v48  ;;  %7643 = vrcp.f32 %v5330_v23 }
0x1313   : > { %7645 = vrcp.f32 %v5332_v28 }
0x1314   : > { %v7634_v33 = vpop.eup %7633 }
0x1315   : > { %6920 = vmatpush3.bf16.msra.mxu1 %v10772_v48  ;;  %v7636_v50 = vpop.eup %7635  ;;  %v5675_v60 = vmul.f32 %v7634_v33, %v10258_v54 }
0x1316   : > { %6921 = vmatprep.subr.bf16.mxu1 %v10776_v5  ;;  %v7638_v11 = vpop.eup %7637  ;;  %v5672_v59 = vmul.f32 %v7636_v50, %v10778_v16 }
0x1317   : > { %v5674_v47 = vmul.f32 %v7638_v11, %v10243_v17  ;;  %v7640_v0 = vpop.eup %7639  ;;  %v5307_v17 = vpop.xlane.xlu1 %5306 }
0x1318   : > { %6906 = vmatmul.mubr.bf16.gmra.mrb[104].mxu1 %v5681_v14  ;;  %v5683_v6 = vpack.c.bf16 %v5673_v63, %v5672_v59  ;;  %v7642_v7 = vpop.eup %7641  ;;  %v5677_v54 = vmul.f32 %v7640_v0, %v10245_v18  ;;  %v5333_v18 = vmax.f32 %v5305_v46, 1e-30  ;;  %v5334_v29 = vmax.f32 %v5307_v17, 1e-30 }
0x1319   : > { %6909 = vmatprep.mubr.bf16.mxu1 %v5682_v24  ;;  %6922 = vmatpush3.bf16.msra.mxu1 %v10776_v5  ;;  %v5684_v12 = vpack.c.bf16 %v5675_v60, %v5674_v47  ;;  %v5676_v13 = vmul.f32 %v7642_v7, %v10237_v26 }
0x131a   : > { %6923 = vmatprep.subr.bf16.mxu1 %v10777_v42  ;;  %7647 = vrcp.f32 %v5333_v18 }
0x131b   : > { %v5685_v9 = vpack.c.bf16 %v5677_v54, %v5676_v13  ;;  %v5309_v41 = vpop.xlane.xlu1 %5308 }
0x131c   : > { %v5335_v26 = vmax.f32 %v5309_v41, 1e-30  ;;  %v7644_v58 = vpop.eup %7643 }
0x131d   : > { %6924 = vmatpush3.bf16.msra.mxu1 %v10777_v42  ;;  %v7646_v43 = vpop.eup %7645  ;;  %v5362_v42 = vmul.f32 %v7644_v58, %v10251_v35  ;;  %v10404_v58 = vld [vmem:[#allocation2] ss:$0 sm:$0xff] }
0x131e   : > { %6925 = vmatprep.subr.bf16.mxu1 %v10779_v34  ;;  %7649 = vrcp.f32 %v5335_v26  ;;  %v5364_v16 = vmul.f32 %v7646_v43, %v10256_v21 }
0x131f   : > { %v5311_v51 = vpop.xlane.xlu1 %5310  ;;  %7651 = vrcp.f32 %v5334_v29 }
0x1320   : > { %6910 = vmatmul.mubr.bf16.gmra.mrb[108].mxu1 %v5683_v6 }
0x1321   : > { %6913 = vmatprep.mubr.bf16.mxu1 %v5684_v12  ;;  %6926 = vmatpush3.bf16.msra.mxu1 %v10779_v34 }
0x1322   : > { %6927 = vmatprep.subr.bf16.mxu1 %v10780_v32 }
0x1323   : > { %v5313_v49 = vpop.xlane.xlu1 %5312 }
0x1324   : > { %v5337_v48 = vmax.f32 %v5313_v49, 1e-30  ;;  %v7648_v44 = vpop.eup %7647 }
0x1325   : > { %6928 = vmatpush3.bf16.msra.mxu1 %v10780_v32  ;;  %v5365_v50 = vmul.f32 %v7648_v44, %v10264_v45 }
0x1326   : > { %6929 = vmatprep.subr.bf16.mxu1 %v10781_v52 }
0x1327   : > { %v5315_v27 = vpop.xlane.xlu1 %5314  ;;  %v5379_v0 = vpack.c.bf16 %v5365_v50, %v5364_v16 }
0x1328   : > { %6914 = vmatmul.mubr.bf16.gmra.mrb[112].mxu1 %v5685_v9  ;;  %v5338_v55 = vmax.f32 %v5315_v27, 1e-30  ;;  %v7650_v62 = vpop.eup %7649 }
0x1329   : > { %6930 = vmatpush3.bf16.msra.mxu1 %v10781_v52  ;;  %v7652_v5 = vpop.eup %7651  ;;  %v5367_v60 = vmul.f32 %v7650_v62, %v10274_v31 }
0x132a   : > { %6931 = vmatprep.subr.bf16.mxu1 %v9945_v38  ;;  %v5366_v34 = vmul.f32 %v7652_v5, %v10269_v3 }
0x132b   : > { %v5319_v37 = vpop.xlane.xlu1 %5318 }
0x132c   : > { %v5340_v36 = vmax.f32 %v5319_v37, 1e-30  ;;  %v5380_v45 = vpack.c.bf16 %v5367_v60, %v5366_v34 }
0x132d   : > { %6932 = vmatpush3.bf16.msra.mxu1 %v9945_v38  ;;  %v5336_v38 = vmax.f32 %v5311_v51, 1e-30 }
0x1333   : > { %v5323_v14 = vpop.xlane.xlu1 %5322 }
0x1334   : > { %v5342_v59 = vmax.f32 %v5323_v14, 1e-30 }
0x1337   : > { %v5327_v35 = vpop.xlane.xlu1 %5326 }
0x1338   : > { %v5344_v32 = vmax.f32 %v5327_v35, 1e-30 }
0x133b   : > { %v5945_v27 = vpop.permute.xlu1 %5944 }
0x133c   : > { %v5301_v53 = vpop.xlane.xlu0 %5300 }
0x133d   : > { %v5331_v56 = vmax.f32 %v5301_v53, 1e-30 }
0x133f   : > { %7653 = vrcp.f32 %v5331_v56 }
0x1340   : > { %v5317_v22 = vpop.xlane.xlu0 %5316  ;;  %7655 = vrcp.f32 %v5337_v48 }
0x1341   : > { %v5339_v1 = vmax.f32 %v5317_v22, 1e-30 }
0x1343   : > { %7657 = vrcp.f32 %v5339_v1 }
0x1344   : > { %v5321_v57 = vpop.xlane.xlu0 %5320  ;;  %7659 = vrcp.f32 %v5336_v38 }
0x1345   : > { %7661 = vrcp.f32 %v5338_v55  ;;  %v5341_v19 = vmax.f32 %v5321_v57, 1e-30 }
0x1347   : > { %7663 = vrcp.f32 %v5341_v19 }
0x1348   : > { %v5325_v24 = vpop.xlane.xlu0 %5324 }
0x1349   : > { %v7654_v33 = vpop.eup %7653  ;;  %v5343_v11 = vmax.f32 %v5325_v24, 1e-30 }
0x134a   : > { %v5363_v63 = vmul.f32 %v7654_v33, %v10309_v61  ;;  %v7656_v12 = vpop.eup %7655 }
0x134b   : > { %7665 = vrcp.f32 %v5343_v11  ;;  %v5369_v7 = vmul.f32 %v7656_v12, %v10280_v40 }
0x134c   : > { %v5378_v47 = vpack.c.bf16 %v5363_v63, %v5362_v42  ;;  %v5329_v6 = vpop.xlane.xlu0 %5328  ;;  %7667 = vrcp.f32 %v5340_v36 }
0x134d   : > { %v7658_v46 = vpop.eup %7657  ;;  %7669 = vrcp.f32 %v5342_v59  ;;  %v5345_v31 = vmax.f32 %v5329_v6, 1e-30 }
0x134e   : > { %6933 = vmatprep.mubr.bf16.mxu1 %v5378_v47  ;;  %v7660_v61 = vpop.eup %7659  ;;  %v5371_v3 = vmul.f32 %v7658_v46, %v10312_v30 }
0x134f   : > { %6934 = vmatmul.mubr.bf16.vlgmr.msra.gmra.mrb[100].mxu1 %v5379_v0  ;;  %v7662_v21 = vpop.eup %7661  ;;  %v5368_v54 = vmul.f32 %v7660_v61, %v10277_v4  ;;  %7671 = vrcp.f32 %v5345_v31 }
0x1350   : > { %6937 = vmatprep.mubr.bf16.mxu1 %v5380_v45  ;;  %v5370_v13 = vmul.f32 %v7662_v21, %v10283_v39  ;;  %7673 = vrcp.f32 %v5344_v32  ;;  %v5947_v48 = vpop.permute.xlu0 %5946 }
0x1351   : > { %v5381_v17 = vpack.c.bf16 %v5369_v7, %v5368_v54  ;;  %v7664_v52 = vpop.eup %7663 }
0x1352   : > { %v5382_v9 = vpack.c.bf16 %v5371_v3, %v5370_v13  ;;  %v5373_v28 = vmul.f32 %v7664_v52, %v10315_v2  ;;  %v5949_v2 = vpop.permute.xlu1 %5948 }
0x1354   : > { %v5955_v22 = vpop.permute.xlu0 %5954 }
0x1355   : > { %v7666_v41 = vpop.eup %7665 }
0x1356   : > { %v7668_v51 = vpop.eup %7667  ;;  %v5375_v40 = vmul.f32 %v7666_v41, %v10318_v10  ;;  %v5951_v10 = vpop.permute.xlu1 %5950 }
0x1357   : > { %6938 = vmatmul.mubr.bf16.gmra.mrb[104].mxu1 %v5381_v17  ;;  %v7670_v23 = vpop.eup %7669  ;;  %v5372_v30 = vmul.f32 %v7668_v51, %v10288_v20 }
0x1358   : > { %6941 = vmatprep.mubr.bf16.mxu1 %v5382_v9  ;;  %v5374_v4 = vmul.f32 %v7670_v23, %v10300_v15  ;;  %v5959_v44 = vpop.permute.xlu0 %5958 }
0x1359   : > { %v5383_v18 = vpack.c.bf16 %v5373_v28, %v5372_v30  ;;  %v7672_v49 = vpop.eup %7671 }
0x135a   : > { %v5384_v39 = vpack.c.bf16 %v5375_v40, %v5374_v4  ;;  %v7674_v26 = vpop.eup %7673  ;;  %v5377_v29 = vmul.f32 %v7672_v49, %v10323_v25  ;;  %v5953_v20 = vpop.permute.xlu1 %5952 }
0x135b   : > { %v5376_v53 = vmul.f32 %v7674_v26, %v10304_v8 }
0x135c   : > { %v5963_v16 = vpop.permute.xlu0 %5962 }
0x135d   : > { %v5385_v56 = vpack.c.bf16 %v5377_v29, %v5376_v53 }
0x135e   : > { %v5957_v55 = vpop.permute.xlu1 %5956 }
0x135f   : > { %6942 = vmatmul.mubr.bf16.gmra.mrb[108].mxu1 %v5383_v18 }
0x1360   : > { %6945 = vmatprep.mubr.bf16.mxu1 %v5384_v39  ;;  %v5967_v32 = vpop.permute.xlu0 %5966 }
0x1362   : > { %v5961_v11 = vpop.permute.xlu1 %5960 }
0x1364   : > { %v5971_v49 = vpop.permute.xlu0 %5970 }
0x1366   : > { %v5965_v61 = vpop.permute.xlu1 %5964 }
0x1367   : > { %6946 = vmatmul.mubr.bf16.gmra.mrb[112].mxu1 %v5385_v56 }
0x136a   : > { %v5969_v28 = vpop.permute.xlu1 %5968 }
0x1422   : > { %v6935_v15 = vpop.f32.mrb[100].mxu1 }
0x1423   : > { %v5914_v1 = vmul.f32 0.5, %v6935_v15  ;;  %v5849_v38 = vpop.f32.mrb[101].mxu1 }
0x1424   : > { %v5912_v37 = vmul.f32 0.5, %v5849_v38  ;;  %v6936_v57 = vpop.f32.mrb[102].mxu1  ;;  %v5975_v38 = vpop.permute.xlu0 %5974 }
0x1425   : > { %v5994_v25 = vadd.f32 %v5949_v2, %v5914_v1  ;;  %v5915_v43 = vmul.f32 0.5, %v6936_v57  ;;  %v5852_v8 = vpop.f32.mrb[103].mxu1 }
0x1426   : > { %v5992_v62 = vadd.f32 %v5945_v27, %v5912_v37  ;;  %v5913_v5 = vmul.f32 0.5, %v5852_v8 }
0x1427   : > { %v6017_v14 = vadd.f32 %v10404_v58, %v5994_v25  ;;  %v5995_v19 = vadd.f32 %v5951_v10, %v5915_v43  ;;  %v5973_v10 = vpop.permute.xlu1 %5972 }
0x1428   : > { %v6015_v24 = vadd.f32 %v10404_v58, %v5992_v62  ;;  %v5993_v33 = vadd.f32 %v5947_v48, %v5913_v5 }
0x1429   : > { %6034 = vst.msk [vmem:[%s10411_s25 + $0x10] sm:$0xff] %vm6031_vm12, %v6017_v14  ;;  %v6018_v50 = vadd.f32 %v10404_v58, %v5995_v19 }
0x142a   : > { %6032 = vst.msk [vmem:[%s10411_s25] sm:$0xff] %vm6031_vm12, %v6015_v24  ;;  %v6016_v36 = vadd.f32 %v10404_v58, %v5993_v33  ;;  %v6939_v42 = vpop.f32.mrb[104].mxu1 }
0x142b   : > { %6035 = vst.msk [vmem:[%s10411_s25 + $0x18] sm:$0xff] %vm6031_vm12, %v6018_v50  ;;  %v5918_v63 = vmul.f32 0.5, %v6939_v42  ;;  %v5865_v60 = vpop.f32.mrb[105].mxu1 }
0x142c   : > { %6033 = vst.msk [vmem:[%s10411_s25 + $0x8] sm:$0xff] %vm6031_vm12, %v6016_v36  ;;  %v5916_v59 = vmul.f32 0.5, %v5865_v60  ;;  %v6940_v47 = vpop.f32.mrb[106].mxu1 }
0x142d   : > { %v5998_v34 = vadd.f32 %v5957_v55, %v5918_v63  ;;  %v5919_v6 = vmul.f32 0.5, %v6940_v47  ;;  %v5868_v0 = vpop.f32.mrb[107].mxu1 }
0x142e   : > { %v5996_v12 = vadd.f32 %v5953_v20, %v5916_v59  ;;  %v5917_v45 = vmul.f32 0.5, %v5868_v0 }
0x142f   : > { %v6021_v46 = vadd.f32 %v10404_v58, %v5998_v34  ;;  %v5999_v35 = vadd.f32 %v5959_v44, %v5919_v6 }
0x1430   : > { %v6019_v31 = vadd.f32 %v10404_v58, %v5996_v12  ;;  %v5997_v21 = vadd.f32 %v5955_v22, %v5917_v45 }
0x1431   : > { %6038 = vst.msk [vmem:[%s10411_s25 + $0x30] sm:$0xff] %vm6031_vm12, %v6021_v46  ;;  %v6022_v7 = vadd.f32 %v10404_v58, %v5999_v35 }
0x1432   : > { %6036 = vst.msk [vmem:[%s10411_s25 + $0x20] sm:$0xff] %vm6031_vm12, %v6019_v31  ;;  %v6020_v3 = vadd.f32 %v10404_v58, %v5997_v21  ;;  %v6943_v54 = vpop.f32.mrb[108].mxu1 }
0x1433   : > { %6039 = vst.msk [vmem:[%s10411_s25 + $0x38] sm:$0xff] %vm6031_vm12, %v6022_v7  ;;  %v5922_v13 = vmul.f32 0.5, %v6943_v54  ;;  %v5881_v17 = vpop.f32.mrb[109].mxu1 }
0x1434   : > { %6037 = vst.msk [vmem:[%s10411_s25 + $0x28] sm:$0xff] %vm6031_vm12, %v6020_v3  ;;  %v5920_v52 = vmul.f32 0.5, %v5881_v17  ;;  %v6944_v9 = vpop.f32.mrb[110].mxu1 }
0x1435   : > { %v6002_v41 = vadd.f32 %v5965_v61, %v5922_v13  ;;  %v5923_v51 = vmul.f32 0.5, %v6944_v9  ;;  %v5884_v23 = vpop.f32.mrb[111].mxu1 }
0x1436   : > { %v6000_v40 = vadd.f32 %v5961_v11, %v5920_v52  ;;  %v5921_v30 = vmul.f32 0.5, %v5884_v23 }
0x1437   : > { %v6025_v4 = vadd.f32 %v10404_v58, %v6002_v41  ;;  %v6003_v18 = vadd.f32 %v5967_v32, %v5923_v51 }
0x1438   : > { %v6023_v39 = vadd.f32 %v10404_v58, %v6000_v40  ;;  %v6001_v26 = vadd.f32 %v5963_v16, %v5921_v30 }
0x1439   : > { %6042 = vst.msk [vmem:[%s10411_s25 + $0x50] sm:$0xff] %vm6031_vm12, %v6025_v4  ;;  %v6026_v29 = vadd.f32 %v10404_v58, %v6003_v18 }
0x143a   : > { %6040 = vst.msk [vmem:[%s10411_s25 + $0x40] sm:$0xff] %vm6031_vm12, %v6023_v39  ;;  %v6024_v53 = vadd.f32 %v10404_v58, %v6001_v26  ;;  %v6947_v56 = vpop.f32.mrb[112].mxu1 }
0x143b   : > { %6043 = vst.msk [vmem:[%s10411_s25 + $0x58] sm:$0xff] %vm6031_vm12, %v6026_v29  ;;  %v5926_v27 = vmul.f32 0.5, %v6947_v56  ;;  %v5897_v2 = vpop.f32.mrb[113].mxu1 }
0x143c   : > { %6041 = vst.msk [vmem:[%s10411_s25 + $0x48] sm:$0xff] %vm6031_vm12, %v6024_v53  ;;  %v5924_v48 = vmul.f32 0.5, %v5897_v2  ;;  %v6948_v20 = vpop.f32.mrb[114].mxu1 }
0x143d   : > { %v6006_v22 = vadd.f32 %v5973_v10, %v5926_v27  ;;  %v5927_v15 = vmul.f32 0.5, %v6948_v20  ;;  %v5900_v1 = vpop.f32.mrb[115].mxu1 }
0x143e   : > { %v6004_v55 = vadd.f32 %v5969_v28, %v5924_v48  ;;  %v5925_v37 = vmul.f32 0.5, %v5900_v1 }
0x143f   : > { %v6029_v57 = vadd.f32 %v10404_v58, %v6006_v22  ;;  %v6007_v25 = vadd.f32 %v5975_v38, %v5927_v15 }
0x1440   : > { %v6027_v43 = vadd.f32 %v10404_v58, %v6004_v55  ;;  %v6005_v8 = vadd.f32 %v5971_v49, %v5925_v37 }
0x1441   : > { %6046 = vst.msk [vmem:[%s10411_s25 + $0x70] sm:$0xff] %vm6031_vm12, %v6029_v57  ;;  %v6030_v44 = vadd.f32 %v10404_v58, %v6007_v25 }
0x1442   : > { %6044 = vst.msk [vmem:[%s10411_s25 + $0x60] sm:$0xff] %vm6031_vm12, %v6027_v43  ;;  %v6028_v62 = vadd.f32 %v10404_v58, %v6005_v8 }
0x1443   : > { %6047 = vst.msk [vmem:[%s10411_s25 + $0x78] sm:$0xff] %vm6031_vm12, %v6030_v44 }
0x1444   : > { %6045 = vst.msk [vmem:[%s10411_s25 + $0x68] sm:$0xff] %vm6031_vm12, %v6028_v62 }
0x1445 PF: > { %s30_s29 = sadd.s32 1, %s7681_s29  }
0x1446   : > { %p27_p5 = scmp.ge.s32.totalorder %s30_s29, 4  }
0x1448   :  { %29 = sbr.rel (!%p27_p5) target bundleno = 4 (0x4), region = 125 }

</bundles_post_ra>
